<compile_context>
chip_gen: v7x
topology: tpu7x:2x2x1
jax: 0.10.0
libtpu: 0.0.40
codegen_flags: <defaults>
</compile_context>

<pallas_src>
import functools

import jax
import jax.numpy as jnp
import numpy as np
from jax.experimental import pallas as pl
from jax.experimental.pallas import tpu as pltpu

D_IN = 10      # module d_in
H = 512        # module hidden width (module default)
L = 3          # module residual hidden layers
TB_MAX = 1024  # max batch tile (sweepable; good default on v5e/v6e/v7x)


def _round_up(n, m):
    return ((n + m - 1) // m) * m


def _cast(v, dt):
    return v if v.dtype == dt else v.astype(dt)


def _pick_batch_tile(batch, tb_max=TB_MAX, min_grid=2):
    """Batch tile: big enough to amortize per-step overhead and fill MXU rows,
    capped so the grid keeps >= min_grid steps when the batch allows it (keeps
    both v7x TensorCores busy).  Multiples of 256 keep the (8, tb//8) output
    slab and the MXU rows dense."""
    tb = _round_up(max(1, pl.cdiv(batch, min_grid)), 256)
    return int(min(max(tb, 256), tb_max))


def _default_act_dtype(matmul_dtype):
    """bf16 activations where the VPU has a bf16 path (v6e/v7x); f32 on v5-era
    chips (bf16 elementwise would be emulated) and for the exact-f32 path."""
    if np.dtype(matmul_dtype) == np.dtype(jnp.float32):
        return jnp.float32
    try:
        kind = jax.devices()[0].device_kind.lower()
    except Exception:
        kind = ""
    return jnp.float32 if "v5" in kind else jnp.bfloat16


def obstacle_kernel(x_ref, w_in_ref, b_in_ref, w_h_ref, b_h_ref,
                    w_out_ref, b_out_ref, o_ref, *, n_hidden, act_dtype):
    mm_dtype = w_in_ref.dtype

    # linear_in + ReLU: low-precision MXU inputs, f32 accumulation; bias/ReLU
    # on the VPU in f32.  K is the zero-padded feature width (16), so the
    # padded lanes contribute exact zeros.
    h0 = jnp.dot(_cast(x_ref[...], mm_dtype), w_in_ref[...],
                 preferred_element_type=jnp.float32)
    x = _cast(jnp.maximum(h0 + b_in_ref[...], 0.0), act_dtype)

    # Residual hidden layers (static unroll): x = ReLU(x @ W + b) + x.
    # With act_dtype=bf16 the residual add and the next layer's MXU input
    # share one bf16 value (no per-layer cast, half the VALU work).
    for i in range(n_hidden):
        y = jnp.dot(_cast(x, mm_dtype), w_h_ref[i],
                    preferred_element_type=jnp.float32) + b_h_ref[i]
        x = _cast(jnp.maximum(y, 0.0), act_dtype) + x

    # linear_out + sigmoid.  A (tb,H)@(H,1) matmul would burn one MXU column
    # and give a 1-lane result; instead do a VPU multiply against W_out^T
    # (1,H) (promotes to f32) with a lane reduction, and write the result as a
    # sublane/lane-dense (8, tb//8) slab.  The leading-dim regroup of x is a
    # free reshape (tile-aligned row groups).
    _, sub, lanes = o_ref.shape
    xg = x.reshape(sub, lanes, x.shape[-1])
    logits = jnp.sum(xg * w_out_ref[...], axis=-1)            # (8, tb//8) f32
    o_ref[...] = jax.nn.sigmoid(
        logits + b_out_ref[0, 0])[None].astype(o_ref.dtype)   # (1, 8, tb//8)


def prepare_params(params, matmul_dtype=jnp.bfloat16):
    """One-time weight preprocessing, hoisted out of the per-call hot path:
    pad W_in's K from d_in to a 16-multiple, cast matmul operands to the MXU
    dtype, transpose W_out to (1, H) for the VPU reduction, shape b_out as a
    (1, 1) f32 scalar (lives in SMEM inside the kernel)."""
    w_in, b_in, w_h, b_h, w_out, b_out = params
    d_in, h_dim = w_in.shape
    d_pad = _round_up(d_in, 16)
    w_in_p = jnp.pad(w_in, ((0, d_pad - d_in), (0, 0))).astype(matmul_dtype)
    return (w_in_p,
            b_in.reshape(1, h_dim).astype(jnp.float32),
            w_h.astype(matmul_dtype),
            b_h.reshape(-1, 1, h_dim).astype(jnp.float32),
            w_out.reshape(1, h_dim).astype(jnp.float32),
            b_out.reshape(1, 1).astype(jnp.float32))


def obstacle_forward(x, prepared, *, act_dtype=None, tb_max=TB_MAX):
    """x: (B, d_in) -> (B, 1) float32, matching PyTorch Obstacle.forward."""
    w_in, b_in, w_h, b_h, w_out_t, b_out = prepared
    matmul_dtype = w_in.dtype
    if act_dtype is None:
        act_dtype = _default_act_dtype(matmul_dtype)
    n_hidden, h_dim = w_h.shape[0], w_h.shape[-1]
    d_pad = w_in.shape[0]
    B, d_in = x.shape

    tb = _pick_batch_tile(B, tb_max)
    b_pad = _round_up(B, tb)
    grid = (b_pad // tb,)

    # x ships narrow (16 features) and in the matmul dtype: it is the only
    # streaming HBM input, so this is the binding DMA.
    x_p = jnp.pad(_cast(x, matmul_dtype), ((0, b_pad - B), (0, d_pad - d_in)))

    kernel = functools.partial(obstacle_kernel, n_hidden=n_hidden,
                               act_dtype=act_dtype)

    out = pl.pallas_call(
        kernel,
        out_shape=jax.ShapeDtypeStruct((b_pad // tb, 8, tb // 8), jnp.float32),
        grid_spec=pltpu.PrefetchScalarGridSpec(
            num_scalar_prefetch=0,
            grid=grid,
            in_specs=[
                # x tile: only block whose index varies with the grid step.
                # (Sweepable: pipeline_mode=pl.Buffered(3) if the x DMA is
                # still exposed in a profile.)
                pl.BlockSpec((tb, d_pad), lambda i: (i, 0)),
                pl.BlockSpec((d_pad, h_dim), lambda i: (0, 0)),                # W_in
                pl.BlockSpec((1, h_dim), lambda i: (0, 0)),                    # b_in
                pl.BlockSpec((n_hidden, h_dim, h_dim), lambda i: (0, 0, 0)),   # W_hidden
                pl.BlockSpec((n_hidden, 1, h_dim), lambda i: (0, 0, 0)),       # b_hidden
                pl.BlockSpec((1, h_dim), lambda i: (0, 0)),                    # W_out^T
                pl.BlockSpec(memory_space=pltpu.MemorySpace.SMEM),             # b_out scalar
            ],
            out_specs=pl.BlockSpec((1, 8, tb // 8), lambda i: (i, 0, 0)),
        ),
        compiler_params=pltpu.CompilerParams(
            dimension_semantics=("parallel",),
            # ~10-15 MiB peak at tb=1024/H=512 (stacked W_h 1.5 MiB bf16 x2
            # buffers + tb x H live activations); 32 MiB fits the scoped VMEM
            # budget on v5e/v6e and v7x (64 MiB physical per TC).
            vmem_limit_bytes=32 * 1024 * 1024),
    )(x_p, w_in, b_in, w_h, b_h, w_out_t, b_out)

    # (grid, 8, tb//8) row-major == batch order; drop the padded rows.
    return out.reshape(b_pad, 1)[:B]


def init_params(key):
    """Deterministic parameter init (PyTorch-Linear-style uniform bounds)."""
    ks = jax.random.split(key, 6)

    def uinit(k, shape, fan_in):
        bound = 1.0 / np.sqrt(fan_in)
        return jax.random.uniform(k, shape, jnp.float32, -bound, bound)

    w_in = uinit(ks[0], (D_IN, H), D_IN)     # stored (in, out) = PyTorch W^T
    b_in = uinit(ks[1], (1, H), D_IN)
    w_h = uinit(ks[2], (L, H, H), H)
    b_h = uinit(ks[3], (L, 1, H), H)
    w_out = uinit(ks[4], (H, 1), H)
    b_out = uinit(ks[5], (1, 1), H)
    return (w_in, b_in, w_h, b_h, w_out, b_out)


def obstacle_reference(x, params):
    """Pure-JAX f32 reference matching the PyTorch forward (HIGHEST precision
    so the exact-f32 kernel path can be compared tightly)."""
    w_in, b_in, w_h, b_h, w_out, b_out = params
    dot = functools.partial(jnp.dot, precision=jax.lax.Precision.HIGHEST)
    h = jnp.maximum(dot(x, w_in) + b_in, 0.0)
    for i in range(w_h.shape[0]):
        h = jnp.maximum(dot(h, w_h[i]) + b_h[i], 0.0) + h
    return jax.nn.sigmoid(dot(h, w_out) + b_out)


if __name__ == "__main__":
    key = jax.random.PRNGKey(0)
    kp, kx1, kx2, kx3 = jax.random.split(key, 4)
    params = init_params(kp)

    prep_f32 = prepare_params(params, jnp.float32)     # exact path
    prep_bf16 = prepare_params(params, jnp.bfloat16)   # fast path

    # --- small batch (grid = 1) --------------------------------------------
    B1 = 8
    x1 = jax.random.normal(kx1, (B1, D_IN), dtype=jnp.float32)
    ref1 = obstacle_reference(x1, params)

    out1_f32 = jax.block_until_ready(obstacle_forward(x1, prep_f32))
    np.testing.assert_allclose(np.asarray(out1_f32), np.asarray(ref1),
                               rtol=1e-4, atol=5e-5)

    out1 = jax.block_until_ready(obstacle_forward(x1, prep_bf16))
    np.testing.assert_allclose(np.asarray(out1), np.asarray(ref1),
                               rtol=0, atol=3e-2)
    assert out1.shape == (B1, 1)

    # --- ragged batch forced onto a multi-step grid (grid > 1 output path) --
    B2 = 600
    x2 = jax.random.normal(kx2, (B2, D_IN), dtype=jnp.float32)
    ref2 = obstacle_reference(x2, params)
    out2 = jax.block_until_ready(obstacle_forward(x2, prep_bf16, tb_max=256))
    np.testing.assert_allclose(np.asarray(out2), np.asarray(ref2),
                               rtol=0, atol=3e-2)
    assert out2.shape == (B2, 1)

    # --- larger ragged batch exercising the default (large) tile ------------
    B3 = 2053
    x3 = jax.random.normal(kx3, (B3, D_IN), dtype=jnp.float32)
    ref3 = obstacle_reference(x3, params)
    out3 = jax.block_until_ready(obstacle_forward(x3, prep_bf16))
    np.testing.assert_allclose(np.asarray(out3), np.asarray(ref3),
                               rtol=0, atol=3e-2)
    assert out3.shape == (B3, 1)

    print("KERNEL_OK")
</pallas_src>

<mosaic_0001>
module attributes {stable_mosaic.version = 11 : i64} {
  func.func @obstacle_kernel(%arg0: i32, %arg1: memref<256x16xf32, #tpu.memory_space<vmem>>, %arg2: memref<16x512xf32, #tpu.memory_space<vmem>>, %arg3: memref<1x512xf32, #tpu.memory_space<vmem>>, %arg4: memref<3x512x512xf32, #tpu.memory_space<vmem>>, %arg5: memref<3x1x512xf32, #tpu.memory_space<vmem>>, %arg6: memref<1x512xf32, #tpu.memory_space<vmem>>, %arg7: memref<1x1xf32, #tpu.memory_space<smem>>, %arg8: memref<1x8x32xf32, #tpu.memory_space<vmem>>) attributes {dimension_semantics = [#tpu.dimension_semantics<parallel>], iteration_bounds = array<i64: 1>, scalar_prefetch = 0 : i64, scratch_operands = 0 : i64, tpu.core_type = #tpu.core_type<tc>, window_params = [{transform_indices = @transform_0, window_bounds = array<i64: 256, 16>}, {pipeline_mode = #tpu.pipeline_mode<synchronous>, transform_indices = @transform_1, window_bounds = array<i64: 16, 512>}, {pipeline_mode = #tpu.pipeline_mode<synchronous>, transform_indices = @transform_2, window_bounds = array<i64: 1, 512>}, {pipeline_mode = #tpu.pipeline_mode<synchronous>, transform_indices = @transform_3, window_bounds = array<i64: 3, 512, 512>}, {pipeline_mode = #tpu.pipeline_mode<synchronous>, transform_indices = @transform_4, window_bounds = array<i64: 3, 1, 512>}, {pipeline_mode = #tpu.pipeline_mode<synchronous>, transform_indices = @transform_5, window_bounds = array<i64: 1, 512>}, {transform_indices = @transform_6, window_bounds = array<i64: 1, 1>}, {transform_indices = @transform_7, window_bounds = array<i64: 1, 8, 32>}]} {
    %c0 = arith.constant 0 : index
    %c0_0 = arith.constant 0 : index
    %0 = vector.load %arg1[%c0, %c0_0] : memref<256x16xf32, #tpu.memory_space<vmem>>, vector<256x16xf32>
    %c0_1 = arith.constant 0 : index
    %c0_2 = arith.constant 0 : index
    %1 = vector.load %arg2[%c0_1, %c0_2] : memref<16x512xf32, #tpu.memory_space<vmem>>, vector<16x512xf32>
    %cst = arith.constant dense<0.000000e+00> : vector<256x512xf32>
    %2 = tpu.matmul %0, %1, %cst {dimension_numbers = #tpu.dot_dimension_numbers<[1], [0], [0], [1], [0, 0, 1, 1], [], []>} : vector<256x16xf32>, vector<16x512xf32>, vector<256x512xf32> -> vector<256x512xf32>
    %c0_3 = arith.constant 0 : index
    %c0_4 = arith.constant 0 : index
    %3 = vector.load %arg3[%c0_3, %c0_4] : memref<1x512xf32, #tpu.memory_space<vmem>>, vector<1x512xf32>
    %4 = vector.broadcast %3 : vector<1x512xf32> to vector<256x512xf32>
    %5 = arith.addf %2, %4 : vector<256x512xf32>
    %cst_5 = arith.constant 0.000000e+00 : f32
    %6 = vector.broadcast %cst_5 : f32 to vector<256x512xf32>
    %7 = arith.maximumf %5, %6 : vector<256x512xf32>
    %c0_6 = arith.constant 0 : index
    %c0_7 = arith.constant 0 : index
    %c0_8 = arith.constant 0 : index
    %8 = vector.load %arg4[%c0_6, %c0_7, %c0_8] : memref<3x512x512xf32, #tpu.memory_space<vmem>>, vector<1x512x512xf32>
    %9 = vector.shape_cast %8 : vector<1x512x512xf32> to vector<512x512xf32>
    %cst_9 = arith.constant dense<0.000000e+00> : vector<256x512xf32>
    %10 = tpu.matmul %7, %9, %cst_9 {dimension_numbers = #tpu.dot_dimension_numbers<[1], [0], [0], [1], [0, 0, 1, 1], [], []>} : vector<256x512xf32>, vector<512x512xf32>, vector<256x512xf32> -> vector<256x512xf32>
    %c0_10 = arith.constant 0 : index
    %c0_11 = arith.constant 0 : index
    %c0_12 = arith.constant 0 : index
    %11 = vector.load %arg5[%c0_10, %c0_11, %c0_12] : memref<3x1x512xf32, #tpu.memory_space<vmem>>, vector<1x1x512xf32>
    %12 = vector.shape_cast %11 : vector<1x1x512xf32> to vector<1x512xf32>
    %13 = vector.broadcast %12 : vector<1x512xf32> to vector<256x512xf32>
    %14 = arith.addf %10, %13 : vector<256x512xf32>
    %cst_13 = arith.constant 0.000000e+00 : f32
    %15 = vector.broadcast %cst_13 : f32 to vector<256x512xf32>
    %16 = arith.maximumf %14, %15 : vector<256x512xf32>
    %17 = arith.addf %16, %7 : vector<256x512xf32>
    %c1 = arith.constant 1 : index
    %c0_14 = arith.constant 0 : index
    %c0_15 = arith.constant 0 : index
    %18 = vector.load %arg4[%c1, %c0_14, %c0_15] : memref<3x512x512xf32, #tpu.memory_space<vmem>>, vector<1x512x512xf32>
    %19 = vector.shape_cast %18 : vector<1x512x512xf32> to vector<512x512xf32>
    %cst_16 = arith.constant dense<0.000000e+00> : vector<256x512xf32>
    %20 = tpu.matmul %17, %19, %cst_16 {dimension_numbers = #tpu.dot_dimension_numbers<[1], [0], [0], [1], [0, 0, 1, 1], [], []>} : vector<256x512xf32>, vector<512x512xf32>, vector<256x512xf32> -> vector<256x512xf32>
    %c1_17 = arith.constant 1 : index
    %c0_18 = arith.constant 0 : index
    %c0_19 = arith.constant 0 : index
    %21 = vector.load %arg5[%c1_17, %c0_18, %c0_19] : memref<3x1x512xf32, #tpu.memory_space<vmem>>, vector<1x1x512xf32>
    %22 = vector.shape_cast %21 : vector<1x1x512xf32> to vector<1x512xf32>
    %23 = vector.broadcast %22 : vector<1x512xf32> to vector<256x512xf32>
    %24 = arith.addf %20, %23 : vector<256x512xf32>
    %cst_20 = arith.constant 0.000000e+00 : f32
    %25 = vector.broadcast %cst_20 : f32 to vector<256x512xf32>
    %26 = arith.maximumf %24, %25 : vector<256x512xf32>
    %27 = arith.addf %26, %17 : vector<256x512xf32>
    %c2 = arith.constant 2 : index
    %c0_21 = arith.constant 0 : index
    %c0_22 = arith.constant 0 : index
    %28 = vector.load %arg4[%c2, %c0_21, %c0_22] : memref<3x512x512xf32, #tpu.memory_space<vmem>>, vector<1x512x512xf32>
    %29 = vector.shape_cast %28 : vector<1x512x512xf32> to vector<512x512xf32>
    %cst_23 = arith.constant dense<0.000000e+00> : vector<256x512xf32>
    %30 = tpu.matmul %27, %29, %cst_23 {dimension_numbers = #tpu.dot_dimension_numbers<[1], [0], [0], [1], [0, 0, 1, 1], [], []>} : vector<256x512xf32>, vector<512x512xf32>, vector<256x512xf32> -> vector<256x512xf32>
    %c2_24 = arith.constant 2 : index
    %c0_25 = arith.constant 0 : index
    %c0_26 = arith.constant 0 : index
    %31 = vector.load %arg5[%c2_24, %c0_25, %c0_26] : memref<3x1x512xf32, #tpu.memory_space<vmem>>, vector<1x1x512xf32>
    %32 = vector.shape_cast %31 : vector<1x1x512xf32> to vector<1x512xf32>
    %33 = vector.broadcast %32 : vector<1x512xf32> to vector<256x512xf32>
    %34 = arith.addf %30, %33 : vector<256x512xf32>
    %cst_27 = arith.constant 0.000000e+00 : f32
    %35 = vector.broadcast %cst_27 : f32 to vector<256x512xf32>
    %36 = arith.maximumf %34, %35 : vector<256x512xf32>
    %37 = arith.addf %36, %27 : vector<256x512xf32>
    %38 = vector.shape_cast %37 : vector<256x512xf32> to vector<8x32x512xf32>
    %c0_28 = arith.constant 0 : index
    %c0_29 = arith.constant 0 : index
    %39 = vector.load %arg6[%c0_28, %c0_29] : memref<1x512xf32, #tpu.memory_space<vmem>>, vector<1x512xf32>
    %40 = vector.shape_cast %39 : vector<1x512xf32> to vector<1x1x512xf32>
    %41 = vector.broadcast %40 : vector<1x1x512xf32> to vector<8x32x512xf32>
    %42 = arith.mulf %38, %41 : vector<8x32x512xf32>
    %cst_30 = arith.constant dense<0.000000e+00> : vector<8x32xf32>
    %43 = vector.multi_reduction <add>, %42, %cst_30 [2] : vector<8x32x512xf32> to vector<8x32xf32>
    %c0_31 = arith.constant 0 : index
    %c0_32 = arith.constant 0 : index
    %44 = memref.load %arg7[%c0_31, %c0_32] : memref<1x1xf32, #tpu.memory_space<smem>>
    %45 = vector.broadcast %44 : f32 to vector<8x32xf32>
    %46 = arith.addf %43, %45 : vector<8x32xf32>
    %47 = arith.negf %46 : vector<8x32xf32>
    %48 = math.exp %47 : vector<8x32xf32>
    %cst_33 = arith.constant 1.000000e+00 : f32
    %49 = vector.broadcast %cst_33 : f32 to vector<8x32xf32>
    %50 = arith.addf %49, %48 : vector<8x32xf32>
    %51 = arith.divf %49, %50 : vector<8x32xf32>
    %52 = vector.shape_cast %51 : vector<8x32xf32> to vector<1x8x32xf32>
    %c0_34 = arith.constant 0 : index
    %c0_35 = arith.constant 0 : index
    %c0_36 = arith.constant 0 : index
    %53 = vector.load %arg8[%c0_34, %c0_35, %c0_36] : memref<1x8x32xf32, #tpu.memory_space<vmem>>, vector<1x8x32xf32>
    tpu.vector_store %arg8[%c0_34, %c0_35, %c0_36], %52 {strides = array<i32>} : memref<1x8x32xf32, #tpu.memory_space<vmem>>, vector<1x8x32xf32>,
    return
  }
  func.func @transform_0(%arg0: i32) -> (i32, i32) {
    %c0_i32 = arith.constant 0 : i32
    %c0_i32_0 = arith.constant 0 : i32
    return %arg0, %c0_i32 : i32, i32
  }
  func.func @transform_1(%arg0: i32) -> (i32, i32) {
    %c0_i32 = arith.constant 0 : i32
    %c0_i32_0 = arith.constant 0 : i32
    %c0_i32_1 = arith.constant 0 : i32
    return %c0_i32, %c0_i32_0 : i32, i32
  }
  func.func @transform_2(%arg0: i32) -> (i32, i32) {
    %c0_i32 = arith.constant 0 : i32
    %c0_i32_0 = arith.constant 0 : i32
    %c0_i32_1 = arith.constant 0 : i32
    return %c0_i32, %c0_i32_0 : i32, i32
  }
  func.func @transform_3(%arg0: i32) -> (i32, i32, i32) {
    %c0_i32 = arith.constant 0 : i32
    %c0_i32_0 = arith.constant 0 : i32
    %c0_i32_1 = arith.constant 0 : i32
    %c0_i32_2 = arith.constant 0 : i32
    return %c0_i32, %c0_i32_0, %c0_i32_1 : i32, i32, i32
  }
  func.func @transform_4(%arg0: i32) -> (i32, i32, i32) {
    %c0_i32 = arith.constant 0 : i32
    %c0_i32_0 = arith.constant 0 : i32
    %c0_i32_1 = arith.constant 0 : i32
    %c0_i32_2 = arith.constant 0 : i32
    return %c0_i32, %c0_i32_0, %c0_i32_1 : i32, i32, i32
  }
  func.func @transform_5(%arg0: i32) -> (i32, i32) {
    %c0_i32 = arith.constant 0 : i32
    %c0_i32_0 = arith.constant 0 : i32
    %c0_i32_1 = arith.constant 0 : i32
    return %c0_i32, %c0_i32_0 : i32, i32
  }
  func.func @transform_6(%arg0: i32) -> (i32, i32) {
    %c0_i32 = arith.constant 0 : i32
    %c0_i32_0 = arith.constant 0 : i32
    %c0_i32_1 = arith.constant 0 : i32
    return %c0_i32, %c0_i32_0 : i32, i32
  }
  func.func @transform_7(%arg0: i32) -> (i32, i32, i32) {
    %c0_i32 = arith.constant 0 : i32
    %c0_i32_0 = arith.constant 0 : i32
    %c0_i32_1 = arith.constant 0 : i32
    return %arg0, %c0_i32, %c0_i32_0 : i32, i32, i32
  }
}

</mosaic_0001>

<bundles_post_ra>
// kernel: tpu_custom_call.1
= control target key start
LH: loop header
LB: loop body
LE: loop exit
PB: predicated region body
PF: predicated region fallthrough
CT: control target
= control target key end

     0   :  { %13 = vsyncpa [#allocation4], 0  ;;  %s12375_s0 = inlined_call_operand.vmem [shape: f32[256,16], index: 0, kind: input, shape index: {}]   ;;  %s12376_s1 = inlined_call_operand.hbm [shape: f32[16,512], index: 1, kind: input, shape index: {}]   ;;  %s12377_s2 = inlined_call_operand.hbm [shape: f32[1,512], index: 2, kind: input, shape index: {}]   ;;  %s12378_s3 = inlined_call_operand.hbm [shape: f32[3,512,512], index: 3, kind: input, shape index: {}]   ;;  %s12379_s4 = inlined_call_operand.hbm [shape: f32[3,1,512], index: 4, kind: input, shape index: {}]   ;;  %s12380_s5 = inlined_call_operand.hbm [shape: f32[1,512], index: 5, kind: input, shape index: {}]   ;;  %s12381_s6 = inlined_call_operand.<no memory space> [shape: f32[1,1], index: 6, kind: input, shape index: {}]   ;;  %s12382_s7 = inlined_call_operand.hbm [shape: f32[1,8,32], index: 7, kind: output, shape index: {}]  }
   0x1   :  { %14 = vsyncpa [#allocation7], 0 }
   0x2   :  { %15 = vsyncpa [#allocation10], 0 }
   0x3   :  { %16 = vsyncpa [#allocation5], 0  ;;  %s8267_s24 = smov [#allocation6]   ;;  %s8268_s26 = smov [#allocation9]  }
   0x4   :  { %s37_s25 = sshll.u32 %s8267_s24, 4  ;;  %s58_s27 = sshll.u32 %s8268_s26, 4  ;;  %s38_s25 = int_to_ptr.vmem [resolvable:$true] %s37_s25  ;;  %s8318_s27 = int_to_ptr.vmem [resolvable:$true] %s58_s27 }
   0x5   :  { %s8127_s30 = scalar_lea.hbm %s12377_s2, 64 }
   0x6   :  { %p8128_p0 = scmp.ne.s32.totalorder %s12377_s2, %s8127_s30  ;;  %p8131_p1 = scmp.lt.u32.totalorder %s8127_s30, %s12377_s2 }
   0x8   :  { %p8133_p2 = pnand %p8131_p1, %p8128_p0 }
   0xa   :  { %8136 = shalt.err (!%p8133_p2)
}
   0xb   :  { %s8137_s12 = scalar_lea.vmem %s38_s25, 64  ;;  %p8142_p4 = scmp.lt.s32.totalorder %s38_s25, %s38_s25 }
   0xc   :  { %p8138_p3 = scmp.ne.s32.totalorder %s38_s25, %s8137_s12  ;;  %p8143_p5 = scmp.lt.s32.totalorder %s8137_s12, %s8137_s12 }
   0xe   :  { %p8144_p6 = por %p8143_p5, %p8142_p4 }
  0x10   :  { %p8145_p7 = pnand %p8144_p6, %p8138_p3 }
  0x12   :  { %8148 = shalt.err (!%p8145_p7)
}
  0x13   :  { %40 = dma.hbm_to_vmem [thread:$0]  %s12377_s2, 64, %s38_s25, [#allocation7]  }
  0x14   :  { %s8149_s17 = scalar_lea.hbm %s12379_s4, 192 }
  0x15   :  { %p8150_p8 = scmp.ne.s32.totalorder %s12379_s4, %s8149_s17  ;;  %p8153_p9 = scmp.lt.u32.totalorder %s8149_s17, %s12379_s4 }
  0x17   :  { %p8155_p10 = pnand %p8153_p9, %p8150_p8 }
  0x19   :  { %8158 = shalt.err (!%p8155_p10)
}
  0x1a   :  { %s8159_s22 = scalar_lea.vmem %s8318_s27, 192  ;;  %p8164_p12 = scmp.lt.s32.totalorder %s8318_s27, %s8318_s27 }
  0x1b   :  { %p8160_p11 = scmp.ne.s32.totalorder %s8318_s27, %s8159_s22  ;;  %p8165_p13 = scmp.lt.s32.totalorder %s8159_s22, %s8159_s22 }
  0x1d   :  { %p8166_p0 = por %p8165_p13, %p8164_p12 }
  0x1f   :  { %p8167_p1 = pnand %p8166_p0, %p8160_p11 }
  0x21   :  { %8170 = shalt.err (!%p8167_p1)
}
  0x22   :  { %s8269_s2 = smov 64   ;;  %s8270_s23 = smov 4  }
  0x23   :  { %64 = dma.hbm_to_vmem [thread:$0]  %s12379_s4, 192, %s8318_s27, [#allocation10], %s8269_s2, %s8269_s2, %s8270_s23  }
  0x24   :  { %s8271_s26 = smov [#allocation3]   ;;  %s8171_s8 = scalar_lea.hbm %s12376_s1, 1024 }
  0x25   :  { %s24_s28 = sshll.u32 %s8271_s26, 4  ;;  %p8172_p2 = scmp.ne.s32.totalorder %s12376_s1, %s8171_s8  ;;  %s25_s28 = int_to_ptr.vmem [resolvable:$true] %s24_s28 }
  0x26   :  { %p8175_p3 = scmp.lt.u32.totalorder %s8171_s8, %s12376_s1 }
  0x28   :  { %p8177_p4 = pnand %p8175_p3, %p8172_p2 }
  0x2a   :  { %8180 = shalt.err (!%p8177_p4)
}
  0x2b   :  { %s8181_s13 = scalar_lea.vmem %s25_s28, 1024  ;;  %p8186_p6 = scmp.lt.s32.totalorder %s25_s28, %s25_s28 }
  0x2c   :  { %p8182_p5 = scmp.ne.s32.totalorder %s25_s28, %s8181_s13  ;;  %p8187_p7 = scmp.lt.s32.totalorder %s8181_s13, %s8181_s13 }
  0x2e   :  { %p8188_p8 = por %p8187_p7, %p8186_p6 }
  0x30   :  { %p8189_p9 = pnand %p8188_p8, %p8182_p5 }
  0x32   :  { %8192 = shalt.err (!%p8189_p9)
}
  0x33   :  { %s8272_s4 = smov 512   ;;  %s8273_s27 = smov 32  }
  0x34   :  { %30 = dma.hbm_to_vmem [thread:$0]  %s12376_s1, 1024, %s25_s28, [#allocation4], %s8272_s4, %s8272_s4, %s8273_s27  }
  0x35   :  { %s8274_s16 = smov [#allocation8]   ;;  %s8275_s18 = smov [#allocation11]  }
  0x36   :  { %s46_s17 = sshll.u32 %s8274_s16, 4  ;;  %s71_s19 = sshll.u32 %s8275_s18, 4  ;;  %s47_s17 = int_to_ptr.vmem [resolvable:$true] %s46_s17  ;;  %s72_s19 = int_to_ptr.vmem [resolvable:$true] %s71_s19 }
  0x37   :  { %s8193_s22 = scalar_lea.hbm %s12378_s3, 98304 }
  0x38   :  { %p8194_p10 = scmp.ne.s32.totalorder %s12378_s3, %s8193_s22  ;;  %p8197_p11 = scmp.lt.u32.totalorder %s8193_s22, %s12378_s3 }
  0x3a   :  { %p8199_p12 = pnand %p8197_p11, %p8194_p10 }
  0x3c   :  { %8202 = shalt.err (!%p8199_p12)
}
  0x3d   :  { %s8203_s1 = scalar_lea.vmem %s47_s17, 98304  ;;  %p8208_p0 = scmp.lt.s32.totalorder %s47_s17, %s47_s17 }
  0x3e   :  { %p8204_p13 = scmp.ne.s32.totalorder %s47_s17, %s8203_s1  ;;  %p8209_p1 = scmp.lt.s32.totalorder %s8203_s1, %s8203_s1 }
  0x40   :  { %p8210_p2 = por %p8209_p1, %p8208_p0 }
  0x42   :  { %p8211_p3 = pnand %p8210_p2, %p8204_p13 }
  0x44   :  { %8214 = shalt.err (!%p8211_p3)
}
  0x45   :  { %52 = dma.hbm_to_vmem [thread:$0]  %s12378_s3, 98304, %s47_s17, [#allocation7], %s8272_s4, %s8272_s4, %s8273_s27  }
  0x46   :  { %s8215_s8 = scalar_lea.hbm %s12380_s5, 64 }
  0x47   :  { %p8216_p4 = scmp.ne.s32.totalorder %s12380_s5, %s8215_s8  ;;  %p8219_p5 = scmp.lt.u32.totalorder %s8215_s8, %s12380_s5 }
  0x49   :  { %p8221_p6 = pnand %p8219_p5, %p8216_p4 }
  0x4b   :  { %8224 = shalt.err (!%p8221_p6)
}
  0x4c   :  { %s8225_s13 = scalar_lea.vmem %s72_s19, 64  ;;  %p8230_p8 = scmp.lt.s32.totalorder %s72_s19, %s72_s19 }
  0x4d   :  { %p8226_p7 = scmp.ne.s32.totalorder %s72_s19, %s8225_s13  ;;  %p8231_p9 = scmp.lt.s32.totalorder %s8225_s13, %s8225_s13 }
  0x4f   :  { %p8232_p10 = por %p8231_p9, %p8230_p8 }
  0x51   :  { %p8233_p11 = pnand %p8232_p10, %p8226_p7 }
  0x53   :  { %8236 = shalt.err (!%p8233_p11)
}
  0x54   :  { %74 = dma.hbm_to_vmem [thread:$0]  %s12380_s5, 64, %s72_s19, [#allocation10]  }
  0x55   :  { %8259 = dma.done.wait [#allocation4], 1024  }
  0x56   :  { %8260 = vsyncadd [#allocation4], 4294966272 }
  0x57   :  { %8261 = dma.done.wait [#allocation7], 98368  }
  0x58   :  { %8262 = vsyncadd [#allocation7], 4294868928 }
  0x59   :  { %8263 = dma.done.wait [#allocation10], 256  }
  0x5a   :  { %8264 = vsyncadd [#allocation10], 4294967040  ;;  %v8276_v0 = vmov 0.0   ;;  %v125_v1 = vld [vmem:[#allocation3 + $0x8] sm:$0xff]  ;;  %v124_v3 = vld [vmem:[#allocation3] sm:$0xff]  ;;  %vm154_vm0 = vcmask 130048  }
  0x5b   :  { %315 = vmatprep.mubr.f32.mxu0 %v8276_v0  ;;  %572 = vmatprep.mubr.f32.mxu1 %v8276_v0  ;;  %v129_v2 = vld [vmem:[#allocation3 + $0x28] sm:$0xff]  ;;  %v128_v5 = vld [vmem:[#allocation3 + $0x20] sm:$0xff]  ;;  %v127_v9 = vld [vmem:[#allocation3 + $0x18] sm:$0xff]  ;;  %vm6162_vm1 = vcmask 130112   ;;  %vm6169_vm2 = vcmask 195712   ;;  %vm6176_vm3 = vcmask 261312  }
  0x5c   :  { %v6441_v4 = vpack.c.bf16 %v129_v2, %v125_v1  ;;  %v6443_v6 = vpack.c.bf16 %v128_v5, %v124_v3  ;;  %v92_v7 = vld [vmem:[%s12375_s0] sm:$0xff]  ;;  %v93_v8 = vld [vmem:[%s12375_s0 + $0x8] sm:$0xff]  ;;  %v131_v10 = vld [vmem:[#allocation3 + $0x38] sm:$0xff]  ;;  %vm6311_vm4 = vcmask 1041409   ;;  %vm6313_vm5 = vcmask 1042434  }
  0x5d   :  { %v126_v11 = vld [vmem:[#allocation3 + $0x10] sm:$0xff]  ;;  %v6445_v13 = vpack.c.bf16 %v131_v10, %v127_v9  ;;  %v893_v18 = vld [vmem:[#allocation8] sm:$0xff]  ;;  %v95_v33 = vld [vmem:[%s12375_s0 + $0x18] sm:$0xff]  ;;  %vm6315_vm6 = vcmask 1043459   ;;  %vm6317_vm7 = vcmask 1044484   ;;  %vm6319_vm8 = vcmask 1045509  }
  0x5e   :  { %6442 = vmatprep.subr.bf16.mxu0 %v6441_v4  ;;  %v130_v12 = vld [vmem:[#allocation3 + $0x30] sm:$0xff]  ;;  %v897_v19 = vld [vmem:[#allocation8 + $0x20] sm:$0xff]  ;;  %v896_v52 = vld [vmem:[#allocation8 + $0x18] sm:$0xff]  ;;  %vm6321_vm9 = vcmask 1046534   ;;  %vm6323_vm10 = vcmask 1047559   ;;  %vm6326_vm11 = vcmask 261120  }
  0x5f   :  { %6444 = vmatpush1.bf16.msra.mxu0 %v6443_v6  ;;  %v6447_v14 = vpack.c.bf16 %v130_v12, %v126_v11  ;;  %v894_v15 = vld [vmem:[#allocation8 + $0x8] sm:$0xff]  ;;  %6446 = vmatprep.subr.bf16.mxu1 %v6445_v13  ;;  %v6451_v21 = vpack.c.bf16 %v897_v19, %v893_v18  ;;  %v901_v25 = vld [vmem:[#allocation8 + $0x40] sm:$0xff]  ;;  %v900_v53 = vld [vmem:[#allocation8 + $0x38] sm:$0xff] }
  0x60   :  { %v898_v16 = vld [vmem:[#allocation8 + $0x28] sm:$0xff]  ;;  %v905_v26 = vld [vmem:[#allocation8 + $0x60] sm:$0xff]  ;;  %v6577_v55 = vpack.c.bf16 %v900_v53, %v896_v52  ;;  %v895_v56 = vld [vmem:[#allocation8 + $0x10] sm:$0xff] }
  0x61   :  { %v6449_v17 = vpack.c.bf16 %v898_v16, %v894_v15  ;;  %v94_v20 = vld [vmem:[%s12375_s0 + $0x10] sm:$0xff]  ;;  %6448 = vmatpush1.bf16.msra.mxu1 %v6447_v14  ;;  %v6455_v27 = vpack.c.bf16 %v905_v26, %v901_v25  ;;  %v909_v31 = vld [vmem:[#allocation8 + $0x80] sm:$0xff]  ;;  %v904_v58 = vld [vmem:[#allocation8 + $0x58] sm:$0xff] }
  0x62   :  { %6345 = vmatmul.mubr.msk.f32.vlgmr.msra.gmra.mrb[0].mxu0 %vm154_vm0, %v92_v7  ;;  %v902_v22 = vld [vmem:[#allocation8 + $0x48] sm:$0xff]  ;;  %v913_v32 = vld [vmem:[#allocation8 + $0xa0] sm:$0xff]  ;;  %v899_v57 = vld [vmem:[#allocation8 + $0x30] sm:$0xff]  ;;  %6578 = vmatprep.subr.bf16.mxu1 %v6577_v55 }
  0x63   :  { %321 = vmatprep.mubr.f32.mxu0 %v8276_v0  ;;  %v906_v23 = vld [vmem:[#allocation8 + $0x68] sm:$0xff]  ;;  %6450 = vmatprep.subr.bf16.mxu0 %v6449_v17  ;;  %v6459_v36 = vpack.c.bf16 %v913_v32, %v909_v31  ;;  %v917_v38 = vld [vmem:[#allocation8 + $0xc0] sm:$0xff]  ;;  %v6579_v60 = vpack.c.bf16 %v899_v57, %v895_v56  ;;  %v908_v61 = vld [vmem:[#allocation8 + $0x78] sm:$0xff] }
  0x64   :  { %v6453_v24 = vpack.c.bf16 %v906_v23, %v902_v22  ;;  %6452 = vmatpush1.bf16.msra.mxu0 %v6451_v21  ;;  %v910_v28 = vld [vmem:[#allocation8 + $0x88] sm:$0xff]  ;;  %6377 = vmatmul.mubr.msk.f32.vlgmr.msra.gmra.mrb[0].mxu1 %vm154_vm0, %v92_v7  ;;  %v921_v39 = vld [vmem:[#allocation8 + $0xe0] sm:$0xff]  ;;  %v903_v62 = vld [vmem:[#allocation8 + $0x50] sm:$0xff]  ;;  %v6581_v4 = vpack.c.bf16 %v908_v61, %v904_v58 }
  0x65   :  { %v914_v29 = vld [vmem:[#allocation8 + $0xa8] sm:$0xff]  ;;  %578 = vmatprep.mubr.f32.mxu1 %v8276_v0  ;;  %v96_v40 = vld [vmem:[%s12375_s0 + $0x20] sm:$0xff]  ;;  %v6463_v43 = vpack.c.bf16 %v921_v39, %v917_v38  ;;  %v907_v63 = vld [vmem:[#allocation8 + $0x70] sm:$0xff]  ;;  %6580 = vmatpush1.bf16.msra.mxu1 %v6579_v60 }
  0x66   :  { %6346 = vmatmul.mubr.msk.f32.gmra.mrb[2].mxu0 %vm154_vm0, %v93_v8  ;;  %6454 = vmatprep.subr.bf16.mxu0 %v6453_v24  ;;  %v6457_v30 = vpack.c.bf16 %v914_v29, %v910_v28  ;;  %v918_v34 = vld [vmem:[#allocation8 + $0xc8] sm:$0xff]  ;;  %v925_v45 = vld [vmem:[#allocation8 + $0x100] sm:$0xff]  ;;  %v6583_v7 = vpack.c.bf16 %v907_v63, %v903_v62  ;;  %v916_v9 = vld [vmem:[#allocation8 + $0xb8] sm:$0xff] }
  0x67   :  { %327 = vmatprep.mubr.f32.mxu0 %v8276_v0  ;;  %v922_v35 = vld [vmem:[#allocation8 + $0xe8] sm:$0xff]  ;;  %v929_v46 = vld [vmem:[#allocation8 + $0x120] sm:$0xff]  ;;  %v911_v12 = vld [vmem:[#allocation8 + $0x90] sm:$0xff]  ;;  %6582 = vmatprep.subr.bf16.mxu1 %v6581_v4 }
  0x68   :  { %6456 = vmatpush1.bf16.msra.mxu0 %v6455_v27  ;;  %v6461_v37 = vpack.c.bf16 %v922_v35, %v918_v34  ;;  %6378 = vmatmul.mubr.msk.f32.gmra.mrb[2].mxu1 %vm154_vm0, %v93_v8  ;;  %v926_v41 = vld [vmem:[#allocation8 + $0x108] sm:$0xff]  ;;  %v933_v50 = vld [vmem:[#allocation8 + $0x140] sm:$0xff]  ;;  %v6467_v54 = vpack.c.bf16 %v929_v46, %v925_v45  ;;  %v912_v8 = vld [vmem:[#allocation8 + $0x98] sm:$0xff] }
  0x69   :  { %6458 = vmatprep.subr.bf16.mxu0 %v6457_v30  ;;  %v930_v42 = vld [vmem:[#allocation8 + $0x128] sm:$0xff]  ;;  %584 = vmatprep.mubr.f32.mxu1 %v8276_v0  ;;  %v937_v51 = vld [vmem:[#allocation8 + $0x160] sm:$0xff]  ;;  %v915_v13 = vld [vmem:[#allocation8 + $0xb0] sm:$0xff]  ;;  %v6585_v17 = vpack.c.bf16 %v916_v9, %v912_v8 }
  0x6a   :  { %6347 = vmatmul.mubr.msk.f32.gmra.mrb[4].mxu0 %vm154_vm0, %v94_v20  ;;  %v6465_v44 = vpack.c.bf16 %v930_v42, %v926_v41  ;;  %v8419_v47 = vld [vmem:[%s12375_s0 + $0x28] sm:$0xff]  ;;  %v8429_v1 = vld [vmem:[%s12375_s0 + $0x30] sm:$0xff]  ;;  %v6471_v5 = vpack.c.bf16 %v937_v51, %v933_v50  ;;  %v8439_v14 = vld [vmem:[%s12375_s0 + $0x38] sm:$0xff]  ;;  %6584 = vmatpush1.bf16.msra.mxu1 %v6583_v7 }
  0x6b   :  { %333 = vmatprep.mubr.f32.mxu0 %v8276_v0  ;;  %v934_v48 = vld [vmem:[#allocation8 + $0x148] sm:$0xff]  ;;  %v941_v6 = vld [vmem:[#allocation8 + $0x180] sm:$0xff]  ;;  %v920_v21 = vld [vmem:[#allocation8 + $0xd8] sm:$0xff]  ;;  %6586 = vmatprep.subr.bf16.mxu1 %v6585_v17 }
  0x6c   :  { %6460 = vmatpush1.bf16.msra.mxu0 %v6459_v36  ;;  %6379 = vmatmul.mubr.msk.f32.gmra.mrb[4].mxu1 %vm154_vm0, %v94_v20  ;;  %v938_v49 = vld [vmem:[#allocation8 + $0x168] sm:$0xff]  ;;  %v945_v11 = vld [vmem:[#allocation8 + $0x1a0] sm:$0xff]  ;;  %v6587_v20 = vpack.c.bf16 %v915_v13, %v911_v12  ;;  %v924_v22 = vld [vmem:[#allocation8 + $0xf8] sm:$0xff] }
  0x6d   :  { %6462 = vmatprep.subr.bf16.mxu0 %v6461_v37  ;;  %590 = vmatprep.mubr.f32.mxu1 %v8276_v0  ;;  %v6469_v59 = vpack.c.bf16 %v938_v49, %v934_v48  ;;  %v942_v2 = vld [vmem:[#allocation8 + $0x188] sm:$0xff]  ;;  %v6475_v18 = vpack.c.bf16 %v945_v11, %v941_v6  ;;  %v949_v19 = vld [vmem:[#allocation8 + $0x1c0] sm:$0xff]  ;;  %v919_v25 = vld [vmem:[#allocation8 + $0xd0] sm:$0xff]  ;;  %v6589_v30 = vpack.c.bf16 %v924_v22, %v920_v21 }
  0x6e   :  { %6348 = vmatmul.mubr.msk.f32.gmra.mrb[6].mxu0 %vm154_vm0, %v95_v33  ;;  %v946_v3 = vld [vmem:[#allocation8 + $0x1a8] sm:$0xff]  ;;  %v953_v24 = vld [vmem:[#allocation8 + $0x1e0] sm:$0xff]  ;;  %v923_v26 = vld [vmem:[#allocation8 + $0xf0] sm:$0xff]  ;;  %6588 = vmatpush1.bf16.msra.mxu1 %v6587_v20 }
  0x6f   :  { %339 = vmatprep.mubr.f32.mxu0 %v8276_v0  ;;  %v6473_v10 = vpack.c.bf16 %v946_v3, %v942_v2  ;;  %v950_v15 = vld [vmem:[#allocation8 + $0x1c8] sm:$0xff]  ;;  %v8449_v27 = vld [vmem:[%s12375_s0 + $0x40] sm:$0xff]  ;;  %v6479_v31 = vpack.c.bf16 %v953_v24, %v949_v19  ;;  %v927_v38 = vld [vmem:[#allocation8 + $0x110] sm:$0xff]  ;;  %6590 = vmatprep.subr.bf16.mxu1 %v6589_v30 }
  0x70   :  { %6464 = vmatpush1.bf16.msra.mxu0 %v6463_v43  ;;  %6380 = vmatmul.mubr.msk.f32.gmra.mrb[6].mxu1 %vm154_vm0, %v95_v33  ;;  %v954_v16 = vld [vmem:[#allocation8 + $0x1e8] sm:$0xff]  ;;  %v957_v32 = vld [vmem:[#allocation8 + $0x200] sm:$0xff]  ;;  %v6591_v33 = vpack.c.bf16 %v923_v26, %v919_v25  ;;  %v928_v34 = vld [vmem:[#allocation8 + $0x118] sm:$0xff] }
  0x71   :  { %6466 = vmatprep.subr.bf16.mxu0 %v6465_v44  ;;  %596 = vmatprep.mubr.f32.mxu1 %v8276_v0  ;;  %v6477_v23 = vpack.c.bf16 %v954_v16, %v950_v15  ;;  %v958_v28 = vld [vmem:[#allocation8 + $0x208] sm:$0xff]  ;;  %v932_v35 = vld [vmem:[#allocation8 + $0x138] sm:$0xff]  ;;  %v961_v37 = vld [vmem:[#allocation8 + $0x220] sm:$0xff] }
  0x72   :  { %6349 = vmatmul.mubr.msk.f32.gmra.mrb[8].mxu0 %vm154_vm0, %v96_v40  ;;  %v962_v29 = vld [vmem:[#allocation8 + $0x228] sm:$0xff]  ;;  %v931_v39 = vld [vmem:[#allocation8 + $0x130] sm:$0xff]  ;;  %v6593_v43 = vpack.c.bf16 %v932_v35, %v928_v34  ;;  %v6483_v44 = vpack.c.bf16 %v961_v37, %v957_v32  ;;  %v965_v45 = vld [vmem:[#allocation8 + $0x240] sm:$0xff]  ;;  %6592 = vmatpush1.bf16.msra.mxu1 %v6591_v33 }
  0x73   :  { %345 = vmatprep.mubr.f32.mxu0 %v8276_v0  ;;  %v6481_v36 = vpack.c.bf16 %v962_v29, %v958_v28  ;;  %v966_v41 = vld [vmem:[#allocation8 + $0x248] sm:$0xff]  ;;  %v6595_v46 = vpack.c.bf16 %v931_v39, %v927_v38  ;;  %v940_v48 = vld [vmem:[#allocation8 + $0x178] sm:$0xff]  ;;  %v969_v50 = vld [vmem:[#allocation8 + $0x260] sm:$0xff] }
  0x74   :  { %6468 = vmatpush1.bf16.msra.mxu0 %v6467_v54  ;;  %6381 = vmatmul.mubr.msk.f32.gmra.mrb[8].mxu1 %vm154_vm0, %v96_v40  ;;  %v8460_v40 = vld [vmem:[%s12375_s0 + $0x48] sm:$0xff]  ;;  %v935_v51 = vld [vmem:[#allocation8 + $0x150] sm:$0xff]  ;;  %v6487_v57 = vpack.c.bf16 %v969_v50, %v965_v45  ;;  %v944_v60 = vld [vmem:[#allocation8 + $0x198] sm:$0xff] }
  0x75   :  { %6470 = vmatprep.subr.bf16.mxu0 %v6469_v59  ;;  %602 = vmatprep.mubr.f32.mxu1 %v8276_v0  ;;  %v970_v42 = vld [vmem:[#allocation8 + $0x268] sm:$0xff]  ;;  %v939_v52 = vld [vmem:[#allocation8 + $0x170] sm:$0xff]  ;;  %v973_v58 = vld [vmem:[#allocation8 + $0x280] sm:$0xff] }
  0x76   :  { %6350 = vmatmul.mubr.msk.f32.gmra.mrb[10].mxu0 %vm154_vm0, %v8419_v47  ;;  %v6485_v49 = vpack.c.bf16 %v970_v42, %v966_v41  ;;  %v8471_v53 = vld [vmem:[%s12375_s0 + $0x50] sm:$0xff]  ;;  %6594 = vmatprep.subr.bf16.mxu1 %v6593_v43  ;;  %v6599_v59 = vpack.c.bf16 %v939_v52, %v935_v51  ;;  %v948_v61 = vld [vmem:[#allocation8 + $0x1b8] sm:$0xff]  ;;  %v977_v63 = vld [vmem:[#allocation8 + $0x2a0] sm:$0xff] }
  0x77   :  { %351 = vmatprep.mubr.f32.mxu0 %v8276_v0  ;;  %v974_v54 = vld [vmem:[#allocation8 + $0x288] sm:$0xff]  ;;  %6596 = vmatpush1.bf16.msra.mxu1 %v6595_v46  ;;  %v947_v2 = vld [vmem:[#allocation8 + $0x1b0] sm:$0xff]  ;;  %v6601_v6 = vpack.c.bf16 %v948_v61, %v944_v60  ;;  %v6491_v7 = vpack.c.bf16 %v977_v63, %v973_v58  ;;  %v981_v8 = vld [vmem:[#allocation8 + $0x2c0] sm:$0xff] }
  0x78   :  { %6472 = vmatpush1.bf16.msra.mxu0 %v6471_v5  ;;  %6382 = vmatmul.mubr.msk.f32.gmra.mrb[10].mxu1 %vm154_vm0, %v8419_v47  ;;  %v936_v47 = vld [vmem:[#allocation8 + $0x158] sm:$0xff]  ;;  %v978_v55 = vld [vmem:[#allocation8 + $0x2a8] sm:$0xff]  ;;  %v985_v13 = vld [vmem:[#allocation8 + $0x2e0] sm:$0xff] }
  0x79   :  { %6474 = vmatprep.subr.bf16.mxu0 %v6473_v10  ;;  %608 = vmatprep.mubr.f32.mxu1 %v8276_v0  ;;  %v6597_v56 = vpack.c.bf16 %v940_v48, %v936_v47  ;;  %v6489_v62 = vpack.c.bf16 %v978_v55, %v974_v54  ;;  %v8482_v3 = vld [vmem:[%s12375_s0 + $0x58] sm:$0xff]  ;;  %v982_v4 = vld [vmem:[#allocation8 + $0x2c8] sm:$0xff]  ;;  %v8493_v16 = vld [vmem:[%s12375_s0 + $0x60] sm:$0xff]  ;;  %v6495_v20 = vpack.c.bf16 %v985_v13, %v981_v8 }
  0x7a   :  { %6351 = vmatmul.mubr.msk.f32.gmra.mrb[12].mxu0 %vm154_vm0, %v8429_v1  ;;  %v986_v5 = vld [vmem:[#allocation8 + $0x2e8] sm:$0xff]  ;;  %v952_v10 = vld [vmem:[#allocation8 + $0x1d8] sm:$0xff]  ;;  %v955_v15 = vld [vmem:[#allocation8 + $0x1f0] sm:$0xff] }
  0x7b   :  { %357 = vmatprep.mubr.f32.mxu0 %v8276_v0  ;;  %6598 = vmatprep.subr.bf16.mxu1 %v6597_v56  ;;  %v956_v11 = vld [vmem:[#allocation8 + $0x1f8] sm:$0xff]  ;;  %v6493_v12 = vpack.c.bf16 %v986_v5, %v982_v4  ;;  %v990_v17 = vld [vmem:[#allocation8 + $0x308] sm:$0xff]  ;;  %v989_v22 = vld [vmem:[#allocation8 + $0x300] sm:$0xff] }
  0x7c   :  { %6476 = vmatpush1.bf16.msra.mxu0 %v6475_v18  ;;  %6383 = vmatmul.mubr.msk.f32.gmra.mrb[12].mxu1 %vm154_vm0, %v8429_v1  ;;  %v943_v1 = vld [vmem:[#allocation8 + $0x190] sm:$0xff]  ;;  %v994_v18 = vld [vmem:[#allocation8 + $0x328] sm:$0xff]  ;;  %v6605_v19 = vpack.c.bf16 %v956_v11, %v952_v10  ;;  %v964_v24 = vld [vmem:[#allocation8 + $0x238] sm:$0xff] }
  0x7d   :  { %6478 = vmatprep.subr.bf16.mxu0 %v6477_v23  ;;  %614 = vmatprep.mubr.f32.mxu1 %v8276_v0  ;;  %v6603_v9 = vpack.c.bf16 %v947_v2, %v943_v1  ;;  %v960_v23 = vld [vmem:[#allocation8 + $0x218] sm:$0xff]  ;;  %v6497_v25 = vpack.c.bf16 %v994_v18, %v990_v17  ;;  %v993_v26 = vld [vmem:[#allocation8 + $0x320] sm:$0xff]  ;;  %v963_v28 = vld [vmem:[#allocation8 + $0x230] sm:$0xff] }
  0x7e   :  { %6352 = vmatmul.mubr.msk.f32.gmra.mrb[14].mxu0 %vm154_vm0, %v8439_v14  ;;  %6600 = vmatpush1.bf16.msra.mxu1 %v6599_v59  ;;  %v8504_v29 = vld [vmem:[%s12375_s0 + $0x68] sm:$0xff]  ;;  %v968_v30 = vld [vmem:[#allocation8 + $0x258] sm:$0xff]  ;;  %v6609_v32 = vpack.c.bf16 %v964_v24, %v960_v23  ;;  %v6499_v33 = vpack.c.bf16 %v993_v26, %v989_v22  ;;  %v967_v35 = vld [vmem:[#allocation8 + $0x250] sm:$0xff] }
  0x7f   :  { %363 = vmatprep.mubr.f32.mxu0 %v8276_v0  ;;  %6602 = vmatprep.subr.bf16.mxu1 %v6601_v6  ;;  %v1002_v37 = vld [vmem:[#allocation8 + $0x368] sm:$0xff]  ;;  %v971_v39 = vld [vmem:[#allocation8 + $0x270] sm:$0xff]  ;;  %v1001_v41 = vld [vmem:[#allocation8 + $0x360] sm:$0xff] }
  0x80   :  { %6480 = vmatpush1.bf16.msra.mxu0 %v6479_v31  ;;  %6384 = vmatmul.mubr.msk.f32.gmra.mrb[14].mxu1 %vm154_vm0, %v8439_v14  ;;  %v951_v14 = vld [vmem:[#allocation8 + $0x1d0] sm:$0xff]  ;;  %v972_v31 = vld [vmem:[#allocation8 + $0x278] sm:$0xff]  ;;  %v6615_v46 = vpack.c.bf16 %v971_v39, %v967_v35  ;;  %v1010_v50 = vld [vmem:[#allocation8 + $0x3a8] sm:$0xff] }
  0x81   :  { %6482 = vmatprep.subr.bf16.mxu0 %v6481_v36  ;;  %620 = vmatprep.mubr.f32.mxu1 %v8276_v0  ;;  %v6607_v21 = vpack.c.bf16 %v955_v15, %v951_v14  ;;  %v998_v36 = vld [vmem:[#allocation8 + $0x348] sm:$0xff]  ;;  %v6613_v38 = vpack.c.bf16 %v972_v31, %v968_v30  ;;  %v976_v43 = vld [vmem:[#allocation8 + $0x298] sm:$0xff]  ;;  %v975_v48 = vld [vmem:[#allocation8 + $0x290] sm:$0xff] }
  0x82   :  { %6353 = vmatmul.mubr.msk.f32.gmra.mrb[16].mxu0 %vm154_vm0, %v8449_v27  ;;  %6604 = vmatpush1.bf16.msra.mxu1 %v6603_v9  ;;  %v106_v42 = vld [vmem:[%s12375_s0 + $0x70] sm:$0xff]  ;;  %v6501_v45 = vpack.c.bf16 %v1002_v37, %v998_v36  ;;  %v1009_v54 = vld [vmem:[#allocation8 + $0x3a0] sm:$0xff]  ;;  %v107_v55 = vld [vmem:[%s12375_s0 + $0x78] sm:$0xff] }
  0x83   :  { %369 = vmatprep.mubr.f32.mxu0 %v8276_v0  ;;  %6606 = vmatprep.subr.bf16.mxu1 %v6605_v19  ;;  %v979_v52 = vld [vmem:[#allocation8 + $0x2b0] sm:$0xff]  ;;  %v984_v56 = vld [vmem:[#allocation8 + $0x2d8] sm:$0xff]  ;;  %v1018_v63 = vld [vmem:[#allocation8 + $0x3e8] sm:$0xff] }
  0x84   :  { %6484 = vmatpush1.bf16.msra.mxu0 %v6483_v44  ;;  %6385 = vmatmul.mubr.msk.f32.gmra.mrb[16].mxu1 %vm154_vm0, %v8449_v27  ;;  %v959_v27 = vld [vmem:[#allocation8 + $0x210] sm:$0xff]  ;;  %v980_v44 = vld [vmem:[#allocation8 + $0x2b8] sm:$0xff]  ;;  %v6619_v59 = vpack.c.bf16 %v979_v52, %v975_v48  ;;  %v1017_v4 = vld [vmem:[#allocation8 + $0x3e0] sm:$0xff] }
  0x85   :  { %6486 = vmatprep.subr.bf16.mxu0 %v6485_v49  ;;  %626 = vmatprep.mubr.f32.mxu1 %v8276_v0  ;;  %v6611_v34 = vpack.c.bf16 %v963_v28, %v959_v27  ;;  %v1006_v49 = vld [vmem:[#allocation8 + $0x388] sm:$0xff]  ;;  %v6617_v51 = vpack.c.bf16 %v980_v44, %v976_v43  ;;  %v983_v60 = vld [vmem:[#allocation8 + $0x2d0] sm:$0xff]  ;;  %v108_v5 = vld [vmem:[%s12375_s0 + $0x80] sm:$0xff] }
  0x86   :  { %6354 = vmatmul.mubr.msk.f32.gmra.mrb[18].mxu0 %vm154_vm0, %v8460_v40  ;;  %6608 = vmatpush1.bf16.msra.mxu1 %v6607_v21  ;;  %v6505_v58 = vpack.c.bf16 %v1010_v50, %v1006_v49  ;;  %v987_v2 = vld [vmem:[#allocation8 + $0x2f0] sm:$0xff]  ;;  %v992_v6 = vld [vmem:[#allocation8 + $0x318] sm:$0xff]  ;;  %v109_v14 = vld [vmem:[%s12375_s0 + $0x88] sm:$0xff] }
  0x87   :  { %375 = vmatprep.mubr.f32.mxu0 %v8276_v0  ;;  %6610 = vmatprep.subr.bf16.mxu1 %v6609_v32  ;;  %v6623_v9 = vpack.c.bf16 %v987_v2, %v983_v60  ;;  %v995_v13 = vld [vmem:[#allocation8 + $0x330] sm:$0xff]  ;;  %v1000_v15 = vld [vmem:[#allocation8 + $0x358] sm:$0xff]  ;;  %v113_v30 = vld [vmem:[%s12375_s0 + $0xa8] sm:$0xff] }
  0x88   :  { %6488 = vmatpush1.bf16.msra.mxu0 %v6487_v57  ;;  %6386 = vmatmul.mubr.msk.f32.gmra.mrb[18].mxu1 %vm154_vm0, %v8460_v40  ;;  %v997_v40 = vld [vmem:[#allocation8 + $0x340] sm:$0xff]  ;;  %v988_v57 = vld [vmem:[#allocation8 + $0x2f8] sm:$0xff]  ;;  %v999_v19 = vld [vmem:[#allocation8 + $0x350] sm:$0xff] }
  0x89   :  { %6490 = vmatprep.subr.bf16.mxu0 %v6489_v62  ;;  %632 = vmatprep.mubr.f32.mxu1 %v8276_v0  ;;  %v6503_v47 = vpack.c.bf16 %v1001_v41, %v997_v40  ;;  %v1014_v62 = vld [vmem:[#allocation8 + $0x3c8] sm:$0xff]  ;;  %v6621_v1 = vpack.c.bf16 %v988_v57, %v984_v56  ;;  %v1008_v22 = vld [vmem:[#allocation8 + $0x398] sm:$0xff]  ;;  %v1007_v28 = vld [vmem:[#allocation8 + $0x390] sm:$0xff] }
  0x8a   :  { %6355 = vmatmul.mubr.msk.f32.gmra.mrb[20].mxu0 %vm154_vm0, %v8471_v53  ;;  %6612 = vmatpush1.bf16.msra.mxu1 %v6611_v34  ;;  %v6509_v8 = vpack.c.bf16 %v1018_v63, %v1014_v62  ;;  %v110_v21 = vld [vmem:[%s12375_s0 + $0x90] sm:$0xff]  ;;  %v1012_v23 = vld [vmem:[#allocation8 + $0x3b8] sm:$0xff]  ;;  %v117_v44 = vld [vmem:[%s12375_s0 + $0xc8] sm:$0xff] }
  0x8b   :  { %381 = vmatprep.mubr.f32.mxu0 %v8276_v0  ;;  %6614 = vmatprep.subr.bf16.mxu1 %v6613_v38  ;;  %v111_v26 = vld [vmem:[%s12375_s0 + $0x98] sm:$0xff]  ;;  %v112_v27 = vld [vmem:[%s12375_s0 + $0xa0] sm:$0xff]  ;;  %v114_v37 = vld [vmem:[%s12375_s0 + $0xb0] sm:$0xff] }
  0x8c   :  { %6492 = vmatpush1.bf16.msra.mxu0 %v6491_v7  ;;  %6387 = vmatmul.mubr.msk.f32.gmra.mrb[20].mxu1 %vm154_vm0, %v8471_v53  ;;  %v1005_v53 = vld [vmem:[#allocation8 + $0x380] sm:$0xff]  ;;  %v996_v7 = vld [vmem:[#allocation8 + $0x338] sm:$0xff]  ;;  %v1015_v35 = vld [vmem:[#allocation8 + $0x3d0] sm:$0xff] }
  0x8d   :  { %6494 = vmatprep.subr.bf16.mxu0 %v6493_v12  ;;  %638 = vmatprep.mubr.f32.mxu1 %v8276_v0  ;;  %v6507_v61 = vpack.c.bf16 %v1009_v54, %v1005_v53  ;;  %v6625_v11 = vpack.c.bf16 %v996_v7, %v992_v6  ;;  %v991_v12 = vld [vmem:[#allocation8 + $0x310] sm:$0xff]  ;;  %v1016_v32 = vld [vmem:[#allocation8 + $0x3d8] sm:$0xff]  ;;  %v1022_v40 = vld [vmem:[#allocation8 + $0x408] sm:$0xff]  ;;  %v12383_v54 = vlaneseq }
  0x8e   :  { %6356 = vmatmul.mubr.msk.f32.gmra.mrb[22].mxu0 %vm154_vm0, %v8482_v3  ;;  %6616 = vmatpush1.bf16.msra.mxu1 %v6615_v46  ;;  %v6627_v17 = vpack.c.bf16 %v995_v13, %v991_v12  ;;  %v1019_v36 = vld [vmem:[#allocation8 + $0x3f0] sm:$0xff]  ;;  %v1026_v41 = vld [vmem:[#allocation8 + $0x428] sm:$0xff]  ;;  %v116_v43 = vld [vmem:[%s12375_s0 + $0xc0] sm:$0xff] }
  0x8f   :  { %387 = vmatprep.mubr.f32.mxu0 %v8276_v0  ;;  %6618 = vmatprep.subr.bf16.mxu1 %v6617_v51  ;;  %v6639_v38 = vpack.c.bf16 %v1019_v36, %v1015_v35  ;;  %v115_v39 = vld [vmem:[%s12375_s0 + $0xb8] sm:$0xff]  ;;  %v121_v48 = vld [vmem:[%s12375_s0 + $0xe8] sm:$0xff]  ;;  %v122_v49 = vld [vmem:[%s12375_s0 + $0xf0] sm:$0xff] }
  0x90   :  { %6496 = vmatpush1.bf16.msra.mxu0 %v6495_v20  ;;  %6388 = vmatmul.mubr.msk.f32.gmra.mrb[22].mxu1 %vm154_vm0, %v8482_v3  ;;  %v1013_v3 = vld [vmem:[#allocation8 + $0x3c0] sm:$0xff]  ;;  %v1003_v20 = vld [vmem:[#allocation8 + $0x370] sm:$0xff]  ;;  %v1024_v51 = vld [vmem:[#allocation8 + $0x418] sm:$0xff] }
  0x91   :  { %6498 = vmatprep.subr.bf16.mxu0 %v6497_v25  ;;  %644 = vmatprep.mubr.f32.mxu1 %v8276_v0  ;;  %v6511_v10 = vpack.c.bf16 %v1017_v4, %v1013_v3  ;;  %v6631_v24 = vpack.c.bf16 %v1003_v20, %v999_v19  ;;  %v6633_v25 = vpack.c.bf16 %v1012_v23, %v1008_v22  ;;  %v119_v46 = vld [vmem:[%s12375_s0 + $0xd8] sm:$0xff]  ;;  %v132_v57 = vld [vmem:[#allocation6] sm:$0xf]  ;;  %v1025_v62 = vld [vmem:[#allocation8 + $0x420] sm:$0xff] }
  0x92   :  { %6357 = vmatmul.mubr.msk.f32.gmra.mrb[24].mxu0 %vm154_vm0, %v8493_v16  ;;  %6620 = vmatpush1.bf16.msra.mxu1 %v6619_v59  ;;  %v123_v50 = vld [vmem:[%s12375_s0 + $0xf8] sm:$0xff]  ;;  %v1030_v2 = vld [vmem:[#allocation8 + $0x448] sm:$0xff]  ;;  %v1029_v12 = vld [vmem:[#allocation8 + $0x440] sm:$0xff] }
  0x93   :  { %393 = vmatprep.mubr.f32.mxu0 %v8276_v0  ;;  %6622 = vmatprep.subr.bf16.mxu1 %v6621_v1  ;;  %v1028_v52 = vld [vmem:[#allocation8 + $0x438] sm:$0xff]  ;;  %v1023_v3 = vld [vmem:[#allocation8 + $0x410] sm:$0xff]  ;;  %v1034_v6 = vld [vmem:[#allocation8 + $0x468] sm:$0xff] }
  0x94   :  { %6500 = vmatpush1.bf16.msra.mxu0 %v6499_v33  ;;  %6389 = vmatmul.mubr.msk.f32.gmra.mrb[24].mxu1 %vm154_vm0, %v8493_v16  ;;  %v1004_v16 = vld [vmem:[#allocation8 + $0x378] sm:$0xff]  ;;  %v6641_v53 = vpack.c.bf16 %v1028_v52, %v1024_v51  ;;  %v1027_v4 = vld [vmem:[#allocation8 + $0x430] sm:$0xff]  ;;  %v1033_v13 = vld [vmem:[#allocation8 + $0x460] sm:$0xff] }
  0x95   :  { %650 = vmatprep.mubr.f32.mxu1 %v8276_v0  ;;  %6502 = vmatprep.subr.bf16.mxu0 %v6501_v45  ;;  %v6629_v18 = vpack.c.bf16 %v1004_v16, %v1000_v15  ;;  %v1020_v33 = vld [vmem:[#allocation8 + $0x3f8] sm:$0xff]  ;;  %v118_v45 = vld [vmem:[%s12375_s0 + $0xd0] sm:$0xff]  ;;  %v1049_v51 = vld [vmem:[#allocation8 + $0x4e0] sm:$0xff] }
  0x96   :  { %6358 = vmatmul.mubr.msk.f32.gmra.mrb[26].mxu0 %vm154_vm0, %v8504_v29  ;;  %6624 = vmatpush1.bf16.msra.mxu1 %v6623_v9  ;;  %v6637_v34 = vpack.c.bf16 %v1020_v33, %v1016_v32  ;;  %v1032_v7 = vld [vmem:[#allocation8 + $0x458] sm:$0xff]  ;;  %v1038_v19 = vld [vmem:[#allocation8 + $0x488] sm:$0xff]  ;;  %v1035_v22 = vld [vmem:[#allocation8 + $0x470] sm:$0xff] }
  0x97   :  { %399 = vmatprep.mubr.f32.mxu0 %v8276_v0  ;;  %6626 = vmatprep.subr.bf16.mxu1 %v6625_v11 }
  0x98   :  { %6504 = vmatpush1.bf16.msra.mxu0 %v6503_v47  ;;  %6390 = vmatmul.mubr.msk.f32.gmra.mrb[26].mxu1 %vm154_vm0, %v8504_v29  ;;  %v1011_v29 = vld [vmem:[#allocation8 + $0x3b0] sm:$0xff]  ;;  %v120_v47 = vld [vmem:[%s12375_s0 + $0xe0] sm:$0xff] }
  0x99   :  { %656 = vmatprep.mubr.f32.mxu1 %v8276_v0  ;;  %6506 = vmatprep.subr.bf16.mxu0 %v6505_v58  ;;  %v6635_v31 = vpack.c.bf16 %v1011_v29, %v1007_v28  ;;  %v6519_v29 = vpack.c.bf16 %v1033_v13, %v1029_v12  ;;  %v1053_v13 = vld [vmem:[#allocation8 + $0x500] sm:$0xff] }
  0x9a   :  { %6359 = vmatmul.mubr.msk.f32.gmra.mrb[28].mxu0 %vm154_vm0, %v106_v42  ;;  %6628 = vmatpush1.bf16.msra.mxu1 %v6627_v17 }
  0x9b   :  { %405 = vmatprep.mubr.f32.mxu0 %v8276_v0  ;;  %6630 = vmatprep.subr.bf16.mxu1 %v6629_v18  ;;  %v6517_v18 = vpack.c.bf16 %v1034_v6, %v1030_v2  ;;  %v1051_v2 = vld [vmem:[#allocation8 + $0x4f0] sm:$0xff]  ;;  %v1056_v6 = vld [vmem:[#allocation8 + $0x518] sm:$0xff] }
  0x9c   :  { %6508 = vmatpush1.bf16.msra.mxu0 %v6507_v61  ;;  %6391 = vmatmul.mubr.msk.f32.gmra.mrb[28].mxu1 %vm154_vm0, %v106_v42  ;;  %v6513_v42 = vpack.c.bf16 %v1026_v41, %v1022_v40  ;;  %v1021_v61 = vld [vmem:[#allocation8 + $0x400] sm:$0xff]  ;;  %v1043_v40 = vld [vmem:[#allocation8 + $0x4b0] sm:$0xff] }
  0x9d   :  { %662 = vmatprep.mubr.f32.mxu1 %v8276_v0  ;;  %6510 = vmatprep.subr.bf16.mxu0 %v6509_v8  ;;  %v1036_v8 = vld [vmem:[#allocation8 + $0x478] sm:$0xff]  ;;  %v6515_v11 = vpack.c.bf16 %v1025_v62, %v1021_v61  ;;  %v1054_v62 = vld [vmem:[#allocation8 + $0x508] sm:$0xff] }
  0x9e   :  { %6360 = vmatmul.mubr.msk.f32.gmra.mrb[30].mxu0 %vm154_vm0, %v107_v55  ;;  %6632 = vmatpush1.bf16.msra.mxu1 %v6631_v24  ;;  %v6645_v20 = vpack.c.bf16 %v1036_v8, %v1032_v7  ;;  %v1042_v24 = vld [vmem:[#allocation8 + $0x4a8] sm:$0xff]  ;;  %v1060_v7 = vld [vmem:[#allocation8 + $0x538] sm:$0xff] }
  0x9f   :  { %411 = vmatprep.mubr.f32.mxu0 %v8276_v0  ;;  %6634 = vmatprep.subr.bf16.mxu1 %v6633_v25  ;;  %v1040_v25 = vld [vmem:[#allocation8 + $0x498] sm:$0xff]  ;;  %v6521_v36 = vpack.c.bf16 %v1042_v24, %v1038_v19  ;;  %v1059_v24 = vld [vmem:[#allocation8 + $0x530] sm:$0xff] }
  0xa0   :  { %6512 = vmatpush1.bf16.msra.mxu0 %v6511_v10  ;;  %6392 = vmatmul.mubr.msk.f32.gmra.mrb[30].mxu1 %vm154_vm0, %v107_v55  ;;  %v8646_v55 = vshrl.u32 %v12383_v54, 7  ;;  %v1110_v54 = vld [vmem:[#allocation8 + $0x6c8] sm:$0xff] }
  0xa1   :  { %668 = vmatprep.mubr.f32.mxu1 %v8276_v0  ;;  %6514 = vmatprep.subr.bf16.mxu0 %v6513_v42 }
  0xa2   :  { %6361 = vmatmul.mubr.msk.f32.gmra.mrb[32].mxu0 %vm154_vm0, %v108_v5  ;;  %6636 = vmatpush1.bf16.msra.mxu1 %v6635_v31  ;;  %12719 = vst [vmem:[#allocation17_spill] sm:$0xff] %v8646_v55  ;;  %v8649_v56 = vsub.s32 0, %v8646_v55  ;;  %v8652_v58 = vsub.s32 1, %v8646_v55  ;;  %v1041_v31 = vld [vmem:[#allocation8 + $0x4a0] sm:$0xff] }
  0xa3   :  { %417 = vmatprep.mubr.f32.mxu0 %v8276_v0  ;;  %6638 = vmatprep.subr.bf16.mxu1 %v6637_v34 }
  0xa4   :  { %6393 = vmatmul.mubr.msk.f32.gmra.mrb[32].mxu1 %vm154_vm0, %v108_v5  ;;  %12720 = vst [vmem:[#allocation18_spill] sm:$0xff] %v8649_v56  ;;  %12721 = vst [vmem:[#allocation19_spill] sm:$0xff] %v8652_v58  ;;  %v8655_v59 = vrot.slane %v132_v57, %v8649_v56 }
  0xa5   :  { %674 = vmatprep.mubr.f32.mxu1 %v8276_v0 }
  0xa6   :  { %6362 = vmatmul.mubr.msk.f32.gmra.mrb[34].mxu0 %vm154_vm0, %v109_v14  ;;  %6640 = vmatpush1.bf16.msra.mxu1 %v6639_v38 }
  0xa7   :  { %423 = vmatprep.mubr.f32.mxu0 %v8276_v0  ;;  %6642 = vmatprep.subr.bf16.mxu1 %v6641_v53 }
  0xa8   :  { %6394 = vmatmul.mubr.msk.f32.gmra.mrb[34].mxu1 %vm154_vm0, %v109_v14  ;;  %v6643_v14 = vpack.c.bf16 %v1027_v4, %v1023_v3 }
  0xa9   :  { %680 = vmatprep.mubr.f32.mxu1 %v8276_v0 }
  0xaa   :  { %6363 = vmatmul.mubr.msk.f32.gmra.mrb[36].mxu0 %vm154_vm0, %v110_v21 }
  0xab   :  { %429 = vmatprep.mubr.f32.mxu0 %v8276_v0 }
  0xac   :  { %6395 = vmatmul.mubr.msk.f32.gmra.mrb[36].mxu1 %vm154_vm0, %v110_v21  ;;  %v1031_v21 = vld [vmem:[#allocation8 + $0x450] sm:$0xff] }
  0xad   :  { %686 = vmatprep.mubr.f32.mxu1 %v8276_v0  ;;  %v6647_v32 = vpack.c.bf16 %v1035_v22, %v1031_v21  ;;  %v1062_v21 = vld [vmem:[#allocation8 + $0x548] sm:$0xff]  ;;  %v6657_v22 = vpack.c.bf16 %v1060_v7, %v1056_v6 }
  0xae   :  { %6364 = vmatmul.mubr.msk.f32.gmra.mrb[38].mxu0 %vm154_vm0, %v111_v26 }
  0xaf   :  { %435 = vmatprep.mubr.f32.mxu0 %v8276_v0 }
  0xb0   :  { %6396 = vmatmul.mubr.msk.f32.gmra.mrb[38].mxu1 %vm154_vm0, %v111_v26  ;;  %v1044_v26 = vld [vmem:[#allocation8 + $0x4b8] sm:$0xff] }
  0xb1   :  { %692 = vmatprep.mubr.f32.mxu1 %v8276_v0  ;;  %v6649_v38 = vpack.c.bf16 %v1044_v26, %v1040_v25 }
  0xb2   :  { %6365 = vmatmul.mubr.msk.f32.gmra.mrb[40].mxu0 %vm154_vm0, %v112_v27 }
  0xb3   :  { %441 = vmatprep.mubr.f32.mxu0 %v8276_v0 }
  0xb4   :  { %6397 = vmatmul.mubr.msk.f32.gmra.mrb[40].mxu1 %vm154_vm0, %v112_v27 }
  0xb5   :  { %698 = vmatprep.mubr.f32.mxu1 %v8276_v0 }
  0xb6   :  { %6366 = vmatmul.mubr.msk.f32.gmra.mrb[42].mxu0 %vm154_vm0, %v113_v30 }
  0xb7   :  { %447 = vmatprep.mubr.f32.mxu0 %v8276_v0 }
  0xb8   :  { %6398 = vmatmul.mubr.msk.f32.gmra.mrb[42].mxu1 %vm154_vm0, %v113_v30  ;;  %v1037_v30 = vld [vmem:[#allocation8 + $0x480] sm:$0xff] }
  0xb9   :  { %704 = vmatprep.mubr.f32.mxu1 %v8276_v0 }
  0xba   :  { %6367 = vmatmul.mubr.msk.f32.gmra.mrb[44].mxu0 %vm154_vm0, %v114_v37 }
  0xbb   :  { %453 = vmatprep.mubr.f32.mxu0 %v8276_v0 }
  0xbc   :  { %6399 = vmatmul.mubr.msk.f32.gmra.mrb[44].mxu1 %vm154_vm0, %v114_v37  ;;  %v1046_v37 = vld [vmem:[#allocation8 + $0x4c8] sm:$0xff] }
  0xbd   :  { %710 = vmatprep.mubr.f32.mxu1 %v8276_v0 }
  0xbe   :  { %6368 = vmatmul.mubr.msk.f32.gmra.mrb[46].mxu0 %vm154_vm0, %v115_v39 }
  0xbf   :  { %459 = vmatprep.mubr.f32.mxu0 %v8276_v0 }
  0xc0   :  { %6400 = vmatmul.mubr.msk.f32.gmra.mrb[46].mxu1 %vm154_vm0, %v115_v39  ;;  %v1039_v39 = vld [vmem:[#allocation8 + $0x490] sm:$0xff] }
  0xc1   :  { %716 = vmatprep.mubr.f32.mxu1 %v8276_v0  ;;  %v6651_v52 = vpack.c.bf16 %v1043_v40, %v1039_v39 }
  0xc2   :  { %6369 = vmatmul.mubr.msk.f32.gmra.mrb[48].mxu0 %vm154_vm0, %v116_v43 }
  0xc3   :  { %465 = vmatprep.mubr.f32.mxu0 %v8276_v0 }
  0xc4   :  { %6401 = vmatmul.mubr.msk.f32.gmra.mrb[48].mxu1 %vm154_vm0, %v116_v43  ;;  %v1050_v43 = vld [vmem:[#allocation8 + $0x4e8] sm:$0xff] }
  0xc5   :  { %722 = vmatprep.mubr.f32.mxu1 %v8276_v0  ;;  %v6525_v61 = vpack.c.bf16 %v1050_v43, %v1046_v37  ;;  %v1065_v37 = vld [vmem:[#allocation8 + $0x560] sm:$0xff] }
  0xc6   :  { %6370 = vmatmul.mubr.msk.f32.gmra.mrb[50].mxu0 %vm154_vm0, %v117_v44 }
  0xc7   :  { %471 = vmatprep.mubr.f32.mxu0 %v8276_v0 }
  0xc8   :  { %6402 = vmatmul.mubr.msk.f32.gmra.mrb[50].mxu1 %vm154_vm0, %v117_v44  ;;  %v1048_v44 = vld [vmem:[#allocation8 + $0x4d8] sm:$0xff] }
  0xc9   :  { %728 = vmatprep.mubr.f32.mxu1 %v8276_v0 }
  0xca   :  { %6371 = vmatmul.mubr.msk.f32.gmra.mrb[52].mxu0 %vm154_vm0, %v118_v45 }
  0xcb   :  { %477 = vmatprep.mubr.f32.mxu0 %v8276_v0 }
  0xcc   :  { %6403 = vmatmul.mubr.msk.f32.gmra.mrb[52].mxu1 %vm154_vm0, %v118_v45  ;;  %v1052_v45 = vld [vmem:[#allocation8 + $0x4f8] sm:$0xff] }
  0xcd   :  { %734 = vmatprep.mubr.f32.mxu1 %v8276_v0 }
  0xce   :  { %6372 = vmatmul.mubr.msk.f32.gmra.mrb[54].mxu0 %vm154_vm0, %v119_v46 }
  0xcf   :  { %483 = vmatprep.mubr.f32.mxu0 %v8276_v0 }
  0xd0   :  { %6404 = vmatmul.mubr.msk.f32.gmra.mrb[54].mxu1 %vm154_vm0, %v119_v46 }
  0xd1   :  { %740 = vmatprep.mubr.f32.mxu1 %v8276_v0 }
  0xd2   :  { %6373 = vmatmul.mubr.msk.f32.gmra.mrb[56].mxu0 %vm154_vm0, %v120_v47 }
  0xd3   :  { %489 = vmatprep.mubr.f32.mxu0 %v8276_v0 }
  0xd4   :  { %6405 = vmatmul.mubr.msk.f32.gmra.mrb[56].mxu1 %vm154_vm0, %v120_v47 }
  0xd5   :  { %746 = vmatprep.mubr.f32.mxu1 %v8276_v0 }
  0xd6   :  { %6374 = vmatmul.mubr.msk.f32.gmra.mrb[58].mxu0 %vm154_vm0, %v121_v48 }
  0xd7   :  { %495 = vmatprep.mubr.f32.mxu0 %v8276_v0 }
  0xd8   :  { %6406 = vmatmul.mubr.msk.f32.gmra.mrb[58].mxu1 %vm154_vm0, %v121_v48 }
  0xd9   :  { %752 = vmatprep.mubr.f32.mxu1 %v8276_v0 }
  0xda   :  { %6375 = vmatmul.mubr.msk.f32.gmra.mrb[60].mxu0 %vm154_vm0, %v122_v49 }
  0xdb   :  { %501 = vmatprep.mubr.f32.mxu0 %v8276_v0 }
  0xdc   :  { %6407 = vmatmul.mubr.msk.f32.gmra.mrb[60].mxu1 %vm154_vm0, %v122_v49  ;;  %v6523_v49 = vpack.c.bf16 %v1041_v31, %v1037_v30  ;;  %v1068_v30 = vld [vmem:[#allocation8 + $0x578] sm:$0xff] }
  0xdd   :  { %758 = vmatprep.mubr.f32.mxu1 %v8276_v0  ;;  %v8658_v0 = vrot.slane %v132_v57, %v8652_v58 }
  0xde   :  { %6376 = vmatmul.mubr.msk.f32.gmra.mrb[62].mxu0 %vm154_vm0, %v123_v50 }
  0xe0   :  { %6408 = vmatmul.mubr.msk.f32.gmra.mrb[62].mxu1 %vm154_vm0, %v123_v50  ;;  %v1045_v50 = vld [vmem:[#allocation8 + $0x4c0] sm:$0xff] }
  0xe1   :  { %v6527_v12 = vpack.c.bf16 %v1049_v51, %v1045_v50 }
 0x135   :  { %v317_v60 = vpop.f32.mrb[0].mxu0 }
 0x136   :  { %v318_v63 = vadd.f32 %v317_v60, %v8655_v59  ;;  %v319_v1 = vpop.f32.mrb[1].mxu0 }
 0x137   :  { %v320_v5 = vadd.f32 %v319_v1, %v8658_v0  ;;  %v8677_v41 = vpop.f32.mrb[0].mxu1  ;;  %v1047_v1 = vld [vmem:[#allocation8 + $0x4d0] sm:$0xff] }
 0x138   :  { %v8664_v15 = vmax.f32 %v318_v63, 0.0  ;;  %v8682_v46 = vpop.f32.mrb[1].mxu1  ;;  %v6653_v63 = vpack.c.bf16 %v1052_v45, %v1048_v44  ;;  %v1070_v44 = vld [vmem:[#allocation8 + $0x588] sm:$0xff] }
 0x139   :  { %v8662_v9 = vmax.f32 %v320_v5, 0.0  ;;  %v323_v10 = vpop.f32.mrb[2].mxu0  ;;  %v1058_v5 = vld [vmem:[#allocation8 + $0x528] sm:$0xff] }
 0x13a   :  { %12723 = vst [vmem:[#allocation21_spill] sm:$0xff] %v8664_v15  ;;  %v324_v16 = vadd.f32 %v323_v10, %v8655_v59  ;;  %v325_v17 = vpop.f32.mrb[3].mxu0 }
 0x13b   :  { %12722 = vst [vmem:[#allocation20_spill] sm:$0xff] %v8662_v9  ;;  %v326_v23 = vadd.f32 %v325_v17, %v8658_v0  ;;  %1235 = vmatprep.mubr.f32.mxu0 %v8662_v9  ;;  %1749 = vmatprep.mubr.f32.mxu1 %v8662_v9  ;;  %v8691_v3 = vpop.f32.mrb[2].mxu1 }
 0x13c   :  { %1236 = vmatmul.mubr.f32.vlgmr.msra.gmra.mrb[64].mxu0 %v8664_v15  ;;  %1750 = vmatmul.mubr.f32.vlgmr.msra.gmra.mrb[64].mxu1 %v8664_v15  ;;  %v8674_v33 = vmax.f32 %v324_v16, 0.0  ;;  %v8696_v8 = vpop.f32.mrb[3].mxu1  ;;  %v6655_v16 = vpack.c.bf16 %v1051_v2, %v1047_v1  ;;  %v1069_v2 = vld [vmem:[#allocation8 + $0x580] sm:$0xff] }
 0x13d   :  { %v8672_v27 = vmax.f32 %v326_v23, 0.0  ;;  %6516 = vmatpush1.bf16.msra.mxu0 %v6515_v11  ;;  %v329_v28 = vpop.f32.mrb[4].mxu0  ;;  %6644 = vmatpush1.bf16.msra.mxu1 %v6643_v14  ;;  %v1057_v14 = vld [vmem:[#allocation8 + $0x520] sm:$0xff]  ;;  %v1055_v23 = vld [vmem:[#allocation8 + $0x510] sm:$0xff] }
 0x13e   :  { %12725 = vst [vmem:[#allocation23_spill] sm:$0xff] %v8674_v33  ;;  %v330_v34 = vadd.f32 %v329_v28, %v8655_v59  ;;  %v331_v35 = vpop.f32.mrb[5].mxu0  ;;  %6518 = vmatprep.subr.bf16.mxu0 %v6517_v18  ;;  %6646 = vmatprep.subr.bf16.mxu1 %v6645_v20  ;;  %v6529_v20 = vpack.c.bf16 %v1058_v5, %v1054_v62  ;;  %v1066_v28 = vld [vmem:[#allocation8 + $0x568] sm:$0xff] }
 0x13f   :  { %12724 = vst [vmem:[#allocation22_spill] sm:$0xff] %v8672_v27  ;;  %v332_v42 = vadd.f32 %v331_v35, %v8658_v0  ;;  %1241 = vmatprep.mubr.f32.mxu0 %v8672_v27  ;;  %1755 = vmatprep.mubr.f32.mxu1 %v8672_v27  ;;  %v8705_v25 = vpop.f32.mrb[4].mxu1  ;;  %v6531_v35 = vpack.c.bf16 %v1057_v14, %v1053_v13  ;;  %v1078_v13 = vld [vmem:[#allocation8 + $0x5c8] sm:$0xff] }
 0x140   :  { %1242 = vmatmul.mubr.f32.gmra.mrb[66].mxu0 %v8674_v33  ;;  %1756 = vmatmul.mubr.f32.gmra.mrb[66].mxu1 %v8674_v33  ;;  %v8688_v53 = vmax.f32 %v330_v34, 0.0  ;;  %v8710_v31 = vpop.f32.mrb[5].mxu1  ;;  %v6533_v43 = vpack.c.bf16 %v1066_v28, %v1062_v21  ;;  %v1082_v21 = vld [vmem:[#allocation8 + $0x5e8] sm:$0xff] }
 0x141   :  { %v8686_v47 = vmax.f32 %v332_v42, 0.0  ;;  %v335_v48 = vpop.f32.mrb[6].mxu0  ;;  %6520 = vmatpush1.bf16.msra.mxu0 %v6519_v29  ;;  %6648 = vmatpush1.bf16.msra.mxu1 %v6647_v32  ;;  %v1064_v29 = vld [vmem:[#allocation8 + $0x558] sm:$0xff] }
 0x142   :  { %12727 = vst [vmem:[#allocation25_spill] sm:$0xff] %v8688_v53  ;;  %v336_v57 = vadd.f32 %v335_v48, %v8655_v59  ;;  %v337_v60 = vpop.f32.mrb[7].mxu0  ;;  %6522 = vmatprep.subr.bf16.mxu0 %v6521_v36  ;;  %6650 = vmatprep.subr.bf16.mxu1 %v6649_v38  ;;  %v1061_v36 = vld [vmem:[#allocation8 + $0x540] sm:$0xff]  ;;  %v6659_v38 = vpack.c.bf16 %v1059_v24, %v1055_v23  ;;  %v1063_v48 = vld [vmem:[#allocation8 + $0x550] sm:$0xff]  ;;  %v1084_v23 = vld [vmem:[#allocation8 + $0x5f8] sm:$0xff] }
 0x143   :  { %12726 = vst [vmem:[#allocation24_spill] sm:$0xff] %v8686_v47  ;;  %v338_v4 = vadd.f32 %v337_v60, %v8658_v0  ;;  %1247 = vmatprep.mubr.f32.mxu0 %v8686_v47  ;;  %1761 = vmatprep.mubr.f32.mxu1 %v8686_v47  ;;  %v6661_v45 = vpack.c.bf16 %v1068_v30, %v1064_v29  ;;  %v8719_v50 = vpop.f32.mrb[6].mxu1  ;;  %v1076_v60 = vld [vmem:[#allocation8 + $0x5b8] sm:$0xff]  ;;  %v1077_v30 = vld [vmem:[#allocation8 + $0x5c0] sm:$0xff] }
 0x144   :  { %1248 = vmatmul.mubr.f32.gmra.mrb[68].mxu0 %v8688_v53  ;;  %1762 = vmatmul.mubr.f32.gmra.mrb[68].mxu1 %v8688_v53  ;;  %v8702_v17 = vmax.f32 %v336_v57, 0.0  ;;  %v1072_v57 = vld [vmem:[#allocation8 + $0x598] sm:$0xff]  ;;  %v6535_v1 = vpack.c.bf16 %v1065_v37, %v1061_v36 }
 0x145   :  { %v8700_v10 = vmax.f32 %v338_v4, 0.0  ;;  %v341_v11 = vpop.f32.mrb[8].mxu0  ;;  %6524 = vmatpush1.bf16.msra.mxu0 %v6523_v49  ;;  %6652 = vmatpush1.bf16.msra.mxu1 %v6651_v52  ;;  %v1067_v49 = vld [vmem:[#allocation8 + $0x570] sm:$0xff]  ;;  %v1074_v52 = vld [vmem:[#allocation8 + $0x5a8] sm:$0xff]  ;;  %v1073_v4 = vld [vmem:[#allocation8 + $0x5a0] sm:$0xff]  ;;  %v6665_v14 = vpack.c.bf16 %v1076_v60, %v1072_v57 }
 0x146   :  { %12729 = vst [vmem:[#allocation27_spill] sm:$0xff] %v8702_v17  ;;  %v342_v18 = vadd.f32 %v341_v11, %v8655_v59  ;;  %v343_v19 = vpop.f32.mrb[9].mxu0  ;;  %6526 = vmatprep.subr.bf16.mxu0 %v6525_v61  ;;  %6654 = vmatprep.subr.bf16.mxu1 %v6653_v63  ;;  %v8724_v61 = vpop.f32.mrb[7].mxu1  ;;  %v6663_v5 = vpack.c.bf16 %v1067_v49, %v1063_v48  ;;  %v1092_v57 = vld [vmem:[#allocation8 + $0x638] sm:$0xff] }
 0x147   :  { %12728 = vst [vmem:[#allocation26_spill] sm:$0xff] %v8700_v10  ;;  %v344_v26 = vadd.f32 %v343_v19, %v8658_v0  ;;  %1253 = vmatprep.mubr.f32.mxu0 %v8700_v10  ;;  %1767 = vmatprep.mubr.f32.mxu1 %v8700_v10  ;;  %v8733_v19 = vpop.f32.mrb[8].mxu1  ;;  %v6539_v29 = vpack.c.bf16 %v1073_v4, %v1069_v2  ;;  %v1085_v4 = vld [vmem:[#allocation8 + $0x600] sm:$0xff]  ;;  %v1143_v10 = vld [vmem:[#allocation8 + $0x7d0] sm:$0xff] }
 0x148   :  { %1254 = vmatmul.mubr.f32.gmra.mrb[70].mxu0 %v8702_v17  ;;  %1768 = vmatmul.mubr.f32.gmra.mrb[70].mxu1 %v8702_v17  ;;  %v8716_v39 = vmax.f32 %v342_v18, 0.0  ;;  %v1075_v18 = vld [vmem:[#allocation8 + $0x5b0] sm:$0xff]  ;;  %v8738_v24 = vpop.f32.mrb[9].mxu1 }
 0x149   :  { %v8714_v32 = vmax.f32 %v344_v26, 0.0  ;;  %v347_v34 = vpop.f32.mrb[10].mxu0  ;;  %6528 = vmatpush1.bf16.msra.mxu0 %v6527_v12  ;;  %6656 = vmatpush1.bf16.msra.mxu1 %v6655_v16  ;;  %v6537_v12 = vpack.c.bf16 %v1074_v52, %v1070_v44  ;;  %v1071_v16 = vld [vmem:[#allocation8 + $0x590] sm:$0xff]  ;;  %v1088_v52 = vld [vmem:[#allocation8 + $0x618] sm:$0xff] }
 0x14a   :  { %12731 = vst [vmem:[#allocation29_spill] sm:$0xff] %v8716_v39  ;;  %v348_v40 = vadd.f32 %v347_v34, %v8655_v59  ;;  %v349_v42 = vpop.f32.mrb[11].mxu0  ;;  %6530 = vmatprep.subr.bf16.mxu0 %v6529_v20  ;;  %6658 = vmatprep.subr.bf16.mxu1 %v6657_v22  ;;  %v1080_v22 = vld [vmem:[#allocation8 + $0x5d8] sm:$0xff]  ;;  %v1081_v34 = vld [vmem:[#allocation8 + $0x5e0] sm:$0xff]  ;;  %v1079_v44 = vld [vmem:[#allocation8 + $0x5d0] sm:$0xff] }
 0x14b   :  { %12730 = vst [vmem:[#allocation28_spill] sm:$0xff] %v8714_v32  ;;  %v350_v51 = vadd.f32 %v349_v42, %v8658_v0  ;;  %1259 = vmatprep.mubr.f32.mxu0 %v8714_v32  ;;  %1773 = vmatprep.mubr.f32.mxu1 %v8714_v32  ;;  %v1086_v42 = vld [vmem:[#allocation8 + $0x608] sm:$0xff]  ;;  %v8747_v48 = vpop.f32.mrb[10].mxu1  ;;  %v6543_v2 = vpack.c.bf16 %v1081_v34, %v1077_v30  ;;  %v1100_v30 = vld [vmem:[#allocation8 + $0x678] sm:$0xff] }
 0x14c   :  { %1260 = vmatmul.mubr.f32.gmra.mrb[72].mxu0 %v8716_v39  ;;  %1774 = vmatmul.mubr.f32.gmra.mrb[72].mxu1 %v8716_v39  ;;  %v8730_v6 = vmax.f32 %v348_v40, 0.0  ;;  %v6541_v40 = vpack.c.bf16 %v1082_v21, %v1078_v13  ;;  %v8752_v60 = vpop.f32.mrb[11].mxu1  ;;  %v1091_v21 = vld [vmem:[#allocation8 + $0x630] sm:$0xff] }
 0x14d   :  { %v8728_v62 = vmax.f32 %v350_v51, 0.0  ;;  %v353_v63 = vpop.f32.mrb[12].mxu0  ;;  %6532 = vmatpush1.bf16.msra.mxu0 %v6531_v35  ;;  %6660 = vmatpush1.bf16.msra.mxu1 %v6659_v38  ;;  %v6667_v35 = vpack.c.bf16 %v1075_v18, %v1071_v16  ;;  %v1090_v51 = vld [vmem:[#allocation8 + $0x628] sm:$0xff]  ;;  %v6673_v18 = vpack.c.bf16 %v1092_v57, %v1088_v52 }
 0x14e   :  { %12733 = vst [vmem:[#allocation31_spill] sm:$0xff] %v8730_v6  ;;  %v354_v7 = vadd.f32 %v353_v63, %v8655_v59  ;;  %v355_v11 = vpop.f32.mrb[13].mxu0  ;;  %6534 = vmatprep.subr.bf16.mxu0 %v6533_v43  ;;  %6662 = vmatprep.subr.bf16.mxu1 %v6661_v45  ;;  %v6669_v43 = vpack.c.bf16 %v1084_v23, %v1080_v22  ;;  %v1083_v45 = vld [vmem:[#allocation8 + $0x5f0] sm:$0xff]  ;;  %v1094_v16 = vld [vmem:[#allocation8 + $0x648] sm:$0xff] }
 0x14f   :  { %12732 = vst [vmem:[#allocation30_spill] sm:$0xff] %v8728_v62  ;;  %v356_v20 = vadd.f32 %v355_v11, %v8658_v0  ;;  %1265 = vmatprep.mubr.f32.mxu0 %v8728_v62  ;;  %1779 = vmatprep.mubr.f32.mxu1 %v8728_v62  ;;  %v8761_v22 = vpop.f32.mrb[12].mxu1  ;;  %v1102_v52 = vld [vmem:[#allocation8 + $0x688] sm:$0xff] }
 0x150   :  { %1266 = vmatmul.mubr.f32.gmra.mrb[74].mxu0 %v8730_v6  ;;  %1780 = vmatmul.mubr.f32.gmra.mrb[74].mxu1 %v8730_v6  ;;  %v8744_v36 = vmax.f32 %v354_v7, 0.0  ;;  %v6671_v7 = vpack.c.bf16 %v1083_v45, %v1079_v44  ;;  %v8766_v34 = vpop.f32.mrb[13].mxu1 }
 0x151   :  { %v8742_v26 = vmax.f32 %v356_v20, 0.0  ;;  %v359_v28 = vpop.f32.mrb[14].mxu0  ;;  %6536 = vmatpush1.bf16.msra.mxu0 %v6535_v1  ;;  %6664 = vmatpush1.bf16.msra.mxu1 %v6663_v5  ;;  %v1089_v5 = vld [vmem:[#allocation8 + $0x620] sm:$0xff]  ;;  %v1087_v20 = vld [vmem:[#allocation8 + $0x610] sm:$0xff] }
 0x152   :  { %12735 = vst [vmem:[#allocation33_spill] sm:$0xff] %v8744_v36  ;;  %v360_v37 = vadd.f32 %v359_v28, %v8655_v59  ;;  %v361_v38 = vpop.f32.mrb[15].mxu0  ;;  %6538 = vmatprep.subr.bf16.mxu0 %v6537_v12  ;;  %6666 = vmatprep.subr.bf16.mxu1 %v6665_v14  ;;  %v6545_v14 = vpack.c.bf16 %v1090_v51, %v1086_v42  ;;  %v1098_v28 = vld [vmem:[#allocation8 + $0x668] sm:$0xff]  ;;  %v1097_v42 = vld [vmem:[#allocation8 + $0x660] sm:$0xff] }
 0x153   :  { %12734 = vst [vmem:[#allocation32_spill] sm:$0xff] %v8742_v26  ;;  %v362_v49 = vadd.f32 %v361_v38, %v8658_v0  ;;  %1271 = vmatprep.mubr.f32.mxu0 %v8742_v26  ;;  %1785 = vmatprep.mubr.f32.mxu1 %v8742_v26  ;;  %v6547_v38 = vpack.c.bf16 %v1089_v5, %v1085_v4  ;;  %v1106_v4 = vld [vmem:[#allocation8 + $0x6a8] sm:$0xff]  ;;  %v1104_v5 = vld [vmem:[#allocation8 + $0x698] sm:$0xff] }
 0x154   :  { %1272 = vmatmul.mubr.f32.gmra.mrb[76].mxu0 %v8744_v36  ;;  %1786 = vmatmul.mubr.f32.gmra.mrb[76].mxu1 %v8744_v36  ;;  %v8758_v11 = vmax.f32 %v360_v37, 0.0  ;;  %v6549_v51 = vpack.c.bf16 %v1098_v28, %v1094_v16 }
 0x155   :  { %v8756_v63 = vmax.f32 %v362_v49, 0.0  ;;  %v365_v1 = vpop.f32.mrb[16].mxu0  ;;  %6540 = vmatpush1.bf16.msra.mxu0 %v6539_v29  ;;  %6668 = vmatpush1.bf16.msra.mxu1 %v6667_v35  ;;  %v1096_v29 = vld [vmem:[#allocation8 + $0x658] sm:$0xff] }
 0x156   :  { %12737 = vst [vmem:[#allocation35_spill] sm:$0xff] %v8758_v11  ;;  %v366_v12 = vadd.f32 %v365_v1, %v8655_v59  ;;  %v367_v13 = vpop.f32.mrb[17].mxu0  ;;  %6542 = vmatprep.subr.bf16.mxu0 %v6541_v40  ;;  %6670 = vmatprep.subr.bf16.mxu1 %v6669_v43  ;;  %v1093_v40 = vld [vmem:[#allocation8 + $0x640] sm:$0xff]  ;;  %v6675_v43 = vpack.c.bf16 %v1091_v21, %v1087_v20  ;;  %v1095_v1 = vld [vmem:[#allocation8 + $0x650] sm:$0xff] }
 0x157   :  { %12736 = vst [vmem:[#allocation34_spill] sm:$0xff] %v8756_v63  ;;  %v368_v23 = vadd.f32 %v367_v13, %v8658_v0  ;;  %1277 = vmatprep.mubr.f32.mxu0 %v8756_v63  ;;  %1791 = vmatprep.mubr.f32.mxu1 %v8756_v63  ;;  %v6677_v57 = vpack.c.bf16 %v1100_v30, %v1096_v29  ;;  %v1099_v13 = vld [vmem:[#allocation8 + $0x670] sm:$0xff]  ;;  %v1101_v20 = vld [vmem:[#allocation8 + $0x680] sm:$0xff] }
 0x158   :  { %1278 = vmatmul.mubr.f32.gmra.mrb[78].mxu0 %v8758_v11  ;;  %1792 = vmatmul.mubr.f32.gmra.mrb[78].mxu1 %v8758_v11  ;;  %v8772_v44 = vmax.f32 %v366_v12, 0.0  ;;  %v1105_v21 = vld [vmem:[#allocation8 + $0x6a0] sm:$0xff]  ;;  %v6679_v28 = vpack.c.bf16 %v1099_v13, %v1095_v1 }
 0x159   :  { %v8770_v35 = vmax.f32 %v368_v23, 0.0  ;;  %v371_v37 = vpop.f32.mrb[18].mxu0  ;;  %6544 = vmatpush1.bf16.msra.mxu0 %v6543_v2  ;;  %6672 = vmatpush1.bf16.msra.mxu1 %v6671_v7  ;;  %v8775_v23 = vpop.f32.mrb[14].mxu1  ;;  %v1108_v7 = vld [vmem:[#allocation8 + $0x6b8] sm:$0xff]  ;;  %v1109_v1 = vld [vmem:[#allocation8 + $0x6c0] sm:$0xff] }
 0x15a   :  { %12739 = vst [vmem:[#allocation37_spill] sm:$0xff] %v8772_v44  ;;  %v372_v45 = vadd.f32 %v371_v37, %v8655_v59  ;;  %v373_v49 = vpop.f32.mrb[19].mxu0  ;;  %6546 = vmatprep.subr.bf16.mxu0 %v6545_v14  ;;  %6674 = vmatprep.subr.bf16.mxu1 %v6673_v18  ;;  %v8780_v12 = vpop.f32.mrb[15].mxu1  ;;  %v6551_v18 = vpack.c.bf16 %v1097_v42, %v1093_v40  ;;  %v1114_v40 = vld [vmem:[#allocation8 + $0x6e8] sm:$0xff]  ;;  %v1112_v42 = vld [vmem:[#allocation8 + $0x6d8] sm:$0xff]  ;;  %v1113_v13 = vld [vmem:[#allocation8 + $0x6e0] sm:$0xff] }
 0x15b   :  { %12738 = vst [vmem:[#allocation36_spill] sm:$0xff] %v8770_v35  ;;  %v374_v2 = vadd.f32 %v373_v49, %v8658_v0  ;;  %1283 = vmatprep.mubr.f32.mxu0 %v8770_v35  ;;  %1797 = vmatprep.mubr.f32.mxu1 %v8770_v35  ;;  %v6553_v49 = vpack.c.bf16 %v1106_v4, %v1102_v52  ;;  %v8789_v11 = vpop.f32.mrb[16].mxu1 }
 0x15c   :  { %1284 = vmatmul.mubr.f32.gmra.mrb[80].mxu0 %v8772_v44  ;;  %1798 = vmatmul.mubr.f32.gmra.mrb[80].mxu1 %v8772_v44  ;;  %v8786_v29 = vmax.f32 %v372_v45, 0.0  ;;  %v6681_v35 = vpack.c.bf16 %v1108_v7, %v1104_v5  ;;  %v1103_v44 = vld [vmem:[#allocation8 + $0x690] sm:$0xff]  ;;  %v8794_v45 = vpop.f32.mrb[17].mxu1 }
 0x15d   :  { %v8784_v14 = vmax.f32 %v374_v2, 0.0  ;;  %v377_v16 = vpop.f32.mrb[20].mxu0  ;;  %6548 = vmatpush1.bf16.msra.mxu0 %v6547_v38  ;;  %6676 = vmatpush1.bf16.msra.mxu1 %v6675_v43  ;;  %v1107_v2 = vld [vmem:[#allocation8 + $0x6b0] sm:$0xff]  ;;  %v1116_v43 = vld [vmem:[#allocation8 + $0x6f8] sm:$0xff]  ;;  %v8803_v36 = vpop.f32.mrb[18].mxu1 }
 0x15e   :  { %12741 = vst [vmem:[#allocation39_spill] sm:$0xff] %v8786_v29  ;;  %v378_v30 = vadd.f32 %v377_v16, %v8655_v59  ;;  %v379_v37 = vpop.f32.mrb[21].mxu0  ;;  %6550 = vmatprep.subr.bf16.mxu0 %v6549_v51  ;;  %6678 = vmatprep.subr.bf16.mxu1 %v6677_v57  ;;  %v6555_v57 = vpack.c.bf16 %v1105_v21, %v1101_v20  ;;  %v1120_v20 = vld [vmem:[#allocation8 + $0x718] sm:$0xff] }
 0x15f   :  { %12740 = vst [vmem:[#allocation38_spill] sm:$0xff] %v8784_v14  ;;  %v380_v38 = vadd.f32 %v379_v37, %v8658_v0  ;;  %1289 = vmatprep.mubr.f32.mxu0 %v8784_v14  ;;  %1803 = vmatprep.mubr.f32.mxu1 %v8784_v14  ;;  %v6683_v4 = vpack.c.bf16 %v1107_v2, %v1103_v44  ;;  %v1118_v14 = vld [vmem:[#allocation8 + $0x708] sm:$0xff]  ;;  %v1124_v21 = vld [vmem:[#allocation8 + $0x738] sm:$0xff]  ;;  %v1121_v2 = vld [vmem:[#allocation8 + $0x720] sm:$0xff] }
 0x160   :  { %1290 = vmatmul.mubr.f32.gmra.mrb[82].mxu0 %v8786_v29  ;;  %1804 = vmatmul.mubr.f32.gmra.mrb[82].mxu1 %v8786_v29  ;;  %v8800_v5 = vmax.f32 %v378_v30, 0.0  ;;  %v6557_v37 = vpack.c.bf16 %v1114_v40, %v1110_v54  ;;  %v6685_v63 = vpack.c.bf16 %v1116_v43, %v1112_v42  ;;  %v1111_v29 = vld [vmem:[#allocation8 + $0x6d0] sm:$0xff]  ;;  %v1122_v44 = vld [vmem:[#allocation8 + $0x728] sm:$0xff]  ;;  %v6559_v30 = vpack.c.bf16 %v1113_v13, %v1109_v1  ;;  %v1128_v1 = vld [vmem:[#allocation8 + $0x758] sm:$0xff] }
 0x161   :  { %v8798_v51 = vmax.f32 %v380_v38, 0.0  ;;  %v383_v52 = vpop.f32.mrb[22].mxu0  ;;  %6552 = vmatpush1.bf16.msra.mxu0 %v6551_v18  ;;  %6680 = vmatpush1.bf16.msra.mxu1 %v6679_v28  ;;  %v1115_v38 = vld [vmem:[#allocation8 + $0x6f0] sm:$0xff]  ;;  %v8808_v28 = vpop.f32.mrb[19].mxu1  ;;  %v6689_v26 = vpack.c.bf16 %v1124_v21, %v1120_v20  ;;  %v1132_v13 = vld [vmem:[#allocation8 + $0x778] sm:$0xff] }
 0x162   :  { %12743 = vst [vmem:[#allocation41_spill] sm:$0xff] %v8800_v5  ;;  %v384_v7 = vadd.f32 %v383_v52, %v8655_v59  ;;  %v385_v16 = vpop.f32.mrb[23].mxu0  ;;  %6554 = vmatprep.subr.bf16.mxu0 %v6553_v49  ;;  %6682 = vmatprep.subr.bf16.mxu1 %v6681_v35  ;;  %v1117_v49 = vld [vmem:[#allocation8 + $0x700] sm:$0xff]  ;;  %v6687_v40 = vpack.c.bf16 %v1115_v38, %v1111_v29  ;;  %v8817_v6 = vpop.f32.mrb[20].mxu1  ;;  %v1130_v29 = vld [vmem:[#allocation8 + $0x768] sm:$0xff] }
 0x163   :  { %12742 = vst [vmem:[#allocation40_spill] sm:$0xff] %v8798_v51  ;;  %v386_v18 = vadd.f32 %v385_v16, %v8658_v0  ;;  %1295 = vmatprep.mubr.f32.mxu0 %v8798_v51  ;;  %1809 = vmatprep.mubr.f32.mxu1 %v8798_v51  ;;  %v6561_v16 = vpack.c.bf16 %v1122_v44, %v1118_v14  ;;  %v1126_v51 = vld [vmem:[#allocation8 + $0x748] sm:$0xff]  ;;  %v1129_v38 = vld [vmem:[#allocation8 + $0x760] sm:$0xff] }
 0x164   :  { %1296 = vmatmul.mubr.f32.gmra.mrb[84].mxu0 %v8800_v5  ;;  %1810 = vmatmul.mubr.f32.gmra.mrb[84].mxu1 %v8800_v5  ;;  %v8814_v42 = vmax.f32 %v384_v7, 0.0  ;;  %v1119_v5 = vld [vmem:[#allocation8 + $0x710] sm:$0xff]  ;;  %v6563_v7 = vpack.c.bf16 %v1121_v2, %v1117_v49  ;;  %v6693_v62 = vpack.c.bf16 %v1132_v13, %v1128_v1  ;;  %v1136_v49 = vld [vmem:[#allocation8 + $0x798] sm:$0xff] }
 0x165   :  { %v8812_v54 = vmax.f32 %v386_v18, 0.0  ;;  %v389_v35 = vpop.f32.mrb[24].mxu0  ;;  %6556 = vmatpush1.bf16.msra.mxu0 %v6555_v57  ;;  %6684 = vmatpush1.bf16.msra.mxu1 %v6683_v4  ;;  %v1123_v18 = vld [vmem:[#allocation8 + $0x730] sm:$0xff]  ;;  %v8822_v4 = vpop.f32.mrb[21].mxu1  ;;  %v1140_v2 = vld [vmem:[#allocation8 + $0x7b8] sm:$0xff] }
 0x166   :  { %12745 = vst [vmem:[#allocation43_spill] sm:$0xff] %v8814_v42  ;;  %v390_v43 = vadd.f32 %v389_v35, %v8655_v59  ;;  %v391_v52 = vpop.f32.mrb[25].mxu0  ;;  %6558 = vmatprep.subr.bf16.mxu0 %v6557_v37  ;;  %6686 = vmatprep.subr.bf16.mxu1 %v6685_v63  ;;  %v1125_v37 = vld [vmem:[#allocation8 + $0x740] sm:$0xff]  ;;  %v6691_v44 = vpack.c.bf16 %v1123_v18, %v1119_v5  ;;  %v8831_v39 = vpop.f32.mrb[22].mxu1  ;;  %v1138_v5 = vld [vmem:[#allocation8 + $0x7a8] sm:$0xff] }
 0x167   :  { %12744 = vst [vmem:[#allocation42_spill] sm:$0xff] %v8812_v54  ;;  %v392_v57 = vadd.f32 %v391_v52, %v8658_v0  ;;  %1301 = vmatprep.mubr.f32.mxu0 %v8812_v54  ;;  %1815 = vmatprep.mubr.f32.mxu1 %v8812_v54  ;;  %v6565_v52 = vpack.c.bf16 %v1130_v29, %v1126_v51  ;;  %v1134_v54 = vld [vmem:[#allocation8 + $0x788] sm:$0xff]  ;;  %v1137_v18 = vld [vmem:[#allocation8 + $0x7a0] sm:$0xff] }
 0x168   :  { %1302 = vmatmul.mubr.f32.gmra.mrb[86].mxu0 %v8814_v42  ;;  %1816 = vmatmul.mubr.f32.gmra.mrb[86].mxu1 %v8814_v42  ;;  %v8828_v20 = vmax.f32 %v390_v43, 0.0  ;;  %v1127_v42 = vld [vmem:[#allocation8 + $0x750] sm:$0xff]  ;;  %v6567_v43 = vpack.c.bf16 %v1129_v38, %v1125_v37  ;;  %v6697_v32 = vpack.c.bf16 %v1140_v2, %v1136_v49  ;;  %v1144_v37 = vld [vmem:[#allocation8 + $0x7d8] sm:$0xff] }
 0x169   :  { %v8826_v63 = vmax.f32 %v392_v57, 0.0  ;;  %v395_v14 = vpop.f32.mrb[26].mxu0  ;;  %6560 = vmatpush1.bf16.msra.mxu0 %v6559_v30  ;;  %6688 = vmatpush1.bf16.msra.mxu1 %v6687_v40  ;;  %v1131_v57 = vld [vmem:[#allocation8 + $0x770] sm:$0xff]  ;;  %v8836_v40 = vpop.f32.mrb[23].mxu1  ;;  %v1148_v38 = vld [vmem:[#allocation8 + $0x7f8] sm:$0xff] }
 0x16a   :  { %12747 = vst [vmem:[#allocation45_spill] sm:$0xff] %v8828_v20  ;;  %v396_v21 = vadd.f32 %v395_v14, %v8655_v59  ;;  %v397_v35 = vpop.f32.mrb[27].mxu0  ;;  %6562 = vmatprep.subr.bf16.mxu0 %v6561_v16  ;;  %6690 = vmatprep.subr.bf16.mxu1 %v6689_v26  ;;  %v1133_v16 = vld [vmem:[#allocation8 + $0x780] sm:$0xff]  ;;  %v6695_v29 = vpack.c.bf16 %v1131_v57, %v1127_v42  ;;  %v8845_v17 = vpop.f32.mrb[24].mxu1  ;;  %v1146_v42 = vld [vmem:[#allocation8 + $0x7e8] sm:$0xff] }
 0x16b   :  { %12746 = vst [vmem:[#allocation44_spill] sm:$0xff] %v8826_v63  ;;  %v398_v30 = vadd.f32 %v397_v35, %v8658_v0  ;;  %1307 = vmatprep.mubr.f32.mxu0 %v8826_v63  ;;  %1821 = vmatprep.mubr.f32.mxu1 %v8826_v63  ;;  %v6569_v35 = vpack.c.bf16 %v1138_v5, %v1134_v54  ;;  %v1142_v63 = vld [vmem:[#allocation8 + $0x7c8] sm:$0xff] }
 0x16c   :  { %1308 = vmatmul.mubr.f32.gmra.mrb[88].mxu0 %v8828_v20  ;;  %1822 = vmatmul.mubr.f32.gmra.mrb[88].mxu1 %v8828_v20  ;;  %v8842_v1 = vmax.f32 %v396_v21, 0.0  ;;  %v1135_v20 = vld [vmem:[#allocation8 + $0x790] sm:$0xff]  ;;  %v6571_v21 = vpack.c.bf16 %v1137_v18, %v1133_v16 }
 0x16d   :  { %v8840_v26 = vmax.f32 %v398_v30, 0.0  ;;  %v401_v51 = vpop.f32.mrb[28].mxu0  ;;  %6564 = vmatpush1.bf16.msra.mxu0 %v6563_v7  ;;  %6692 = vmatpush1.bf16.msra.mxu1 %v6691_v44  ;;  %v1139_v30 = vld [vmem:[#allocation8 + $0x7b0] sm:$0xff]  ;;  %v8850_v44 = vpop.f32.mrb[25].mxu1 }
 0x16e   :  { %12749 = vst [vmem:[#allocation47_spill] sm:$0xff] %v8842_v1  ;;  %v402_v13 = vadd.f32 %v401_v51, %v8655_v59  ;;  %v403_v14 = vpop.f32.mrb[29].mxu0  ;;  %6566 = vmatprep.subr.bf16.mxu0 %v6565_v52  ;;  %6694 = vmatprep.subr.bf16.mxu1 %v6693_v62  ;;  %v1141_v52 = vld [vmem:[#allocation8 + $0x7c0] sm:$0xff]  ;;  %v6699_v57 = vpack.c.bf16 %v1139_v30, %v1135_v20 }
 0x16f   :  { %12748 = vst [vmem:[#allocation46_spill] sm:$0xff] %v8840_v26  ;;  %v404_v7 = vadd.f32 %v403_v14, %v8658_v0  ;;  %1313 = vmatprep.mubr.f32.mxu0 %v8840_v26  ;;  %1827 = vmatprep.mubr.f32.mxu1 %v8840_v26  ;;  %v6573_v51 = vpack.c.bf16 %v1146_v42, %v1142_v63  ;;  %v1145_v14 = vld [vmem:[#allocation8 + $0x7e0] sm:$0xff] }
 0x170   :  { %1314 = vmatmul.mubr.f32.gmra.mrb[90].mxu0 %v8842_v1  ;;  %1828 = vmatmul.mubr.f32.gmra.mrb[90].mxu1 %v8842_v1  ;;  %v8856_v5 = vmax.f32 %v402_v13, 0.0  ;;  %v6701_v26 = vpack.c.bf16 %v1148_v38, %v1144_v37  ;;  %v1147_v1 = vld [vmem:[#allocation8 + $0x7f0] sm:$0xff]  ;;  %v6575_v16 = vpack.c.bf16 %v1145_v14, %v1141_v52 }
 0x171   :  { %v8854_v62 = vmax.f32 %v404_v7, 0.0  ;;  %v407_v54 = vpop.f32.mrb[30].mxu0  ;;  %6568 = vmatpush1.bf16.msra.mxu0 %v6567_v43  ;;  %6696 = vmatpush1.bf16.msra.mxu1 %v6695_v29  ;;  %v8859_v7 = vpop.f32.mrb[26].mxu1  ;;  %v6703_v18 = vpack.c.bf16 %v1147_v1, %v1143_v10 }
 0x172   :  { %12751 = vst [vmem:[#allocation49_spill] sm:$0xff] %v8856_v5  ;;  %v408_v49 = vadd.f32 %v407_v54, %v8655_v59  ;;  %v409_v2 = vpop.f32.mrb[31].mxu0  ;;  %6570 = vmatprep.subr.bf16.mxu0 %v6569_v35  ;;  %6698 = vmatprep.subr.bf16.mxu1 %v6697_v32  ;;  %v8864_v20 = vpop.f32.mrb[27].mxu1 }
 0x173   :  { %12750 = vst [vmem:[#allocation48_spill] sm:$0xff] %v8854_v62  ;;  %v410_v43 = vadd.f32 %v409_v2, %v8658_v0  ;;  %1319 = vmatprep.mubr.f32.mxu0 %v8854_v62  ;;  %1833 = vmatprep.mubr.f32.mxu1 %v8854_v62  ;;  %v8873_v30 = vpop.f32.mrb[28].mxu1 }
 0x174   :  { %1320 = vmatmul.mubr.f32.gmra.mrb[92].mxu0 %v8856_v5  ;;  %1834 = vmatmul.mubr.f32.gmra.mrb[92].mxu1 %v8856_v5  ;;  %v8870_v29 = vmax.f32 %v408_v49, 0.0  ;;  %v8878_v37 = vpop.f32.mrb[29].mxu1 }
 0x175   :  { %v8868_v63 = vmax.f32 %v410_v43, 0.0  ;;  %v413_v32 = vpop.f32.mrb[32].mxu0  ;;  %6572 = vmatpush1.bf16.msra.mxu0 %v6571_v21  ;;  %6700 = vmatpush1.bf16.msra.mxu1 %v6699_v57  ;;  %v8887_v21 = vpop.f32.mrb[30].mxu1 }
 0x176   :  { %12753 = vst [vmem:[#allocation51_spill] sm:$0xff] %v8870_v29  ;;  %v414_v13 = vadd.f32 %v413_v32, %v8655_v59  ;;  %v415_v35 = vpop.f32.mrb[33].mxu0  ;;  %6574 = vmatprep.subr.bf16.mxu0 %v6573_v51  ;;  %6702 = vmatprep.subr.bf16.mxu1 %v6701_v26  ;;  %v8892_v57 = vpop.f32.mrb[31].mxu1 }
 0x177   :  { %12752 = vst [vmem:[#allocation50_spill] sm:$0xff] %v8868_v63  ;;  %v416_v42 = vadd.f32 %v415_v35, %v8658_v0  ;;  %1325 = vmatprep.mubr.f32.mxu0 %v8868_v63  ;;  %1839 = vmatprep.mubr.f32.mxu1 %v8868_v63  ;;  %v8901_v32 = vpop.f32.mrb[32].mxu1 }
 0x178   :  { %1326 = vmatmul.mubr.f32.gmra.mrb[94].mxu0 %v8870_v29  ;;  %1840 = vmatmul.mubr.f32.gmra.mrb[94].mxu1 %v8870_v29  ;;  %v8884_v26 = vmax.f32 %v414_v13, 0.0 }
 0x179   :  { %v8882_v10 = vmax.f32 %v416_v42, 0.0  ;;  %v419_v1 = vpop.f32.mrb[34].mxu0  ;;  %6576 = vmatpush1.bf16.msra.mxu0 %v6575_v16  ;;  %6704 = vmatpush1.bf16.msra.mxu1 %v6703_v18  ;;  %v8906_v18 = vpop.f32.mrb[33].mxu1 }
 0x17a   :  { %12755 = vst [vmem:[#allocation53_spill] sm:$0xff] %v8884_v26  ;;  %v420_v38 = vadd.f32 %v419_v1, %v8655_v59  ;;  %v421_v54 = vpop.f32.mrb[35].mxu0 }
 0x17b   :  { %12754 = vst [vmem:[#allocation52_spill] sm:$0xff] %v8882_v10  ;;  %v422_v52 = vadd.f32 %v421_v54, %v8658_v0  ;;  %1331 = vmatprep.mubr.f32.mxu0 %v8882_v10  ;;  %1845 = vmatprep.mubr.f32.mxu1 %v8882_v10  ;;  %v8915_v54 = vpop.f32.mrb[34].mxu1 }
 0x17c   :  { %1332 = vmatmul.mubr.f32.gmra.mrb[96].mxu0 %v8884_v26  ;;  %1846 = vmatmul.mubr.f32.gmra.mrb[96].mxu1 %v8884_v26  ;;  %v8898_v51 = vmax.f32 %v420_v38, 0.0 }
 0x17d   :  { %v8896_v49 = vmax.f32 %v422_v52, 0.0  ;;  %v425_v2 = vpop.f32.mrb[36].mxu0 }
 0x17e   :  { %12757 = vst [vmem:[#allocation55_spill] sm:$0xff] %v8898_v51  ;;  %v426_v14 = vadd.f32 %v425_v2, %v8655_v59  ;;  %v427_v43 = vpop.f32.mrb[37].mxu0  ;;  %v8920_v2 = vpop.f32.mrb[35].mxu1 }
 0x17f   :  { %12756 = vst [vmem:[#allocation54_spill] sm:$0xff] %v8896_v49  ;;  %v428_v16 = vadd.f32 %v427_v43, %v8658_v0  ;;  %1337 = vmatprep.mubr.f32.mxu0 %v8896_v49  ;;  %1851 = vmatprep.mubr.f32.mxu1 %v8896_v49  ;;  %v8929_v49 = vpop.f32.mrb[36].mxu1 }
 0x180   :  { %1338 = vmatmul.mubr.f32.gmra.mrb[98].mxu0 %v8898_v51  ;;  %1852 = vmatmul.mubr.f32.gmra.mrb[98].mxu1 %v8898_v51  ;;  %v8912_v42 = vmax.f32 %v426_v14, 0.0 }
 0x181   :  { %v8910_v13 = vmax.f32 %v428_v16, 0.0  ;;  %v431_v35 = vpop.f32.mrb[38].mxu0 }
 0x182   :  { %12759 = vst [vmem:[#allocation57_spill] sm:$0xff] %v8912_v42  ;;  %v432_v1 = vadd.f32 %v431_v35, %v8655_v59  ;;  %v433_v38 = vpop.f32.mrb[39].mxu0 }
 0x183   :  { %12758 = vst [vmem:[#allocation56_spill] sm:$0xff] %v8910_v13  ;;  %v434_v52 = vadd.f32 %v433_v38, %v8658_v0  ;;  %1343 = vmatprep.mubr.f32.mxu0 %v8910_v13  ;;  %1857 = vmatprep.mubr.f32.mxu1 %v8910_v13  ;;  %v8934_v13 = vpop.f32.mrb[37].mxu1 }
 0x184   :  { %1344 = vmatmul.mubr.f32.gmra.mrb[100].mxu0 %v8912_v42  ;;  %1858 = vmatmul.mubr.f32.gmra.mrb[100].mxu1 %v8912_v42  ;;  %v8926_v16 = vmax.f32 %v432_v1, 0.0  ;;  %v8943_v10 = vpop.f32.mrb[38].mxu1 }
 0x185   :  { %v8924_v43 = vmax.f32 %v434_v52, 0.0  ;;  %v437_v14 = vpop.f32.mrb[40].mxu0 }
 0x186   :  { %12761 = vst [vmem:[#allocation59_spill] sm:$0xff] %v8926_v16  ;;  %v438_v35 = vadd.f32 %v437_v14, %v8655_v59  ;;  %v439_v51 = vpop.f32.mrb[41].mxu0 }
 0x187   :  { %12760 = vst [vmem:[#allocation58_spill] sm:$0xff] %v8924_v43  ;;  %v440_v38 = vadd.f32 %v439_v51, %v8658_v0  ;;  %1349 = vmatprep.mubr.f32.mxu0 %v8924_v43  ;;  %1863 = vmatprep.mubr.f32.mxu1 %v8924_v43  ;;  %v8948_v43 = vpop.f32.mrb[39].mxu1 }
 0x188   :  { %1350 = vmatmul.mubr.f32.gmra.mrb[102].mxu0 %v8926_v16  ;;  %1864 = vmatmul.mubr.f32.gmra.mrb[102].mxu1 %v8926_v16  ;;  %v8940_v42 = vmax.f32 %v438_v35, 0.0  ;;  %v8957_v63 = vpop.f32.mrb[40].mxu1 }
 0x189   :  { %v8938_v52 = vmax.f32 %v440_v38, 0.0  ;;  %v443_v1 = vpop.f32.mrb[42].mxu0 }
 0x18a   :  { %12763 = vst [vmem:[#allocation61_spill] sm:$0xff] %v8940_v42  ;;  %v444_v14 = vadd.f32 %v443_v1, %v8655_v59  ;;  %v445_v26 = vpop.f32.mrb[43].mxu0 }
 0x18b   :  { %12762 = vst [vmem:[#allocation60_spill] sm:$0xff] %v8938_v52  ;;  %v446_v51 = vadd.f32 %v445_v26, %v8658_v0  ;;  %1355 = vmatprep.mubr.f32.mxu0 %v8938_v52  ;;  %1869 = vmatprep.mubr.f32.mxu1 %v8938_v52  ;;  %v8962_v52 = vpop.f32.mrb[41].mxu1 }
 0x18c   :  { %1356 = vmatmul.mubr.f32.gmra.mrb[104].mxu0 %v8940_v42  ;;  %1870 = vmatmul.mubr.f32.gmra.mrb[104].mxu1 %v8940_v42  ;;  %v8954_v16 = vmax.f32 %v444_v14, 0.0  ;;  %v8971_v62 = vpop.f32.mrb[42].mxu1 }
 0x18d   :  { %v8952_v38 = vmax.f32 %v446_v51, 0.0  ;;  %v449_v35 = vpop.f32.mrb[44].mxu0  ;;  %12768 = vst [vmem:[#allocation66_spill] sm:$0xff] %v8971_v62  ;;  %v2471_v62 = vld [vmem:[#allocation8 + $0x878] sm:$0xff] }
 0x18e   :  { %12765 = vst [vmem:[#allocation63_spill] sm:$0xff] %v8954_v16  ;;  %v450_v1 = vadd.f32 %v449_v35, %v8655_v59  ;;  %v451_v29 = vpop.f32.mrb[45].mxu0 }
 0x18f   :  { %12764 = vst [vmem:[#allocation62_spill] sm:$0xff] %v8952_v38  ;;  %v452_v26 = vadd.f32 %v451_v29, %v8658_v0  ;;  %1361 = vmatprep.mubr.f32.mxu0 %v8952_v38  ;;  %1875 = vmatprep.mubr.f32.mxu1 %v8952_v38  ;;  %v8976_v38 = vpop.f32.mrb[43].mxu1 }
 0x190   :  { %1362 = vmatmul.mubr.f32.gmra.mrb[106].mxu0 %v8954_v16  ;;  %1876 = vmatmul.mubr.f32.gmra.mrb[106].mxu1 %v8954_v16  ;;  %v8968_v42 = vmax.f32 %v450_v1, 0.0  ;;  %v2457_v16 = vld [vmem:[#allocation8 + $0x808] sm:$0xff]  ;;  %v8985_v33 = vpop.f32.mrb[44].mxu1 }
 0x191   :  { %v8966_v51 = vmax.f32 %v452_v26, 0.0  ;;  %v455_v14 = vpop.f32.mrb[46].mxu0  ;;  %12771 = vst [vmem:[#allocation69_spill] sm:$0xff] %v8985_v33 }
 0x192   :  { %12767 = vst [vmem:[#allocation65_spill] sm:$0xff] %v8968_v42  ;;  %v456_v35 = vadd.f32 %v455_v14, %v8655_v59  ;;  %v457_v5 = vpop.f32.mrb[47].mxu0  ;;  %v2461_v14 = vld [vmem:[#allocation8 + $0x828] sm:$0xff] }
 0x193   :  { %12766 = vst [vmem:[#allocation64_spill] sm:$0xff] %v8966_v51  ;;  %v458_v29 = vadd.f32 %v457_v5, %v8658_v0  ;;  %1367 = vmatprep.mubr.f32.mxu0 %v8966_v51  ;;  %1881 = vmatprep.mubr.f32.mxu1 %v8966_v51  ;;  %v6705_v27 = vpack.c.bf16 %v2461_v14, %v2457_v16 }
 0x194   :  { %1368 = vmatmul.mubr.f32.gmra.mrb[108].mxu0 %v8968_v42  ;;  %1882 = vmatmul.mubr.f32.gmra.mrb[108].mxu1 %v8968_v42  ;;  %v8982_v53 = vmax.f32 %v456_v35, 0.0  ;;  %v8990_v42 = vpop.f32.mrb[45].mxu1 }
 0x195   :  { %v8980_v26 = vmax.f32 %v458_v29, 0.0  ;;  %v461_v1 = vpop.f32.mrb[48].mxu0  ;;  %12772 = vst [vmem:[#allocation70_spill] sm:$0xff] %v8990_v42  ;;  %6706 = vmatprep.subr.bf16.mxu0 %v6705_v27  ;;  %v2466_v42 = vld [vmem:[#allocation8 + $0x850] sm:$0xff] }
 0x196   :  { %12770 = vst [vmem:[#allocation68_spill] sm:$0xff] %v8982_v53  ;;  %v462_v47 = vadd.f32 %v461_v1, %v8655_v59  ;;  %v463_v5 = vpop.f32.mrb[49].mxu0 }
 0x197   :  { %12769 = vst [vmem:[#allocation67_spill] sm:$0xff] %v8980_v26  ;;  %v464_v51 = vadd.f32 %v463_v5, %v8658_v0  ;;  %1373 = vmatprep.mubr.f32.mxu0 %v8980_v26  ;;  %1887 = vmatprep.mubr.f32.mxu1 %v8980_v26  ;;  %v8999_v5 = vpop.f32.mrb[46].mxu1 }
 0x198   :  { %1374 = vmatmul.mubr.f32.gmra.mrb[110].mxu0 %v8982_v53  ;;  %1888 = vmatmul.mubr.f32.gmra.mrb[110].mxu1 %v8982_v53  ;;  %v8996_v1 = vmax.f32 %v462_v47, 0.0  ;;  %12775 = vst [vmem:[#allocation73_spill] sm:$0xff] %v8999_v5  ;;  %v9004_v26 = vpop.f32.mrb[47].mxu1 }
 0x199   :  { %v8994_v35 = vmax.f32 %v464_v51, 0.0  ;;  %v467_v29 = vpop.f32.mrb[50].mxu0  ;;  %12776 = vst [vmem:[#allocation74_spill] sm:$0xff] %v9004_v26  ;;  %v9013_v9 = vpop.f32.mrb[48].mxu1  ;;  %v2467_v26 = vld [vmem:[#allocation8 + $0x858] sm:$0xff] }
 0x19a   :  { %12774 = vst [vmem:[#allocation72_spill] sm:$0xff] %v8996_v1  ;;  %v468_v16 = vadd.f32 %v467_v29, %v8655_v59  ;;  %v469_v14 = vpop.f32.mrb[51].mxu0  ;;  %12779 = vst [vmem:[#allocation77_spill] sm:$0xff] %v9013_v9 }
 0x19b   :  { %12773 = vst [vmem:[#allocation71_spill] sm:$0xff] %v8994_v35  ;;  %v470_v15 = vadd.f32 %v469_v14, %v8658_v0  ;;  %1379 = vmatprep.mubr.f32.mxu0 %v8994_v35  ;;  %1893 = vmatprep.mubr.f32.mxu1 %v8994_v35  ;;  %v9018_v35 = vpop.f32.mrb[49].mxu1 }
 0x19c   :  { %1380 = vmatmul.mubr.f32.gmra.mrb[112].mxu0 %v8996_v1  ;;  %1894 = vmatmul.mubr.f32.gmra.mrb[112].mxu1 %v8996_v1  ;;  %v9010_v51 = vmax.f32 %v468_v16, 0.0  ;;  %12780 = vst [vmem:[#allocation78_spill] sm:$0xff] %v9018_v35  ;;  %v9027_v56 = vpop.f32.mrb[50].mxu1 }
 0x19d   :  { %v9008_v27 = vmax.f32 %v470_v15, 0.0  ;;  %v473_v47 = vpop.f32.mrb[52].mxu0  ;;  %12783 = vst [vmem:[#allocation81_spill] sm:$0xff] %v9027_v56 }
 0x19e   :  { %12778 = vst [vmem:[#allocation76_spill] sm:$0xff] %v9010_v51  ;;  %v474_v29 = vadd.f32 %v473_v47, %v8655_v59  ;;  %v475_v53 = vpop.f32.mrb[53].mxu0 }
 0x19f   :  { %12777 = vst [vmem:[#allocation75_spill] sm:$0xff] %v9008_v27  ;;  %v476_v14 = vadd.f32 %v475_v53, %v8658_v0  ;;  %1385 = vmatprep.mubr.f32.mxu0 %v9008_v27  ;;  %1899 = vmatprep.mubr.f32.mxu1 %v9008_v27  ;;  %v9032_v27 = vpop.f32.mrb[51].mxu1 }
 0x1a0   :  { %1386 = vmatmul.mubr.f32.gmra.mrb[114].mxu0 %v9010_v51  ;;  %1900 = vmatmul.mubr.f32.gmra.mrb[114].mxu1 %v9010_v51  ;;  %v9024_v1 = vmax.f32 %v474_v29, 0.0  ;;  %12784 = vst [vmem:[#allocation82_spill] sm:$0xff] %v9032_v27  ;;  %v9041_v9 = vpop.f32.mrb[52].mxu1 }
 0x1a1   :  { %v9022_v15 = vmax.f32 %v476_v14, 0.0  ;;  %v479_v16 = vpop.f32.mrb[54].mxu0  ;;  %12787 = vst [vmem:[#allocation85_spill] sm:$0xff] %v9041_v9 }
 0x1a2   :  { %12782 = vst [vmem:[#allocation80_spill] sm:$0xff] %v9024_v1  ;;  %v480_v47 = vadd.f32 %v479_v16, %v8655_v59  ;;  %v481_v58 = vpop.f32.mrb[55].mxu0 }
 0x1a3   :  { %12781 = vst [vmem:[#allocation79_spill] sm:$0xff] %v9022_v15  ;;  %v482_v53 = vadd.f32 %v481_v58, %v8658_v0  ;;  %1391 = vmatprep.mubr.f32.mxu0 %v9022_v15  ;;  %1905 = vmatprep.mubr.f32.mxu1 %v9022_v15  ;;  %v9046_v15 = vpop.f32.mrb[53].mxu1 }
 0x1a4   :  { %1392 = vmatmul.mubr.f32.gmra.mrb[116].mxu0 %v9024_v1  ;;  %1906 = vmatmul.mubr.f32.gmra.mrb[116].mxu1 %v9024_v1  ;;  %v9038_v51 = vmax.f32 %v480_v47, 0.0  ;;  %12788 = vst [vmem:[#allocation86_spill] sm:$0xff] %v9046_v15  ;;  %v9058_v27 = vpop.f32.mrb[54].mxu1  ;;  %v8124_v15 = vld [vmem:[#allocation6] sm:$0xf] }
 0x1a5   :  { %v9036_v14 = vmax.f32 %v482_v53, 0.0  ;;  %v485_v29 = vpop.f32.mrb[56].mxu0  ;;  %12792 = vst [vmem:[#allocation90_spill] sm:$0xff] %v9058_v27 }
 0x1a6   :  { %12786 = vst [vmem:[#allocation84_spill] sm:$0xff] %v9038_v51  ;;  %v486_v16 = vadd.f32 %v485_v29, %v8655_v59  ;;  %v487_v56 = vpop.f32.mrb[57].mxu0  ;;  %v9053_v29 = vsub.s32 3, %v8646_v55 }
 0x1a7   :  { %12785 = vst [vmem:[#allocation83_spill] sm:$0xff] %v9036_v14  ;;  %v488_v58 = vadd.f32 %v487_v56, %v8658_v0  ;;  %1397 = vmatprep.mubr.f32.mxu0 %v9036_v14  ;;  %1911 = vmatprep.mubr.f32.mxu1 %v9036_v14 }
 0x1a8   :  { %1398 = vmatmul.mubr.f32.gmra.mrb[118].mxu0 %v9038_v51  ;;  %1912 = vmatmul.mubr.f32.gmra.mrb[118].mxu1 %v9038_v51  ;;  %12790 = vst [vmem:[#allocation88_spill] sm:$0xff] %v9053_v29  ;;  %v9055_v1 = vmax.f32 %v486_v16, 0.0  ;;  %v9063_v51 = vpop.f32.mrb[55].mxu1 }
 0x1a9   :  { %v9050_v53 = vmax.f32 %v488_v58, 0.0  ;;  %v491_v47 = vpop.f32.mrb[58].mxu0  ;;  %12793 = vst [vmem:[#allocation91_spill] sm:$0xff] %v9063_v51  ;;  %v9078_v51 = vpop.f32.mrb[56].mxu1 }
 0x1aa   :  { %12791 = vst [vmem:[#allocation89_spill] sm:$0xff] %v9055_v1  ;;  %v492_v56 = vadd.f32 %v491_v47, %v8655_v59  ;;  %v493_v9 = vpop.f32.mrb[59].mxu0  ;;  %v9070_v47 = vrot.slane %v8124_v15, %v9053_v29  ;;  %12797 = vst [vmem:[#allocation95_spill] sm:$0xff] %v9078_v51 }
 0x1ab   :  { %12789 = vst [vmem:[#allocation87_spill] sm:$0xff] %v9050_v53  ;;  %v494_v14 = vadd.f32 %v493_v9, %v8658_v0  ;;  %1403 = vmatprep.mubr.f32.mxu0 %v9050_v53  ;;  %1917 = vmatprep.mubr.f32.mxu1 %v9050_v53  ;;  %v9076_v53 = vsub.s32 2, %v8646_v55 }
 0x1ac   :  { %1404 = vmatmul.mubr.f32.gmra.mrb[120].mxu0 %v9055_v1  ;;  %1918 = vmatmul.mubr.f32.gmra.mrb[120].mxu1 %v9055_v1  ;;  %v9072_v27 = vmax.f32 %v492_v56, 0.0  ;;  %v577_v55 = vadd.f32 %v8682_v46, %v9070_v47 }
 0x1ad   :  { %v9067_v58 = vmax.f32 %v494_v14, 0.0  ;;  %v497_v16 = vpop.f32.mrb[60].mxu0  ;;  %12796 = vst [vmem:[#allocation94_spill] sm:$0xff] %v9076_v53  ;;  %v9083_v14 = vpop.f32.mrb[57].mxu1  ;;  %v9095_v51 = vrot.slane %v8124_v15, %v9076_v53  ;;  %v583_v15 = vadd.f32 %v8696_v8, %v9070_v47  ;;  %v2469_v8 = vld [vmem:[#allocation8 + $0x868] sm:$0xff] }
 0x1ae   :  { %12795 = vst [vmem:[#allocation93_spill] sm:$0xff] %v9072_v27  ;;  %v498_v9 = vadd.f32 %v497_v16, %v8655_v59  ;;  %v499_v5 = vpop.f32.mrb[61].mxu0  ;;  %12798 = vst [vmem:[#allocation96_spill] sm:$0xff] %v9083_v14 }
 0x1af   :  { %12794 = vst [vmem:[#allocation92_spill] sm:$0xff] %v9067_v58  ;;  %v500_v35 = vadd.f32 %v499_v5, %v8658_v0  ;;  %1409 = vmatprep.mubr.f32.mxu0 %v9067_v58  ;;  %1923 = vmatprep.mubr.f32.mxu1 %v9067_v58  ;;  %v9097_v58 = vpop.f32.mrb[58].mxu1 }
 0x1b0   :  { %1410 = vmatmul.mubr.f32.gmra.mrb[122].mxu0 %v9072_v27  ;;  %1924 = vmatmul.mubr.f32.gmra.mrb[122].mxu1 %v9072_v27  ;;  %v9091_v29 = vmax.f32 %v498_v9, 0.0  ;;  %12801 = vst [vmem:[#allocation99_spill] sm:$0xff] %v9097_v58  ;;  %v2468_v58 = vld [vmem:[#allocation8 + $0x860] sm:$0xff] }
 0x1b1   :  { %v9087_v56 = vmax.f32 %v500_v35, 0.0  ;;  %v503_v16 = vpop.f32.mrb[62].mxu0  ;;  %v9102_v35 = vpop.f32.mrb[59].mxu1 }
 0x1b2   :  { %12800 = vst [vmem:[#allocation98_spill] sm:$0xff] %v9091_v29  ;;  %v504_v5 = vadd.f32 %v503_v16, %v8655_v59  ;;  %v505_v1 = vpop.f32.mrb[63].mxu0  ;;  %12802 = vst [vmem:[#allocation100_spill] sm:$0xff] %v9102_v35  ;;  %v9108_v59 = vmax.f32 %v577_v55, 0.0  ;;  %v2456_v16 = vld [vmem:[#allocation8 + $0x800] sm:$0xff]  ;;  %v2465_v55 = vld [vmem:[#allocation8 + $0x848] sm:$0xff] }
 0x1b3   :  { %12799 = vst [vmem:[#allocation97_spill] sm:$0xff] %v9087_v56  ;;  %v506_v14 = vadd.f32 %v505_v1, %v8658_v0  ;;  %1415 = vmatprep.mubr.f32.mxu0 %v9087_v56  ;;  %1929 = vmatprep.mubr.f32.mxu1 %v9087_v56  ;;  %v575_v0 = vadd.f32 %v8677_v41, %v9095_v51  ;;  %v9116_v1 = vpop.f32.mrb[60].mxu1 }
 0x1b4   :  { %1416 = vmatmul.mubr.f32.gmra.mrb[124].mxu0 %v9091_v29  ;;  %1930 = vmatmul.mubr.f32.gmra.mrb[124].mxu1 %v9091_v29  ;;  %12804 = vst [vmem:[#allocation102_spill] sm:$0xff] %v9108_v59  ;;  %v9112_v9 = vmax.f32 %v504_v5, 0.0  ;;  %12806 = vst [vmem:[#allocation104_spill] sm:$0xff] %v9116_v1  ;;  %v2460_v29 = vld [vmem:[#allocation8 + $0x820] sm:$0xff]  ;;  %v9124_v5 = vmax.f32 %v583_v15, 0.0  ;;  %v589_v41 = vadd.f32 %v8710_v31, %v9070_v47 }
 0x1b5   :  { %v9106_v46 = vmax.f32 %v506_v14, 0.0  ;;  %v9120_v14 = vpop.f32.mrb[61].mxu1  ;;  %v581_v56 = vadd.f32 %v8691_v3, %v9095_v51  ;;  %v6707_v27 = vpack.c.bf16 %v2460_v29, %v2456_v16  ;;  %v2464_v1 = vld [vmem:[#allocation8 + $0x840] sm:$0xff]  ;;  %v595_v3 = vadd.f32 %v8724_v61, %v9070_v47  ;;  %v2485_v61 = vld [vmem:[#allocation8 + $0x8e8] sm:$0xff] }
 0x1b6   :  { %12805 = vst [vmem:[#allocation103_spill] sm:$0xff] %v9112_v9  ;;  %12807 = vst [vmem:[#allocation105_spill] sm:$0xff] %v9120_v14  ;;  %v9134_v53 = vpop.f32.mrb[62].mxu1  ;;  %v2477_v14 = vld [vmem:[#allocation8 + $0x8a8] sm:$0xff]  ;;  %v9140_v31 = vmax.f32 %v589_v41, 0.0  ;;  %v2472_v29 = vld [vmem:[#allocation8 + $0x880] sm:$0xff] }
 0x1b7   :  { %12803 = vst [vmem:[#allocation101_spill] sm:$0xff] %v9106_v46  ;;  %1421 = vmatprep.mubr.f32.mxu0 %v9106_v46  ;;  %1935 = vmatprep.mubr.f32.mxu1 %v9106_v46  ;;  %12808 = vst [vmem:[#allocation106_spill] sm:$0xff] %v9124_v5  ;;  %v9130_v46 = vmax.f32 %v575_v0, 0.0  ;;  %v9136_v15 = vpop.f32.mrb[63].mxu1  ;;  %v2476_v0 = vld [vmem:[#allocation8 + $0x8a0] sm:$0xff]  ;;  %v9146_v16 = vmax.f32 %v581_v56, 0.0 }
 0x1b8   :  { %1422 = vmatmul.mubr.f32.gmra.mrb[126].mxu0 %v9112_v9  ;;  %1936 = vmatmul.mubr.f32.gmra.mrb[126].mxu1 %v9112_v9  ;;  %12810 = vst [vmem:[#allocation108_spill] sm:$0xff] %v9134_v53  ;;  %v6709_v9 = vpack.c.bf16 %v2469_v8, %v2465_v55  ;;  %12811 = vst [vmem:[#allocation109_spill] sm:$0xff] %v9136_v15  ;;  %v587_v55 = vadd.f32 %v8705_v25, %v9095_v51  ;;  %v2459_v53 = vld [vmem:[#allocation8 + $0x818] sm:$0xff]  ;;  %v2458_v15 = vld [vmem:[#allocation8 + $0x810] sm:$0xff] }
 0x1b9   :  { %1492 = vmatprep.mubr.f32.mxu0 %v9108_v59  ;;  %2006 = vmatprep.mubr.f32.mxu1 %v9108_v59  ;;  %12809 = vst [vmem:[#allocation107_spill] sm:$0xff] %v9130_v46  ;;  %v2473_v59 = vld [vmem:[#allocation8 + $0x888] sm:$0xff]  ;;  %12812 = vst [vmem:[#allocation110_spill] sm:$0xff] %v9140_v31  ;;  %v6711_v8 = vpack.c.bf16 %v2468_v58, %v2464_v1  ;;  %v2463_v41 = vld [vmem:[#allocation8 + $0x838] sm:$0xff] }
 0x1ba   :  { %12813 = vst [vmem:[#allocation111_spill] sm:$0xff] %v9146_v16  ;;  %v6713_v35 = vpack.c.bf16 %v2477_v14, %v2473_v59  ;;  %v6833_v33 = vpack.c.bf16 %v2463_v41, %v2459_v53  ;;  %v2470_v25 = vld [vmem:[#allocation8 + $0x870] sm:$0xff]  ;;  %v601_v53 = vadd.f32 %v8738_v24, %v9070_v47  ;;  %v9158_v58 = vmax.f32 %v587_v55, 0.0  ;;  %v2480_v1 = vld [vmem:[#allocation8 + $0x8c0] sm:$0xff]  ;;  %v2493_v24 = vld [vmem:[#allocation8 + $0x928] sm:$0xff] }
 0x1bb   :  { %v593_v59 = vadd.f32 %v8719_v50, %v9095_v51  ;;  %v2484_v14 = vld [vmem:[#allocation8 + $0x8e0] sm:$0xff]  ;;  %v6839_v41 = vpack.c.bf16 %v2470_v25, %v2466_v42  ;;  %v2474_v55 = vld [vmem:[#allocation8 + $0x890] sm:$0xff]  ;;  %v599_v42 = vadd.f32 %v8733_v19, %v9095_v51  ;;  %v2483_v25 = vld [vmem:[#allocation8 + $0x8d8] sm:$0xff] }
 0x1bc   :  { %1493 = vmatmul.mubr.f32.vlgmr.msra.gmra.mrb[64].mxu0 %v9130_v46  ;;  %2007 = vmatmul.mubr.f32.vlgmr.msra.gmra.mrb[64].mxu1 %v9130_v46  ;;  %v2481_v46 = vld [vmem:[#allocation8 + $0x8c8] sm:$0xff]  ;;  %v2478_v50 = vld [vmem:[#allocation8 + $0x8b0] sm:$0xff] }
 0x1bd   :  { %1498 = vmatprep.mubr.f32.mxu0 %v9124_v5  ;;  %2012 = vmatprep.mubr.f32.mxu1 %v9124_v5  ;;  %v2462_v5 = vld [vmem:[#allocation8 + $0x830] sm:$0xff] }
 0x1be   :  { %6708 = vmatpush1.bf16.msra.mxu0 %v6707_v27  ;;  %v6835_v56 = vpack.c.bf16 %v2462_v5, %v2458_v15  ;;  %v9152_v27 = vmax.f32 %v595_v3, 0.0  ;;  %6834 = vmatprep.subr.bf16.mxu1 %v6833_v33  ;;  %v6837_v5 = vpack.c.bf16 %v2471_v62, %v2467_v26  ;;  %v6717_v15 = vpack.c.bf16 %v2485_v61, %v2481_v46  ;;  %v2489_v3 = vld [vmem:[#allocation8 + $0x908] sm:$0xff]  ;;  %v2492_v46 = vld [vmem:[#allocation8 + $0x920] sm:$0xff]  ;;  %v2486_v19 = vld [vmem:[#allocation8 + $0x8f0] sm:$0xff] }
 0x1bf   :  { %6710 = vmatprep.subr.bf16.mxu0 %v6709_v9  ;;  %v6715_v9 = vpack.c.bf16 %v2476_v0, %v2472_v29  ;;  %v607_v33 = vadd.f32 %v8752_v60, %v9070_v47  ;;  %v9170_v62 = vmax.f32 %v593_v59, 0.0  ;;  %v6719_v26 = vpack.c.bf16 %v2484_v14, %v2480_v1  ;;  %v2497_v61 = vld [vmem:[#allocation8 + $0x948] sm:$0xff]  ;;  %v2482_v59 = vld [vmem:[#allocation8 + $0x8d0] sm:$0xff] }
 0x1c0   :  { %1499 = vmatmul.mubr.f32.gmra.mrb[66].mxu0 %v9146_v16  ;;  %2013 = vmatmul.mubr.f32.gmra.mrb[66].mxu1 %v9146_v16  ;;  %v2479_v16 = vld [vmem:[#allocation8 + $0x8b8] sm:$0xff]  ;;  %v6721_v0 = vpack.c.bf16 %v2493_v24, %v2489_v3  ;;  %v2501_v60 = vld [vmem:[#allocation8 + $0x968] sm:$0xff]  ;;  %v605_v1 = vadd.f32 %v8747_v48, %v9095_v51  ;;  %v2494_v48 = vld [vmem:[#allocation8 + $0x930] sm:$0xff] }
 0x1c1   :  { %1504 = vmatprep.mubr.f32.mxu0 %v9140_v31  ;;  %2018 = vmatprep.mubr.f32.mxu1 %v9140_v31  ;;  %v2475_v31 = vld [vmem:[#allocation8 + $0x898] sm:$0xff]  ;;  %v2505_v24 = vld [vmem:[#allocation8 + $0x988] sm:$0xff] }
 0x1c2   :  { %6712 = vmatpush1.bf16.msra.mxu0 %v6711_v8  ;;  %6836 = vmatpush1.bf16.msra.mxu1 %v6835_v56  ;;  %v9164_v8 = vmax.f32 %v601_v53, 0.0  ;;  %v6841_v29 = vpack.c.bf16 %v2479_v16, %v2475_v31  ;;  %v6843_v56 = vpack.c.bf16 %v2478_v50, %v2474_v55  ;;  %v2487_v53 = vld [vmem:[#allocation8 + $0x8f8] sm:$0xff]  ;;  %v613_v31 = vadd.f32 %v8766_v34, %v9070_v47  ;;  %v2509_v34 = vld [vmem:[#allocation8 + $0x9a8] sm:$0xff] }
 0x1c3   :  { %6714 = vmatprep.subr.bf16.mxu0 %v6713_v35  ;;  %v2488_v35 = vld [vmem:[#allocation8 + $0x900] sm:$0xff]  ;;  %6838 = vmatprep.subr.bf16.mxu1 %v6837_v5  ;;  %v9182_v16 = vmax.f32 %v599_v42, 0.0  ;;  %v6845_v3 = vpack.c.bf16 %v2487_v53, %v2483_v25  ;;  %v6847_v55 = vpack.c.bf16 %v2486_v19, %v2482_v59  ;;  %v2491_v50 = vld [vmem:[#allocation8 + $0x918] sm:$0xff]  ;;  %v2490_v42 = vld [vmem:[#allocation8 + $0x910] sm:$0xff]  ;;  %v6729_v53 = vpack.c.bf16 %v2509_v34, %v2505_v24 }
 0x1c4   :  { %1505 = vmatmul.mubr.f32.gmra.mrb[68].mxu0 %v9158_v58  ;;  %2019 = vmatmul.mubr.f32.gmra.mrb[68].mxu1 %v9158_v58  ;;  %v6723_v14 = vpack.c.bf16 %v2492_v46, %v2488_v35  ;;  %v2496_v5 = vld [vmem:[#allocation8 + $0x940] sm:$0xff]  ;;  %v619_v35 = vadd.f32 %v8780_v12, %v9070_v47  ;;  %v9194_v46 = vmax.f32 %v605_v1, 0.0  ;;  %v6851_v59 = vpack.c.bf16 %v2494_v48, %v2490_v42  ;;  %v2499_v19 = vld [vmem:[#allocation8 + $0x958] sm:$0xff]  ;;  %v2517_v12 = vld [vmem:[#allocation8 + $0x9e8] sm:$0xff] }
 0x1c5   :  { %1510 = vmatprep.mubr.f32.mxu0 %v9152_v27  ;;  %2024 = vmatprep.mubr.f32.mxu1 %v9152_v27  ;;  %v2498_v1 = vld [vmem:[#allocation8 + $0x950] sm:$0xff]  ;;  %v2512_v24 = vld [vmem:[#allocation8 + $0x9c0] sm:$0xff]  ;;  %v2521_v34 = vld [vmem:[#allocation8 + $0xa08] sm:$0xff] }
 0x1c6   :  { %6716 = vmatpush1.bf16.msra.mxu0 %v6715_v9  ;;  %6840 = vmatpush1.bf16.msra.mxu1 %v6839_v41  ;;  %v9176_v9 = vmax.f32 %v607_v33, 0.0  ;;  %v6725_v41 = vpack.c.bf16 %v2501_v60, %v2497_v61  ;;  %v2495_v33 = vld [vmem:[#allocation8 + $0x938] sm:$0xff]  ;;  %v2504_v61 = vld [vmem:[#allocation8 + $0x980] sm:$0xff]  ;;  %v2513_v60 = vld [vmem:[#allocation8 + $0x9c8] sm:$0xff] }
 0x1c7   :  { %6718 = vmatprep.subr.bf16.mxu0 %v6717_v15  ;;  %v2500_v15 = vld [vmem:[#allocation8 + $0x960] sm:$0xff]  ;;  %6842 = vmatprep.subr.bf16.mxu1 %v6841_v29  ;;  %v611_v29 = vadd.f32 %v8761_v22, %v9095_v51  ;;  %v6849_v25 = vpack.c.bf16 %v2495_v33, %v2491_v50  ;;  %v2502_v22 = vld [vmem:[#allocation8 + $0x970] sm:$0xff]  ;;  %v6733_v33 = vpack.c.bf16 %v2517_v12, %v2513_v60  ;;  %v2507_v48 = vld [vmem:[#allocation8 + $0x998] sm:$0xff] }
 0x1c8   :  { %1511 = vmatmul.mubr.f32.gmra.mrb[70].mxu0 %v9170_v62  ;;  %2025 = vmatmul.mubr.f32.gmra.mrb[70].mxu1 %v9170_v62  ;;  %v6855_v42 = vpack.c.bf16 %v2502_v22, %v2498_v1  ;;  %v2520_v60 = vld [vmem:[#allocation8 + $0xa00] sm:$0xff]  ;;  %v2529_v12 = vld [vmem:[#allocation8 + $0xa48] sm:$0xff]  ;;  %v2515_v22 = vld [vmem:[#allocation8 + $0x9d8] sm:$0xff] }
 0x1c9   :  { %1516 = vmatprep.mubr.f32.mxu0 %v9164_v8  ;;  %2030 = vmatprep.mubr.f32.mxu1 %v9164_v8 }
 0x1ca   :  { %6720 = vmatpush1.bf16.msra.mxu0 %v6719_v26  ;;  %6844 = vmatpush1.bf16.msra.mxu1 %v6843_v56  ;;  %v9188_v26 = vmax.f32 %v613_v31, 0.0  ;;  %v2508_v56 = vld [vmem:[#allocation8 + $0x9a0] sm:$0xff]  ;;  %v2503_v31 = vld [vmem:[#allocation8 + $0x978] sm:$0xff] }
 0x1cb   :  { %6722 = vmatprep.subr.bf16.mxu0 %v6721_v0  ;;  %v6727_v0 = vpack.c.bf16 %v2500_v15, %v2496_v5  ;;  %6846 = vmatprep.subr.bf16.mxu1 %v6845_v3  ;;  %v625_v5 = vadd.f32 %v8794_v45, %v9070_v47  ;;  %v9206_v15 = vmax.f32 %v611_v29, 0.0  ;;  %v617_v3 = vadd.f32 %v8775_v23, %v9095_v51  ;;  %v2525_v45 = vld [vmem:[#allocation8 + $0xa28] sm:$0xff]  ;;  %v2506_v29 = vld [vmem:[#allocation8 + $0x990] sm:$0xff] }
 0x1cc   :  { %1517 = vmatmul.mubr.f32.gmra.mrb[72].mxu0 %v9182_v16  ;;  %2031 = vmatmul.mubr.f32.gmra.mrb[72].mxu1 %v9182_v16  ;;  %v6853_v50 = vpack.c.bf16 %v2503_v31, %v2499_v19  ;;  %v2510_v23 = vld [vmem:[#allocation8 + $0x9b0] sm:$0xff]  ;;  %v6737_v31 = vpack.c.bf16 %v2525_v45, %v2521_v34  ;;  %v2528_v34 = vld [vmem:[#allocation8 + $0xa40] sm:$0xff]  ;;  %v2537_v45 = vld [vmem:[#allocation8 + $0xa88] sm:$0xff] }
 0x1cd   :  { %1522 = vmatprep.mubr.f32.mxu0 %v9176_v9  ;;  %2036 = vmatprep.mubr.f32.mxu1 %v9176_v9  ;;  %v6859_v1 = vpack.c.bf16 %v2510_v23, %v2506_v29  ;;  %v2523_v23 = vld [vmem:[#allocation8 + $0xa18] sm:$0xff] }
 0x1ce   :  { %6724 = vmatpush1.bf16.msra.mxu0 %v6723_v14  ;;  %6848 = vmatpush1.bf16.msra.mxu1 %v6847_v55  ;;  %v9200_v14 = vmax.f32 %v619_v35, 0.0  ;;  %v2516_v55 = vld [vmem:[#allocation8 + $0x9e0] sm:$0xff]  ;;  %v2511_v35 = vld [vmem:[#allocation8 + $0x9b8] sm:$0xff] }
 0x1cf   :  { %6726 = vmatprep.subr.bf16.mxu0 %v6725_v41  ;;  %v6731_v41 = vpack.c.bf16 %v2508_v56, %v2504_v61  ;;  %6850 = vmatprep.subr.bf16.mxu1 %v6849_v25  ;;  %v631_v61 = vadd.f32 %v8808_v28, %v9070_v47  ;;  %v9218_v56 = vmax.f32 %v617_v3, 0.0  ;;  %v623_v25 = vadd.f32 %v8789_v11, %v9095_v51  ;;  %v2533_v28 = vld [vmem:[#allocation8 + $0xa68] sm:$0xff]  ;;  %v2514_v3 = vld [vmem:[#allocation8 + $0x9d0] sm:$0xff] }
 0x1d0   :  { %1523 = vmatmul.mubr.f32.gmra.mrb[74].mxu0 %v9194_v46  ;;  %2037 = vmatmul.mubr.f32.gmra.mrb[74].mxu1 %v9194_v46  ;;  %v6857_v19 = vpack.c.bf16 %v2511_v35, %v2507_v48  ;;  %v2518_v11 = vld [vmem:[#allocation8 + $0x9f0] sm:$0xff]  ;;  %v6741_v35 = vpack.c.bf16 %v2533_v28, %v2529_v12  ;;  %v2536_v12 = vld [vmem:[#allocation8 + $0xa80] sm:$0xff]  ;;  %v2545_v28 = vld [vmem:[#allocation8 + $0xac8] sm:$0xff] }
 0x1d1   :  { %1528 = vmatprep.mubr.f32.mxu0 %v9188_v26  ;;  %2042 = vmatprep.mubr.f32.mxu1 %v9188_v26  ;;  %v6863_v29 = vpack.c.bf16 %v2518_v11, %v2514_v3  ;;  %v2531_v11 = vld [vmem:[#allocation8 + $0xa58] sm:$0xff] }
 0x1d2   :  { %6728 = vmatpush1.bf16.msra.mxu0 %v6727_v0  ;;  %6852 = vmatpush1.bf16.msra.mxu1 %v6851_v59  ;;  %v9212_v0 = vmax.f32 %v625_v5, 0.0  ;;  %v2524_v59 = vld [vmem:[#allocation8 + $0xa20] sm:$0xff]  ;;  %v2519_v5 = vld [vmem:[#allocation8 + $0x9f8] sm:$0xff] }
 0x1d3   :  { %6730 = vmatprep.subr.bf16.mxu0 %v6729_v53  ;;  %v6735_v53 = vpack.c.bf16 %v2516_v55, %v2512_v24  ;;  %6854 = vmatprep.subr.bf16.mxu1 %v6853_v50  ;;  %v637_v24 = vadd.f32 %v8822_v4, %v9070_v47  ;;  %v9230_v55 = vmax.f32 %v623_v25, 0.0  ;;  %v629_v50 = vadd.f32 %v8803_v36, %v9095_v51  ;;  %v2541_v4 = vld [vmem:[#allocation8 + $0xaa8] sm:$0xff]  ;;  %v2522_v25 = vld [vmem:[#allocation8 + $0xa10] sm:$0xff] }
 0x1d4   :  { %1529 = vmatmul.mubr.f32.gmra.mrb[76].mxu0 %v9206_v15  ;;  %2043 = vmatmul.mubr.f32.gmra.mrb[76].mxu1 %v9206_v15  ;;  %v6861_v48 = vpack.c.bf16 %v2519_v5, %v2515_v22  ;;  %v2526_v36 = vld [vmem:[#allocation8 + $0xa30] sm:$0xff]  ;;  %v6745_v5 = vpack.c.bf16 %v2541_v4, %v2537_v45  ;;  %v2544_v45 = vld [vmem:[#allocation8 + $0xac0] sm:$0xff]  ;;  %v2553_v4 = vld [vmem:[#allocation8 + $0xb08] sm:$0xff] }
 0x1d5   :  { %1534 = vmatprep.mubr.f32.mxu0 %v9200_v14  ;;  %2048 = vmatprep.mubr.f32.mxu1 %v9200_v14  ;;  %v6867_v3 = vpack.c.bf16 %v2526_v36, %v2522_v25  ;;  %v2539_v36 = vld [vmem:[#allocation8 + $0xa98] sm:$0xff] }
 0x1d6   :  { %6732 = vmatpush1.bf16.msra.mxu0 %v6731_v41  ;;  %6856 = vmatpush1.bf16.msra.mxu1 %v6855_v42  ;;  %v9224_v41 = vmax.f32 %v631_v61, 0.0  ;;  %v2532_v42 = vld [vmem:[#allocation8 + $0xa60] sm:$0xff]  ;;  %v2527_v61 = vld [vmem:[#allocation8 + $0xa38] sm:$0xff] }
 0x1d7   :  { %6734 = vmatprep.subr.bf16.mxu0 %v6733_v33  ;;  %v6739_v33 = vpack.c.bf16 %v2524_v59, %v2520_v60  ;;  %6858 = vmatprep.subr.bf16.mxu1 %v6857_v19  ;;  %v643_v60 = vadd.f32 %v8836_v40, %v9070_v47  ;;  %v9242_v59 = vmax.f32 %v629_v50, 0.0  ;;  %v635_v19 = vadd.f32 %v8817_v6, %v9095_v51  ;;  %v2549_v40 = vld [vmem:[#allocation8 + $0xae8] sm:$0xff]  ;;  %v2530_v50 = vld [vmem:[#allocation8 + $0xa50] sm:$0xff] }
 0x1d8   :  { %1535 = vmatmul.mubr.f32.gmra.mrb[78].mxu0 %v9218_v56  ;;  %2049 = vmatmul.mubr.f32.gmra.mrb[78].mxu1 %v9218_v56  ;;  %v6865_v22 = vpack.c.bf16 %v2527_v61, %v2523_v23  ;;  %v2534_v6 = vld [vmem:[#allocation8 + $0xa70] sm:$0xff]  ;;  %v6749_v61 = vpack.c.bf16 %v2549_v40, %v2545_v28  ;;  %v2552_v28 = vld [vmem:[#allocation8 + $0xb00] sm:$0xff]  ;;  %v2561_v40 = vld [vmem:[#allocation8 + $0xb48] sm:$0xff] }
 0x1d9   :  { %1540 = vmatprep.mubr.f32.mxu0 %v9212_v0  ;;  %2054 = vmatprep.mubr.f32.mxu1 %v9212_v0  ;;  %12815 = vst [vmem:[#allocation113_spill] sm:$0xff] %v9242_v59  ;;  %v6871_v25 = vpack.c.bf16 %v2534_v6, %v2530_v50  ;;  %v2547_v6 = vld [vmem:[#allocation8 + $0xad8] sm:$0xff] }
 0x1da   :  { %6736 = vmatpush1.bf16.msra.mxu0 %v6735_v53  ;;  %6860 = vmatpush1.bf16.msra.mxu1 %v6859_v1  ;;  %v9236_v53 = vmax.f32 %v637_v24, 0.0  ;;  %v2540_v1 = vld [vmem:[#allocation8 + $0xaa0] sm:$0xff]  ;;  %v2535_v24 = vld [vmem:[#allocation8 + $0xa78] sm:$0xff] }
 0x1db   :  { %6738 = vmatprep.subr.bf16.mxu0 %v6737_v31  ;;  %v6743_v31 = vpack.c.bf16 %v2532_v42, %v2528_v34  ;;  %6862 = vmatprep.subr.bf16.mxu1 %v6861_v48  ;;  %v649_v34 = vadd.f32 %v8850_v44, %v9070_v47  ;;  %v9254_v42 = vmax.f32 %v635_v19, 0.0  ;;  %v641_v48 = vadd.f32 %v8831_v39, %v9095_v51  ;;  %v2557_v44 = vld [vmem:[#allocation8 + $0xb28] sm:$0xff]  ;;  %v2538_v19 = vld [vmem:[#allocation8 + $0xa90] sm:$0xff] }
 0x1dc   :  { %1541 = vmatmul.mubr.f32.gmra.mrb[80].mxu0 %v9230_v55  ;;  %2055 = vmatmul.mubr.f32.gmra.mrb[80].mxu1 %v9230_v55  ;;  %12814 = vst [vmem:[#allocation112_spill] sm:$0xff] %v9236_v53  ;;  %v6869_v23 = vpack.c.bf16 %v2535_v24, %v2531_v11  ;;  %v2542_v39 = vld [vmem:[#allocation8 + $0xab0] sm:$0xff]  ;;  %v6753_v24 = vpack.c.bf16 %v2557_v44, %v2553_v4  ;;  %v2560_v4 = vld [vmem:[#allocation8 + $0xb40] sm:$0xff] }
 0x1dd   :  { %1546 = vmatprep.mubr.f32.mxu0 %v9224_v41  ;;  %2060 = vmatprep.mubr.f32.mxu1 %v9224_v41  ;;  %12817 = vst [vmem:[#allocation115_spill] sm:$0xff] %v9254_v42  ;;  %v6875_v50 = vpack.c.bf16 %v2542_v39, %v2538_v19  ;;  %v2569_v19 = vld [vmem:[#allocation8 + $0xb88] sm:$0xff]  ;;  %v2555_v39 = vld [vmem:[#allocation8 + $0xb18] sm:$0xff] }
 0x1de   :  { %6740 = vmatpush1.bf16.msra.mxu0 %v6739_v33  ;;  %6864 = vmatpush1.bf16.msra.mxu1 %v6863_v29  ;;  %v9248_v33 = vmax.f32 %v643_v60, 0.0  ;;  %v2548_v29 = vld [vmem:[#allocation8 + $0xae0] sm:$0xff]  ;;  %v2543_v60 = vld [vmem:[#allocation8 + $0xab8] sm:$0xff] }
 0x1df   :  { %6742 = vmatprep.subr.bf16.mxu0 %v6741_v35  ;;  %v6747_v35 = vpack.c.bf16 %v2540_v1, %v2536_v12  ;;  %6866 = vmatprep.subr.bf16.mxu1 %v6865_v22  ;;  %v655_v12 = vadd.f32 %v8864_v20, %v9070_v47  ;;  %v9266_v1 = vmax.f32 %v641_v48, 0.0  ;;  %v647_v22 = vadd.f32 %v8845_v17, %v9095_v51  ;;  %v2565_v20 = vld [vmem:[#allocation8 + $0xb68] sm:$0xff]  ;;  %v2546_v48 = vld [vmem:[#allocation8 + $0xad0] sm:$0xff] }
 0x1e0   :  { %1547 = vmatmul.mubr.f32.gmra.mrb[82].mxu0 %v9242_v59  ;;  %2061 = vmatmul.mubr.f32.gmra.mrb[82].mxu1 %v9242_v59  ;;  %12816 = vst [vmem:[#allocation114_spill] sm:$0xff] %v9248_v33  ;;  %v6873_v11 = vpack.c.bf16 %v2543_v60, %v2539_v36  ;;  %v2550_v17 = vld [vmem:[#allocation8 + $0xaf0] sm:$0xff]  ;;  %v6757_v60 = vpack.c.bf16 %v2565_v20, %v2561_v40  ;;  %v2568_v40 = vld [vmem:[#allocation8 + $0xb80] sm:$0xff] }
 0x1e1   :  { %1552 = vmatprep.mubr.f32.mxu0 %v9236_v53  ;;  %2066 = vmatprep.mubr.f32.mxu1 %v9236_v53  ;;  %12819 = vst [vmem:[#allocation117_spill] sm:$0xff] %v9266_v1  ;;  %v6879_v44 = vpack.c.bf16 %v2550_v17, %v2546_v48  ;;  %v2563_v48 = vld [vmem:[#allocation8 + $0xb58] sm:$0xff] }
 0x1e2   :  { %6744 = vmatpush1.bf16.msra.mxu0 %v6743_v31  ;;  %6868 = vmatpush1.bf16.msra.mxu1 %v6867_v3  ;;  %v9260_v31 = vmax.f32 %v649_v34, 0.0  ;;  %v2556_v3 = vld [vmem:[#allocation8 + $0xb20] sm:$0xff]  ;;  %v2551_v34 = vld [vmem:[#allocation8 + $0xaf8] sm:$0xff] }
 0x1e3   :  { %6746 = vmatprep.subr.bf16.mxu0 %v6745_v5  ;;  %v6751_v5 = vpack.c.bf16 %v2548_v29, %v2544_v45  ;;  %6870 = vmatprep.subr.bf16.mxu1 %v6869_v23  ;;  %v661_v45 = vadd.f32 %v8878_v37, %v9070_v47  ;;  %v9278_v29 = vmax.f32 %v647_v22, 0.0  ;;  %v653_v23 = vadd.f32 %v8859_v7, %v9095_v51  ;;  %v2573_v37 = vld [vmem:[#allocation8 + $0xba8] sm:$0xff]  ;;  %v2554_v22 = vld [vmem:[#allocation8 + $0xb10] sm:$0xff]  ;;  %v2567_v17 = vld [vmem:[#allocation8 + $0xb78] sm:$0xff] }
 0x1e4   :  { %1553 = vmatmul.mubr.f32.gmra.mrb[84].mxu0 %v9254_v42  ;;  %2067 = vmatmul.mubr.f32.gmra.mrb[84].mxu1 %v9254_v42  ;;  %12818 = vst [vmem:[#allocation116_spill] sm:$0xff] %v9260_v31  ;;  %v6877_v36 = vpack.c.bf16 %v2551_v34, %v2547_v6  ;;  %v2558_v7 = vld [vmem:[#allocation8 + $0xb30] sm:$0xff]  ;;  %v6761_v6 = vpack.c.bf16 %v2573_v37, %v2569_v19  ;;  %v2572_v34 = vld [vmem:[#allocation8 + $0xba0] sm:$0xff] }
 0x1e5   :  { %1558 = vmatprep.mubr.f32.mxu0 %v9248_v33  ;;  %2072 = vmatprep.mubr.f32.mxu1 %v9248_v33  ;;  %12821 = vst [vmem:[#allocation119_spill] sm:$0xff] %v9278_v29  ;;  %v6883_v20 = vpack.c.bf16 %v2558_v7, %v2554_v22  ;;  %v671_v19 = vadd.f32 %v8901_v32, %v9095_v51 }
 0x1e6   :  { %6748 = vmatpush1.bf16.msra.mxu0 %v6747_v35  ;;  %6872 = vmatpush1.bf16.msra.mxu1 %v6871_v25  ;;  %v9272_v35 = vmax.f32 %v655_v12, 0.0  ;;  %v2564_v25 = vld [vmem:[#allocation8 + $0xb60] sm:$0xff]  ;;  %v2559_v12 = vld [vmem:[#allocation8 + $0xb38] sm:$0xff]  ;;  %v677_v32 = vadd.f32 %v8915_v54, %v9095_v51  ;;  %v691_v22 = vadd.f32 %v8948_v43, %v9070_v47  ;;  %v689_v43 = vadd.f32 %v8943_v10, %v9095_v51 }
 0x1e7   :  { %6750 = vmatprep.subr.bf16.mxu0 %v6749_v61  ;;  %v6755_v61 = vpack.c.bf16 %v2556_v3, %v2552_v28  ;;  %6874 = vmatprep.subr.bf16.mxu1 %v6873_v11  ;;  %v667_v28 = vadd.f32 %v8892_v57, %v9070_v47  ;;  %v9290_v3 = vmax.f32 %v653_v23, 0.0  ;;  %v659_v11 = vadd.f32 %v8873_v30, %v9095_v51  ;;  %v2562_v57 = vld [vmem:[#allocation8 + $0xb50] sm:$0xff] }
 0x1e8   :  { %1559 = vmatmul.mubr.f32.gmra.mrb[86].mxu0 %v9266_v1  ;;  %2073 = vmatmul.mubr.f32.gmra.mrb[86].mxu1 %v9266_v1  ;;  %12820 = vst [vmem:[#allocation118_spill] sm:$0xff] %v9272_v35  ;;  %v673_v30 = vadd.f32 %v8906_v18, %v9070_v47  ;;  %v9338_v7 = vmax.f32 %v677_v32, 0.0  ;;  %v9344_v54 = vmax.f32 %v691_v22, 0.0  ;;  %v12845_v32 = vld [vmem:[#allocation78_spill] sm:$0xff] }
 0x1e9   :  { %1564 = vmatprep.mubr.f32.mxu0 %v9260_v31  ;;  %2078 = vmatprep.mubr.f32.mxu1 %v9260_v31  ;;  %12823 = vst [vmem:[#allocation121_spill] sm:$0xff] %v9290_v3  ;;  %v9296_v23 = vmax.f32 %v667_v28, 0.0  ;;  %v697_v28 = vadd.f32 %v8962_v52, %v9070_v47  ;;  %v695_v52 = vadd.f32 %v8957_v63, %v9095_v51 }
 0x1ea   :  { %6752 = vmatpush1.bf16.msra.mxu0 %v6751_v5  ;;  %6876 = vmatpush1.bf16.msra.mxu1 %v6875_v50  ;;  %v9284_v5 = vmax.f32 %v661_v45, 0.0  ;;  %v6881_v50 = vpack.c.bf16 %v2559_v12, %v2555_v39  ;;  %v2566_v45 = vld [vmem:[#allocation8 + $0xb70] sm:$0xff]  ;;  %v9326_v12 = vmax.f32 %v671_v19, 0.0  ;;  %12831 = vst [vmem:[#allocation129_spill] sm:$0xff] %v9338_v7  ;;  %12832 = vst [vmem:[#allocation130_spill] sm:$0xff] %v9344_v54 }
 0x1eb   :  { %6754 = vmatprep.subr.bf16.mxu0 %v6753_v24  ;;  %v6759_v24 = vpack.c.bf16 %v2564_v25, %v2560_v4  ;;  %6878 = vmatprep.subr.bf16.mxu1 %v6877_v36  ;;  %12824 = vst [vmem:[#allocation122_spill] sm:$0xff] %v9296_v23  ;;  %v665_v4 = vadd.f32 %v8887_v21, %v9095_v51 }
 0x1ec   :  { %1565 = vmatmul.mubr.f32.gmra.mrb[88].mxu0 %v9278_v29  ;;  %2079 = vmatmul.mubr.f32.gmra.mrb[88].mxu1 %v9278_v29  ;;  %12822 = vst [vmem:[#allocation120_spill] sm:$0xff] %v9284_v5  ;;  %v6763_v25 = vpack.c.bf16 %v2572_v34, %v2568_v40  ;;  %v6885_v36 = vpack.c.bf16 %v2567_v17, %v2563_v48  ;;  %12829 = vst [vmem:[#allocation127_spill] sm:$0xff] %v9326_v12  ;;  %v9362_v40 = vmax.f32 %v689_v43, 0.0  ;;  %v12841_v48 = vld [vmem:[#allocation74_spill] sm:$0xff]  ;;  %v2579_v43 = vld [vmem:[#allocation8 + $0xbd8] sm:$0xff] }
 0x1ed   :  { %1570 = vmatprep.mubr.f32.mxu0 %v9272_v35  ;;  %2084 = vmatprep.mubr.f32.mxu1 %v9272_v35  ;;  %v679_v21 = vadd.f32 %v8920_v2, %v9070_v47  ;;  %v9314_v18 = vmax.f32 %v665_v4, 0.0  ;;  %v685_v2 = vadd.f32 %v8934_v13, %v9070_v47  ;;  %v683_v13 = vadd.f32 %v8929_v49, %v9095_v51  ;;  %v12843_v4 = vld [vmem:[#allocation69_spill] sm:$0xff] }
 0x1ee   :  { %6756 = vmatpush1.bf16.msra.mxu0 %v6755_v61  ;;  %6880 = vmatpush1.bf16.msra.mxu1 %v6879_v44  ;;  %v9302_v61 = vmax.f32 %v659_v11, 0.0  ;;  %v9308_v44 = vmax.f32 %v673_v30, 0.0  ;;  %v9356_v49 = vmax.f32 %v697_v28, 0.0  ;;  %12835 = vst [vmem:[#allocation133_spill] sm:$0xff] %v9362_v40  ;;  %v9374_v34 = vmax.f32 %v695_v52, 0.0  ;;  %v2581_v28 = vld [vmem:[#allocation8 + $0xbe8] sm:$0xff] }
 0x1ef   :  { %6758 = vmatprep.subr.bf16.mxu0 %v6757_v60  ;;  %6882 = vmatprep.subr.bf16.mxu1 %v6881_v50  ;;  %v6887_v60 = vpack.c.bf16 %v2566_v45, %v2562_v57  ;;  %12827 = vst [vmem:[#allocation125_spill] sm:$0xff] %v9314_v18  ;;  %v9320_v39 = vmax.f32 %v679_v21, 0.0  ;;  %v9332_v37 = vmax.f32 %v685_v2, 0.0  ;;  %v9350_v11 = vmax.f32 %v683_v13, 0.0  ;;  %v12837_v50 = vld [vmem:[#allocation70_spill] sm:$0xff]  ;;  %v2571_v57 = vld [vmem:[#allocation8 + $0xb98] sm:$0xff] }
 0x1f0   :  { %1571 = vmatmul.mubr.f32.gmra.mrb[90].mxu0 %v9290_v3  ;;  %2085 = vmatmul.mubr.f32.gmra.mrb[90].mxu1 %v9290_v3  ;;  %12825 = vst [vmem:[#allocation123_spill] sm:$0xff] %v9302_v61  ;;  %12826 = vst [vmem:[#allocation124_spill] sm:$0xff] %v9308_v44  ;;  %v715_v17 = vadd.f32 %v12841_v48, %v9070_v47  ;;  %v2575_v45 = vld [vmem:[#allocation8 + $0xbb8] sm:$0xff]  ;;  %v2574_v21 = vld [vmem:[#allocation8 + $0xbb0] sm:$0xff]  ;;  %v721_v22 = vadd.f32 %v12845_v32, %v9070_v47 }
 0x1f1   :  { %1576 = vmatprep.mubr.f32.mxu0 %v9284_v5  ;;  %2090 = vmatprep.mubr.f32.mxu1 %v9284_v5  ;;  %12828 = vst [vmem:[#allocation126_spill] sm:$0xff] %v9320_v39  ;;  %12830 = vst [vmem:[#allocation128_spill] sm:$0xff] %v9332_v37  ;;  %v2577_v13 = vld [vmem:[#allocation8 + $0xbc8] sm:$0xff]  ;;  %v12847_v52 = vld [vmem:[#allocation73_spill] sm:$0xff] }
 0x1f2   :  { %6760 = vmatpush1.bf16.msra.mxu0 %v6759_v24  ;;  %6884 = vmatpush1.bf16.msra.mxu1 %v6883_v20  ;;  %12833 = vst [vmem:[#allocation131_spill] sm:$0xff] %v9350_v11  ;;  %12834 = vst [vmem:[#allocation132_spill] sm:$0xff] %v9356_v49  ;;  %v703_v24 = vadd.f32 %v8976_v38, %v9070_v47  ;;  %v12839_v38 = vld [vmem:[#allocation66_spill] sm:$0xff]  ;;  %v9392_v2 = vmax.f32 %v715_v17, 0.0  ;;  %v2583_v48 = vld [vmem:[#allocation8 + $0xbf8] sm:$0xff] }
 0x1f3   :  { %6762 = vmatprep.subr.bf16.mxu0 %v6761_v6  ;;  %6886 = vmatprep.subr.bf16.mxu1 %v6885_v36  ;;  %v709_v6 = vadd.f32 %v12837_v50, %v9070_v47  ;;  %12838 = vst [vmem:[#allocation70_spill] sm:$0xff] %v9374_v34  ;;  %v701_v20 = vadd.f32 %v12839_v38, %v9095_v51  ;;  %v2576_v38 = vld [vmem:[#allocation8 + $0xbc0] sm:$0xff] }
 0x1f4   :  { %1577 = vmatmul.mubr.f32.gmra.mrb[92].mxu0 %v9302_v61  ;;  %2091 = vmatmul.mubr.f32.gmra.mrb[92].mxu1 %v9302_v61  ;;  %v9368_v10 = vmax.f32 %v703_v24, 0.0  ;;  %v6889_v36 = vpack.c.bf16 %v2575_v45, %v2571_v57  ;;  %12844 = vst [vmem:[#allocation69_spill] sm:$0xff] %v9392_v2  ;;  %v713_v50 = vadd.f32 %v12847_v52, %v9095_v51  ;;  %v2578_v45 = vld [vmem:[#allocation8 + $0xbd0] sm:$0xff] }
 0x1f5   :  { %1582 = vmatprep.mubr.f32.mxu0 %v9296_v23  ;;  %2096 = vmatprep.mubr.f32.mxu1 %v9296_v23  ;;  %v9380_v63 = vmax.f32 %v709_v6, 0.0  ;;  %v9386_v30 = vmax.f32 %v701_v20, 0.0  ;;  %v6765_v6 = vpack.c.bf16 %v2581_v28, %v2577_v13  ;;  %v2580_v20 = vld [vmem:[#allocation8 + $0xbe0] sm:$0xff]  ;;  %v6893_v57 = vpack.c.bf16 %v2583_v48, %v2579_v43 }
 0x1f6   :  { %6764 = vmatpush1.bf16.msra.mxu0 %v6763_v25  ;;  %6888 = vmatpush1.bf16.msra.mxu1 %v6887_v60  ;;  %12836 = vst [vmem:[#allocation134_spill] sm:$0xff] %v9368_v10  ;;  %v707_v25 = vadd.f32 %v12843_v4, %v9095_v51  ;;  %v2570_v60 = vld [vmem:[#allocation8 + $0xb90] sm:$0xff]  ;;  %v6767_v17 = vpack.c.bf16 %v2580_v20, %v2576_v38  ;;  %v9410_v32 = vmax.f32 %v713_v50, 0.0  ;;  %v12853_v28 = vld [vmem:[#allocation86_spill] sm:$0xff]  ;;  %v12855_v50 = vld [vmem:[#allocation81_spill] sm:$0xff] }
 0x1f7   :  { %12840 = vst [vmem:[#allocation66_spill] sm:$0xff] %v9380_v63  ;;  %12842 = vst [vmem:[#allocation74_spill] sm:$0xff] %v9386_v30  ;;  %v6891_v19 = vpack.c.bf16 %v2574_v21, %v2570_v60  ;;  %6890 = vmatprep.subr.bf16.mxu1 %v6889_v36  ;;  %v2582_v4 = vld [vmem:[#allocation8 + $0xbf0] sm:$0xff]  ;;  %v12849_v21 = vld [vmem:[#allocation82_spill] sm:$0xff]  ;;  %6766 = vmatprep.subr.bf16.mxu0 %v6765_v6  ;;  %v733_v43 = vadd.f32 %v12853_v28, %v9070_v47 }
 0x1f8   :  { %1583 = vmatmul.mubr.f32.gmra.mrb[94].mxu0 %v9314_v18  ;;  %2097 = vmatmul.mubr.f32.gmra.mrb[94].mxu1 %v9314_v18  ;;  %v9398_v24 = vmax.f32 %v707_v25, 0.0  ;;  %v6895_v60 = vpack.c.bf16 %v2582_v4, %v2578_v45  ;;  %v9404_v25 = vmax.f32 %v721_v22, 0.0  ;;  %v727_v36 = vadd.f32 %v12849_v21, %v9070_v47  ;;  %12850 = vst [vmem:[#allocation82_spill] sm:$0xff] %v9410_v32  ;;  %v2585_v38 = vld [vmem:[#allocation8 + $0xc08] sm:$0xff] }
 0x1f9   :  { %1588 = vmatprep.mubr.f32.mxu0 %v9308_v44  ;;  %2102 = vmatprep.mubr.f32.mxu1 %v9308_v44  ;;  %v725_v6 = vadd.f32 %v12855_v50, %v9095_v51  ;;  %v2589_v20 = vld [vmem:[#allocation8 + $0xc28] sm:$0xff]  ;;  %v9428_v48 = vmax.f32 %v733_v43, 0.0  ;;  %v12863_v43 = vld [vmem:[#allocation90_spill] sm:$0xff] }
 0x1fa   :  { %12846 = vst [vmem:[#allocation78_spill] sm:$0xff] %v9398_v24  ;;  %6892 = vmatpush1.bf16.msra.mxu1 %v6891_v19  ;;  %12848 = vst [vmem:[#allocation73_spill] sm:$0xff] %v9404_v25  ;;  %v12851_v19 = vld [vmem:[#allocation77_spill] sm:$0xff]  ;;  %6768 = vmatpush1.bf16.msra.mxu0 %v6767_v17  ;;  %v9416_v22 = vmax.f32 %v727_v36, 0.0  ;;  %v12857_v17 = vld [vmem:[#allocation91_spill] sm:$0xff]  ;;  %v6769_v45 = vpack.c.bf16 %v2589_v20, %v2585_v38  ;;  %v737_v50 = vadd.f32 %v12863_v43, %v9095_v51 }
 0x1fb   :  { %v719_v13 = vadd.f32 %v12851_v19, %v9095_v51  ;;  %6894 = vmatprep.subr.bf16.mxu1 %v6893_v57  ;;  %12856 = vst [vmem:[#allocation81_spill] sm:$0xff] %v9428_v48  ;;  %v739_v57 = vadd.f32 %v12857_v17, %v9070_v47  ;;  %v9434_v4 = vmax.f32 %v725_v6, 0.0  ;;  %v12861_v19 = vld [vmem:[#allocation96_spill] sm:$0xff]  ;;  %v12871_v43 = vld [vmem:[#allocation99_spill] sm:$0xff] }
 0x1fc   :  { %1589 = vmatmul.mubr.f32.gmra.mrb[96].mxu0 %v9326_v12  ;;  %2103 = vmatmul.mubr.f32.gmra.mrb[96].mxu1 %v9326_v12  ;;  %12852 = vst [vmem:[#allocation77_spill] sm:$0xff] %v9416_v22  ;;  %v12865_v38 = vld [vmem:[#allocation100_spill] sm:$0xff]  ;;  %v9458_v17 = vmax.f32 %v737_v50, 0.0  ;;  %v749_v50 = vadd.f32 %v12871_v43, %v9095_v51 }
 0x1fd   :  { %1594 = vmatprep.mubr.f32.mxu0 %v9320_v39  ;;  %2108 = vmatprep.mubr.f32.mxu1 %v9320_v39  ;;  %v9422_v52 = vmax.f32 %v719_v13, 0.0  ;;  %12858 = vst [vmem:[#allocation91_spill] sm:$0xff] %v9434_v4  ;;  %v9440_v36 = vmax.f32 %v739_v57, 0.0  ;;  %v745_v13 = vadd.f32 %v12861_v19, %v9070_v47  ;;  %v751_v20 = vadd.f32 %v12865_v38, %v9070_v47  ;;  %v12867_v57 = vld [vmem:[#allocation95_spill] sm:$0xff] }
 0x1fe   :  { %6896 = vmatpush1.bf16.msra.mxu1 %v6895_v60  ;;  %v12859_v60 = vld [vmem:[#allocation85_spill] sm:$0xff]  ;;  %6770 = vmatprep.subr.bf16.mxu0 %v6769_v45  ;;  %12866 = vst [vmem:[#allocation100_spill] sm:$0xff] %v9458_v17  ;;  %v743_v45 = vadd.f32 %v12867_v57, %v9095_v51 }
 0x1ff   :  { %12854 = vst [vmem:[#allocation86_spill] sm:$0xff] %v9422_v52  ;;  %v731_v21 = vadd.f32 %v12859_v60, %v9095_v51  ;;  %12860 = vst [vmem:[#allocation85_spill] sm:$0xff] %v9440_v36  ;;  %v9452_v6 = vmax.f32 %v745_v13, 0.0  ;;  %v9464_v60 = vmax.f32 %v751_v20, 0.0  ;;  %v12873_v20 = vld [vmem:[#allocation109_spill] sm:$0xff] }
 0x200   :  { %1595 = vmatmul.mubr.f32.gmra.mrb[98].mxu0 %v9338_v7  ;;  %2109 = vmatmul.mubr.f32.gmra.mrb[98].mxu1 %v9338_v7  ;;  %v9470_v13 = vmax.f32 %v743_v45, 0.0  ;;  %v763_v57 = vadd.f32 %v12873_v20, %v9070_v47  ;;  %v12875_v45 = vld [vmem:[#allocation104_spill] sm:$0xff]  ;;  %v2587_v20 = vld [vmem:[#allocation8 + $0xc18] sm:$0xff] }
 0x201   :  { %1600 = vmatprep.mubr.f32.mxu0 %v9332_v37  ;;  %2114 = vmatprep.mubr.f32.mxu1 %v9332_v37  ;;  %v9446_v28 = vmax.f32 %v731_v21, 0.0  ;;  %12864 = vst [vmem:[#allocation90_spill] sm:$0xff] %v9452_v6  ;;  %12868 = vst [vmem:[#allocation95_spill] sm:$0xff] %v9464_v60  ;;  %v12869_v21 = vld [vmem:[#allocation105_spill] sm:$0xff] }
 0x202   :  { %v757_v19 = vadd.f32 %v12869_v21, %v9070_v47  ;;  %12870 = vst [vmem:[#allocation105_spill] sm:$0xff] %v9470_v13  ;;  %v755_v21 = vadd.f32 %v12875_v45, %v9095_v51  ;;  %v9488_v43 = vmax.f32 %v763_v57, 0.0  ;;  %v2591_v57 = vld [vmem:[#allocation8 + $0xc38] sm:$0xff] }
 0x203   :  { %12862 = vst [vmem:[#allocation96_spill] sm:$0xff] %v9446_v28  ;;  %v6897_v45 = vpack.c.bf16 %v2591_v57, %v2587_v20  ;;  %v2584_v20 = vld [vmem:[#allocation8 + $0xc00] sm:$0xff] }
 0x204   :  { %1601 = vmatmul.mubr.f32.gmra.mrb[100].mxu0 %v9350_v11  ;;  %2115 = vmatmul.mubr.f32.gmra.mrb[100].mxu1 %v9350_v11  ;;  %v9476_v38 = vmax.f32 %v757_v19, 0.0  ;;  %12876 = vst [vmem:[#allocation104_spill] sm:$0xff] %v9488_v43  ;;  %v9492_v19 = vmax.f32 %v755_v21, 0.0  ;;  %v1149_v21 = vld [vmem:[#allocation9] sm:$0xf] }
 0x205   :  { %1606 = vmatprep.mubr.f32.mxu0 %v9344_v54  ;;  %2120 = vmatprep.mubr.f32.mxu1 %v9344_v54  ;;  %v2588_v57 = vld [vmem:[#allocation8 + $0xc20] sm:$0xff] }
 0x206   :  { %12872 = vst [vmem:[#allocation99_spill] sm:$0xff] %v9476_v38  ;;  %12877 = vst [vmem:[#allocation135_spill] sm:$0xff] %v9492_v19  ;;  %6898 = vmatprep.subr.bf16.mxu1 %v6897_v45 }
 0x208   :  { %1607 = vmatmul.mubr.f32.gmra.mrb[102].mxu0 %v9362_v40  ;;  %2121 = vmatmul.mubr.f32.gmra.mrb[102].mxu1 %v9362_v40 }
 0x209   :  { %1612 = vmatprep.mubr.f32.mxu0 %v9356_v49  ;;  %2126 = vmatprep.mubr.f32.mxu1 %v9356_v49  ;;  %v2604_v49 = vld [vmem:[#allocation8 + $0xca0] sm:$0xff] }
 0x20c   :  { %1613 = vmatmul.mubr.f32.gmra.mrb[104].mxu0 %v9374_v34  ;;  %2127 = vmatmul.mubr.f32.gmra.mrb[104].mxu1 %v9374_v34 }
 0x20d   :  { %1618 = vmatprep.mubr.f32.mxu0 %v9368_v10  ;;  %2132 = vmatprep.mubr.f32.mxu1 %v9368_v10 }
 0x210   :  { %1619 = vmatmul.mubr.f32.gmra.mrb[106].mxu0 %v9386_v30  ;;  %2133 = vmatmul.mubr.f32.gmra.mrb[106].mxu1 %v9386_v30 }
 0x211   :  { %1624 = vmatprep.mubr.f32.mxu0 %v9380_v63  ;;  %2138 = vmatprep.mubr.f32.mxu1 %v9380_v63  ;;  %v2596_v63 = vld [vmem:[#allocation8 + $0xc60] sm:$0xff] }
 0x214   :  { %1625 = vmatmul.mubr.f32.gmra.mrb[108].mxu0 %v9398_v24  ;;  %2139 = vmatmul.mubr.f32.gmra.mrb[108].mxu1 %v9398_v24  ;;  %v2592_v24 = vld [vmem:[#allocation8 + $0xc40] sm:$0xff] }
 0x215   :  { %1630 = vmatprep.mubr.f32.mxu0 %v9392_v2  ;;  %2144 = vmatprep.mubr.f32.mxu1 %v9392_v2 }
 0x218   :  { %1631 = vmatmul.mubr.f32.gmra.mrb[110].mxu0 %v9410_v32  ;;  %2145 = vmatmul.mubr.f32.gmra.mrb[110].mxu1 %v9410_v32 }
 0x219   :  { %1636 = vmatprep.mubr.f32.mxu0 %v9404_v25  ;;  %2150 = vmatprep.mubr.f32.mxu1 %v9404_v25 }
 0x21c   :  { %1637 = vmatmul.mubr.f32.gmra.mrb[112].mxu0 %v9422_v52  ;;  %2151 = vmatmul.mubr.f32.gmra.mrb[112].mxu1 %v9422_v52 }
 0x21d   :  { %1642 = vmatprep.mubr.f32.mxu0 %v9416_v22  ;;  %2156 = vmatprep.mubr.f32.mxu1 %v9416_v22 }
 0x220   :  { %1643 = vmatmul.mubr.f32.gmra.mrb[114].mxu0 %v9434_v4  ;;  %2157 = vmatmul.mubr.f32.gmra.mrb[114].mxu1 %v9434_v4 }
 0x221   :  { %1648 = vmatprep.mubr.f32.mxu0 %v9428_v48  ;;  %2162 = vmatprep.mubr.f32.mxu1 %v9428_v48  ;;  %v2593_v48 = vld [vmem:[#allocation8 + $0xc48] sm:$0xff] }
 0x224   :  { %1649 = vmatmul.mubr.f32.gmra.mrb[116].mxu0 %v9446_v28  ;;  %2163 = vmatmul.mubr.f32.gmra.mrb[116].mxu1 %v9446_v28 }
 0x225   :  { %1654 = vmatprep.mubr.f32.mxu0 %v9440_v36  ;;  %2168 = vmatprep.mubr.f32.mxu1 %v9440_v36 }
 0x228   :  { %1655 = vmatmul.mubr.f32.gmra.mrb[118].mxu0 %v9458_v17  ;;  %2169 = vmatmul.mubr.f32.gmra.mrb[118].mxu1 %v9458_v17 }
 0x229   :  { %1660 = vmatprep.mubr.f32.mxu0 %v9452_v6  ;;  %2174 = vmatprep.mubr.f32.mxu1 %v9452_v6  ;;  %v9482_v6 = vmax.f32 %v749_v50, 0.0 }
 0x22b   :  { %12874 = vst [vmem:[#allocation109_spill] sm:$0xff] %v9482_v6 }
 0x22c   :  { %1661 = vmatmul.mubr.f32.gmra.mrb[120].mxu0 %v9470_v13  ;;  %2175 = vmatmul.mubr.f32.gmra.mrb[120].mxu1 %v9470_v13 }
 0x22d   :  { %1666 = vmatprep.mubr.f32.mxu0 %v9464_v60  ;;  %2180 = vmatprep.mubr.f32.mxu1 %v9464_v60  ;;  %v12878_v60 = vld [vmem:[#allocation108_spill] sm:$0xff] }
 0x22e   :  { %v761_v47 = vadd.f32 %v12878_v60, %v9095_v51  ;;  %v12880_v51 = vld [vmem:[#allocation18_spill] sm:$0xff] }
 0x22f   :  { %v9505_v60 = vrot.slane %v1149_v21, %v12880_v51 }
 0x230   :  { %1667 = vmatmul.mubr.f32.gmra.mrb[122].mxu0 %v9482_v6  ;;  %2181 = vmatmul.mubr.f32.gmra.mrb[122].mxu1 %v9482_v6  ;;  %v9500_v50 = vmax.f32 %v761_v47, 0.0 }
 0x231   :  { %1672 = vmatprep.mubr.f32.mxu0 %v9476_v38  ;;  %2186 = vmatprep.mubr.f32.mxu1 %v9476_v38  ;;  %v12881_v38 = vld [vmem:[#allocation19_spill] sm:$0xff] }
 0x232   :  { %12879 = vst [vmem:[#allocation108_spill] sm:$0xff] %v9500_v50 }
 0x234   :  { %1673 = vmatmul.mubr.f32.gmra.mrb[124].mxu0 %v9492_v19  ;;  %2187 = vmatmul.mubr.f32.gmra.mrb[124].mxu1 %v9492_v19  ;;  %v9508_v19 = vrot.slane %v1149_v21, %v12881_v38  ;;  %v2597_v21 = vld [vmem:[#allocation8 + $0xc68] sm:$0xff] }
 0x235   :  { %1678 = vmatprep.mubr.f32.mxu0 %v9488_v43  ;;  %2192 = vmatprep.mubr.f32.mxu1 %v9488_v43  ;;  %v6773_v2 = vpack.c.bf16 %v2597_v21, %v2593_v48  ;;  %v12886_v48 = vld [vmem:[#allocation22_spill] sm:$0xff]  ;;  %v12888_v21 = vld [vmem:[#allocation23_spill] sm:$0xff] }
 0x238   :  { %1679 = vmatmul.mubr.f32.gmra.mrb[126].mxu0 %v9500_v50  ;;  %2193 = vmatmul.mubr.f32.gmra.mrb[126].mxu1 %v9500_v50 }
 0x28f   :  { %v1494_v6 = vpop.f32.mrb[64].mxu0  ;;  %v9510_v13 = vpop.f32.mrb[64].mxu1 }
 0x290   :  { %v7217_v47 = vadd.f32 %v1494_v6, %v9505_v60  ;;  %v1496_v43 = vpop.f32.mrb[65].mxu0  ;;  %v9513_v17 = vpop.f32.mrb[65].mxu1  ;;  %v12882_v6 = vld [vmem:[#allocation20_spill] sm:$0xff] }
 0x291   :  { %v7218_v50 = vadd.f32 %v1496_v43, %v9508_v19  ;;  %v6771_v43 = vpack.c.bf16 %v2588_v57, %v2584_v20 }
 0x292   :  { %v2199_v36 = vmax.f32 %v7217_v47, 0.0  ;;  %v12884_v47 = vld [vmem:[#allocation21_spill] sm:$0xff] }
 0x293   :  { %v2200_v45 = vmax.f32 %v7218_v50, 0.0  ;;  %v1500_v28 = vpop.f32.mrb[66].mxu0  ;;  %v9516_v51 = vpop.f32.mrb[66].mxu1 }
 0x294   :  { %v7219_v38 = vadd.f32 %v1500_v28, %v9505_v60  ;;  %v1502_v4 = vpop.f32.mrb[67].mxu0  ;;  %v9519_v22 = vpop.f32.mrb[67].mxu1  ;;  %v9526_v32 = vadd.f32 %v2199_v36, %v12884_v47  ;;  %v2601_v28 = vld [vmem:[#allocation8 + $0xc88] sm:$0xff] }
 0x295   :  { %v9522_v52 = vadd.f32 %v2200_v45, %v12882_v6  ;;  %v7220_v25 = vadd.f32 %v1502_v4, %v9508_v19  ;;  %v2605_v45 = vld [vmem:[#allocation8 + $0xca8] sm:$0xff] }
 0x296   :  { %12885 = vst [vmem:[#allocation21_spill] sm:$0xff] %v9526_v32  ;;  %v2203_v50 = vmax.f32 %v7219_v38, 0.0  ;;  %v6775_v38 = vpack.c.bf16 %v2596_v63, %v2592_v24  ;;  %v2613_v63 = vld [vmem:[#allocation8 + $0xce8] sm:$0xff] }
 0x297   :  { %12883 = vst [vmem:[#allocation20_spill] sm:$0xff] %v9522_v52  ;;  %v2204_v30 = vmax.f32 %v7220_v25, 0.0  ;;  %v1506_v10 = vpop.f32.mrb[68].mxu0  ;;  %v9528_v34 = vpop.f32.mrb[68].mxu1  ;;  %2799 = vmatprep.mubr.f32.mxu0 %v9522_v52  ;;  %3313 = vmatprep.mubr.f32.mxu1 %v9522_v52  ;;  %v2600_v52 = vld [vmem:[#allocation8 + $0xc80] sm:$0xff] }
 0x298   :  { %v7221_v4 = vadd.f32 %v1506_v10, %v9505_v60  ;;  %v1508_v20 = vpop.f32.mrb[69].mxu0  ;;  %v9533_v57 = vpop.f32.mrb[69].mxu1  ;;  %2800 = vmatmul.mubr.f32.vlgmr.msra.gmra.mrb[128].mxu0 %v9526_v32  ;;  %v9541_v6 = vadd.f32 %v2203_v50, %v12888_v21  ;;  %3314 = vmatmul.mubr.f32.vlgmr.msra.gmra.mrb[128].mxu1 %v9526_v32  ;;  %v6777_v10 = vpack.c.bf16 %v2605_v45, %v2601_v28  ;;  %v2608_v21 = vld [vmem:[#allocation8 + $0xcc0] sm:$0xff] }
 0x299   :  { %v9537_v36 = vadd.f32 %v2204_v30, %v12886_v48  ;;  %v7222_v25 = vadd.f32 %v1508_v20, %v9508_v19  ;;  %6772 = vmatpush1.bf16.msra.mxu0 %v6771_v43  ;;  %v2609_v30 = vld [vmem:[#allocation8 + $0xcc8] sm:$0xff]  ;;  %v12892_v20 = vld [vmem:[#allocation25_spill] sm:$0xff] }
 0x29a   :  { %12889 = vst [vmem:[#allocation23_spill] sm:$0xff] %v9541_v6  ;;  %v2207_v47 = vmax.f32 %v7221_v4, 0.0  ;;  %6774 = vmatprep.subr.bf16.mxu0 %v6773_v2  ;;  %v12890_v2 = vld [vmem:[#allocation24_spill] sm:$0xff]  ;;  %v6779_v4 = vpack.c.bf16 %v2604_v49, %v2600_v52  ;;  %v2621_v49 = vld [vmem:[#allocation8 + $0xd28] sm:$0xff] }
 0x29b   :  { %12887 = vst [vmem:[#allocation22_spill] sm:$0xff] %v9537_v36  ;;  %v2208_v40 = vmax.f32 %v7222_v25, 0.0  ;;  %v1512_v54 = vpop.f32.mrb[70].mxu0  ;;  %v9544_v11 = vpop.f32.mrb[70].mxu1  ;;  %2805 = vmatprep.mubr.f32.mxu0 %v9537_v36  ;;  %3319 = vmatprep.mubr.f32.mxu1 %v9537_v36  ;;  %v2612_v36 = vld [vmem:[#allocation8 + $0xce0] sm:$0xff] }
 0x29c   :  { %v7223_v24 = vadd.f32 %v1512_v54, %v9505_v60  ;;  %v1514_v43 = vpop.f32.mrb[71].mxu0  ;;  %v9549_v50 = vpop.f32.mrb[71].mxu1  ;;  %2806 = vmatmul.mubr.f32.gmra.mrb[130].mxu0 %v9541_v6  ;;  %v9557_v48 = vadd.f32 %v2207_v47, %v12892_v20  ;;  %3320 = vmatmul.mubr.f32.gmra.mrb[130].mxu1 %v9541_v6  ;;  %v6781_v54 = vpack.c.bf16 %v2613_v63, %v2609_v30  ;;  %v2616_v20 = vld [vmem:[#allocation8 + $0xd00] sm:$0xff] }
 0x29d   :  { %v9553_v28 = vadd.f32 %v2208_v40, %v12890_v2  ;;  %v7224_v45 = vadd.f32 %v1514_v43, %v9508_v19  ;;  %6776 = vmatpush1.bf16.msra.mxu0 %v6775_v38  ;;  %v2617_v40 = vld [vmem:[#allocation8 + $0xd08] sm:$0xff] }
 0x29e   :  { %12893 = vst [vmem:[#allocation25_spill] sm:$0xff] %v9557_v48  ;;  %v2211_v25 = vmax.f32 %v7223_v24, 0.0  ;;  %6778 = vmatprep.subr.bf16.mxu0 %v6777_v10  ;;  %v12894_v10 = vld [vmem:[#allocation26_spill] sm:$0xff]  ;;  %v6783_v24 = vpack.c.bf16 %v2612_v36, %v2608_v21  ;;  %v12896_v43 = vld [vmem:[#allocation27_spill] sm:$0xff] }
 0x29f   :  { %12891 = vst [vmem:[#allocation24_spill] sm:$0xff] %v9553_v28  ;;  %v2212_v32 = vmax.f32 %v7224_v45, 0.0  ;;  %v1518_v37 = vpop.f32.mrb[72].mxu0  ;;  %v9560_v7 = vpop.f32.mrb[72].mxu1  ;;  %2811 = vmatprep.mubr.f32.mxu0 %v9553_v28  ;;  %3325 = vmatprep.mubr.f32.mxu1 %v9553_v28  ;;  %v2620_v28 = vld [vmem:[#allocation8 + $0xd20] sm:$0xff]  ;;  %v2629_v36 = vld [vmem:[#allocation8 + $0xd68] sm:$0xff] }
 0x2a0   :  { %v7225_v52 = vadd.f32 %v1518_v37, %v9505_v60  ;;  %v1520_v38 = vpop.f32.mrb[73].mxu0  ;;  %v9565_v47 = vpop.f32.mrb[73].mxu1  ;;  %2812 = vmatmul.mubr.f32.gmra.mrb[132].mxu0 %v9557_v48  ;;  %v9573_v2 = vadd.f32 %v2211_v25, %v12896_v43  ;;  %3326 = vmatmul.mubr.f32.gmra.mrb[132].mxu1 %v9557_v48  ;;  %v6785_v37 = vpack.c.bf16 %v2621_v49, %v2617_v40  ;;  %v2624_v43 = vld [vmem:[#allocation8 + $0xd40] sm:$0xff] }
 0x2a1   :  { %v9569_v30 = vadd.f32 %v2212_v32, %v12894_v10  ;;  %v7226_v63 = vadd.f32 %v1520_v38, %v9508_v19  ;;  %6780 = vmatpush1.bf16.msra.mxu0 %v6779_v4  ;;  %v2625_v32 = vld [vmem:[#allocation8 + $0xd48] sm:$0xff]  ;;  %v12900_v38 = vld [vmem:[#allocation29_spill] sm:$0xff] }
 0x2a2   :  { %12897 = vst [vmem:[#allocation27_spill] sm:$0xff] %v9573_v2  ;;  %v2215_v45 = vmax.f32 %v7225_v52, 0.0  ;;  %6782 = vmatprep.subr.bf16.mxu0 %v6781_v54  ;;  %v12898_v54 = vld [vmem:[#allocation28_spill] sm:$0xff]  ;;  %v6787_v52 = vpack.c.bf16 %v2620_v28, %v2616_v20  ;;  %v2637_v28 = vld [vmem:[#allocation8 + $0xda8] sm:$0xff] }
 0x2a3   :  { %12895 = vst [vmem:[#allocation26_spill] sm:$0xff] %v9569_v30  ;;  %v2216_v6 = vmax.f32 %v7226_v63, 0.0  ;;  %v1524_v39 = vpop.f32.mrb[74].mxu0  ;;  %v9576_v12 = vpop.f32.mrb[74].mxu1  ;;  %2817 = vmatprep.mubr.f32.mxu0 %v9569_v30  ;;  %3331 = vmatprep.mubr.f32.mxu1 %v9569_v30  ;;  %v2628_v30 = vld [vmem:[#allocation8 + $0xd60] sm:$0xff] }
 0x2a4   :  { %v7227_v4 = vadd.f32 %v1524_v39, %v9505_v60  ;;  %v1526_v25 = vpop.f32.mrb[75].mxu0  ;;  %v9581_v21 = vpop.f32.mrb[75].mxu1  ;;  %2818 = vmatmul.mubr.f32.gmra.mrb[134].mxu0 %v9573_v2  ;;  %v9589_v10 = vadd.f32 %v2215_v45, %v12900_v38  ;;  %3332 = vmatmul.mubr.f32.gmra.mrb[134].mxu1 %v9573_v2  ;;  %v6789_v39 = vpack.c.bf16 %v2629_v36, %v2625_v32  ;;  %v2632_v38 = vld [vmem:[#allocation8 + $0xd80] sm:$0xff] }
 0x2a5   :  { %v9585_v40 = vadd.f32 %v2216_v6, %v12898_v54  ;;  %v7228_v49 = vadd.f32 %v1526_v25, %v9508_v19  ;;  %6784 = vmatpush1.bf16.msra.mxu0 %v6783_v24  ;;  %v2633_v6 = vld [vmem:[#allocation8 + $0xd88] sm:$0xff] }
 0x2a6   :  { %12901 = vst [vmem:[#allocation29_spill] sm:$0xff] %v9589_v10  ;;  %v2219_v63 = vmax.f32 %v7227_v4, 0.0  ;;  %6786 = vmatprep.subr.bf16.mxu0 %v6785_v37  ;;  %v12902_v37 = vld [vmem:[#allocation30_spill] sm:$0xff]  ;;  %v6791_v4 = vpack.c.bf16 %v2628_v30, %v2624_v43  ;;  %v12904_v25 = vld [vmem:[#allocation31_spill] sm:$0xff] }
 0x2a7   :  { %12899 = vst [vmem:[#allocation28_spill] sm:$0xff] %v9585_v40  ;;  %v2220_v48 = vmax.f32 %v7228_v49, 0.0  ;;  %v1530_v44 = vpop.f32.mrb[76].mxu0  ;;  %v9592_v18 = vpop.f32.mrb[76].mxu1  ;;  %2823 = vmatprep.mubr.f32.mxu0 %v9585_v40  ;;  %3337 = vmatprep.mubr.f32.mxu1 %v9585_v40  ;;  %v2636_v40 = vld [vmem:[#allocation8 + $0xda0] sm:$0xff]  ;;  %v2645_v30 = vld [vmem:[#allocation8 + $0xde8] sm:$0xff] }
 0x2a8   :  { %v7229_v24 = vadd.f32 %v1530_v44, %v9505_v60  ;;  %v1532_v45 = vpop.f32.mrb[77].mxu0  ;;  %v9597_v20 = vpop.f32.mrb[77].mxu1  ;;  %2824 = vmatmul.mubr.f32.gmra.mrb[136].mxu0 %v9589_v10  ;;  %v9605_v54 = vadd.f32 %v2219_v63, %v12904_v25  ;;  %3338 = vmatmul.mubr.f32.gmra.mrb[136].mxu1 %v9589_v10  ;;  %v6793_v44 = vpack.c.bf16 %v2637_v28, %v2633_v6  ;;  %v2640_v25 = vld [vmem:[#allocation8 + $0xdc0] sm:$0xff] }
 0x2a9   :  { %v9601_v32 = vadd.f32 %v2220_v48, %v12902_v37  ;;  %v7230_v36 = vadd.f32 %v1532_v45, %v9508_v19  ;;  %6788 = vmatpush1.bf16.msra.mxu0 %v6787_v52  ;;  %v2641_v48 = vld [vmem:[#allocation8 + $0xdc8] sm:$0xff]  ;;  %v12908_v45 = vld [vmem:[#allocation33_spill] sm:$0xff] }
 0x2aa   :  { %12905 = vst [vmem:[#allocation31_spill] sm:$0xff] %v9605_v54  ;;  %v2223_v49 = vmax.f32 %v7229_v24, 0.0  ;;  %6790 = vmatprep.subr.bf16.mxu0 %v6789_v39  ;;  %v12906_v39 = vld [vmem:[#allocation32_spill] sm:$0xff]  ;;  %v6795_v24 = vpack.c.bf16 %v2636_v40, %v2632_v38  ;;  %v2653_v40 = vld [vmem:[#allocation8 + $0xe28] sm:$0xff] }
 0x2ab   :  { %12903 = vst [vmem:[#allocation30_spill] sm:$0xff] %v9601_v32  ;;  %v2224_v2 = vmax.f32 %v7230_v36, 0.0  ;;  %v1536_v23 = vpop.f32.mrb[78].mxu0  ;;  %v9608_v61 = vpop.f32.mrb[78].mxu1  ;;  %2829 = vmatprep.mubr.f32.mxu0 %v9601_v32  ;;  %3343 = vmatprep.mubr.f32.mxu1 %v9601_v32  ;;  %v2644_v32 = vld [vmem:[#allocation8 + $0xde0] sm:$0xff] }
 0x2ac   :  { %v7231_v52 = vadd.f32 %v1536_v23, %v9505_v60  ;;  %v1538_v63 = vpop.f32.mrb[79].mxu0  ;;  %v9613_v43 = vpop.f32.mrb[79].mxu1  ;;  %2830 = vmatmul.mubr.f32.gmra.mrb[138].mxu0 %v9605_v54  ;;  %v9621_v37 = vadd.f32 %v2223_v49, %v12908_v45  ;;  %3344 = vmatmul.mubr.f32.gmra.mrb[138].mxu1 %v9605_v54  ;;  %v6797_v23 = vpack.c.bf16 %v2645_v30, %v2641_v48  ;;  %v2648_v45 = vld [vmem:[#allocation8 + $0xe00] sm:$0xff] }
 0x2ad   :  { %v9617_v6 = vadd.f32 %v2224_v2, %v12906_v39  ;;  %v7232_v28 = vadd.f32 %v1538_v63, %v9508_v19  ;;  %6792 = vmatpush1.bf16.msra.mxu0 %v6791_v4  ;;  %v2649_v2 = vld [vmem:[#allocation8 + $0xe08] sm:$0xff] }
 0x2ae   :  { %12909 = vst [vmem:[#allocation33_spill] sm:$0xff] %v9621_v37  ;;  %v2227_v36 = vmax.f32 %v7231_v52, 0.0  ;;  %6794 = vmatprep.subr.bf16.mxu0 %v6793_v44  ;;  %v12910_v44 = vld [vmem:[#allocation34_spill] sm:$0xff]  ;;  %v6799_v52 = vpack.c.bf16 %v2644_v32, %v2640_v25  ;;  %v12912_v63 = vld [vmem:[#allocation35_spill] sm:$0xff] }
 0x2af   :  { %12907 = vst [vmem:[#allocation32_spill] sm:$0xff] %v9617_v6  ;;  %v2228_v10 = vmax.f32 %v7232_v28, 0.0  ;;  %v1542_v5 = vpop.f32.mrb[80].mxu0  ;;  %v9624_v3 = vpop.f32.mrb[80].mxu1  ;;  %2835 = vmatprep.mubr.f32.mxu0 %v9617_v6  ;;  %3349 = vmatprep.mubr.f32.mxu1 %v9617_v6  ;;  %v2652_v6 = vld [vmem:[#allocation8 + $0xe20] sm:$0xff]  ;;  %v2661_v32 = vld [vmem:[#allocation8 + $0xe68] sm:$0xff] }
 0x2b0   :  { %v7233_v4 = vadd.f32 %v1542_v5, %v9505_v60  ;;  %v1544_v49 = vpop.f32.mrb[81].mxu0  ;;  %v9629_v38 = vpop.f32.mrb[81].mxu1  ;;  %2836 = vmatmul.mubr.f32.gmra.mrb[140].mxu0 %v9621_v37  ;;  %v9637_v39 = vadd.f32 %v2227_v36, %v12912_v63  ;;  %3350 = vmatmul.mubr.f32.gmra.mrb[140].mxu1 %v9621_v37  ;;  %v6801_v5 = vpack.c.bf16 %v2653_v40, %v2649_v2  ;;  %v2590_v63 = vld [vmem:[#allocation8 + $0xc30] sm:$0xff] }
 0x2b1   :  { %v9633_v48 = vadd.f32 %v2228_v10, %v12910_v44  ;;  %v7234_v30 = vadd.f32 %v1544_v49, %v9508_v19  ;;  %6796 = vmatpush1.bf16.msra.mxu0 %v6795_v24  ;;  %v2657_v10 = vld [vmem:[#allocation8 + $0xe48] sm:$0xff]  ;;  %v12916_v49 = vld [vmem:[#allocation37_spill] sm:$0xff] }
 0x2b2   :  { %12913 = vst [vmem:[#allocation35_spill] sm:$0xff] %v9637_v39  ;;  %v2231_v28 = vmax.f32 %v7233_v4, 0.0  ;;  %6798 = vmatprep.subr.bf16.mxu0 %v6797_v23  ;;  %v12914_v23 = vld [vmem:[#allocation36_spill] sm:$0xff]  ;;  %v6803_v4 = vpack.c.bf16 %v2652_v6, %v2648_v45  ;;  %v2599_v6 = vld [vmem:[#allocation8 + $0xc78] sm:$0xff] }
 0x2b3   :  { %12911 = vst [vmem:[#allocation34_spill] sm:$0xff] %v9633_v48  ;;  %v2232_v54 = vmax.f32 %v7234_v30, 0.0  ;;  %v1548_v35 = vpop.f32.mrb[82].mxu0  ;;  %v9640_v29 = vpop.f32.mrb[82].mxu1  ;;  %2841 = vmatprep.mubr.f32.mxu0 %v9633_v48  ;;  %3355 = vmatprep.mubr.f32.mxu1 %v9633_v48  ;;  %v6805_v48 = vpack.c.bf16 %v2661_v32, %v2657_v10 }
 0x2b4   :  { %v7235_v24 = vadd.f32 %v1548_v35, %v9505_v60  ;;  %v1550_v36 = vpop.f32.mrb[83].mxu0  ;;  %v9645_v25 = vpop.f32.mrb[83].mxu1  ;;  %2842 = vmatmul.mubr.f32.gmra.mrb[142].mxu0 %v9637_v39  ;;  %v9653_v44 = vadd.f32 %v2231_v28, %v12916_v49  ;;  %3356 = vmatmul.mubr.f32.gmra.mrb[142].mxu1 %v9637_v39  ;;  %v2586_v35 = vld [vmem:[#allocation8 + $0xc10] sm:$0xff] }
 0x2b5   :  { %v9649_v2 = vadd.f32 %v2232_v54, %v12914_v23  ;;  %v7236_v40 = vadd.f32 %v1550_v36, %v9508_v19  ;;  %6800 = vmatpush1.bf16.msra.mxu0 %v6799_v52  ;;  %v2595_v54 = vld [vmem:[#allocation8 + $0xc58] sm:$0xff]  ;;  %v6899_v32 = vpack.c.bf16 %v2590_v63, %v2586_v35  ;;  %v12920_v36 = vld [vmem:[#allocation39_spill] sm:$0xff] }
 0x2b6   :  { %12917 = vst [vmem:[#allocation37_spill] sm:$0xff] %v9653_v44  ;;  %v2235_v30 = vmax.f32 %v7235_v24, 0.0  ;;  %6802 = vmatprep.subr.bf16.mxu0 %v6801_v5  ;;  %v12918_v5 = vld [vmem:[#allocation38_spill] sm:$0xff]  ;;  %v6901_v49 = vpack.c.bf16 %v2599_v6, %v2595_v54  ;;  %v12924_v54 = vld [vmem:[#allocation40_spill] sm:$0xff] }
 0x2b7   :  { %12915 = vst [vmem:[#allocation36_spill] sm:$0xff] %v9649_v2  ;;  %v2236_v37 = vmax.f32 %v7236_v40, 0.0  ;;  %v1554_v31 = vpop.f32.mrb[84].mxu0  ;;  %v9656_v1 = vpop.f32.mrb[84].mxu1  ;;  %2847 = vmatprep.mubr.f32.mxu0 %v9649_v2  ;;  %3361 = vmatprep.mubr.f32.mxu1 %v9649_v2  ;;  %v2598_v2 = vld [vmem:[#allocation8 + $0xc70] sm:$0xff] }
 0x2b8   :  { %v7237_v52 = vadd.f32 %v1554_v31, %v9505_v60  ;;  %v1556_v28 = vpop.f32.mrb[85].mxu0  ;;  %v9661_v45 = vpop.f32.mrb[85].mxu1  ;;  %2848 = vmatmul.mubr.f32.gmra.mrb[144].mxu0 %v9653_v44  ;;  %v9669_v23 = vadd.f32 %v2235_v30, %v12920_v36  ;;  %3362 = vmatmul.mubr.f32.gmra.mrb[144].mxu1 %v9653_v44  ;;  %v2594_v31 = vld [vmem:[#allocation8 + $0xc50] sm:$0xff]  ;;  %v2603_v36 = vld [vmem:[#allocation8 + $0xc98] sm:$0xff] }
 0x2b9   :  { %v9665_v24 = vadd.f32 %v2236_v37, %v12918_v5  ;;  %v7238_v10 = vadd.f32 %v1556_v28, %v9508_v19  ;;  %6804 = vmatpush1.bf16.msra.mxu0 %v6803_v4  ;;  %v2656_v37 = vld [vmem:[#allocation8 + $0xe40] sm:$0xff]  ;;  %6900 = vmatpush1.bf16.msra.mxu1 %v6899_v32  ;;  %v12926_v28 = vld [vmem:[#allocation41_spill] sm:$0xff] }
 0x2ba   :  { %12921 = vst [vmem:[#allocation39_spill] sm:$0xff] %v9669_v23  ;;  %v2239_v40 = vmax.f32 %v7237_v52, 0.0  ;;  %6806 = vmatprep.subr.bf16.mxu0 %v6805_v48  ;;  %v2660_v4 = vld [vmem:[#allocation8 + $0xe60] sm:$0xff]  ;;  %v6903_v52 = vpack.c.bf16 %v2598_v2, %v2594_v31  ;;  %6902 = vmatprep.subr.bf16.mxu1 %v6901_v49  ;;  %v2669_v2 = vld [vmem:[#allocation8 + $0xea8] sm:$0xff] }
 0x2bb   :  { %12919 = vst [vmem:[#allocation38_spill] sm:$0xff] %v9665_v24  ;;  %v2240_v39 = vmax.f32 %v7238_v10, 0.0  ;;  %v1560_v33 = vpop.f32.mrb[86].mxu0  ;;  %v9672_v42 = vpop.f32.mrb[86].mxu1  ;;  %2853 = vmatprep.mubr.f32.mxu0 %v9665_v24  ;;  %3367 = vmatprep.mubr.f32.mxu1 %v9665_v24  ;;  %v2607_v24 = vld [vmem:[#allocation8 + $0xcb8] sm:$0xff]  ;;  %v12930_v49 = vld [vmem:[#allocation42_spill] sm:$0xff] }
 0x2bc   :  { %12922 = vst [vmem:[#allocation136_spill] sm:$0xff] %v9672_v42  ;;  %v7239_v30 = vadd.f32 %v1560_v33, %v9505_v60  ;;  %v1562_v35 = vpop.f32.mrb[87].mxu0  ;;  %v9677_v63 = vpop.f32.mrb[87].mxu1  ;;  %2854 = vmatmul.mubr.f32.gmra.mrb[146].mxu0 %v9669_v23  ;;  %v9685_v5 = vadd.f32 %v2239_v40, %v12926_v28  ;;  %3368 = vmatmul.mubr.f32.gmra.mrb[146].mxu1 %v9669_v23  ;;  %v2606_v28 = vld [vmem:[#allocation8 + $0xcb0] sm:$0xff] }
 0x2bd   :  { %12923 = vst [vmem:[#allocation137_spill] sm:$0xff] %v9677_v63  ;;  %v9681_v6 = vadd.f32 %v2240_v39, %v12924_v54  ;;  %v7240_v48 = vadd.f32 %v1562_v35, %v9508_v19  ;;  %v6807_v33 = vpack.c.bf16 %v2660_v4, %v2656_v37  ;;  %v2665_v39 = vld [vmem:[#allocation8 + $0xe88] sm:$0xff]  ;;  %6904 = vmatpush1.bf16.msra.mxu1 %v6903_v52  ;;  %v2711_v63 = vld [vmem:[#allocation8 + $0xff8] sm:$0xff] }
 0x2be   :  { %12927 = vst [vmem:[#allocation41_spill] sm:$0xff] %v9685_v5  ;;  %v2243_v10 = vmax.f32 %v7239_v30, 0.0  ;;  %v6905_v30 = vpack.c.bf16 %v2607_v24, %v2603_v36  ;;  %v12932_v35 = vld [vmem:[#allocation43_spill] sm:$0xff]  ;;  %v2615_v24 = vld [vmem:[#allocation8 + $0xcf8] sm:$0xff] }
 0x2bf   :  { %12925 = vst [vmem:[#allocation40_spill] sm:$0xff] %v9681_v6  ;;  %v2244_v44 = vmax.f32 %v7240_v48, 0.0  ;;  %v1566_v53 = vpop.f32.mrb[88].mxu0  ;;  %v9688_v42 = vpop.f32.mrb[88].mxu1  ;;  %2859 = vmatprep.mubr.f32.mxu0 %v9681_v6  ;;  %3373 = vmatprep.mubr.f32.mxu1 %v9681_v6  ;;  %v6809_v6 = vpack.c.bf16 %v2669_v2, %v2665_v39 }
 0x2c0   :  { %12928 = vst [vmem:[#allocation138_spill] sm:$0xff] %v9688_v42  ;;  %v7241_v32 = vadd.f32 %v1566_v53, %v9505_v60  ;;  %v1568_v40 = vpop.f32.mrb[89].mxu0  ;;  %v9693_v31 = vpop.f32.mrb[89].mxu1  ;;  %2860 = vmatmul.mubr.f32.gmra.mrb[148].mxu0 %v9685_v5  ;;  %v9701_v54 = vadd.f32 %v2243_v10, %v12932_v35  ;;  %3374 = vmatmul.mubr.f32.gmra.mrb[148].mxu1 %v9685_v5  ;;  %v2602_v53 = vld [vmem:[#allocation8 + $0xc90] sm:$0xff] }
 0x2c1   :  { %12929 = vst [vmem:[#allocation139_spill] sm:$0xff] %v9693_v31  ;;  %v9697_v37 = vadd.f32 %v2244_v44, %v12930_v49  ;;  %v7242_v4 = vadd.f32 %v1568_v40, %v9508_v19  ;;  %6808 = vmatpush1.bf16.msra.mxu0 %v6807_v33  ;;  %v2611_v44 = vld [vmem:[#allocation8 + $0xcd8] sm:$0xff]  ;;  %v12936_v33 = vld [vmem:[#allocation44_spill] sm:$0xff]  ;;  %6906 = vmatprep.subr.bf16.mxu1 %v6905_v30  ;;  %v2668_v30 = vld [vmem:[#allocation8 + $0xea0] sm:$0xff] }
 0x2c2   :  { %12933 = vst [vmem:[#allocation43_spill] sm:$0xff] %v9701_v54  ;;  %v2247_v48 = vmax.f32 %v7241_v32, 0.0  ;;  %v6907_v2 = vpack.c.bf16 %v2606_v28, %v2602_v53  ;;  %v12938_v40 = vld [vmem:[#allocation45_spill] sm:$0xff]  ;;  %v6909_v35 = vpack.c.bf16 %v2615_v24, %v2611_v44  ;;  %6810 = vmatprep.subr.bf16.mxu0 %v6809_v6  ;;  %v12942_v44 = vld [vmem:[#allocation46_spill] sm:$0xff] }
 0x2c3   :  { %12931 = vst [vmem:[#allocation42_spill] sm:$0xff] %v9697_v37  ;;  %v2248_v23 = vmax.f32 %v7242_v4, 0.0  ;;  %v1572_v42 = vpop.f32.mrb[90].mxu0  ;;  %v9704_v31 = vpop.f32.mrb[90].mxu1  ;;  %2865 = vmatprep.mubr.f32.mxu0 %v9697_v37  ;;  %3379 = vmatprep.mubr.f32.mxu1 %v9697_v37  ;;  %v2614_v37 = vld [vmem:[#allocation8 + $0xcf0] sm:$0xff] }
 0x2c4   :  { %12934 = vst [vmem:[#allocation140_spill] sm:$0xff] %v9704_v31  ;;  %v7243_v52 = vadd.f32 %v1572_v42, %v9505_v60  ;;  %v1574_v10 = vpop.f32.mrb[91].mxu0  ;;  %v9709_v36 = vpop.f32.mrb[91].mxu1  ;;  %2866 = vmatmul.mubr.f32.gmra.mrb[150].mxu0 %v9701_v54  ;;  %v9717_v49 = vadd.f32 %v2247_v48, %v12938_v40  ;;  %3380 = vmatmul.mubr.f32.gmra.mrb[150].mxu1 %v9701_v54  ;;  %v2610_v42 = vld [vmem:[#allocation8 + $0xcd0] sm:$0xff]  ;;  %v2619_v40 = vld [vmem:[#allocation8 + $0xd18] sm:$0xff] }
 0x2c5   :  { %12935 = vst [vmem:[#allocation141_spill] sm:$0xff] %v9709_v36  ;;  %v9713_v32 = vadd.f32 %v2248_v23, %v12936_v33  ;;  %v7244_v39 = vadd.f32 %v1574_v10, %v9508_v19  ;;  %v2664_v23 = vld [vmem:[#allocation8 + $0xe80] sm:$0xff]  ;;  %6908 = vmatpush1.bf16.msra.mxu1 %v6907_v2  ;;  %v12944_v10 = vld [vmem:[#allocation47_spill] sm:$0xff] }
 0x2c6   :  { %12939 = vst [vmem:[#allocation45_spill] sm:$0xff] %v9717_v49  ;;  %v2251_v4 = vmax.f32 %v7243_v52, 0.0  ;;  %v6911_v52 = vpack.c.bf16 %v2614_v37, %v2610_v42  ;;  %6910 = vmatprep.subr.bf16.mxu1 %v6909_v35  ;;  %v2677_v37 = vld [vmem:[#allocation8 + $0xee8] sm:$0xff]  ;;  %v12948_v35 = vld [vmem:[#allocation48_spill] sm:$0xff] }
 0x2c7   :  { %12937 = vst [vmem:[#allocation44_spill] sm:$0xff] %v9713_v32  ;;  %v2252_v5 = vmax.f32 %v7244_v39, 0.0  ;;  %v1578_v31 = vpop.f32.mrb[92].mxu0  ;;  %v9720_v36 = vpop.f32.mrb[92].mxu1  ;;  %2871 = vmatprep.mubr.f32.mxu0 %v9713_v32  ;;  %3385 = vmatprep.mubr.f32.mxu1 %v9713_v32  ;;  %v2623_v32 = vld [vmem:[#allocation8 + $0xd38] sm:$0xff] }
 0x2c8   :  { %12940 = vst [vmem:[#allocation142_spill] sm:$0xff] %v9720_v36  ;;  %v7245_v48 = vadd.f32 %v1578_v31, %v9505_v60  ;;  %v1580_v53 = vpop.f32.mrb[93].mxu0  ;;  %v9725_v28 = vpop.f32.mrb[93].mxu1  ;;  %2872 = vmatmul.mubr.f32.gmra.mrb[152].mxu0 %v9717_v49  ;;  %v9733_v33 = vadd.f32 %v2251_v4, %v12944_v10  ;;  %3386 = vmatmul.mubr.f32.gmra.mrb[152].mxu1 %v9717_v49  ;;  %v2622_v10 = vld [vmem:[#allocation8 + $0xd30] sm:$0xff] }
 0x2c9   :  { %12941 = vst [vmem:[#allocation143_spill] sm:$0xff] %v9725_v28  ;;  %v9729_v24 = vadd.f32 %v2252_v5, %v12942_v44  ;;  %v7246_v6 = vadd.f32 %v1580_v53, %v9508_v19  ;;  %v6811_v31 = vpack.c.bf16 %v2668_v30, %v2664_v23  ;;  %v2673_v5 = vld [vmem:[#allocation8 + $0xec8] sm:$0xff]  ;;  %6912 = vmatpush1.bf16.msra.mxu1 %v6911_v52  ;;  %v12950_v53 = vld [vmem:[#allocation49_spill] sm:$0xff] }
 0x2ca   :  { %12945 = vst [vmem:[#allocation47_spill] sm:$0xff] %v9733_v33  ;;  %v2255_v39 = vmax.f32 %v7245_v48, 0.0  ;;  %v6913_v48 = vpack.c.bf16 %v2623_v32, %v2619_v40  ;;  %v2631_v32 = vld [vmem:[#allocation8 + $0xd78] sm:$0xff] }
 0x2cb   :  { %12943 = vst [vmem:[#allocation46_spill] sm:$0xff] %v9729_v24  ;;  %v2256_v54 = vmax.f32 %v7246_v6, 0.0  ;;  %v1584_v36 = vpop.f32.mrb[94].mxu0  ;;  %v9736_v28 = vpop.f32.mrb[94].mxu1  ;;  %2877 = vmatprep.mubr.f32.mxu0 %v9729_v24  ;;  %3391 = vmatprep.mubr.f32.mxu1 %v9729_v24  ;;  %v6813_v24 = vpack.c.bf16 %v2677_v37, %v2673_v5 }
 0x2cc   :  { %12946 = vst [vmem:[#allocation144_spill] sm:$0xff] %v9736_v28  ;;  %v7247_v2 = vadd.f32 %v1584_v36, %v9505_v60  ;;  %v1586_v4 = vpop.f32.mrb[95].mxu0  ;;  %v9741_v42 = vpop.f32.mrb[95].mxu1  ;;  %2878 = vmatmul.mubr.f32.gmra.mrb[154].mxu0 %v9733_v33  ;;  %v9749_v44 = vadd.f32 %v2255_v39, %v12950_v53  ;;  %3392 = vmatmul.mubr.f32.gmra.mrb[154].mxu1 %v9733_v33  ;;  %v2618_v36 = vld [vmem:[#allocation8 + $0xd10] sm:$0xff] }
 0x2cd   :  { %12947 = vst [vmem:[#allocation145_spill] sm:$0xff] %v9741_v42  ;;  %v9745_v23 = vadd.f32 %v2256_v54, %v12948_v35  ;;  %v7248_v30 = vadd.f32 %v1586_v4, %v9508_v19  ;;  %6812 = vmatpush1.bf16.msra.mxu0 %v6811_v31  ;;  %v2627_v54 = vld [vmem:[#allocation8 + $0xd58] sm:$0xff]  ;;  %v12954_v31 = vld [vmem:[#allocation50_spill] sm:$0xff]  ;;  %6914 = vmatprep.subr.bf16.mxu1 %v6913_v48  ;;  %v12956_v4 = vld [vmem:[#allocation51_spill] sm:$0xff] }
 0x2ce   :  { %12951 = vst [vmem:[#allocation49_spill] sm:$0xff] %v9749_v44  ;;  %v2259_v6 = vmax.f32 %v7247_v2, 0.0  ;;  %v6915_v37 = vpack.c.bf16 %v2622_v10, %v2618_v36  ;;  %v6917_v53 = vpack.c.bf16 %v2631_v32, %v2627_v54  ;;  %6814 = vmatprep.subr.bf16.mxu0 %v6813_v24  ;;  %v2676_v48 = vld [vmem:[#allocation8 + $0xee0] sm:$0xff]  ;;  %v12960_v54 = vld [vmem:[#allocation52_spill] sm:$0xff] }
 0x2cf   :  { %12949 = vst [vmem:[#allocation48_spill] sm:$0xff] %v9745_v23  ;;  %v2260_v49 = vmax.f32 %v7248_v30, 0.0  ;;  %v1590_v28 = vpop.f32.mrb[96].mxu0  ;;  %v9752_v42 = vpop.f32.mrb[96].mxu1  ;;  %2883 = vmatprep.mubr.f32.mxu0 %v9745_v23  ;;  %3397 = vmatprep.mubr.f32.mxu1 %v9745_v23  ;;  %v2630_v23 = vld [vmem:[#allocation8 + $0xd70] sm:$0xff] }
 0x2d0   :  { %12952 = vst [vmem:[#allocation146_spill] sm:$0xff] %v9752_v42  ;;  %v7249_v52 = vadd.f32 %v1590_v28, %v9505_v60  ;;  %v1592_v39 = vpop.f32.mrb[97].mxu0  ;;  %v9757_v40 = vpop.f32.mrb[97].mxu1  ;;  %2884 = vmatmul.mubr.f32.gmra.mrb[156].mxu0 %v9749_v44  ;;  %v9765_v35 = vadd.f32 %v2259_v6, %v12956_v4  ;;  %3398 = vmatmul.mubr.f32.gmra.mrb[156].mxu1 %v9749_v44  ;;  %v2626_v28 = vld [vmem:[#allocation8 + $0xd50] sm:$0xff]  ;;  %v2635_v4 = vld [vmem:[#allocation8 + $0xd98] sm:$0xff] }
 0x2d1   :  { %12953 = vst [vmem:[#allocation147_spill] sm:$0xff] %v9757_v40  ;;  %v9761_v2 = vadd.f32 %v2260_v49, %v12954_v31  ;;  %v7250_v5 = vadd.f32 %v1592_v39, %v9508_v19  ;;  %v2672_v49 = vld [vmem:[#allocation8 + $0xec0] sm:$0xff]  ;;  %6916 = vmatpush1.bf16.msra.mxu1 %v6915_v37  ;;  %v12962_v39 = vld [vmem:[#allocation53_spill] sm:$0xff] }
 0x2d2   :  { %12957 = vst [vmem:[#allocation51_spill] sm:$0xff] %v9765_v35  ;;  %v2263_v30 = vmax.f32 %v7249_v52, 0.0  ;;  %v6919_v52 = vpack.c.bf16 %v2630_v23, %v2626_v28  ;;  %6918 = vmatprep.subr.bf16.mxu1 %v6917_v53  ;;  %v2685_v23 = vld [vmem:[#allocation8 + $0xf28] sm:$0xff]  ;;  %v12966_v53 = vld [vmem:[#allocation54_spill] sm:$0xff] }
 0x2d3   :  { %12955 = vst [vmem:[#allocation50_spill] sm:$0xff] %v9761_v2  ;;  %v2264_v33 = vmax.f32 %v7250_v5, 0.0  ;;  %v1596_v42 = vpop.f32.mrb[98].mxu0  ;;  %v9768_v40 = vpop.f32.mrb[98].mxu1  ;;  %2889 = vmatprep.mubr.f32.mxu0 %v9761_v2  ;;  %3403 = vmatprep.mubr.f32.mxu1 %v9761_v2  ;;  %v2639_v2 = vld [vmem:[#allocation8 + $0xdb8] sm:$0xff] }
 0x2d4   :  { %12958 = vst [vmem:[#allocation148_spill] sm:$0xff] %v9768_v40  ;;  %v7251_v6 = vadd.f32 %v1596_v42, %v9505_v60  ;;  %v1598_v36 = vpop.f32.mrb[99].mxu0  ;;  %v9773_v10 = vpop.f32.mrb[99].mxu1  ;;  %2890 = vmatmul.mubr.f32.gmra.mrb[158].mxu0 %v9765_v35  ;;  %v9781_v31 = vadd.f32 %v2263_v30, %v12962_v39  ;;  %3404 = vmatmul.mubr.f32.gmra.mrb[158].mxu1 %v9765_v35  ;;  %v2638_v39 = vld [vmem:[#allocation8 + $0xdb0] sm:$0xff] }
 0x2d5   :  { %12959 = vst [vmem:[#allocation149_spill] sm:$0xff] %v9773_v10  ;;  %v9777_v32 = vadd.f32 %v2264_v33, %v12960_v54  ;;  %v7252_v24 = vadd.f32 %v1598_v36, %v9508_v19  ;;  %v6815_v42 = vpack.c.bf16 %v2676_v48, %v2672_v49  ;;  %v2681_v33 = vld [vmem:[#allocation8 + $0xf08] sm:$0xff]  ;;  %6920 = vmatpush1.bf16.msra.mxu1 %v6919_v52 }
 0x2d6   :  { %12963 = vst [vmem:[#allocation53_spill] sm:$0xff] %v9781_v31  ;;  %v2267_v5 = vmax.f32 %v7251_v6, 0.0  ;;  %v6921_v6 = vpack.c.bf16 %v2639_v2, %v2635_v4  ;;  %v12968_v36 = vld [vmem:[#allocation55_spill] sm:$0xff]  ;;  %v2647_v2 = vld [vmem:[#allocation8 + $0xdf8] sm:$0xff] }
 0x2d7   :  { %12961 = vst [vmem:[#allocation52_spill] sm:$0xff] %v9777_v32  ;;  %v2268_v44 = vmax.f32 %v7252_v24, 0.0  ;;  %v1602_v40 = vpop.f32.mrb[100].mxu0  ;;  %v9784_v10 = vpop.f32.mrb[100].mxu1  ;;  %2895 = vmatprep.mubr.f32.mxu0 %v9777_v32  ;;  %3409 = vmatprep.mubr.f32.mxu1 %v9777_v32  ;;  %v6817_v32 = vpack.c.bf16 %v2685_v23, %v2681_v33 }
 0x2d8   :  { %12964 = vst [vmem:[#allocation150_spill] sm:$0xff] %v9784_v10  ;;  %v7253_v37 = vadd.f32 %v1602_v40, %v9505_v60  ;;  %v1604_v30 = vpop.f32.mrb[101].mxu0  ;;  %v9789_v28 = vpop.f32.mrb[101].mxu1  ;;  %2896 = vmatmul.mubr.f32.gmra.mrb[160].mxu0 %v9781_v31  ;;  %v9797_v54 = vadd.f32 %v2267_v5, %v12968_v36  ;;  %3410 = vmatmul.mubr.f32.gmra.mrb[160].mxu1 %v9781_v31  ;;  %v2634_v40 = vld [vmem:[#allocation8 + $0xd90] sm:$0xff] }
 0x2d9   :  { %12965 = vst [vmem:[#allocation151_spill] sm:$0xff] %v9789_v28  ;;  %v9793_v49 = vadd.f32 %v2268_v44, %v12966_v53  ;;  %v7254_v48 = vadd.f32 %v1604_v30, %v9508_v19  ;;  %6816 = vmatpush1.bf16.msra.mxu0 %v6815_v42  ;;  %v2643_v44 = vld [vmem:[#allocation8 + $0xdd8] sm:$0xff]  ;;  %v12972_v42 = vld [vmem:[#allocation56_spill] sm:$0xff]  ;;  %6922 = vmatprep.subr.bf16.mxu1 %v6921_v6  ;;  %v2684_v6 = vld [vmem:[#allocation8 + $0xf20] sm:$0xff] }
 0x2da   :  { %12969 = vst [vmem:[#allocation55_spill] sm:$0xff] %v9797_v54  ;;  %v2271_v24 = vmax.f32 %v7253_v37, 0.0  ;;  %v6923_v23 = vpack.c.bf16 %v2638_v39, %v2634_v40  ;;  %v12974_v30 = vld [vmem:[#allocation57_spill] sm:$0xff]  ;;  %v6925_v36 = vpack.c.bf16 %v2647_v2, %v2643_v44  ;;  %6818 = vmatprep.subr.bf16.mxu0 %v6817_v32  ;;  %v12978_v44 = vld [vmem:[#allocation58_spill] sm:$0xff] }
 0x2db   :  { %12967 = vst [vmem:[#allocation54_spill] sm:$0xff] %v9793_v49  ;;  %v2272_v35 = vmax.f32 %v7254_v48, 0.0  ;;  %v1608_v10 = vpop.f32.mrb[102].mxu0  ;;  %v9800_v28 = vpop.f32.mrb[102].mxu1  ;;  %2901 = vmatprep.mubr.f32.mxu0 %v9793_v49  ;;  %3415 = vmatprep.mubr.f32.mxu1 %v9793_v49  ;;  %v2646_v49 = vld [vmem:[#allocation8 + $0xdf0] sm:$0xff] }
 0x2dc   :  { %12970 = vst [vmem:[#allocation152_spill] sm:$0xff] %v9800_v28  ;;  %v7255_v52 = vadd.f32 %v1608_v10, %v9505_v60  ;;  %v1610_v5 = vpop.f32.mrb[103].mxu0  ;;  %v9805_v4 = vpop.f32.mrb[103].mxu1  ;;  %2902 = vmatmul.mubr.f32.gmra.mrb[162].mxu0 %v9797_v54  ;;  %v9813_v53 = vadd.f32 %v2271_v24, %v12974_v30  ;;  %3416 = vmatmul.mubr.f32.gmra.mrb[162].mxu1 %v9797_v54  ;;  %v2642_v10 = vld [vmem:[#allocation8 + $0xdd0] sm:$0xff]  ;;  %v2651_v30 = vld [vmem:[#allocation8 + $0xe18] sm:$0xff] }
 0x2dd   :  { %12971 = vst [vmem:[#allocation153_spill] sm:$0xff] %v9805_v4  ;;  %v9809_v37 = vadd.f32 %v2272_v35, %v12972_v42  ;;  %v7256_v33 = vadd.f32 %v1610_v5, %v9508_v19  ;;  %v2680_v35 = vld [vmem:[#allocation8 + $0xf00] sm:$0xff]  ;;  %6924 = vmatpush1.bf16.msra.mxu1 %v6923_v23  ;;  %v12980_v5 = vld [vmem:[#allocation59_spill] sm:$0xff] }
 0x2de   :  { %12975 = vst [vmem:[#allocation57_spill] sm:$0xff] %v9813_v53  ;;  %v2275_v48 = vmax.f32 %v7255_v52, 0.0  ;;  %v6927_v52 = vpack.c.bf16 %v2646_v49, %v2642_v10  ;;  %6926 = vmatprep.subr.bf16.mxu1 %v6925_v36  ;;  %v2693_v49 = vld [vmem:[#allocation8 + $0xf68] sm:$0xff]  ;;  %v12984_v36 = vld [vmem:[#allocation60_spill] sm:$0xff] }
 0x2df   :  { %12973 = vst [vmem:[#allocation56_spill] sm:$0xff] %v9809_v37  ;;  %v2276_v31 = vmax.f32 %v7256_v33, 0.0  ;;  %v1614_v28 = vpop.f32.mrb[104].mxu0  ;;  %v9816_v4 = vpop.f32.mrb[104].mxu1  ;;  %2907 = vmatprep.mubr.f32.mxu0 %v9809_v37  ;;  %3421 = vmatprep.mubr.f32.mxu1 %v9809_v37  ;;  %v2655_v37 = vld [vmem:[#allocation8 + $0xe38] sm:$0xff] }
 0x2e0   :  { %12976 = vst [vmem:[#allocation154_spill] sm:$0xff] %v9816_v4  ;;  %v7257_v24 = vadd.f32 %v1614_v28, %v9505_v60  ;;  %v1616_v40 = vpop.f32.mrb[105].mxu0  ;;  %v9821_v39 = vpop.f32.mrb[105].mxu1  ;;  %2908 = vmatmul.mubr.f32.gmra.mrb[164].mxu0 %v9813_v53  ;;  %v9829_v42 = vadd.f32 %v2275_v48, %v12980_v5  ;;  %3422 = vmatmul.mubr.f32.gmra.mrb[164].mxu1 %v9813_v53  ;;  %v2654_v5 = vld [vmem:[#allocation8 + $0xe30] sm:$0xff] }
 0x2e1   :  { %12977 = vst [vmem:[#allocation155_spill] sm:$0xff] %v9821_v39  ;;  %v9825_v2 = vadd.f32 %v2276_v31, %v12978_v44  ;;  %v7258_v32 = vadd.f32 %v1616_v40, %v9508_v19  ;;  %v6819_v28 = vpack.c.bf16 %v2684_v6, %v2680_v35  ;;  %v2689_v31 = vld [vmem:[#allocation8 + $0xf48] sm:$0xff]  ;;  %6928 = vmatpush1.bf16.msra.mxu1 %v6927_v52  ;;  %v12986_v40 = vld [vmem:[#allocation61_spill] sm:$0xff] }
 0x2e2   :  { %12981 = vst [vmem:[#allocation59_spill] sm:$0xff] %v9829_v42  ;;  %v2279_v33 = vmax.f32 %v7257_v24, 0.0  ;;  %v6929_v24 = vpack.c.bf16 %v2655_v37, %v2651_v30  ;;  %v2663_v37 = vld [vmem:[#allocation8 + $0xe78] sm:$0xff] }
 0x2e3   :  { %12979 = vst [vmem:[#allocation58_spill] sm:$0xff] %v9825_v2  ;;  %v2280_v54 = vmax.f32 %v7258_v32, 0.0  ;;  %v1620_v4 = vpop.f32.mrb[106].mxu0  ;;  %v9832_v39 = vpop.f32.mrb[106].mxu1  ;;  %2913 = vmatprep.mubr.f32.mxu0 %v9825_v2  ;;  %3427 = vmatprep.mubr.f32.mxu1 %v9825_v2  ;;  %v6821_v2 = vpack.c.bf16 %v2693_v49, %v2689_v31 }
 0x2e4   :  { %12982 = vst [vmem:[#allocation156_spill] sm:$0xff] %v9832_v39  ;;  %v7259_v23 = vadd.f32 %v1620_v4, %v9505_v60  ;;  %v1622_v48 = vpop.f32.mrb[107].mxu0  ;;  %v9837_v10 = vpop.f32.mrb[107].mxu1  ;;  %2914 = vmatmul.mubr.f32.gmra.mrb[166].mxu0 %v9829_v42  ;;  %v9845_v44 = vadd.f32 %v2279_v33, %v12986_v40  ;;  %3428 = vmatmul.mubr.f32.gmra.mrb[166].mxu1 %v9829_v42  ;;  %v2650_v4 = vld [vmem:[#allocation8 + $0xe10] sm:$0xff] }
 0x2e5   :  { %12983 = vst [vmem:[#allocation157_spill] sm:$0xff] %v9837_v10  ;;  %v9841_v35 = vadd.f32 %v2280_v54, %v12984_v36  ;;  %v7260_v6 = vadd.f32 %v1622_v48, %v9508_v19  ;;  %6820 = vmatpush1.bf16.msra.mxu0 %v6819_v28  ;;  %v2659_v54 = vld [vmem:[#allocation8 + $0xe58] sm:$0xff]  ;;  %v12990_v28 = vld [vmem:[#allocation62_spill] sm:$0xff]  ;;  %6930 = vmatprep.subr.bf16.mxu1 %v6929_v24  ;;  %v12992_v48 = vld [vmem:[#allocation63_spill] sm:$0xff] }
 0x2e6   :  { %12987 = vst [vmem:[#allocation61_spill] sm:$0xff] %v9845_v44  ;;  %v2283_v32 = vmax.f32 %v7259_v23, 0.0  ;;  %v6931_v49 = vpack.c.bf16 %v2654_v5, %v2650_v4  ;;  %v6933_v40 = vpack.c.bf16 %v2663_v37, %v2659_v54  ;;  %6822 = vmatprep.subr.bf16.mxu0 %v6821_v2  ;;  %v2692_v24 = vld [vmem:[#allocation8 + $0xf60] sm:$0xff]  ;;  %v12996_v54 = vld [vmem:[#allocation64_spill] sm:$0xff] }
 0x2e7   :  { %12985 = vst [vmem:[#allocation60_spill] sm:$0xff] %v9841_v35  ;;  %v2284_v53 = vmax.f32 %v7260_v6, 0.0  ;;  %v1626_v39 = vpop.f32.mrb[108].mxu0  ;;  %v9848_v10 = vpop.f32.mrb[108].mxu1  ;;  %2919 = vmatprep.mubr.f32.mxu0 %v9841_v35  ;;  %3433 = vmatprep.mubr.f32.mxu1 %v9841_v35  ;;  %v2662_v35 = vld [vmem:[#allocation8 + $0xe70] sm:$0xff] }
 0x2e8   :  { %12988 = vst [vmem:[#allocation158_spill] sm:$0xff] %v9848_v10  ;;  %v7261_v52 = vadd.f32 %v1626_v39, %v9505_v60  ;;  %v1628_v33 = vpop.f32.mrb[109].mxu0  ;;  %v9853_v30 = vpop.f32.mrb[109].mxu1  ;;  %2920 = vmatmul.mubr.f32.gmra.mrb[168].mxu0 %v9845_v44  ;;  %v9861_v36 = vadd.f32 %v2283_v32, %v12992_v48  ;;  %3434 = vmatmul.mubr.f32.gmra.mrb[168].mxu1 %v9845_v44  ;;  %v2658_v39 = vld [vmem:[#allocation8 + $0xe50] sm:$0xff]  ;;  %v2667_v48 = vld [vmem:[#allocation8 + $0xe98] sm:$0xff] }
 0x2e9   :  { %12989 = vst [vmem:[#allocation159_spill] sm:$0xff] %v9853_v30  ;;  %v9857_v23 = vadd.f32 %v2284_v53, %v12990_v28  ;;  %v7262_v31 = vadd.f32 %v1628_v33, %v9508_v19  ;;  %v2688_v53 = vld [vmem:[#allocation8 + $0xf40] sm:$0xff]  ;;  %6932 = vmatpush1.bf16.msra.mxu1 %v6931_v49  ;;  %v12998_v33 = vld [vmem:[#allocation65_spill] sm:$0xff] }
 0x2ea   :  { %12993 = vst [vmem:[#allocation63_spill] sm:$0xff] %v9861_v36  ;;  %v2287_v6 = vmax.f32 %v7261_v52, 0.0  ;;  %v6935_v52 = vpack.c.bf16 %v2662_v35, %v2658_v39  ;;  %6934 = vmatprep.subr.bf16.mxu1 %v6933_v40  ;;  %v2701_v35 = vld [vmem:[#allocation8 + $0xfa8] sm:$0xff] }
 0x2eb   :  { %12991 = vst [vmem:[#allocation62_spill] sm:$0xff] %v9857_v23  ;;  %v2288_v42 = vmax.f32 %v7262_v31, 0.0  ;;  %v1632_v10 = vpop.f32.mrb[110].mxu0  ;;  %v9864_v30 = vpop.f32.mrb[110].mxu1  ;;  %2925 = vmatprep.mubr.f32.mxu0 %v9857_v23  ;;  %3439 = vmatprep.mubr.f32.mxu1 %v9857_v23  ;;  %v2671_v23 = vld [vmem:[#allocation8 + $0xeb8] sm:$0xff]  ;;  %v13002_v40 = vld [vmem:[#allocation67_spill] sm:$0xff] }
 0x2ec   :  { %12994 = vst [vmem:[#allocation160_spill] sm:$0xff] %v9864_v30  ;;  %v7263_v32 = vadd.f32 %v1632_v10, %v9505_v60  ;;  %v1634_v4 = vpop.f32.mrb[111].mxu0  ;;  %v9869_v5 = vpop.f32.mrb[111].mxu1  ;;  %2926 = vmatmul.mubr.f32.gmra.mrb[170].mxu0 %v9861_v36  ;;  %v9877_v28 = vadd.f32 %v2287_v6, %v12998_v33  ;;  %3440 = vmatmul.mubr.f32.gmra.mrb[170].mxu1 %v9861_v36  ;;  %v2670_v33 = vld [vmem:[#allocation8 + $0xeb0] sm:$0xff] }
 0x2ed   :  { %12995 = vst [vmem:[#allocation161_spill] sm:$0xff] %v9869_v5  ;;  %v9873_v37 = vadd.f32 %v2288_v42, %v12996_v54  ;;  %v7264_v2 = vadd.f32 %v1634_v4, %v9508_v19  ;;  %v6823_v10 = vpack.c.bf16 %v2692_v24, %v2688_v53  ;;  %v2697_v42 = vld [vmem:[#allocation8 + $0xf88] sm:$0xff]  ;;  %6936 = vmatpush1.bf16.msra.mxu1 %v6935_v52  ;;  %v13004_v4 = vld [vmem:[#allocation68_spill] sm:$0xff] }
 0x2ee   :  { %12999 = vst [vmem:[#allocation65_spill] sm:$0xff] %v9877_v28  ;;  %v2291_v31 = vmax.f32 %v7263_v32, 0.0  ;;  %v6937_v32 = vpack.c.bf16 %v2671_v23, %v2667_v48  ;;  %v2679_v23 = vld [vmem:[#allocation8 + $0xef8] sm:$0xff] }
 0x2ef   :  { %12997 = vst [vmem:[#allocation64_spill] sm:$0xff] %v9873_v37  ;;  %v2292_v44 = vmax.f32 %v7264_v2, 0.0  ;;  %v1638_v30 = vpop.f32.mrb[112].mxu0  ;;  %v9880_v5 = vpop.f32.mrb[112].mxu1  ;;  %2931 = vmatprep.mubr.f32.mxu0 %v9873_v37  ;;  %3445 = vmatprep.mubr.f32.mxu1 %v9873_v37  ;;  %v6825_v37 = vpack.c.bf16 %v2701_v35, %v2697_v42 }
 0x2f0   :  { %13000 = vst [vmem:[#allocation162_spill] sm:$0xff] %v9880_v5  ;;  %v7265_v49 = vadd.f32 %v1638_v30, %v9505_v60  ;;  %v1640_v6 = vpop.f32.mrb[113].mxu0  ;;  %v9885_v39 = vpop.f32.mrb[113].mxu1  ;;  %2932 = vmatmul.mubr.f32.gmra.mrb[172].mxu0 %v9877_v28  ;;  %v9893_v54 = vadd.f32 %v2291_v31, %v13004_v4  ;;  %3446 = vmatmul.mubr.f32.gmra.mrb[172].mxu1 %v9877_v28  ;;  %v2666_v30 = vld [vmem:[#allocation8 + $0xe90] sm:$0xff] }
 0x2f1   :  { %13001 = vst [vmem:[#allocation163_spill] sm:$0xff] %v9885_v39  ;;  %v9889_v53 = vadd.f32 %v2292_v44, %v13002_v40  ;;  %v7266_v24 = vadd.f32 %v1640_v6, %v9508_v19  ;;  %6824 = vmatpush1.bf16.msra.mxu0 %v6823_v10  ;;  %v2675_v44 = vld [vmem:[#allocation8 + $0xed8] sm:$0xff]  ;;  %v13008_v10 = vld [vmem:[#allocation71_spill] sm:$0xff]  ;;  %6938 = vmatprep.subr.bf16.mxu1 %v6937_v32  ;;  %v13010_v6 = vld [vmem:[#allocation72_spill] sm:$0xff] }
 0x2f2   :  { %13005 = vst [vmem:[#allocation68_spill] sm:$0xff] %v9893_v54  ;;  %v2295_v2 = vmax.f32 %v7265_v49, 0.0  ;;  %v6939_v35 = vpack.c.bf16 %v2670_v33, %v2666_v30  ;;  %v6941_v4 = vpack.c.bf16 %v2679_v23, %v2675_v44  ;;  %6826 = vmatprep.subr.bf16.mxu0 %v6825_v37  ;;  %v2700_v32 = vld [vmem:[#allocation8 + $0xfa0] sm:$0xff]  ;;  %v13014_v44 = vld [vmem:[#allocation75_spill] sm:$0xff] }
 0x2f3   :  { %13003 = vst [vmem:[#allocation67_spill] sm:$0xff] %v9889_v53  ;;  %v2296_v36 = vmax.f32 %v7266_v24, 0.0  ;;  %v1644_v5 = vpop.f32.mrb[114].mxu0  ;;  %v9896_v39 = vpop.f32.mrb[114].mxu1  ;;  %2937 = vmatprep.mubr.f32.mxu0 %v9889_v53  ;;  %3451 = vmatprep.mubr.f32.mxu1 %v9889_v53  ;;  %v2678_v53 = vld [vmem:[#allocation8 + $0xef0] sm:$0xff] }
 0x2f4   :  { %13006 = vst [vmem:[#allocation164_spill] sm:$0xff] %v9896_v39  ;;  %v7267_v52 = vadd.f32 %v1644_v5, %v9505_v60  ;;  %v1646_v31 = vpop.f32.mrb[115].mxu0  ;;  %v9901_v48 = vpop.f32.mrb[115].mxu1  ;;  %2938 = vmatmul.mubr.f32.gmra.mrb[174].mxu0 %v9893_v54  ;;  %v9909_v40 = vadd.f32 %v2295_v2, %v13010_v6  ;;  %3452 = vmatmul.mubr.f32.gmra.mrb[174].mxu1 %v9893_v54  ;;  %v2674_v5 = vld [vmem:[#allocation8 + $0xed0] sm:$0xff]  ;;  %v2683_v6 = vld [vmem:[#allocation8 + $0xf18] sm:$0xff] }
 0x2f5   :  { %13007 = vst [vmem:[#allocation165_spill] sm:$0xff] %v9901_v48  ;;  %v9905_v49 = vadd.f32 %v2296_v36, %v13008_v10  ;;  %v7268_v42 = vadd.f32 %v1646_v31, %v9508_v19  ;;  %v2696_v36 = vld [vmem:[#allocation8 + $0xf80] sm:$0xff]  ;;  %6940 = vmatpush1.bf16.msra.mxu1 %v6939_v35  ;;  %v13016_v31 = vld [vmem:[#allocation76_spill] sm:$0xff] }
 0x2f6   :  { %13011 = vst [vmem:[#allocation72_spill] sm:$0xff] %v9909_v40  ;;  %v2299_v24 = vmax.f32 %v7267_v52, 0.0  ;;  %v6943_v52 = vpack.c.bf16 %v2678_v53, %v2674_v5  ;;  %6942 = vmatprep.subr.bf16.mxu1 %v6941_v4  ;;  %v2709_v53 = vld [vmem:[#allocation8 + $0xfe8] sm:$0xff] }
 0x2f7   :  { %13009 = vst [vmem:[#allocation71_spill] sm:$0xff] %v9905_v49  ;;  %v2300_v28 = vmax.f32 %v7268_v42, 0.0  ;;  %v1650_v39 = vpop.f32.mrb[116].mxu0  ;;  %v9912_v48 = vpop.f32.mrb[116].mxu1  ;;  %2943 = vmatprep.mubr.f32.mxu0 %v9905_v49  ;;  %3457 = vmatprep.mubr.f32.mxu1 %v9905_v49  ;;  %v2687_v49 = vld [vmem:[#allocation8 + $0xf38] sm:$0xff]  ;;  %v13020_v4 = vld [vmem:[#allocation79_spill] sm:$0xff] }
 0x2f8   :  { %13012 = vst [vmem:[#allocation166_spill] sm:$0xff] %v9912_v48  ;;  %v7269_v2 = vadd.f32 %v1650_v39, %v9505_v60  ;;  %v1652_v30 = vpop.f32.mrb[117].mxu0  ;;  %v9917_v33 = vpop.f32.mrb[117].mxu1  ;;  %2944 = vmatmul.mubr.f32.gmra.mrb[176].mxu0 %v9909_v40  ;;  %v9925_v10 = vadd.f32 %v2299_v24, %v13016_v31  ;;  %3458 = vmatmul.mubr.f32.gmra.mrb[176].mxu1 %v9909_v40  ;;  %v2686_v31 = vld [vmem:[#allocation8 + $0xf30] sm:$0xff] }
 0x2f9   :  { %13013 = vst [vmem:[#allocation167_spill] sm:$0xff] %v9917_v33  ;;  %v9921_v23 = vadd.f32 %v2300_v28, %v13014_v44  ;;  %v7270_v37 = vadd.f32 %v1652_v30, %v9508_v19  ;;  %v6827_v39 = vpack.c.bf16 %v2700_v32, %v2696_v36  ;;  %v2705_v28 = vld [vmem:[#allocation8 + $0xfc8] sm:$0xff]  ;;  %6944 = vmatpush1.bf16.msra.mxu1 %v6943_v52  ;;  %v13022_v30 = vld [vmem:[#allocation80_spill] sm:$0xff] }
 0x2fa   :  { %13017 = vst [vmem:[#allocation76_spill] sm:$0xff] %v9925_v10  ;;  %v2303_v42 = vmax.f32 %v7269_v2, 0.0  ;;  %v6945_v2 = vpack.c.bf16 %v2687_v49, %v2683_v6  ;;  %v2695_v49 = vld [vmem:[#allocation8 + $0xf78] sm:$0xff] }
 0x2fb   :  { %13015 = vst [vmem:[#allocation75_spill] sm:$0xff] %v9921_v23  ;;  %v2304_v54 = vmax.f32 %v7270_v37, 0.0  ;;  %v1656_v48 = vpop.f32.mrb[118].mxu0  ;;  %v9928_v33 = vpop.f32.mrb[118].mxu1  ;;  %2949 = vmatprep.mubr.f32.mxu0 %v9921_v23  ;;  %3463 = vmatprep.mubr.f32.mxu1 %v9921_v23  ;;  %v6829_v23 = vpack.c.bf16 %v2709_v53, %v2705_v28 }
 0x2fc   :  { %13018 = vst [vmem:[#allocation168_spill] sm:$0xff] %v9928_v33  ;;  %v7271_v35 = vadd.f32 %v1656_v48, %v9505_v60  ;;  %v1658_v24 = vpop.f32.mrb[119].mxu0  ;;  %v9933_v5 = vpop.f32.mrb[119].mxu1  ;;  %2950 = vmatmul.mubr.f32.gmra.mrb[178].mxu0 %v9925_v10  ;;  %v9941_v44 = vadd.f32 %v2303_v42, %v13022_v30  ;;  %3464 = vmatmul.mubr.f32.gmra.mrb[178].mxu1 %v9925_v10  ;;  %v2682_v48 = vld [vmem:[#allocation8 + $0xf10] sm:$0xff] }
 0x2fd   :  { %13019 = vst [vmem:[#allocation169_spill] sm:$0xff] %v9933_v5  ;;  %v9937_v36 = vadd.f32 %v2304_v54, %v13020_v4  ;;  %v7272_v32 = vadd.f32 %v1658_v24, %v9508_v19  ;;  %6828 = vmatpush1.bf16.msra.mxu0 %v6827_v39  ;;  %v2691_v54 = vld [vmem:[#allocation8 + $0xf58] sm:$0xff]  ;;  %v13026_v39 = vld [vmem:[#allocation83_spill] sm:$0xff]  ;;  %6946 = vmatprep.subr.bf16.mxu1 %v6945_v2  ;;  %v13028_v24 = vld [vmem:[#allocation84_spill] sm:$0xff] }
 0x2fe   :  { %13023 = vst [vmem:[#allocation80_spill] sm:$0xff] %v9941_v44  ;;  %v2307_v37 = vmax.f32 %v7271_v35, 0.0  ;;  %v6947_v53 = vpack.c.bf16 %v2686_v31, %v2682_v48  ;;  %v6949_v30 = vpack.c.bf16 %v2695_v49, %v2691_v54  ;;  %6830 = vmatprep.subr.bf16.mxu0 %v6829_v23  ;;  %v2708_v2 = vld [vmem:[#allocation8 + $0xfe0] sm:$0xff]  ;;  %v13032_v54 = vld [vmem:[#allocation87_spill] sm:$0xff] }
 0x2ff   :  { %13021 = vst [vmem:[#allocation79_spill] sm:$0xff] %v9937_v36  ;;  %v2308_v40 = vmax.f32 %v7272_v32, 0.0  ;;  %v1662_v33 = vpop.f32.mrb[120].mxu0  ;;  %v9944_v5 = vpop.f32.mrb[120].mxu1  ;;  %2955 = vmatprep.mubr.f32.mxu0 %v9937_v36  ;;  %3469 = vmatprep.mubr.f32.mxu1 %v9937_v36  ;;  %v2694_v36 = vld [vmem:[#allocation8 + $0xf70] sm:$0xff] }
 0x300   :  { %13024 = vst [vmem:[#allocation170_spill] sm:$0xff] %v9944_v5  ;;  %v7273_v52 = vadd.f32 %v1662_v33, %v9505_v60  ;;  %v1664_v42 = vpop.f32.mrb[121].mxu0  ;;  %v9949_v6 = vpop.f32.mrb[121].mxu1  ;;  %2956 = vmatmul.mubr.f32.gmra.mrb[180].mxu0 %v9941_v44  ;;  %v9957_v4 = vadd.f32 %v2307_v37, %v13028_v24  ;;  %3470 = vmatmul.mubr.f32.gmra.mrb[180].mxu1 %v9941_v44  ;;  %v2690_v33 = vld [vmem:[#allocation8 + $0xf50] sm:$0xff]  ;;  %v2699_v24 = vld [vmem:[#allocation8 + $0xf98] sm:$0xff] }
 0x301   :  { %13025 = vst [vmem:[#allocation171_spill] sm:$0xff] %v9949_v6  ;;  %v9953_v35 = vadd.f32 %v2308_v40, %v13026_v39  ;;  %v7274_v28 = vadd.f32 %v1664_v42, %v9508_v19  ;;  %v2704_v40 = vld [vmem:[#allocation8 + $0xfc0] sm:$0xff]  ;;  %6948 = vmatpush1.bf16.msra.mxu1 %v6947_v53  ;;  %v13034_v42 = vld [vmem:[#allocation89_spill] sm:$0xff]  ;;  %v4025_v53 = vld [vmem:[#allocation8 + $0x1028] sm:$0xff] }
 0x302   :  { %13029 = vst [vmem:[#allocation84_spill] sm:$0xff] %v9957_v4  ;;  %v2311_v32 = vmax.f32 %v7273_v52, 0.0  ;;  %v6951_v52 = vpack.c.bf16 %v2694_v36, %v2690_v33  ;;  %6950 = vmatprep.subr.bf16.mxu1 %v6949_v30  ;;  %v8125_v44 = vld [vmem:[#allocation9] sm:$0xf]  ;;  %v4021_v36 = vld [vmem:[#allocation8 + $0x1008] sm:$0xff] }
 0x303   :  { %13027 = vst [vmem:[#allocation83_spill] sm:$0xff] %v9953_v35  ;;  %v2312_v10 = vmax.f32 %v7274_v28, 0.0  ;;  %v1668_v5 = vpop.f32.mrb[122].mxu0  ;;  %v9960_v6 = vpop.f32.mrb[122].mxu1  ;;  %2961 = vmatprep.mubr.f32.mxu0 %v9953_v35  ;;  %3475 = vmatprep.mubr.f32.mxu1 %v9953_v35  ;;  %v2703_v35 = vld [vmem:[#allocation8 + $0xfb8] sm:$0xff] }
 0x304   :  { %13030 = vst [vmem:[#allocation172_spill] sm:$0xff] %v9960_v6  ;;  %v7275_v37 = vadd.f32 %v1668_v5, %v9505_v60  ;;  %v1670_v48 = vpop.f32.mrb[123].mxu0  ;;  %v9965_v31 = vpop.f32.mrb[123].mxu1  ;;  %2962 = vmatmul.mubr.f32.gmra.mrb[182].mxu0 %v9957_v4  ;;  %v9973_v39 = vadd.f32 %v2311_v32, %v13034_v42  ;;  %3476 = vmatmul.mubr.f32.gmra.mrb[182].mxu1 %v9957_v4  ;;  %v13035_v6 = vld [vmem:[#allocation88_spill] sm:$0xff]  ;;  %v13041_v4 = vld [vmem:[#allocation93_spill] sm:$0xff] }
 0x305   :  { %13031 = vst [vmem:[#allocation173_spill] sm:$0xff] %v9965_v31  ;;  %v9969_v49 = vadd.f32 %v2312_v10, %v13032_v54  ;;  %v7276_v23 = vadd.f32 %v1670_v48, %v9508_v19  ;;  %v6831_v5 = vpack.c.bf16 %v2708_v2, %v2704_v40  ;;  %v9977_v31 = vrot.slane %v8125_v44, %v13035_v6  ;;  %v13038_v40 = vld [vmem:[#allocation92_spill] sm:$0xff]  ;;  %v13040_v6 = vld [vmem:[#allocation94_spill] sm:$0xff] }
 0x306   :  { %v2315_v28 = vmax.f32 %v7275_v37, 0.0  ;;  %6952 = vmatpush1.bf16.msra.mxu1 %v6951_v52  ;;  %v6953_v48 = vpack.c.bf16 %v2703_v35, %v2699_v24  ;;  %v2702_v42 = vld [vmem:[#allocation8 + $0xfb0] sm:$0xff] }
 0x307   :  { %13033 = vst [vmem:[#allocation87_spill] sm:$0xff] %v9969_v49  ;;  %v2316_v10 = vmax.f32 %v7276_v23, 0.0  ;;  %v1674_v54 = vpop.f32.mrb[124].mxu0  ;;  %v9979_v59 = vpop.f32.mrb[124].mxu1  ;;  %2967 = vmatprep.mubr.f32.mxu0 %v9969_v49  ;;  %3481 = vmatprep.mubr.f32.mxu1 %v9969_v49  ;;  %v2698_v23 = vld [vmem:[#allocation8 + $0xf90] sm:$0xff]  ;;  %v9992_v49 = vrot.slane %v8125_v44, %v13040_v6 }
 0x308   :  { %13036 = vst [vmem:[#allocation89_spill] sm:$0xff] %v9979_v59  ;;  %v7277_v32 = vadd.f32 %v1674_v54, %v9505_v60  ;;  %v1676_v30 = vpop.f32.mrb[125].mxu0  ;;  %v9984_v33 = vpop.f32.mrb[125].mxu1  ;;  %2968 = vmatmul.mubr.f32.gmra.mrb[184].mxu0 %v9973_v39  ;;  %v9995_v59 = vadd.f32 %v2315_v28, %v13041_v4  ;;  %3482 = vmatmul.mubr.f32.gmra.mrb[184].mxu1 %v9973_v39 }
 0x309   :  { %13037 = vst [vmem:[#allocation174_spill] sm:$0xff] %v9984_v33  ;;  %v9988_v2 = vadd.f32 %v2316_v10, %v13038_v40  ;;  %v7278_v37 = vadd.f32 %v1676_v30, %v9508_v19  ;;  %6832 = vmatpush1.bf16.msra.mxu0 %v6831_v5  ;;  %v2707_v33 = vld [vmem:[#allocation8 + $0xfd8] sm:$0xff]  ;;  %v6961_v10 = vpack.c.bf16 %v4025_v53, %v4021_v36  ;;  %v2706_v40 = vld [vmem:[#allocation8 + $0xfd0] sm:$0xff] }
 0x30a   :  { %v2319_v54 = vmax.f32 %v7277_v32, 0.0  ;;  %v7282_v30 = vadd.f32 %v9513_v17, %v9977_v31  ;;  %v6955_v5 = vpack.c.bf16 %v2702_v42, %v2698_v23  ;;  %v13042_v36 = vld [vmem:[#allocation97_spill] sm:$0xff]  ;;  %6954 = vmatprep.subr.bf16.mxu1 %v6953_v48  ;;  %v6957_v32 = vpack.c.bf16 %v2711_v63, %v2707_v33 }
 0x30b   :  { %13039 = vst [vmem:[#allocation92_spill] sm:$0xff] %v9988_v2  ;;  %v2320_v52 = vmax.f32 %v7278_v37, 0.0  ;;  %v1680_v35 = vpop.f32.mrb[126].mxu0  ;;  %v10000_v24 = vpop.f32.mrb[126].mxu1  ;;  %2973 = vmatprep.mubr.f32.mxu0 %v9988_v2  ;;  %3487 = vmatprep.mubr.f32.mxu1 %v9988_v2  ;;  %v2710_v37 = vld [vmem:[#allocation8 + $0xff0] sm:$0xff]  ;;  %v7281_v6 = vadd.f32 %v9510_v13, %v9992_v49  ;;  %v13043_v2 = vld [vmem:[#allocation98_spill] sm:$0xff] }
 0x30c   :  { %v7279_v44 = vadd.f32 %v1680_v35, %v9505_v60  ;;  %v1682_v4 = vpop.f32.mrb[127].mxu0  ;;  %v10005_v28 = vpop.f32.mrb[127].mxu1  ;;  %2974 = vmatmul.mubr.f32.gmra.mrb[186].mxu0 %v9995_v59  ;;  %v10015_v60 = vadd.f32 %v2319_v54, %v13043_v2  ;;  %3488 = vmatmul.mubr.f32.gmra.mrb[186].mxu1 %v9995_v59  ;;  %v4023_v23 = vld [vmem:[#allocation8 + $0x1018] sm:$0xff]  ;;  %v6959_v13 = vpack.c.bf16 %v2710_v37, %v2706_v40  ;;  %v4026_v37 = vld [vmem:[#allocation8 + $0x1030] sm:$0xff] }
 0x30d   :  { %v10009_v53 = vadd.f32 %v2320_v52, %v13042_v36  ;;  %v7280_v17 = vadd.f32 %v1682_v4, %v9508_v19  ;;  %6962 = vmatprep.subr.bf16.mxu0 %v6961_v10  ;;  %v4027_v42 = vld [vmem:[#allocation8 + $0x1038] sm:$0xff]  ;;  %v2202_v52 = vmax.f32 %v7282_v30, 0.0  ;;  %v7284_v19 = vadd.f32 %v9519_v22, %v9977_v31  ;;  %6956 = vmatpush1.bf16.msra.mxu1 %v6955_v5  ;;  %v13047_v30 = vld [vmem:[#allocation103_spill] sm:$0xff]  ;;  %v4024_v4 = vld [vmem:[#allocation8 + $0x1020] sm:$0xff] }
 0x30e   :  { %13044 = vst [vmem:[#allocation93_spill] sm:$0xff] %v10015_v60  ;;  %v2323_v35 = vmax.f32 %v7279_v44, 0.0  ;;  %v13045_v63 = vld [vmem:[#allocation101_spill] sm:$0xff]  ;;  %6958 = vmatprep.subr.bf16.mxu1 %v6957_v32  ;;  %v7089_v2 = vpack.c.bf16 %v4027_v42, %v4023_v23  ;;  %v2201_v54 = vmax.f32 %v7281_v6, 0.0  ;;  %v7283_v10 = vadd.f32 %v9516_v51, %v9992_v49  ;;  %v4020_v44 = vld [vmem:[#allocation8 + $0x1000] sm:$0xff]  ;;  %v4029_v6 = vld [vmem:[#allocation8 + $0x1048] sm:$0xff] }
 0x30f   :  { %v2324_v48 = vmax.f32 %v7280_v17, 0.0  ;;  %2979 = vmatprep.mubr.f32.mxu0 %v10009_v53  ;;  %3493 = vmatprep.mubr.f32.mxu1 %v10009_v53  ;;  %v13049_v36 = vld [vmem:[#allocation102_spill] sm:$0xff]  ;;  %v2206_v5 = vmax.f32 %v7284_v19, 0.0  ;;  %v7286_v40 = vadd.f32 %v9533_v57, %v9977_v31  ;;  %v4033_v51 = vld [vmem:[#allocation8 + $0x1068] sm:$0xff]  ;;  %v4022_v32 = vld [vmem:[#allocation8 + $0x1010] sm:$0xff] }
 0x310   :  { %2980 = vmatmul.mubr.f32.gmra.mrb[188].mxu0 %v10015_v60  ;;  %v10029_v22 = vadd.f32 %v2323_v35, %v13047_v30  ;;  %3494 = vmatmul.mubr.f32.gmra.mrb[188].mxu1 %v10015_v60  ;;  %v10033_v17 = vadd.f32 %v2202_v52, %v13049_v36  ;;  %v6963_v35 = vpack.c.bf16 %v4024_v4, %v4020_v44  ;;  %v4031_v23 = vld [vmem:[#allocation8 + $0x1058] sm:$0xff]  ;;  %v13051_v52 = vld [vmem:[#allocation107_spill] sm:$0xff]  ;;  %v2205_v57 = vmax.f32 %v7283_v10, 0.0  ;;  %v4028_v30 = vld [vmem:[#allocation8 + $0x1040] sm:$0xff] }
 0x311   :  { %v10024_v33 = vadd.f32 %v2324_v48, %v13045_v63  ;;  %6960 = vmatpush1.bf16.msra.mxu1 %v6959_v13  ;;  %v4035_v42 = vld [vmem:[#allocation8 + $0x1078] sm:$0xff]  ;;  %v10042_v19 = vadd.f32 %v2201_v54, %v13051_v52  ;;  %v7285_v48 = vadd.f32 %v9528_v34, %v9992_v49  ;;  %v6965_v63 = vpack.c.bf16 %v4033_v51, %v4029_v6  ;;  %v4032_v13 = vld [vmem:[#allocation8 + $0x1060] sm:$0xff]  ;;  %v4037_v44 = vld [vmem:[#allocation8 + $0x1088] sm:$0xff] }
 0x312   :  { %13048 = vst [vmem:[#allocation98_spill] sm:$0xff] %v10029_v22  ;;  %13050 = vst [vmem:[#allocation101_spill] sm:$0xff] %v10033_v17  ;;  %7090 = vmatprep.subr.bf16.mxu1 %v7089_v2  ;;  %v13052_v36 = vld [vmem:[#allocation106_spill] sm:$0xff]  ;;  %v2210_v60 = vmax.f32 %v7286_v40, 0.0  ;;  %v7288_v2 = vadd.f32 %v9549_v50, %v9977_v31  ;;  %v7091_v54 = vpack.c.bf16 %v4026_v37, %v4022_v32  ;;  %v4041_v10 = vld [vmem:[#allocation8 + $0x10a8] sm:$0xff] }
 0x313   :  { %13046 = vst [vmem:[#allocation97_spill] sm:$0xff] %v10024_v33  ;;  %2985 = vmatprep.mubr.f32.mxu0 %v10024_v33  ;;  %3499 = vmatprep.mubr.f32.mxu1 %v10024_v33  ;;  %v10048_v33 = vadd.f32 %v2206_v5, %v13052_v36  ;;  %v7093_v34 = vpack.c.bf16 %v4035_v42, %v4031_v23  ;;  %v4030_v4 = vld [vmem:[#allocation8 + $0x1050] sm:$0xff]  ;;  %v4039_v5 = vld [vmem:[#allocation8 + $0x1098] sm:$0xff]  ;;  %v13053_v40 = vld [vmem:[#allocation111_spill] sm:$0xff]  ;;  %v2209_v50 = vmax.f32 %v7285_v48, 0.0 }
 0x314   :  { %2986 = vmatmul.mubr.f32.gmra.mrb[190].mxu0 %v10029_v22  ;;  %3500 = vmatmul.mubr.f32.gmra.mrb[190].mxu1 %v10029_v22  ;;  %v4034_v52 = vld [vmem:[#allocation8 + $0x1070] sm:$0xff]  ;;  %v6967_v6 = vpack.c.bf16 %v4032_v13, %v4028_v30  ;;  %v4043_v51 = vld [vmem:[#allocation8 + $0x10b8] sm:$0xff]  ;;  %v10056_v36 = vadd.f32 %v2205_v57, %v13053_v40  ;;  %v7287_v32 = vadd.f32 %v9544_v11, %v9992_v49  ;;  %v4036_v23 = vld [vmem:[#allocation8 + $0x1080] sm:$0xff] }
 0x315   :  { %3056 = vmatprep.mubr.f32.mxu0 %v10033_v17  ;;  %3570 = vmatprep.mubr.f32.mxu1 %v10033_v17  ;;  %v6969_v37 = vpack.c.bf16 %v4041_v10, %v4037_v44  ;;  %v4040_v42 = vld [vmem:[#allocation8 + $0x10a0] sm:$0xff]  ;;  %v7290_v30 = vadd.f32 %v9565_v47, %v9977_v31  ;;  %v7095_v57 = vpack.c.bf16 %v4034_v52, %v4030_v4  ;;  %v4045_v48 = vld [vmem:[#allocation8 + $0x10c8] sm:$0xff]  ;;  %v4042_v44 = vld [vmem:[#allocation8 + $0x10b0] sm:$0xff] }
 0x316   :  { %v13054_v17 = vld [vmem:[#allocation110_spill] sm:$0xff]  ;;  %v4049_v13 = vld [vmem:[#allocation8 + $0x10e8] sm:$0xff]  ;;  %v7097_v11 = vpack.c.bf16 %v4043_v51, %v4039_v5  ;;  %v10070_v47 = vadd.f32 %v2209_v50, %v9158_v58  ;;  %v2213_v10 = vmax.f32 %v7287_v32, 0.0  ;;  %v7292_v51 = vadd.f32 %v9581_v21, %v9977_v31  ;;  %v4046_v32 = vld [vmem:[#allocation8 + $0x10d0] sm:$0xff] }
 0x317   :  { %v10062_v22 = vadd.f32 %v2210_v60, %v13054_v17  ;;  %v6971_v60 = vpack.c.bf16 %v4040_v42, %v4036_v23  ;;  %v4047_v17 = vld [vmem:[#allocation8 + $0x10d8] sm:$0xff]  ;;  %v4044_v4 = vld [vmem:[#allocation8 + $0x10c0] sm:$0xff]  ;;  %v4053_v40 = vld [vmem:[#allocation8 + $0x1108] sm:$0xff] }
 0x318   :  { %3057 = vmatmul.mubr.f32.vlgmr.msra.gmra.mrb[128].mxu0 %v10042_v19  ;;  %3571 = vmatmul.mubr.f32.vlgmr.msra.gmra.mrb[128].mxu1 %v10042_v19  ;;  %v4048_v52 = vld [vmem:[#allocation8 + $0x10e0] sm:$0xff]  ;;  %v4057_v50 = vld [vmem:[#allocation8 + $0x1128] sm:$0xff]  ;;  %v4055_v23 = vld [vmem:[#allocation8 + $0x1118] sm:$0xff]  ;;  %v10084_v21 = vadd.f32 %v2213_v10, %v9170_v62 }
 0x319   :  { %3062 = vmatprep.mubr.f32.mxu0 %v10048_v33  ;;  %6964 = vmatpush1.bf16.msra.mxu0 %v6963_v35  ;;  %v2214_v35 = vmax.f32 %v7288_v2, 0.0  ;;  %v4051_v2 = vld [vmem:[#allocation8 + $0x10f8] sm:$0xff]  ;;  %v4058_v10 = vld [vmem:[#allocation8 + $0x1130] sm:$0xff] }
 0x31a   :  { %6966 = vmatprep.subr.bf16.mxu0 %v6965_v63  ;;  %3576 = vmatprep.mubr.f32.mxu1 %v10048_v33  ;;  %v4038_v63 = vld [vmem:[#allocation8 + $0x1090] sm:$0xff]  ;;  %v4059_v42 = vld [vmem:[#allocation8 + $0x1138] sm:$0xff] }
 0x31b   :  { %7092 = vmatpush1.bf16.msra.mxu1 %v7091_v54  ;;  %v7289_v54 = vadd.f32 %v9560_v7, %v9992_v49  ;;  %v10076_v5 = vadd.f32 %v2214_v35, %v9152_v27  ;;  %v7099_v58 = vpack.c.bf16 %v4042_v44, %v4038_v63  ;;  %v7101_v7 = vpack.c.bf16 %v4051_v2, %v4047_v17  ;;  %v4065_v17 = vld [vmem:[#allocation8 + $0x1168] sm:$0xff]  ;;  %v4054_v2 = vld [vmem:[#allocation8 + $0x1110] sm:$0xff] }
 0x31c   :  { %3063 = vmatmul.mubr.f32.gmra.mrb[130].mxu0 %v10056_v36  ;;  %7094 = vmatprep.subr.bf16.mxu1 %v7093_v34  ;;  %v6973_v34 = vpack.c.bf16 %v4049_v13, %v4045_v48  ;;  %v6975_v27 = vpack.c.bf16 %v4048_v52, %v4044_v4  ;;  %v4052_v48 = vld [vmem:[#allocation8 + $0x1100] sm:$0xff]  ;;  %v2222_v63 = vmax.f32 %v7292_v51, 0.0  ;;  %v7294_v44 = vadd.f32 %v9597_v20, %v9977_v31 }
 0x31d   :  { %3068 = vmatprep.mubr.f32.mxu0 %v10062_v22  ;;  %6968 = vmatpush1.bf16.msra.mxu0 %v6967_v6  ;;  %v2218_v6 = vmax.f32 %v7290_v30, 0.0  ;;  %v2217_v35 = vmax.f32 %v7289_v54, 0.0  ;;  %v7291_v30 = vadd.f32 %v9576_v12, %v9992_v49  ;;  %v4056_v13 = vld [vmem:[#allocation8 + $0x1120] sm:$0xff]  ;;  %v7105_v12 = vpack.c.bf16 %v4059_v42, %v4055_v23  ;;  %v4063_v54 = vld [vmem:[#allocation8 + $0x1158] sm:$0xff]  ;;  %v4066_v23 = vld [vmem:[#allocation8 + $0x1170] sm:$0xff] }
 0x31e   :  { %3577 = vmatmul.mubr.f32.gmra.mrb[130].mxu1 %v10056_v36  ;;  %6970 = vmatprep.subr.bf16.mxu0 %v6969_v37  ;;  %v4050_v37 = vld [vmem:[#allocation8 + $0x10f0] sm:$0xff]  ;;  %v7293_v52 = vadd.f32 %v9592_v18, %v9992_v49  ;;  %v4060_v51 = vld [vmem:[#allocation8 + $0x1140] sm:$0xff]  ;;  %v4071_v42 = vld [vmem:[#allocation8 + $0x1198] sm:$0xff] }
 0x31f   :  { %3582 = vmatprep.mubr.f32.mxu1 %v10062_v22  ;;  %7096 = vmatpush1.bf16.msra.mxu1 %v7095_v57  ;;  %v6977_v57 = vpack.c.bf16 %v4057_v50, %v4053_v40  ;;  %v7103_v62 = vpack.c.bf16 %v4050_v37, %v4046_v32  ;;  %v10098_v20 = vadd.f32 %v2217_v35, %v9182_v16  ;;  %v2221_v4 = vmax.f32 %v7291_v30, 0.0  ;;  %v4069_v32 = vld [vmem:[#allocation8 + $0x1188] sm:$0xff]  ;;  %v4075_v35 = vld [vmem:[#allocation8 + $0x11b8] sm:$0xff] }
 0x320   :  { %3069 = vmatmul.mubr.f32.gmra.mrb[132].mxu0 %v10070_v47  ;;  %7098 = vmatprep.subr.bf16.mxu1 %v7097_v11  ;;  %v10090_v11 = vadd.f32 %v2218_v6, %v9164_v8  ;;  %v6979_v8 = vpack.c.bf16 %v4056_v13, %v4052_v48  ;;  %v10104_v40 = vadd.f32 %v2222_v63, %v9176_v9  ;;  %v2226_v50 = vmax.f32 %v7294_v44, 0.0  ;;  %v4073_v37 = vld [vmem:[#allocation8 + $0x11a8] sm:$0xff]  ;;  %v4068_v13 = vld [vmem:[#allocation8 + $0x1180] sm:$0xff] }
 0x321   :  { %3074 = vmatprep.mubr.f32.mxu0 %v10076_v5  ;;  %6972 = vmatpush1.bf16.msra.mxu0 %v6971_v60  ;;  %v4061_v60 = vld [vmem:[#allocation8 + $0x1148] sm:$0xff]  ;;  %v7107_v16 = vpack.c.bf16 %v4058_v10, %v4054_v2  ;;  %v2225_v30 = vmax.f32 %v7293_v52, 0.0  ;;  %v6985_v48 = vpack.c.bf16 %v4073_v37, %v4069_v32  ;;  %v4072_v63 = vld [vmem:[#allocation8 + $0x11a0] sm:$0xff]  ;;  %v4070_v2 = vld [vmem:[#allocation8 + $0x1190] sm:$0xff] }
 0x322   :  { %3583 = vmatmul.mubr.f32.gmra.mrb[132].mxu1 %v10070_v47  ;;  %6974 = vmatprep.subr.bf16.mxu0 %v6973_v34  ;;  %v4067_v34 = vld [vmem:[#allocation8 + $0x1178] sm:$0xff]  ;;  %v6981_v6 = vpack.c.bf16 %v4065_v17, %v4061_v60  ;;  %v10118_v44 = vadd.f32 %v2226_v50, %v9188_v26  ;;  %v7298_v60 = vadd.f32 %v9629_v38, %v9977_v31  ;;  %v4077_v17 = vld [vmem:[#allocation8 + $0x11c8] sm:$0xff]  ;;  %v4074_v10 = vld [vmem:[#allocation8 + $0x11b0] sm:$0xff] }
 0x323   :  { %3588 = vmatprep.mubr.f32.mxu1 %v10076_v5  ;;  %7100 = vmatpush1.bf16.msra.mxu1 %v7099_v58  ;;  %v4064_v58 = vld [vmem:[#allocation8 + $0x1160] sm:$0xff]  ;;  %v7109_v18 = vpack.c.bf16 %v4067_v34, %v4063_v54  ;;  %v6987_v26 = vpack.c.bf16 %v4072_v63, %v4068_v13  ;;  %v4083_v54 = vld [vmem:[#allocation8 + $0x11f8] sm:$0xff]  ;;  %v10126_v38 = vadd.f32 %v2225_v30, %v9206_v15  ;;  %v4089_v32 = vld [vmem:[#allocation8 + $0x1228] sm:$0xff] }
 0x324   :  { %3075 = vmatmul.mubr.f32.gmra.mrb[134].mxu0 %v10084_v21  ;;  %7102 = vmatprep.subr.bf16.mxu1 %v7101_v7  ;;  %v7296_v7 = vadd.f32 %v9613_v43, %v9977_v31  ;;  %v6983_v9 = vpack.c.bf16 %v4064_v58, %v4060_v51  ;;  %v10112_v43 = vadd.f32 %v2221_v4, %v9194_v46  ;;  %v4080_v51 = vld [vmem:[#allocation8 + $0x11e0] sm:$0xff]  ;;  %v2234_v50 = vmax.f32 %v7298_v60, 0.0  ;;  %v4078_v37 = vld [vmem:[#allocation8 + $0x11d0] sm:$0xff]  ;;  %v4097_v60 = vld [vmem:[#allocation8 + $0x1268] sm:$0xff] }
 0x325   :  { %3080 = vmatprep.mubr.f32.mxu0 %v10090_v11  ;;  %6976 = vmatpush1.bf16.msra.mxu0 %v6975_v27  ;;  %v4062_v27 = vld [vmem:[#allocation8 + $0x1150] sm:$0xff]  ;;  %v7297_v4 = vadd.f32 %v9624_v3, %v9992_v49  ;;  %v7115_v15 = vpack.c.bf16 %v4074_v10, %v4070_v2  ;;  %v4084_v30 = vld [vmem:[#allocation8 + $0x1200] sm:$0xff]  ;;  %v7302_v63 = vadd.f32 %v9661_v45, %v9977_v31 }
 0x326   :  { %3589 = vmatmul.mubr.f32.gmra.mrb[134].mxu1 %v10084_v21  ;;  %6978 = vmatprep.subr.bf16.mxu0 %v6977_v57  ;;  %v7295_v57 = vadd.f32 %v9608_v61, %v9992_v49  ;;  %v7111_v46 = vpack.c.bf16 %v4066_v23, %v4062_v27  ;;  %v7113_v61 = vpack.c.bf16 %v4075_v35, %v4071_v42  ;;  %v4087_v27 = vld [vmem:[#allocation8 + $0x1218] sm:$0xff] }
 0x327   :  { %3594 = vmatprep.mubr.f32.mxu1 %v10090_v11  ;;  %7104 = vmatpush1.bf16.msra.mxu1 %v7103_v62  ;;  %v2230_v62 = vmax.f32 %v7296_v7, 0.0  ;;  %v7300_v7 = vadd.f32 %v9645_v25, %v9977_v31  ;;  %v4091_v23 = vld [vmem:[#allocation8 + $0x1238] sm:$0xff]  ;;  %v7299_v42 = vadd.f32 %v9640_v29, %v9992_v49  ;;  %v7301_v10 = vadd.f32 %v9656_v1, %v9992_v49 }
 0x328   :  { %3081 = vmatmul.mubr.f32.gmra.mrb[136].mxu0 %v10098_v20  ;;  %7106 = vmatprep.subr.bf16.mxu1 %v7105_v12  ;;  %v4081_v12 = vld [vmem:[#allocation8 + $0x11e8] sm:$0xff]  ;;  %v2229_v34 = vmax.f32 %v7295_v57, 0.0  ;;  %v4088_v57 = vld [vmem:[#allocation8 + $0x1220] sm:$0xff]  ;;  %v7121_v29 = vpack.c.bf16 %v4091_v23, %v4087_v27 }
 0x329   :  { %3086 = vmatprep.mubr.f32.mxu0 %v10104_v40  ;;  %6980 = vmatpush1.bf16.msra.mxu0 %v6979_v8  ;;  %v4079_v8 = vld [vmem:[#allocation8 + $0x11d8] sm:$0xff]  ;;  %v6989_v52 = vpack.c.bf16 %v4081_v12, %v4077_v17  ;;  %v10132_v58 = vadd.f32 %v2230_v62, %v9200_v14  ;;  %v2238_v13 = vmax.f32 %v7300_v7, 0.0  ;;  %v4093_v62 = vld [vmem:[#allocation8 + $0x1248] sm:$0xff]  ;;  %v4090_v17 = vld [vmem:[#allocation8 + $0x1230] sm:$0xff]  ;;  %v2237_v2 = vmax.f32 %v7299_v42, 0.0 }
 0x32a   :  { %3595 = vmatmul.mubr.f32.gmra.mrb[136].mxu1 %v10098_v20  ;;  %6982 = vmatprep.subr.bf16.mxu0 %v6981_v6  ;;  %v4076_v6 = vld [vmem:[#allocation8 + $0x11c0] sm:$0xff]  ;;  %v7117_v3 = vpack.c.bf16 %v4083_v54, %v4079_v8  ;;  %v10140_v25 = vadd.f32 %v2229_v34, %v9218_v56  ;;  %v4095_v12 = vld [vmem:[#allocation8 + $0x1258] sm:$0xff]  ;;  %v4094_v7 = vld [vmem:[#allocation8 + $0x1250] sm:$0xff] }
 0x32b   :  { %3600 = vmatprep.mubr.f32.mxu1 %v10104_v40  ;;  %7108 = vmatpush1.bf16.msra.mxu1 %v7107_v16  ;;  %13055 = vst [vmem:[#allocation103_spill] sm:$0xff] %v10132_v58  ;;  %v4085_v16 = vld [vmem:[#allocation8 + $0x1208] sm:$0xff]  ;;  %v6991_v14 = vpack.c.bf16 %v4080_v51, %v4076_v6  ;;  %v4092_v8 = vld [vmem:[#allocation8 + $0x1240] sm:$0xff]  ;;  %v10160_v34 = vadd.f32 %v2238_v13, %v9224_v41 }
 0x32c   :  { %3087 = vmatmul.mubr.f32.gmra.mrb[138].mxu0 %v10112_v43  ;;  %7110 = vmatprep.subr.bf16.mxu1 %v7109_v18  ;;  %v4082_v18 = vld [vmem:[#allocation8 + $0x11f0] sm:$0xff]  ;;  %13056 = vst [vmem:[#allocation102_spill] sm:$0xff] %v10140_v25  ;;  %v6993_v35 = vpack.c.bf16 %v4089_v32, %v4085_v16  ;;  %v4096_v54 = vld [vmem:[#allocation8 + $0x1260] sm:$0xff]  ;;  %v4101_v51 = vld [vmem:[#allocation8 + $0x1288] sm:$0xff] }
 0x32d   :  { %3092 = vmatprep.mubr.f32.mxu0 %v10118_v44  ;;  %6984 = vmatpush1.bf16.msra.mxu0 %v6983_v9  ;;  %v2233_v9 = vmax.f32 %v7297_v4, 0.0  ;;  %v7119_v56 = vpack.c.bf16 %v4082_v18, %v4078_v37  ;;  %13059 = vst [vmem:[#allocation111_spill] sm:$0xff] %v10160_v34  ;;  %v2242_v4 = vmax.f32 %v7302_v63, 0.0  ;;  %v6999_v41 = vpack.c.bf16 %v4096_v54, %v4092_v8  ;;  %v4103_v16 = vld [vmem:[#allocation8 + $0x1298] sm:$0xff]  ;;  %v4104_v42 = vld [vmem:[#allocation8 + $0x12a0] sm:$0xff]  ;;  %v13066_v13 = vld [vmem:[#allocation139_spill] sm:$0xff] }
 0x32e   :  { %3601 = vmatmul.mubr.f32.gmra.mrb[138].mxu1 %v10112_v43  ;;  %6986 = vmatprep.subr.bf16.mxu0 %v6985_v48  ;;  %v10146_v48 = vadd.f32 %v2234_v50, %v9212_v0  ;;  %v6995_v0 = vpack.c.bf16 %v4088_v57, %v4084_v30  ;;  %v4105_v50 = vld [vmem:[#allocation8 + $0x12a8] sm:$0xff]  ;;  %v4107_v32 = vld [vmem:[#allocation8 + $0x12b8] sm:$0xff]  ;;  %v2241_v18 = vmax.f32 %v7301_v10, 0.0  ;;  %v7306_v63 = vadd.f32 %v13066_v13, %v9977_v31  ;;  %v13069_v8 = vld [vmem:[#allocation138_spill] sm:$0xff] }
 0x32f   :  { %3606 = vmatprep.mubr.f32.mxu1 %v10118_v44  ;;  %7112 = vmatpush1.bf16.msra.mxu1 %v7111_v46  ;;  %v4086_v46 = vld [vmem:[#allocation8 + $0x1210] sm:$0xff]  ;;  %v10154_v45 = vadd.f32 %v2233_v9, %v9230_v55  ;;  %v7001_v23 = vpack.c.bf16 %v4105_v50, %v4101_v51  ;;  %v4100_v9 = vld [vmem:[#allocation8 + $0x1280] sm:$0xff]  ;;  %v7305_v54 = vadd.f32 %v13069_v8, %v9992_v49 }
 0x330   :  { %3093 = vmatmul.mubr.f32.gmra.mrb[140].mxu0 %v10126_v38  ;;  %7114 = vmatprep.subr.bf16.mxu1 %v7113_v61  ;;  %13057 = vst [vmem:[#allocation107_spill] sm:$0xff] %v10146_v48  ;;  %v4099_v61 = vld [vmem:[#allocation8 + $0x1278] sm:$0xff]  ;;  %v7123_v55 = vpack.c.bf16 %v4090_v17, %v4086_v46  ;;  %v4102_v46 = vld [vmem:[#allocation8 + $0x1290] sm:$0xff]  ;;  %v2250_v50 = vmax.f32 %v7306_v63, 0.0 }
 0x331   :  { %3098 = vmatprep.mubr.f32.mxu0 %v10132_v58  ;;  %6988 = vmatpush1.bf16.msra.mxu0 %v6987_v26  ;;  %13058 = vst [vmem:[#allocation106_spill] sm:$0xff] %v10154_v45  ;;  %v6997_v26 = vpack.c.bf16 %v4097_v60, %v4093_v62  ;;  %v7125_v1 = vpack.c.bf16 %v4099_v61, %v4095_v12  ;;  %v4109_v62 = vld [vmem:[#allocation8 + $0x12c8] sm:$0xff]  ;;  %v4106_v17 = vld [vmem:[#allocation8 + $0x12b0] sm:$0xff]  ;;  %v4111_v12 = vld [vmem:[#allocation8 + $0x12d8] sm:$0xff] }
 0x332   :  { %3607 = vmatmul.mubr.f32.gmra.mrb[140].mxu1 %v10126_v38  ;;  %6990 = vmatprep.subr.bf16.mxu0 %v6989_v52  ;;  %v13060_v52 = vld [vmem:[#allocation137_spill] sm:$0xff]  ;;  %v4113_v60 = vld [vmem:[#allocation8 + $0x12e8] sm:$0xff]  ;;  %v4118_v8 = vld [vmem:[#allocation8 + $0x1310] sm:$0xff] }
 0x333   :  { %3612 = vmatprep.mubr.f32.mxu1 %v10132_v58  ;;  %7116 = vmatpush1.bf16.msra.mxu1 %v7115_v15  ;;  %v7304_v6 = vadd.f32 %v13060_v52, %v9977_v31  ;;  %v4098_v15 = vld [vmem:[#allocation8 + $0x1270] sm:$0xff]  ;;  %v4115_v61 = vld [vmem:[#allocation8 + $0x12f8] sm:$0xff]  ;;  %v4108_v52 = vld [vmem:[#allocation8 + $0x12c0] sm:$0xff] }
 0x334   :  { %3099 = vmatmul.mubr.f32.gmra.mrb[142].mxu0 %v10140_v25  ;;  %7118 = vmatprep.subr.bf16.mxu1 %v7117_v3  ;;  %v13061_v3 = vld [vmem:[#allocation113_spill] sm:$0xff] }
 0x335   :  { %3104 = vmatprep.mubr.f32.mxu0 %v10146_v48  ;;  %6992 = vmatpush1.bf16.msra.mxu0 %v6991_v14  ;;  %v10168_v37 = vadd.f32 %v2237_v2, %v13061_v3  ;;  %v13063_v14 = vld [vmem:[#allocation136_spill] sm:$0xff]  ;;  %v2246_v57 = vmax.f32 %v7304_v6, 0.0  ;;  %v13067_v2 = vld [vmem:[#allocation115_spill] sm:$0xff]  ;;  %v4112_v6 = vld [vmem:[#allocation8 + $0x12e0] sm:$0xff] }
 0x336   :  { %3613 = vmatmul.mubr.f32.gmra.mrb[142].mxu1 %v10140_v25  ;;  %6994 = vmatprep.subr.bf16.mxu0 %v6993_v35  ;;  %v7303_v27 = vadd.f32 %v13063_v14, %v9992_v49  ;;  %v13064_v35 = vld [vmem:[#allocation112_spill] sm:$0xff]  ;;  %v10182_v10 = vadd.f32 %v2241_v18, %v13067_v2  ;;  %v7007_v14 = vpack.c.bf16 %v4112_v6, %v4108_v52  ;;  %v4129_v2 = vld [vmem:[#allocation8 + $0x1368] sm:$0xff]  ;;  %v4127_v52 = vld [vmem:[#allocation8 + $0x1358] sm:$0xff] }
 0x337   :  { %3618 = vmatprep.mubr.f32.mxu1 %v10146_v48  ;;  %7120 = vmatpush1.bf16.msra.mxu1 %v7119_v56  ;;  %13062 = vst [vmem:[#allocation110_spill] sm:$0xff] %v10168_v37  ;;  %v10174_v30 = vadd.f32 %v2242_v4, %v13064_v35  ;;  %v7127_v56 = vpack.c.bf16 %v4098_v15, %v4094_v7  ;;  %v4110_v3 = vld [vmem:[#allocation8 + $0x12d0] sm:$0xff]  ;;  %v2249_v35 = vmax.f32 %v7305_v54, 0.0  ;;  %v4131_v6 = vld [vmem:[#allocation8 + $0x1378] sm:$0xff] }
 0x338   :  { %3105 = vmatmul.mubr.f32.gmra.mrb[144].mxu0 %v10154_v45  ;;  %7122 = vmatprep.subr.bf16.mxu1 %v7121_v29  ;;  %v7129_v29 = vpack.c.bf16 %v4107_v32, %v4103_v16  ;;  %13068 = vst [vmem:[#allocation113_spill] sm:$0xff] %v10182_v10  ;;  %v7005_v4 = vpack.c.bf16 %v4113_v60, %v4109_v62  ;;  %v4121_v16 = vld [vmem:[#allocation8 + $0x1328] sm:$0xff]  ;;  %v4114_v18 = vld [vmem:[#allocation8 + $0x12f0] sm:$0xff]  ;;  %v4120_v62 = vld [vmem:[#allocation8 + $0x1320] sm:$0xff] }
 0x339   :  { %3110 = vmatprep.mubr.f32.mxu0 %v10160_v34  ;;  %6996 = vmatpush1.bf16.msra.mxu0 %v6995_v0  ;;  %13065 = vst [vmem:[#allocation137_spill] sm:$0xff] %v10174_v30  ;;  %v7003_v0 = vpack.c.bf16 %v4104_v42, %v4100_v9  ;;  %v7131_v15 = vpack.c.bf16 %v4106_v17, %v4102_v46  ;;  %v13073_v9 = vld [vmem:[#allocation117_spill] sm:$0xff]  ;;  %v13076_v60 = vld [vmem:[#allocation116_spill] sm:$0xff]  ;;  %v13078_v17 = vld [vmem:[#allocation143_spill] sm:$0xff] }
 0x33a   :  { %3619 = vmatmul.mubr.f32.gmra.mrb[144].mxu1 %v10154_v45  ;;  %6998 = vmatprep.subr.bf16.mxu0 %v6997_v26  ;;  %v2245_v26 = vmax.f32 %v7303_v27, 0.0  ;;  %v7133_v32 = vpack.c.bf16 %v4115_v61, %v4111_v12  ;;  %v4119_v27 = vld [vmem:[#allocation8 + $0x1318] sm:$0xff]  ;;  %v7135_v12 = vpack.c.bf16 %v4114_v18, %v4110_v3  ;;  %v4125_v61 = vld [vmem:[#allocation8 + $0x1348] sm:$0xff]  ;;  %v4122_v54 = vld [vmem:[#allocation8 + $0x1330] sm:$0xff] }
 0x33b   :  { %3624 = vmatprep.mubr.f32.mxu1 %v10160_v34  ;;  %7124 = vmatpush1.bf16.msra.mxu1 %v7123_v55  ;;  %v13070_v55 = vld [vmem:[#allocation114_spill] sm:$0xff] }
 0x33c   :  { %3111 = vmatmul.mubr.f32.gmra.mrb[146].mxu0 %v10168_v37  ;;  %7126 = vmatprep.subr.bf16.mxu1 %v7125_v1  ;;  %v10188_v51 = vadd.f32 %v2246_v57, %v13070_v55  ;;  %v13072_v1 = vld [vmem:[#allocation141_spill] sm:$0xff]  ;;  %v10196_v42 = vadd.f32 %v2245_v26, %v13073_v9  ;;  %v13075_v57 = vld [vmem:[#allocation140_spill] sm:$0xff]  ;;  %v13079_v55 = vld [vmem:[#allocation119_spill] sm:$0xff]  ;;  %v7139_v9 = vpack.c.bf16 %v4122_v54, %v4118_v8 }
 0x33d   :  { %3116 = vmatprep.mubr.f32.mxu0 %v10174_v30  ;;  %7000 = vmatpush1.bf16.msra.mxu0 %v6999_v41  ;;  %v7308_v7 = vadd.f32 %v13072_v1, %v9977_v31  ;;  %v4117_v41 = vld [vmem:[#allocation8 + $0x1308] sm:$0xff]  ;;  %v7307_v13 = vadd.f32 %v13075_v57, %v9992_v49  ;;  %v13082_v3 = vld [vmem:[#allocation118_spill] sm:$0xff] }
 0x33e   :  { %3625 = vmatmul.mubr.f32.gmra.mrb[146].mxu1 %v10168_v37  ;;  %7002 = vmatprep.subr.bf16.mxu0 %v7001_v23  ;;  %13071 = vst [vmem:[#allocation136_spill] sm:$0xff] %v10188_v51  ;;  %v4123_v23 = vld [vmem:[#allocation8 + $0x1338] sm:$0xff]  ;;  %13074 = vst [vmem:[#allocation112_spill] sm:$0xff] %v10196_v42  ;;  %v7009_v63 = vpack.c.bf16 %v4121_v16, %v4117_v41  ;;  %v7013_v41 = vpack.c.bf16 %v4129_v2, %v4125_v61  ;;  %v4124_v16 = vld [vmem:[#allocation8 + $0x1340] sm:$0xff] }
 0x33f   :  { %3630 = vmatprep.mubr.f32.mxu1 %v10174_v30  ;;  %7128 = vmatpush1.bf16.msra.mxu1 %v7127_v56  ;;  %v4116_v56 = vld [vmem:[#allocation8 + $0x1300] sm:$0xff]  ;;  %v2254_v46 = vmax.f32 %v7308_v7, 0.0  ;;  %v7137_v26 = vpack.c.bf16 %v4123_v23, %v4119_v27  ;;  %v2253_v1 = vmax.f32 %v7307_v13, 0.0  ;;  %v13084_v27 = vld [vmem:[#allocation145_spill] sm:$0xff]  ;;  %v4137_v57 = vld [vmem:[#allocation8 + $0x13a8] sm:$0xff]  ;;  %v7141_v13 = vpack.c.bf16 %v4131_v6, %v4127_v52 }
 0x340   :  { %3117 = vmatmul.mubr.f32.gmra.mrb[148].mxu0 %v10182_v10  ;;  %7130 = vmatprep.subr.bf16.mxu1 %v7129_v29  ;;  %v10202_v29 = vadd.f32 %v2250_v50, %v13076_v60  ;;  %v10210_v50 = vadd.f32 %v2249_v35, %v13079_v55  ;;  %v13081_v7 = vld [vmem:[#allocation142_spill] sm:$0xff]  ;;  %v7312_v23 = vadd.f32 %v13084_v27, %v9977_v31  ;;  %v4133_v35 = vld [vmem:[#allocation8 + $0x1388] sm:$0xff]  ;;  %v4135_v60 = vld [vmem:[#allocation8 + $0x1398] sm:$0xff] }
 0x341   :  { %3122 = vmatprep.mubr.f32.mxu0 %v10188_v51  ;;  %7004 = vmatpush1.bf16.msra.mxu0 %v7003_v0  ;;  %v7310_v0 = vadd.f32 %v13078_v17, %v9977_v31  ;;  %v10216_v18 = vadd.f32 %v2254_v46, %v13082_v3  ;;  %v4139_v46 = vld [vmem:[#allocation8 + $0x13b8] sm:$0xff]  ;;  %v4132_v8 = vld [vmem:[#allocation8 + $0x1380] sm:$0xff]  ;;  %v13088_v52 = vld [vmem:[#allocation120_spill] sm:$0xff] }
 0x342   :  { %3631 = vmatmul.mubr.f32.gmra.mrb[148].mxu1 %v10182_v10  ;;  %7006 = vmatprep.subr.bf16.mxu0 %v7005_v4  ;;  %13077 = vst [vmem:[#allocation139_spill] sm:$0xff] %v10202_v29  ;;  %v7011_v4 = vpack.c.bf16 %v4120_v62, %v4116_v56  ;;  %13080 = vst [vmem:[#allocation115_spill] sm:$0xff] %v10210_v50  ;;  %v4130_v56 = vld [vmem:[#allocation8 + $0x1370] sm:$0xff]  ;;  %v13085_v17 = vld [vmem:[#allocation121_spill] sm:$0xff] }
 0x343   :  { %3636 = vmatprep.mubr.f32.mxu1 %v10188_v51  ;;  %7132 = vmatpush1.bf16.msra.mxu1 %v7131_v15  ;;  %v7309_v15 = vadd.f32 %v13081_v7, %v9992_v49  ;;  %13083 = vst [vmem:[#allocation138_spill] sm:$0xff] %v10216_v18  ;;  %v4136_v54 = vld [vmem:[#allocation8 + $0x13a0] sm:$0xff]  ;;  %v13090_v55 = vld [vmem:[#allocation147_spill] sm:$0xff] }
 0x344   :  { %3123 = vmatmul.mubr.f32.gmra.mrb[150].mxu0 %v10196_v42  ;;  %7134 = vmatprep.subr.bf16.mxu1 %v7133_v32  ;;  %v4128_v32 = vld [vmem:[#allocation8 + $0x1360] sm:$0xff]  ;;  %v7314_v7 = vadd.f32 %v13090_v55, %v9977_v31  ;;  %v13091_v3 = vld [vmem:[#allocation123_spill] sm:$0xff] }
 0x345   :  { %3128 = vmatprep.mubr.f32.mxu0 %v10202_v29  ;;  %7008 = vmatpush1.bf16.msra.mxu0 %v7007_v14  ;;  %v2258_v14 = vmax.f32 %v7310_v0, 0.0  ;;  %v7015_v62 = vpack.c.bf16 %v4128_v32, %v4124_v16  ;;  %v10224_v0 = vadd.f32 %v2253_v1, %v13085_v17  ;;  %v2257_v61 = vmax.f32 %v7309_v15, 0.0  ;;  %v4134_v16 = vld [vmem:[#allocation8 + $0x1390] sm:$0xff] }
 0x346   :  { %3637 = vmatmul.mubr.f32.gmra.mrb[150].mxu1 %v10196_v42  ;;  %7010 = vmatprep.subr.bf16.mxu0 %v7009_v63  ;;  %v4126_v63 = vld [vmem:[#allocation8 + $0x1350] sm:$0xff]  ;;  %v7145_v15 = vpack.c.bf16 %v4139_v46, %v4135_v60  ;;  %v7019_v32 = vpack.c.bf16 %v4136_v54, %v4132_v8  ;;  %v13097_v60 = vld [vmem:[#allocation125_spill] sm:$0xff]  ;;  %v13102_v54 = vld [vmem:[#allocation151_spill] sm:$0xff] }
 0x347   :  { %3642 = vmatprep.mubr.f32.mxu1 %v10202_v29  ;;  %7136 = vmatpush1.bf16.msra.mxu1 %v7135_v12  ;;  %13086 = vst [vmem:[#allocation114_spill] sm:$0xff] %v10224_v0  ;;  %v13087_v12 = vld [vmem:[#allocation144_spill] sm:$0xff]  ;;  %v10230_v6 = vadd.f32 %v2258_v14, %v13088_v52  ;;  %v7143_v1 = vpack.c.bf16 %v4130_v56, %v4126_v63  ;;  %v13096_v63 = vld [vmem:[#allocation149_spill] sm:$0xff] }
 0x348   :  { %3129 = vmatmul.mubr.f32.gmra.mrb[152].mxu0 %v10210_v50  ;;  %7138 = vmatprep.subr.bf16.mxu1 %v7137_v26  ;;  %v7311_v2 = vadd.f32 %v13087_v12, %v9992_v49  ;;  %v7017_v26 = vpack.c.bf16 %v4137_v57, %v4133_v35  ;;  %v10238_v14 = vadd.f32 %v2257_v61, %v13091_v3  ;;  %v13099_v61 = vld [vmem:[#allocation148_spill] sm:$0xff]  ;;  %v13108_v3 = vld [vmem:[#allocation153_spill] sm:$0xff] }
 0x349   :  { %3134 = vmatprep.mubr.f32.mxu0 %v10216_v18  ;;  %7012 = vmatpush1.bf16.msra.mxu0 %v7011_v4  ;;  %13089 = vst [vmem:[#allocation141_spill] sm:$0xff] %v10230_v6  ;;  %v2262_v4 = vmax.f32 %v7312_v23, 0.0  ;;  %v13093_v23 = vld [vmem:[#allocation146_spill] sm:$0xff]  ;;  %v7316_v56 = vadd.f32 %v13096_v63, %v9977_v31  ;;  %v7315_v12 = vadd.f32 %v13099_v61, %v9992_v49 }
 0x34a   :  { %3643 = vmatmul.mubr.f32.gmra.mrb[152].mxu1 %v10210_v50  ;;  %7014 = vmatprep.subr.bf16.mxu0 %v7013_v41  ;;  %v4138_v41 = vld [vmem:[#allocation8 + $0x13b0] sm:$0xff]  ;;  %13092 = vst [vmem:[#allocation117_spill] sm:$0xff] %v10238_v14  ;;  %v2261_v27 = vmax.f32 %v7311_v2, 0.0  ;;  %v7313_v35 = vadd.f32 %v13093_v23, %v9992_v49  ;;  %v7318_v52 = vadd.f32 %v13102_v54, %v9977_v31  ;;  %v13109_v23 = vld [vmem:[#allocation129_spill] sm:$0xff]  ;;  %v13117_v54 = vld [vmem:[#allocation154_spill] sm:$0xff] }
 0x34b   :  { %3648 = vmatprep.mubr.f32.mxu1 %v10216_v18  ;;  %7140 = vmatpush1.bf16.msra.mxu1 %v7139_v9  ;;  %v13094_v9 = vld [vmem:[#allocation122_spill] sm:$0xff]  ;;  %v13100_v2 = vld [vmem:[#allocation124_spill] sm:$0xff]  ;;  %v2270_v8 = vmax.f32 %v7316_v56, 0.0 }
 0x34c   :  { %3135 = vmatmul.mubr.f32.gmra.mrb[154].mxu0 %v10224_v0  ;;  %7142 = vmatprep.subr.bf16.mxu1 %v7141_v13  ;;  %v10244_v57 = vadd.f32 %v2262_v4, %v13094_v9  ;;  %v2266_v13 = vmax.f32 %v7314_v7, 0.0  ;;  %v10252_v46 = vadd.f32 %v2261_v27, %v13097_v60  ;;  %v2265_v17 = vmax.f32 %v7313_v35, 0.0  ;;  %v13103_v4 = vld [vmem:[#allocation127_spill] sm:$0xff]  ;;  %v13112_v56 = vld [vmem:[#allocation128_spill] sm:$0xff] }
 0x34d   :  { %3140 = vmatprep.mubr.f32.mxu0 %v10230_v6  ;;  %7016 = vmatpush1.bf16.msra.mxu0 %v7015_v62  ;;  %v7147_v62 = vpack.c.bf16 %v4138_v41, %v4134_v16  ;;  %v2269_v7 = vmax.f32 %v7315_v12, 0.0  ;;  %v13106_v16 = vld [vmem:[#allocation126_spill] sm:$0xff]  ;;  %v7320_v27 = vadd.f32 %v13108_v3, %v9977_v31  ;;  %v13115_v12 = vld [vmem:[#allocation131_spill] sm:$0xff] }
 0x34e   :  { %3649 = vmatmul.mubr.f32.gmra.mrb[154].mxu1 %v10224_v0  ;;  %7018 = vmatprep.subr.bf16.mxu0 %v7017_v26  ;;  %13095 = vst [vmem:[#allocation140_spill] sm:$0xff] %v10244_v57  ;;  %13098 = vst [vmem:[#allocation116_spill] sm:$0xff] %v10252_v46  ;;  %v10258_v26 = vadd.f32 %v2266_v13, %v13100_v2  ;;  %v10266_v55 = vadd.f32 %v2265_v17, %v13103_v4  ;;  %v13111_v13 = vld [vmem:[#allocation152_spill] sm:$0xff]  ;;  %v13114_v17 = vld [vmem:[#allocation155_spill] sm:$0xff] }
 0x34f   :  { %3654 = vmatprep.mubr.f32.mxu1 %v10230_v6  ;;  %7144 = vmatpush1.bf16.msra.mxu1 %v7143_v1  ;;  %v13105_v1 = vld [vmem:[#allocation150_spill] sm:$0xff]  ;;  %v10272_v41 = vadd.f32 %v2270_v8, %v13106_v16  ;;  %v10280_v35 = vadd.f32 %v2269_v7, %v13109_v23  ;;  %v7319_v63 = vadd.f32 %v13111_v13, %v9992_v49  ;;  %v2278_v60 = vmax.f32 %v7320_v27, 0.0  ;;  %v13123_v23 = vld [vmem:[#allocation156_spill] sm:$0xff] }
 0x350   :  { %3141 = vmatmul.mubr.f32.gmra.mrb[156].mxu0 %v10238_v14  ;;  %7146 = vmatprep.subr.bf16.mxu1 %v7145_v15  ;;  %13101 = vst [vmem:[#allocation143_spill] sm:$0xff] %v10258_v26  ;;  %13104 = vst [vmem:[#allocation119_spill] sm:$0xff] %v10266_v55  ;;  %v7317_v15 = vadd.f32 %v13105_v1, %v9992_v49  ;;  %v7322_v61 = vadd.f32 %v13114_v17, %v9977_v31  ;;  %v13118_v4 = vld [vmem:[#allocation130_spill] sm:$0xff]  ;;  %v13124_v13 = vld [vmem:[#allocation132_spill] sm:$0xff] }
 0x351   :  { %3146 = vmatprep.mubr.f32.mxu0 %v10244_v57  ;;  %7020 = vmatpush1.bf16.msra.mxu0 %v7019_v32  ;;  %13107 = vst [vmem:[#allocation142_spill] sm:$0xff] %v10272_v41  ;;  %v2274_v32 = vmax.f32 %v7318_v52, 0.0  ;;  %13110 = vst [vmem:[#allocation118_spill] sm:$0xff] %v10280_v35  ;;  %v2277_v8 = vmax.f32 %v7319_v63, 0.0  ;;  %v7321_v52 = vadd.f32 %v13117_v54, %v9992_v49  ;;  %v13129_v54 = vld [vmem:[#allocation158_spill] sm:$0xff] }
 0x352   :  { %3655 = vmatmul.mubr.f32.gmra.mrb[156].mxu1 %v10238_v14  ;;  %v2273_v9 = vmax.f32 %v7317_v15, 0.0  ;;  %v10300_v7 = vadd.f32 %v2278_v60, %v13118_v4  ;;  %v2282_v1 = vmax.f32 %v7322_v61, 0.0  ;;  %v13120_v15 = vld [vmem:[#allocation157_spill] sm:$0xff]  ;;  %v13126_v60 = vld [vmem:[#allocation159_spill] sm:$0xff]  ;;  %v13127_v61 = vld [vmem:[#allocation70_spill] sm:$0xff] }
 0x353   :  { %3660 = vmatprep.mubr.f32.mxu1 %v10244_v57  ;;  %7148 = vmatpush1.bf16.msra.mxu1 %v7147_v62  ;;  %v10286_v62 = vadd.f32 %v2274_v32, %v13112_v56  ;;  %v7324_v16 = vadd.f32 %v13120_v15, %v9977_v31  ;;  %v13121_v32 = vld [vmem:[#allocation133_spill] sm:$0xff]  ;;  %v2281_v27 = vmax.f32 %v7321_v52, 0.0  ;;  %v7326_v17 = vadd.f32 %v13126_v60, %v9977_v31  ;;  %v13130_v4 = vld [vmem:[#allocation134_spill] sm:$0xff]  ;;  %v4162_v57 = vld [vmem:[#allocation8 + $0x1470] sm:$0xff] }
 0x354   :  { %3147 = vmatmul.mubr.f32.gmra.mrb[158].mxu0 %v10252_v46  ;;  %v10294_v2 = vadd.f32 %v2273_v9, %v13115_v12  ;;  %13119 = vst [vmem:[#allocation144_spill] sm:$0xff] %v10300_v7  ;;  %v10308_v3 = vadd.f32 %v2277_v8, %v13121_v32  ;;  %v7323_v9 = vadd.f32 %v13123_v23, %v9992_v49 }
 0x355   :  { %3152 = vmatprep.mubr.f32.mxu0 %v10258_v26  ;;  %13113 = vst [vmem:[#allocation145_spill] sm:$0xff] %v10286_v62  ;;  %v10314_v63 = vadd.f32 %v2282_v1, %v13124_v13  ;;  %v2286_v56 = vmax.f32 %v7324_v16, 0.0  ;;  %v10322_v12 = vadd.f32 %v2281_v27, %v13127_v61  ;;  %v7325_v52 = vadd.f32 %v13129_v54, %v9992_v49  ;;  %v13132_v16 = vld [vmem:[#allocation161_spill] sm:$0xff]  ;;  %v13133_v27 = vld [vmem:[#allocation74_spill] sm:$0xff]  ;;  %v13135_v13 = vld [vmem:[#allocation160_spill] sm:$0xff] }
 0x356   :  { %3661 = vmatmul.mubr.f32.gmra.mrb[158].mxu1 %v10252_v46  ;;  %13116 = vst [vmem:[#allocation121_spill] sm:$0xff] %v10294_v2  ;;  %13122 = vst [vmem:[#allocation120_spill] sm:$0xff] %v10308_v3  ;;  %v2285_v8 = vmax.f32 %v7323_v9, 0.0  ;;  %v2290_v15 = vmax.f32 %v7326_v17, 0.0  ;;  %v7328_v32 = vadd.f32 %v13132_v16, %v9977_v31  ;;  %v7327_v60 = vadd.f32 %v13135_v13, %v9992_v49  ;;  %v13138_v54 = vld [vmem:[#allocation163_spill] sm:$0xff]  ;;  %v4158_v46 = vld [vmem:[#allocation8 + $0x1450] sm:$0xff] }
 0x357   :  { %3666 = vmatprep.mubr.f32.mxu1 %v10258_v26  ;;  %13125 = vst [vmem:[#allocation147_spill] sm:$0xff] %v10314_v63  ;;  %13128 = vst [vmem:[#allocation123_spill] sm:$0xff] %v10322_v12  ;;  %v10328_v1 = vadd.f32 %v2286_v56, %v13130_v4  ;;  %v2289_v9 = vmax.f32 %v7325_v52, 0.0  ;;  %v13136_v56 = vld [vmem:[#allocation66_spill] sm:$0xff]  ;;  %v7330_v4 = vadd.f32 %v13138_v54, %v9977_v31  ;;  %v13144_v54 = vld [vmem:[#allocation165_spill] sm:$0xff] }
 0x358   :  { %3153 = vmatmul.mubr.f32.gmra.mrb[160].mxu0 %v10266_v55  ;;  %v10336_v23 = vadd.f32 %v2285_v8, %v13133_v27  ;;  %v10342_v17 = vadd.f32 %v2290_v15, %v13136_v56  ;;  %v2294_v61 = vmax.f32 %v7328_v32, 0.0  ;;  %v13139_v8 = vld [vmem:[#allocation78_spill] sm:$0xff]  ;;  %v2293_v16 = vmax.f32 %v7327_v60, 0.0  ;;  %v13142_v15 = vld [vmem:[#allocation69_spill] sm:$0xff] }
 0x359   :  { %3158 = vmatprep.mubr.f32.mxu0 %v10272_v41  ;;  %13131 = vst [vmem:[#allocation146_spill] sm:$0xff] %v10328_v1  ;;  %v10350_v52 = vadd.f32 %v2289_v9, %v13139_v8  ;;  %v13141_v27 = vld [vmem:[#allocation162_spill] sm:$0xff]  ;;  %v2298_v56 = vmax.f32 %v7330_v4, 0.0  ;;  %v4146_v4 = vld [vmem:[#allocation8 + $0x13f0] sm:$0xff] }
 0x35a   :  { %3667 = vmatmul.mubr.f32.gmra.mrb[160].mxu1 %v10266_v55  ;;  %13134 = vst [vmem:[#allocation122_spill] sm:$0xff] %v10336_v23  ;;  %13137 = vst [vmem:[#allocation149_spill] sm:$0xff] %v10342_v17  ;;  %v7329_v13 = vadd.f32 %v13141_v27, %v9992_v49  ;;  %v10356_v32 = vadd.f32 %v2294_v61, %v13142_v15  ;;  %v4140_v60 = vld [vmem:[#allocation8 + $0x13c0] sm:$0xff]  ;;  %v4147_v27 = vld [vmem:[#allocation8 + $0x13f8] sm:$0xff] }
 0x35b   :  { %3672 = vmatprep.mubr.f32.mxu1 %v10272_v41  ;;  %13140 = vst [vmem:[#allocation125_spill] sm:$0xff] %v10350_v52  ;;  %v4144_v8 = vld [vmem:[#allocation8 + $0x13e0] sm:$0xff]  ;;  %v4142_v15 = vld [vmem:[#allocation8 + $0x13d0] sm:$0xff] }
 0x35c   :  { %3159 = vmatmul.mubr.f32.gmra.mrb[162].mxu0 %v10280_v35  ;;  %13143 = vst [vmem:[#allocation148_spill] sm:$0xff] %v10356_v32 }
 0x35d   :  { %3164 = vmatprep.mubr.f32.mxu0 %v10286_v62 }
 0x35e   :  { %3673 = vmatmul.mubr.f32.gmra.mrb[162].mxu1 %v10280_v35 }
 0x35f   :  { %3678 = vmatprep.mubr.f32.mxu1 %v10286_v62 }
 0x360   :  { %3165 = vmatmul.mubr.f32.gmra.mrb[164].mxu0 %v10294_v2 }
 0x361   :  { %3170 = vmatprep.mubr.f32.mxu0 %v10300_v7 }
 0x362   :  { %3679 = vmatmul.mubr.f32.gmra.mrb[164].mxu1 %v10294_v2 }
 0x363   :  { %3684 = vmatprep.mubr.f32.mxu1 %v10300_v7  ;;  %v13145_v7 = vld [vmem:[#allocation82_spill] sm:$0xff] }
 0x364   :  { %3171 = vmatmul.mubr.f32.gmra.mrb[166].mxu0 %v10308_v3  ;;  %v10364_v2 = vadd.f32 %v2293_v16, %v13145_v7  ;;  %v13151_v7 = vld [vmem:[#allocation86_spill] sm:$0xff] }
 0x365   :  { %3176 = vmatprep.mubr.f32.mxu0 %v10314_v63 }
 0x366   :  { %3685 = vmatmul.mubr.f32.gmra.mrb[166].mxu1 %v10308_v3  ;;  %v4143_v3 = vld [vmem:[#allocation8 + $0x13d8] sm:$0xff]  ;;  %13146 = vst [vmem:[#allocation124_spill] sm:$0xff] %v10364_v2 }
 0x367   :  { %3690 = vmatprep.mubr.f32.mxu1 %v10314_v63  ;;  %v4145_v63 = vld [vmem:[#allocation8 + $0x13e8] sm:$0xff]  ;;  %v7149_v61 = vpack.c.bf16 %v4147_v27, %v4143_v3 }
 0x368   :  { %3177 = vmatmul.mubr.f32.gmra.mrb[168].mxu0 %v10322_v12 }
 0x369   :  { %3182 = vmatprep.mubr.f32.mxu0 %v10328_v1  ;;  %7150 = vmatprep.subr.bf16.mxu1 %v7149_v61  ;;  %v13157_v61 = vld [vmem:[#allocation91_spill] sm:$0xff] }
 0x36a   :  { %3691 = vmatmul.mubr.f32.gmra.mrb[168].mxu1 %v10322_v12  ;;  %v4141_v12 = vld [vmem:[#allocation8 + $0x13c8] sm:$0xff] }
 0x36b   :  { %3696 = vmatprep.mubr.f32.mxu1 %v10328_v1  ;;  %v7332_v1 = vadd.f32 %v13144_v54, %v9977_v31  ;;  %v7021_v9 = vpack.c.bf16 %v4145_v63, %v4141_v12  ;;  %v2297_v54 = vmax.f32 %v7329_v13, 0.0  ;;  %v7151_v63 = vpack.c.bf16 %v4146_v4, %v4142_v15  ;;  %v13148_v12 = vld [vmem:[#allocation73_spill] sm:$0xff]  ;;  %v13153_v13 = vld [vmem:[#allocation166_spill] sm:$0xff]  ;;  %v13159_v4 = vld [vmem:[#allocation168_spill] sm:$0xff] }
 0x36c   :  { %3183 = vmatmul.mubr.f32.gmra.mrb[170].mxu0 %v10336_v23  ;;  %v10370_v35 = vadd.f32 %v2298_v56, %v13148_v12  ;;  %v7333_v56 = vadd.f32 %v13153_v13, %v9992_v49  ;;  %v13160_v12 = vld [vmem:[#allocation81_spill] sm:$0xff] }
 0x36d   :  { %3188 = vmatprep.mubr.f32.mxu0 %v10342_v17  ;;  %7022 = vmatprep.subr.bf16.mxu0 %v7021_v9  ;;  %v2302_v41 = vmax.f32 %v7332_v1, 0.0  ;;  %v13154_v1 = vld [vmem:[#allocation77_spill] sm:$0xff] }
 0x36e   :  { %3697 = vmatmul.mubr.f32.gmra.mrb[170].mxu1 %v10336_v23  ;;  %v7023_v23 = vpack.c.bf16 %v4144_v8, %v4140_v60  ;;  %13149 = vst [vmem:[#allocation151_spill] sm:$0xff] %v10370_v35  ;;  %v13150_v60 = vld [vmem:[#allocation167_spill] sm:$0xff]  ;;  %v2305_v15 = vmax.f32 %v7333_v56, 0.0  ;;  %v4155_v56 = vld [vmem:[#allocation8 + $0x1438] sm:$0xff] }
 0x36f   :  { %3702 = vmatprep.mubr.f32.mxu1 %v10342_v17  ;;  %v13147_v17 = vld [vmem:[#allocation164_spill] sm:$0xff]  ;;  %v7334_v3 = vadd.f32 %v13150_v60, %v9977_v31  ;;  %7152 = vmatpush1.bf16.msra.mxu1 %v7151_v63  ;;  %v10384_v9 = vadd.f32 %v2302_v41, %v13154_v1  ;;  %v4149_v41 = vld [vmem:[#allocation8 + $0x1408] sm:$0xff] }
 0x370   :  { %3189 = vmatmul.mubr.f32.gmra.mrb[172].mxu0 %v10350_v52  ;;  %v7331_v62 = vadd.f32 %v13147_v17, %v9992_v49  ;;  %v10378_v17 = vadd.f32 %v2297_v54, %v13151_v7  ;;  %v7335_v54 = vadd.f32 %v13159_v4, %v9992_v49  ;;  %v4153_v63 = vld [vmem:[#allocation8 + $0x1428] sm:$0xff] }
 0x371   :  { %3194 = vmatprep.mubr.f32.mxu0 %v10356_v32  ;;  %7024 = vmatpush1.bf16.msra.mxu0 %v7023_v23  ;;  %13155 = vst [vmem:[#allocation150_spill] sm:$0xff] %v10384_v9  ;;  %v2306_v8 = vmax.f32 %v7334_v3, 0.0  ;;  %v13156_v23 = vld [vmem:[#allocation169_spill] sm:$0xff]  ;;  %v13162_v7 = vld [vmem:[#allocation171_spill] sm:$0xff]  ;;  %v7025_v1 = vpack.c.bf16 %v4153_v63, %v4149_v41 }
 0x372   :  { %3703 = vmatmul.mubr.f32.gmra.mrb[172].mxu1 %v10350_v52  ;;  %13152 = vst [vmem:[#allocation127_spill] sm:$0xff] %v10378_v17  ;;  %v2301_v16 = vmax.f32 %v7331_v62, 0.0  ;;  %v7336_v27 = vadd.f32 %v13156_v23, %v9977_v31  ;;  %v7338_v13 = vadd.f32 %v13162_v7, %v9977_v31  ;;  %v13166_v7 = vld [vmem:[#allocation85_spill] sm:$0xff] }
 0x373   :  { %3708 = vmatprep.mubr.f32.mxu1 %v10356_v32  ;;  %v10398_v60 = vadd.f32 %v2306_v8, %v13160_v12  ;;  %7026 = vmatprep.subr.bf16.mxu0 %v7025_v1  ;;  %v2309_v8 = vmax.f32 %v7335_v54, 0.0  ;;  %v13168_v63 = vld [vmem:[#allocation173_spill] sm:$0xff] }
 0x374   :  { %3195 = vmatmul.mubr.f32.gmra.mrb[174].mxu0 %v10364_v2  ;;  %v10392_v62 = vadd.f32 %v2301_v16, %v13157_v61  ;;  %v2310_v3 = vmax.f32 %v7336_v27, 0.0  ;;  %v4151_v16 = vld [vmem:[#allocation8 + $0x1418] sm:$0xff]  ;;  %v13163_v61 = vld [vmem:[#allocation96_spill] sm:$0xff]  ;;  %v13165_v27 = vld [vmem:[#allocation170_spill] sm:$0xff]  ;;  %v2314_v41 = vmax.f32 %v7338_v13, 0.0 }
 0x375   :  { %3200 = vmatprep.mubr.f32.mxu0 %v10370_v35  ;;  %13161 = vst [vmem:[#allocation153_spill] sm:$0xff] %v10398_v60  ;;  %v7153_v23 = vpack.c.bf16 %v4155_v56, %v4151_v16  ;;  %v10406_v4 = vadd.f32 %v2305_v15, %v13163_v61  ;;  %v7337_v12 = vadd.f32 %v13165_v27, %v9992_v49  ;;  %v13169_v15 = vld [vmem:[#allocation100_spill] sm:$0xff]  ;;  %v13174_v27 = vld [vmem:[#allocation174_spill] sm:$0xff]  ;;  %v13194_v32 = vld [vmem:[#allocation21_spill] sm:$0xff] }
 0x376   :  { %3709 = vmatmul.mubr.f32.gmra.mrb[174].mxu1 %v10364_v2  ;;  %13158 = vst [vmem:[#allocation126_spill] sm:$0xff] %v10392_v62  ;;  %v10420_v54 = vadd.f32 %v2309_v8, %v13169_v15  ;;  %v13171_v16 = vld [vmem:[#allocation172_spill] sm:$0xff]  ;;  %v13175_v8 = vld [vmem:[#allocation105_spill] sm:$0xff]  ;;  %v4160_v2 = vld [vmem:[#allocation8 + $0x1460] sm:$0xff] }
 0x377   :  { %3714 = vmatprep.mubr.f32.mxu1 %v10370_v35  ;;  %13164 = vst [vmem:[#allocation129_spill] sm:$0xff] %v10406_v4  ;;  %7154 = vmatprep.subr.bf16.mxu1 %v7153_v23  ;;  %v2313_v1 = vmax.f32 %v7337_v12, 0.0  ;;  %v7339_v56 = vadd.f32 %v13171_v16, %v9992_v49  ;;  %v7342_v23 = vadd.f32 %v13174_v27, %v9977_v31  ;;  %v4156_v35 = vld [vmem:[#allocation8 + $0x1440] sm:$0xff] }
 0x378   :  { %3201 = vmatmul.mubr.f32.gmra.mrb[176].mxu0 %v10378_v17  ;;  %13170 = vst [vmem:[#allocation128_spill] sm:$0xff] %v10420_v54 }
 0x379   :  { %3206 = vmatprep.mubr.f32.mxu0 %v10384_v9  ;;  %v10434_v12 = vadd.f32 %v2313_v1, %v13175_v8  ;;  %v2322_v16 = vmax.f32 %v7342_v23, 0.0  ;;  %v13180_v1 = vld [vmem:[#allocation109_spill] sm:$0xff]  ;;  %v7343_v8 = vadd.f32 %v10000_v24, %v9992_v49  ;;  %v13188_v24 = vld [vmem:[#allocation108_spill] sm:$0xff] }
 0x37a   :  { %3715 = vmatmul.mubr.f32.gmra.mrb[176].mxu1 %v10378_v17  ;;  %v7340_v17 = vadd.f32 %v13168_v63, %v9977_v31  ;;  %v13177_v63 = vld [vmem:[#allocation89_spill] sm:$0xff] }
 0x37b   :  { %3720 = vmatprep.mubr.f32.mxu1 %v10384_v9  ;;  %v10412_v9 = vadd.f32 %v2310_v3, %v13166_v7  ;;  %v13172_v3 = vld [vmem:[#allocation90_spill] sm:$0xff]  ;;  %13176 = vst [vmem:[#allocation131_spill] sm:$0xff] %v10434_v12  ;;  %v2317_v7 = vmax.f32 %v7339_v56, 0.0  ;;  %v7341_v15 = vadd.f32 %v13177_v63, %v9992_v49 }
 0x37c   :  { %3207 = vmatmul.mubr.f32.gmra.mrb[178].mxu0 %v10392_v62  ;;  %v10426_v13 = vadd.f32 %v2314_v41, %v13172_v3  ;;  %v2318_v61 = vmax.f32 %v7340_v17, 0.0  ;;  %v13178_v41 = vld [vmem:[#allocation95_spill] sm:$0xff]  ;;  %v7344_v3 = vadd.f32 %v10005_v28, %v9977_v31 }
 0x37d   :  { %3212 = vmatprep.mubr.f32.mxu0 %v10398_v60  ;;  %13167 = vst [vmem:[#allocation152_spill] sm:$0xff] %v10412_v9  ;;  %v10448_v56 = vadd.f32 %v2317_v7, %v13180_v1  ;;  %v2321_v27 = vmax.f32 %v7341_v15, 0.0  ;;  %v13184_v31 = vld [vmem:[#allocation135_spill] sm:$0xff]  ;;  %v2325_v7 = vmax.f32 %v7343_v8, 0.0  ;;  %v13186_v15 = vld [vmem:[#allocation104_spill] sm:$0xff] }
 0x37e   :  { %3721 = vmatmul.mubr.f32.gmra.mrb[178].mxu1 %v10392_v62  ;;  %13173 = vst [vmem:[#allocation155_spill] sm:$0xff] %v10426_v13  ;;  %v10440_v17 = vadd.f32 %v2318_v61, %v13178_v41  ;;  %v13182_v61 = vld [vmem:[#allocation99_spill] sm:$0xff]  ;;  %v2326_v63 = vmax.f32 %v7344_v3, 0.0  ;;  %v13190_v3 = vld [vmem:[#allocation18_spill] sm:$0xff] }
 0x37f   :  { %3726 = vmatprep.mubr.f32.mxu1 %v10398_v60  ;;  %13181 = vst [vmem:[#allocation130_spill] sm:$0xff] %v10448_v56  ;;  %v10454_v23 = vadd.f32 %v2322_v16, %v13182_v61  ;;  %v10460_v28 = vadd.f32 %v2321_v27, %v13184_v31  ;;  %v10470_v41 = vadd.f32 %v2325_v7, %v13188_v24  ;;  %v2713_v16 = vld [vmem:[#allocation9 + $0x4] sm:$0xf]  ;;  %v13191_v27 = vld [vmem:[#allocation19_spill] sm:$0xff] }
 0x380   :  { %3213 = vmatmul.mubr.f32.gmra.mrb[180].mxu0 %v10406_v4  ;;  %13179 = vst [vmem:[#allocation154_spill] sm:$0xff] %v10440_v17  ;;  %v10464_v49 = vadd.f32 %v2326_v63, %v13186_v15  ;;  %v10477_v1 = vrot.slane %v2713_v16, %v13190_v3  ;;  %v10480_v8 = vrot.slane %v2713_v16, %v13191_v27  ;;  %v4148_v24 = vld [vmem:[#allocation8 + $0x1400] sm:$0xff]  ;;  %v4157_v3 = vld [vmem:[#allocation8 + $0x1448] sm:$0xff]  ;;  %v4159_v27 = vld [vmem:[#allocation8 + $0x1458] sm:$0xff] }
 0x381   :  { %3218 = vmatprep.mubr.f32.mxu0 %v10412_v9  ;;  %13183 = vst [vmem:[#allocation157_spill] sm:$0xff] %v10454_v23  ;;  %13185 = vst [vmem:[#allocation133_spill] sm:$0xff] %v10460_v28  ;;  %v4161_v16 = vld [vmem:[#allocation8 + $0x1468] sm:$0xff] }
 0x382   :  { %3727 = vmatmul.mubr.f32.gmra.mrb[180].mxu1 %v10406_v4  ;;  %13187 = vst [vmem:[#allocation156_spill] sm:$0xff] %v10464_v49  ;;  %13189 = vst [vmem:[#allocation132_spill] sm:$0xff] %v10470_v41  ;;  %v7029_v26 = vpack.c.bf16 %v4161_v16, %v4157_v3  ;;  %v7159_v16 = vpack.c.bf16 %v4162_v57, %v4158_v46  ;;  %v4177_v57 = vld [vmem:[#allocation8 + $0x14e8] sm:$0xff]  ;;  %v4175_v46 = vld [vmem:[#allocation8 + $0x14d8] sm:$0xff] }
 0x383   :  { %3732 = vmatprep.mubr.f32.mxu1 %v10412_v9  ;;  %v13192_v9 = vld [vmem:[#allocation20_spill] sm:$0xff] }
 0x384   :  { %3219 = vmatmul.mubr.f32.gmra.mrb[182].mxu0 %v10420_v54 }
 0x385   :  { %3224 = vmatprep.mubr.f32.mxu0 %v10426_v13 }
 0x386   :  { %3733 = vmatmul.mubr.f32.gmra.mrb[182].mxu1 %v10420_v54 }
 0x387   :  { %3738 = vmatprep.mubr.f32.mxu1 %v10426_v13  ;;  %v4163_v13 = vld [vmem:[#allocation8 + $0x1478] sm:$0xff] }
 0x388   :  { %3225 = vmatmul.mubr.f32.gmra.mrb[184].mxu0 %v10434_v12 }
 0x389   :  { %3230 = vmatprep.mubr.f32.mxu0 %v10440_v17 }
 0x38a   :  { %3739 = vmatmul.mubr.f32.gmra.mrb[184].mxu1 %v10434_v12 }
 0x38b   :  { %3744 = vmatprep.mubr.f32.mxu1 %v10440_v17 }
 0x38c   :  { %3231 = vmatmul.mubr.f32.gmra.mrb[186].mxu0 %v10448_v56 }
 0x38d   :  { %3236 = vmatprep.mubr.f32.mxu0 %v10454_v23 }
 0x38e   :  { %3745 = vmatmul.mubr.f32.gmra.mrb[186].mxu1 %v10448_v56  ;;  %v4154_v56 = vld [vmem:[#allocation8 + $0x1430] sm:$0xff] }
 0x38f   :  { %3750 = vmatprep.mubr.f32.mxu1 %v10454_v23 }
 0x390   :  { %3237 = vmatmul.mubr.f32.gmra.mrb[188].mxu0 %v10460_v28 }
 0x391   :  { %3242 = vmatprep.mubr.f32.mxu0 %v10464_v49 }
 0x392   :  { %3751 = vmatmul.mubr.f32.gmra.mrb[188].mxu1 %v10460_v28 }
 0x393   :  { %3756 = vmatprep.mubr.f32.mxu1 %v10464_v49  ;;  %v4152_v49 = vld [vmem:[#allocation8 + $0x1420] sm:$0xff] }
 0x394   :  { %3243 = vmatmul.mubr.f32.gmra.mrb[190].mxu0 %v10470_v41  ;;  %v7027_v60 = vpack.c.bf16 %v4152_v49, %v4148_v24  ;;  %v4171_v49 = vld [vmem:[#allocation8 + $0x14b8] sm:$0xff] }
 0x396   :  { %3757 = vmatmul.mubr.f32.gmra.mrb[190].mxu1 %v10470_v41  ;;  %v4150_v41 = vld [vmem:[#allocation8 + $0x1410] sm:$0xff] }
 0x397   :  { %v7155_v62 = vpack.c.bf16 %v4154_v56, %v4150_v41  ;;  %v4167_v56 = vld [vmem:[#allocation8 + $0x1498] sm:$0xff]  ;;  %v13196_v41 = vld [vmem:[#allocation22_spill] sm:$0xff] }
 0x3eb   :  { %v3058_v61 = vpop.f32.mrb[128].mxu0  ;;  %v10483_v7 = vpop.f32.mrb[128].mxu1 }
 0x3ec   :  { %v7345_v63 = vadd.f32 %v3058_v61, %v10477_v1  ;;  %v3060_v31 = vpop.f32.mrb[129].mxu0  ;;  %v10486_v23 = vpop.f32.mrb[129].mxu1 }
 0x3ed   :  { %v7346_v15 = vadd.f32 %v3060_v31, %v10480_v8 }
 0x3ee   :  { %v3763_v28 = vmax.f32 %v7345_v63, 0.0 }
 0x3ef   :  { %v3764_v17 = vmax.f32 %v7346_v15, 0.0  ;;  %v3064_v12 = vpop.f32.mrb[130].mxu0 }
 0x3f0   :  { %v7347_v61 = vadd.f32 %v3064_v12, %v10477_v1  ;;  %v3066_v54 = vpop.f32.mrb[131].mxu0  ;;  %v10496_v15 = vadd.f32 %v3763_v28, %v13194_v32  ;;  %v7157_v12 = vpack.c.bf16 %v4163_v13, %v4159_v27  ;;  %v7031_v13 = vpack.c.bf16 %v4160_v2, %v4156_v35 }
 0x3f1   :  { %v10490_v4 = vadd.f32 %v3764_v17, %v13192_v9  ;;  %v10492_v31 = vpop.f32.mrb[130].mxu1  ;;  %v7348_v63 = vadd.f32 %v3066_v54, %v10480_v8  ;;  %v4165_v9 = vld [vmem:[#allocation8 + $0x1488] sm:$0xff]  ;;  %v7161_v2 = vpack.c.bf16 %v4171_v49, %v4167_v56  ;;  %v4172_v49 = vld [vmem:[#allocation8 + $0x14c0] sm:$0xff] }
 0x3f2   :  { %13195 = vst [vmem:[#allocation70_spill] sm:$0xff] %v10496_v15  ;;  %v3767_v52 = vmax.f32 %v7347_v61, 0.0  ;;  %v10498_v55 = vpop.f32.mrb[131].mxu1  ;;  %v4169_v54 = vld [vmem:[#allocation8 + $0x14a8] sm:$0xff]  ;;  %v4164_v61 = vld [vmem:[#allocation8 + $0x1480] sm:$0xff] }
 0x3f3   :  { %13193 = vst [vmem:[#allocation159_spill] sm:$0xff] %v10490_v4  ;;  %v3768_v17 = vmax.f32 %v7348_v63, 0.0  ;;  %v3070_v14 = vpop.f32.mrb[132].mxu0  ;;  %4363 = vmatprep.mubr.f32.mxu0 %v10490_v4  ;;  %4877 = vmatprep.mubr.f32.mxu1 %v10490_v4  ;;  %v4168_v63 = vld [vmem:[#allocation8 + $0x14a0] sm:$0xff]  ;;  %v13198_v4 = vld [vmem:[#allocation23_spill] sm:$0xff]  ;;  %v7033_v35 = vpack.c.bf16 %v4169_v54, %v4165_v9 }
 0x3f4   :  { %v7349_v32 = vadd.f32 %v3070_v14, %v10477_v1  ;;  %v3072_v28 = vpop.f32.mrb[133].mxu0  ;;  %4364 = vmatmul.mubr.f32.vlgmr.msra.gmra.mrb[192].mxu0 %v10496_v15  ;;  %4878 = vmatmul.mubr.f32.vlgmr.msra.gmra.mrb[192].mxu1 %v10496_v15  ;;  %v10512_v14 = vadd.f32 %v3767_v52, %v13198_v4  ;;  %v4173_v15 = vld [vmem:[#allocation8 + $0x14c8] sm:$0xff]  ;;  %v4179_v52 = vld [vmem:[#allocation8 + $0x14f8] sm:$0xff]  ;;  %v13200_v4 = vld [vmem:[#allocation24_spill] sm:$0xff] }
 0x3f5   :  { %v10506_v3 = vadd.f32 %v3768_v17, %v13196_v41  ;;  %v10508_v27 = vpop.f32.mrb[132].mxu1  ;;  %v7350_v24 = vadd.f32 %v3072_v28, %v10480_v8  ;;  %7028 = vmatpush1.bf16.msra.mxu0 %v7027_v60  ;;  %7156 = vmatpush1.bf16.msra.mxu1 %v7155_v62  ;;  %v4166_v17 = vld [vmem:[#allocation8 + $0x1490] sm:$0xff] }
 0x3f6   :  { %13199 = vst [vmem:[#allocation134_spill] sm:$0xff] %v10512_v14  ;;  %v3771_v6 = vmax.f32 %v7349_v32, 0.0  ;;  %v10514_v0 = vpop.f32.mrb[133].mxu1  ;;  %7030 = vmatprep.subr.bf16.mxu0 %v7029_v26  ;;  %7158 = vmatprep.subr.bf16.mxu1 %v7157_v12  ;;  %v4170_v41 = vld [vmem:[#allocation8 + $0x14b0] sm:$0xff]  ;;  %v7035_v26 = vpack.c.bf16 %v4168_v63, %v4164_v61  ;;  %v4176_v32 = vld [vmem:[#allocation8 + $0x14e0] sm:$0xff]  ;;  %v7037_v61 = vpack.c.bf16 %v4177_v57, %v4173_v15 }
 0x3f7   :  { %13197 = vst [vmem:[#allocation158_spill] sm:$0xff] %v10506_v3  ;;  %v3772_v18 = vmax.f32 %v7350_v24, 0.0  ;;  %v3076_v28 = vpop.f32.mrb[134].mxu0  ;;  %4369 = vmatprep.mubr.f32.mxu0 %v10506_v3  ;;  %4883 = vmatprep.mubr.f32.mxu1 %v10506_v3  ;;  %v7163_v56 = vpack.c.bf16 %v4170_v41, %v4166_v17  ;;  %v13202_v24 = vld [vmem:[#allocation25_spill] sm:$0xff]  ;;  %v4174_v63 = vld [vmem:[#allocation8 + $0x14d0] sm:$0xff]  ;;  %v7039_v15 = vpack.c.bf16 %v4176_v32, %v4172_v49 }
 0x3f8   :  { %v7351_v62 = vadd.f32 %v3076_v28, %v10477_v1  ;;  %v3078_v60 = vpop.f32.mrb[135].mxu0  ;;  %4370 = vmatmul.mubr.f32.gmra.mrb[194].mxu0 %v10512_v14  ;;  %4884 = vmatmul.mubr.f32.gmra.mrb[194].mxu1 %v10512_v14  ;;  %v10528_v28 = vadd.f32 %v3771_v6, %v13202_v24  ;;  %v4181_v14 = vld [vmem:[#allocation8 + $0x1508] sm:$0xff]  ;;  %v4187_v6 = vld [vmem:[#allocation8 + $0x1538] sm:$0xff]  ;;  %v4182_v32 = vld [vmem:[#allocation8 + $0x1510] sm:$0xff] }
 0x3f9   :  { %v10522_v12 = vadd.f32 %v3772_v18, %v13200_v4  ;;  %v10524_v9 = vpop.f32.mrb[134].mxu1  ;;  %v7352_v54 = vadd.f32 %v3078_v60, %v10480_v8  ;;  %7032 = vmatpush1.bf16.msra.mxu0 %v7031_v13  ;;  %7160 = vmatpush1.bf16.msra.mxu1 %v7159_v16  ;;  %v7165_v18 = vpack.c.bf16 %v4179_v52, %v4175_v46  ;;  %v4178_v4 = vld [vmem:[#allocation8 + $0x14f0] sm:$0xff]  ;;  %v4185_v13 = vld [vmem:[#allocation8 + $0x1528] sm:$0xff]  ;;  %v4183_v16 = vld [vmem:[#allocation8 + $0x1518] sm:$0xff] }
 0x3fa   :  { %13203 = vst [vmem:[#allocation74_spill] sm:$0xff] %v10528_v28  ;;  %v3775_v3 = vmax.f32 %v7351_v62, 0.0  ;;  %v10530_v50 = vpop.f32.mrb[135].mxu1  ;;  %7034 = vmatprep.subr.bf16.mxu0 %v7033_v35  ;;  %7162 = vmatprep.subr.bf16.mxu1 %v7161_v2  ;;  %v13204_v35 = vld [vmem:[#allocation26_spill] sm:$0xff]  ;;  %v7167_v52 = vpack.c.bf16 %v4178_v4, %v4174_v63  ;;  %v13206_v24 = vld [vmem:[#allocation27_spill] sm:$0xff]  ;;  %v7041_v49 = vpack.c.bf16 %v4185_v13, %v4181_v14 }
 0x3fb   :  { %13201 = vst [vmem:[#allocation161_spill] sm:$0xff] %v10522_v12  ;;  %v3776_v29 = vmax.f32 %v7352_v54, 0.0  ;;  %v3082_v60 = vpop.f32.mrb[136].mxu0  ;;  %4375 = vmatprep.mubr.f32.mxu0 %v10522_v12  ;;  %4889 = vmatprep.mubr.f32.mxu1 %v10522_v12  ;;  %v4180_v62 = vld [vmem:[#allocation8 + $0x1500] sm:$0xff] }
 0x3fc   :  { %v7353_v17 = vadd.f32 %v3082_v60, %v10477_v1  ;;  %v3084_v41 = vpop.f32.mrb[137].mxu0  ;;  %4376 = vmatmul.mubr.f32.gmra.mrb[196].mxu0 %v10528_v28  ;;  %4890 = vmatmul.mubr.f32.gmra.mrb[196].mxu1 %v10528_v28  ;;  %v4184_v54 = vld [vmem:[#allocation8 + $0x1520] sm:$0xff]  ;;  %v10544_v60 = vadd.f32 %v3775_v3, %v13206_v24  ;;  %v4189_v28 = vld [vmem:[#allocation8 + $0x1548] sm:$0xff]  ;;  %v4195_v3 = vld [vmem:[#allocation8 + $0x1578] sm:$0xff] }
 0x3fd   :  { %v10538_v2 = vadd.f32 %v3776_v29, %v13204_v35  ;;  %v10540_v57 = vpop.f32.mrb[136].mxu1  ;;  %v7354_v46 = vadd.f32 %v3084_v41, %v10480_v8  ;;  %7036 = vmatpush1.bf16.msra.mxu0 %v7035_v26  ;;  %7164 = vmatpush1.bf16.msra.mxu1 %v7163_v56  ;;  %v7169_v29 = vpack.c.bf16 %v4187_v6, %v4183_v16  ;;  %v4186_v35 = vld [vmem:[#allocation8 + $0x1530] sm:$0xff]  ;;  %v4193_v26 = vld [vmem:[#allocation8 + $0x1568] sm:$0xff]  ;;  %v4191_v56 = vld [vmem:[#allocation8 + $0x1558] sm:$0xff] }
 0x3fe   :  { %13207 = vst [vmem:[#allocation66_spill] sm:$0xff] %v10544_v60  ;;  %v3779_v12 = vmax.f32 %v7353_v17, 0.0  ;;  %v10546_v42 = vpop.f32.mrb[137].mxu1  ;;  %7038 = vmatprep.subr.bf16.mxu0 %v7037_v61  ;;  %7166 = vmatprep.subr.bf16.mxu1 %v7165_v18  ;;  %v7043_v14 = vpack.c.bf16 %v4184_v54, %v4180_v62  ;;  %v13208_v61 = vld [vmem:[#allocation28_spill] sm:$0xff]  ;;  %v7171_v6 = vpack.c.bf16 %v4186_v35, %v4182_v32  ;;  %v4188_v17 = vld [vmem:[#allocation8 + $0x1540] sm:$0xff]  ;;  %v13210_v24 = vld [vmem:[#allocation29_spill] sm:$0xff] }
 0x3ff   :  { %13205 = vst [vmem:[#allocation160_spill] sm:$0xff] %v10538_v2  ;;  %v3780_v51 = vmax.f32 %v7354_v46, 0.0  ;;  %v3088_v41 = vpop.f32.mrb[138].mxu0  ;;  %4381 = vmatprep.mubr.f32.mxu0 %v10538_v2  ;;  %4895 = vmatprep.mubr.f32.mxu1 %v10538_v2  ;;  %v4192_v46 = vld [vmem:[#allocation8 + $0x1560] sm:$0xff]  ;;  %v7045_v62 = vpack.c.bf16 %v4193_v26, %v4189_v28  ;;  %v4190_v54 = vld [vmem:[#allocation8 + $0x1550] sm:$0xff] }
 0x400   :  { %v7355_v63 = vadd.f32 %v3088_v41, %v10477_v1  ;;  %v3090_v4 = vpop.f32.mrb[139].mxu0  ;;  %4382 = vmatmul.mubr.f32.gmra.mrb[198].mxu0 %v10544_v60  ;;  %4896 = vmatmul.mubr.f32.gmra.mrb[198].mxu1 %v10544_v60  ;;  %v10560_v41 = vadd.f32 %v3779_v12, %v13210_v24  ;;  %v4197_v60 = vld [vmem:[#allocation8 + $0x1588] sm:$0xff]  ;;  %v4203_v12 = vld [vmem:[#allocation8 + $0x15b8] sm:$0xff]  ;;  %v7047_v28 = vpack.c.bf16 %v4192_v46, %v4188_v17  ;;  %v4198_v46 = vld [vmem:[#allocation8 + $0x1590] sm:$0xff] }
 0x401   :  { %v10554_v18 = vadd.f32 %v3780_v51, %v13208_v61  ;;  %v10556_v13 = vpop.f32.mrb[138].mxu1  ;;  %v7356_v16 = vadd.f32 %v3090_v4, %v10480_v8  ;;  %7040 = vmatpush1.bf16.msra.mxu0 %v7039_v15  ;;  %7168 = vmatpush1.bf16.msra.mxu1 %v7167_v52  ;;  %v7173_v51 = vpack.c.bf16 %v4195_v3, %v4191_v56  ;;  %v4194_v61 = vld [vmem:[#allocation8 + $0x1570] sm:$0xff]  ;;  %v4201_v15 = vld [vmem:[#allocation8 + $0x15a8] sm:$0xff]  ;;  %v4199_v52 = vld [vmem:[#allocation8 + $0x1598] sm:$0xff] }
 0x402   :  { %13211 = vst [vmem:[#allocation78_spill] sm:$0xff] %v10560_v41  ;;  %v3783_v2 = vmax.f32 %v7355_v63, 0.0  ;;  %v10562_v10 = vpop.f32.mrb[139].mxu1  ;;  %7042 = vmatprep.subr.bf16.mxu0 %v7041_v49  ;;  %7170 = vmatprep.subr.bf16.mxu1 %v7169_v29  ;;  %v13212_v49 = vld [vmem:[#allocation30_spill] sm:$0xff]  ;;  %v7175_v3 = vpack.c.bf16 %v4194_v61, %v4190_v54  ;;  %v13214_v24 = vld [vmem:[#allocation31_spill] sm:$0xff]  ;;  %v7049_v17 = vpack.c.bf16 %v4201_v15, %v4197_v60 }
 0x403   :  { %13209 = vst [vmem:[#allocation163_spill] sm:$0xff] %v10554_v18  ;;  %v3784_v30 = vmax.f32 %v7356_v16, 0.0  ;;  %v3094_v4 = vpop.f32.mrb[140].mxu0  ;;  %4387 = vmatprep.mubr.f32.mxu0 %v10554_v18  ;;  %4901 = vmatprep.mubr.f32.mxu1 %v10554_v18  ;;  %v4196_v63 = vld [vmem:[#allocation8 + $0x1580] sm:$0xff] }
 0x404   :  { %v7357_v32 = vadd.f32 %v3094_v4, %v10477_v1  ;;  %v3096_v35 = vpop.f32.mrb[141].mxu0  ;;  %4388 = vmatmul.mubr.f32.gmra.mrb[200].mxu0 %v10560_v41  ;;  %4902 = vmatmul.mubr.f32.gmra.mrb[200].mxu1 %v10560_v41  ;;  %v4200_v16 = vld [vmem:[#allocation8 + $0x15a0] sm:$0xff]  ;;  %v10576_v4 = vadd.f32 %v3783_v2, %v13214_v24  ;;  %v4205_v41 = vld [vmem:[#allocation8 + $0x15c8] sm:$0xff]  ;;  %v4211_v2 = vld [vmem:[#allocation8 + $0x15f8] sm:$0xff] }
 0x405   :  { %v10570_v29 = vadd.f32 %v3784_v30, %v13212_v49  ;;  %v10572_v26 = vpop.f32.mrb[140].mxu1  ;;  %v7358_v56 = vadd.f32 %v3096_v35, %v10480_v8  ;;  %7044 = vmatpush1.bf16.msra.mxu0 %v7043_v14  ;;  %7172 = vmatpush1.bf16.msra.mxu1 %v7171_v6  ;;  %v7177_v30 = vpack.c.bf16 %v4203_v12, %v4199_v52  ;;  %v4202_v49 = vld [vmem:[#allocation8 + $0x15b0] sm:$0xff]  ;;  %v4209_v14 = vld [vmem:[#allocation8 + $0x15e8] sm:$0xff]  ;;  %v4207_v6 = vld [vmem:[#allocation8 + $0x15d8] sm:$0xff] }
 0x406   :  { %13215 = vst [vmem:[#allocation69_spill] sm:$0xff] %v10576_v4  ;;  %v3787_v18 = vmax.f32 %v7357_v32, 0.0  ;;  %v10578_v37 = vpop.f32.mrb[141].mxu1  ;;  %7046 = vmatprep.subr.bf16.mxu0 %v7045_v62  ;;  %7174 = vmatprep.subr.bf16.mxu1 %v7173_v51  ;;  %v7051_v60 = vpack.c.bf16 %v4200_v16, %v4196_v63  ;;  %v13216_v62 = vld [vmem:[#allocation32_spill] sm:$0xff]  ;;  %v7179_v12 = vpack.c.bf16 %v4202_v49, %v4198_v46  ;;  %v4204_v32 = vld [vmem:[#allocation8 + $0x15c0] sm:$0xff]  ;;  %v13218_v24 = vld [vmem:[#allocation33_spill] sm:$0xff] }
 0x407   :  { %13213 = vst [vmem:[#allocation162_spill] sm:$0xff] %v10570_v29  ;;  %v3788_v34 = vmax.f32 %v7358_v56, 0.0  ;;  %v3100_v35 = vpop.f32.mrb[142].mxu0  ;;  %4393 = vmatprep.mubr.f32.mxu0 %v10570_v29  ;;  %4907 = vmatprep.mubr.f32.mxu1 %v10570_v29  ;;  %v4208_v56 = vld [vmem:[#allocation8 + $0x15e0] sm:$0xff]  ;;  %v7053_v63 = vpack.c.bf16 %v4209_v14, %v4205_v41  ;;  %v4206_v16 = vld [vmem:[#allocation8 + $0x15d0] sm:$0xff] }
 0x408   :  { %v7359_v54 = vadd.f32 %v3100_v35, %v10477_v1  ;;  %v3102_v61 = vpop.f32.mrb[143].mxu0  ;;  %4394 = vmatmul.mubr.f32.gmra.mrb[202].mxu0 %v10576_v4  ;;  %4908 = vmatmul.mubr.f32.gmra.mrb[202].mxu1 %v10576_v4  ;;  %v10592_v35 = vadd.f32 %v3787_v18, %v13218_v24  ;;  %v4213_v4 = vld [vmem:[#allocation8 + $0x1608] sm:$0xff]  ;;  %v4219_v18 = vld [vmem:[#allocation8 + $0x1638] sm:$0xff]  ;;  %v7055_v41 = vpack.c.bf16 %v4208_v56, %v4204_v32  ;;  %v4214_v56 = vld [vmem:[#allocation8 + $0x1610] sm:$0xff] }
 0x409   :  { %v10586_v51 = vadd.f32 %v3788_v34, %v13216_v62  ;;  %v10588_v15 = vpop.f32.mrb[142].mxu1  ;;  %v7360_v52 = vadd.f32 %v3102_v61, %v10480_v8  ;;  %7048 = vmatpush1.bf16.msra.mxu0 %v7047_v28  ;;  %7176 = vmatpush1.bf16.msra.mxu1 %v7175_v3  ;;  %v7181_v34 = vpack.c.bf16 %v4211_v2, %v4207_v6  ;;  %v4210_v62 = vld [vmem:[#allocation8 + $0x15f0] sm:$0xff]  ;;  %v4217_v28 = vld [vmem:[#allocation8 + $0x1628] sm:$0xff]  ;;  %v4215_v3 = vld [vmem:[#allocation8 + $0x1618] sm:$0xff] }
 0x40a   :  { %13219 = vst [vmem:[#allocation82_spill] sm:$0xff] %v10592_v35  ;;  %v3791_v29 = vmax.f32 %v7359_v54, 0.0  ;;  %v10594_v45 = vpop.f32.mrb[143].mxu1  ;;  %7050 = vmatprep.subr.bf16.mxu0 %v7049_v17  ;;  %7178 = vmatprep.subr.bf16.mxu1 %v7177_v30  ;;  %v13220_v17 = vld [vmem:[#allocation34_spill] sm:$0xff]  ;;  %v7183_v2 = vpack.c.bf16 %v4210_v62, %v4206_v16  ;;  %v13223_v24 = vld [vmem:[#allocation35_spill] sm:$0xff]  ;;  %v7057_v32 = vpack.c.bf16 %v4217_v28, %v4213_v4 }
 0x40b   :  { %13217 = vst [vmem:[#allocation165_spill] sm:$0xff] %v10586_v51  ;;  %v3792_v48 = vmax.f32 %v7360_v52, 0.0  ;;  %v3106_v61 = vpop.f32.mrb[144].mxu0  ;;  %4399 = vmatprep.mubr.f32.mxu0 %v10586_v51  ;;  %4913 = vmatprep.mubr.f32.mxu1 %v10586_v51  ;;  %v4212_v54 = vld [vmem:[#allocation8 + $0x1600] sm:$0xff] }
 0x40c   :  { %v7361_v46 = vadd.f32 %v3106_v61, %v10477_v1  ;;  %v3108_v49 = vpop.f32.mrb[145].mxu0  ;;  %4400 = vmatmul.mubr.f32.gmra.mrb[204].mxu0 %v10592_v35  ;;  %4914 = vmatmul.mubr.f32.gmra.mrb[204].mxu1 %v10592_v35  ;;  %v4216_v52 = vld [vmem:[#allocation8 + $0x1620] sm:$0xff]  ;;  %v10608_v61 = vadd.f32 %v3791_v29, %v13223_v24  ;;  %v4221_v35 = vld [vmem:[#allocation8 + $0x1648] sm:$0xff]  ;;  %v4227_v29 = vld [vmem:[#allocation8 + $0x1678] sm:$0xff] }
 0x40d   :  { %v10602_v30 = vadd.f32 %v3792_v48, %v13220_v17  ;;  %v10604_v14 = vpop.f32.mrb[144].mxu1  ;;  %v7362_v6 = vadd.f32 %v3108_v49, %v10480_v8  ;;  %7052 = vmatpush1.bf16.msra.mxu0 %v7051_v60  ;;  %7180 = vmatpush1.bf16.msra.mxu1 %v7179_v12  ;;  %v7185_v48 = vpack.c.bf16 %v4219_v18, %v4215_v3  ;;  %v4218_v17 = vld [vmem:[#allocation8 + $0x1630] sm:$0xff]  ;;  %v4225_v60 = vld [vmem:[#allocation8 + $0x1668] sm:$0xff]  ;;  %v4223_v12 = vld [vmem:[#allocation8 + $0x1658] sm:$0xff] }
 0x40e   :  { %13222 = vst [vmem:[#allocation73_spill] sm:$0xff] %v10604_v14  ;;  %13224 = vst [vmem:[#allocation167_spill] sm:$0xff] %v10608_v61  ;;  %v3795_v51 = vmax.f32 %v7361_v46, 0.0  ;;  %v10610_v25 = vpop.f32.mrb[145].mxu1  ;;  %7054 = vmatprep.subr.bf16.mxu0 %v7053_v63  ;;  %7182 = vmatprep.subr.bf16.mxu1 %v7181_v34  ;;  %v7059_v4 = vpack.c.bf16 %v4216_v52, %v4212_v54  ;;  %v13225_v63 = vld [vmem:[#allocation36_spill] sm:$0xff]  ;;  %v7187_v18 = vpack.c.bf16 %v4218_v17, %v4214_v56  ;;  %v4220_v46 = vld [vmem:[#allocation8 + $0x1640] sm:$0xff] }
 0x40f   :  { %13221 = vst [vmem:[#allocation164_spill] sm:$0xff] %v10602_v30  ;;  %v3796_v58 = vmax.f32 %v7362_v6, 0.0  ;;  %v3112_v49 = vpop.f32.mrb[146].mxu0  ;;  %4405 = vmatprep.mubr.f32.mxu0 %v10602_v30  ;;  %4919 = vmatprep.mubr.f32.mxu1 %v10602_v30  ;;  %v4224_v6 = vld [vmem:[#allocation8 + $0x1660] sm:$0xff]  ;;  %v13228_v24 = vld [vmem:[#allocation37_spill] sm:$0xff]  ;;  %v7061_v54 = vpack.c.bf16 %v4225_v60, %v4221_v35  ;;  %v4222_v52 = vld [vmem:[#allocation8 + $0x1650] sm:$0xff] }
 0x410   :  { %v7363_v16 = vadd.f32 %v3112_v49, %v10477_v1  ;;  %v3114_v62 = vpop.f32.mrb[147].mxu0  ;;  %4406 = vmatmul.mubr.f32.gmra.mrb[206].mxu0 %v10608_v61  ;;  %4920 = vmatmul.mubr.f32.gmra.mrb[206].mxu1 %v10608_v61  ;;  %v10624_v49 = vadd.f32 %v3795_v51, %v13228_v24  ;;  %v4229_v61 = vld [vmem:[#allocation8 + $0x1688] sm:$0xff]  ;;  %v4235_v51 = vld [vmem:[#allocation8 + $0x16b8] sm:$0xff]  ;;  %v7063_v35 = vpack.c.bf16 %v4224_v6, %v4220_v46  ;;  %v4230_v6 = vld [vmem:[#allocation8 + $0x1690] sm:$0xff] }
 0x411   :  { %v10618_v34 = vadd.f32 %v3796_v58, %v13225_v63  ;;  %v10620_v28 = vpop.f32.mrb[146].mxu1  ;;  %v7364_v3 = vadd.f32 %v3114_v62, %v10480_v8  ;;  %7056 = vmatpush1.bf16.msra.mxu0 %v7055_v41  ;;  %7184 = vmatpush1.bf16.msra.mxu1 %v7183_v2  ;;  %v7189_v58 = vpack.c.bf16 %v4227_v29, %v4223_v12  ;;  %v4226_v63 = vld [vmem:[#allocation8 + $0x1670] sm:$0xff]  ;;  %v4233_v41 = vld [vmem:[#allocation8 + $0x16a8] sm:$0xff]  ;;  %v4231_v2 = vld [vmem:[#allocation8 + $0x1698] sm:$0xff] }
 0x412   :  { %13227 = vst [vmem:[#allocation166_spill] sm:$0xff] %v10620_v28  ;;  %13229 = vst [vmem:[#allocation77_spill] sm:$0xff] %v10624_v49  ;;  %v3799_v30 = vmax.f32 %v7363_v16, 0.0  ;;  %v10626_v14 = vpop.f32.mrb[147].mxu1  ;;  %7058 = vmatprep.subr.bf16.mxu0 %v7057_v32  ;;  %7186 = vmatprep.subr.bf16.mxu1 %v7185_v48  ;;  %v13231_v32 = vld [vmem:[#allocation38_spill] sm:$0xff]  ;;  %v7191_v29 = vpack.c.bf16 %v4226_v63, %v4222_v52  ;;  %v13234_v24 = vld [vmem:[#allocation39_spill] sm:$0xff]  ;;  %v7065_v46 = vpack.c.bf16 %v4233_v41, %v4229_v61 }
 0x413   :  { %13226 = vst [vmem:[#allocation86_spill] sm:$0xff] %v10618_v34  ;;  %13230 = vst [vmem:[#allocation169_spill] sm:$0xff] %v10626_v14  ;;  %v3800_v28 = vmax.f32 %v7364_v3, 0.0  ;;  %v3118_v62 = vpop.f32.mrb[148].mxu0  ;;  %4411 = vmatprep.mubr.f32.mxu0 %v10618_v34  ;;  %4925 = vmatprep.mubr.f32.mxu1 %v10618_v34  ;;  %v4228_v16 = vld [vmem:[#allocation8 + $0x1680] sm:$0xff] }
 0x414   :  { %v7365_v56 = vadd.f32 %v3118_v62, %v10477_v1  ;;  %v3120_v17 = vpop.f32.mrb[149].mxu0  ;;  %4412 = vmatmul.mubr.f32.gmra.mrb[208].mxu0 %v10624_v49  ;;  %4926 = vmatmul.mubr.f32.gmra.mrb[208].mxu1 %v10624_v49  ;;  %v4232_v3 = vld [vmem:[#allocation8 + $0x16a0] sm:$0xff]  ;;  %v10640_v62 = vadd.f32 %v3799_v30, %v13234_v24  ;;  %v4237_v49 = vld [vmem:[#allocation8 + $0x16c8] sm:$0xff]  ;;  %v4243_v30 = vld [vmem:[#allocation8 + $0x16f8] sm:$0xff] }
 0x415   :  { %v10634_v48 = vadd.f32 %v3800_v28, %v13231_v32  ;;  %v10636_v60 = vpop.f32.mrb[148].mxu1  ;;  %v7366_v12 = vadd.f32 %v3120_v17, %v10480_v8  ;;  %7060 = vmatpush1.bf16.msra.mxu0 %v7059_v4  ;;  %7188 = vmatpush1.bf16.msra.mxu1 %v7187_v18  ;;  %v7193_v28 = vpack.c.bf16 %v4235_v51, %v4231_v2  ;;  %v4234_v32 = vld [vmem:[#allocation8 + $0x16b0] sm:$0xff]  ;;  %v4241_v4 = vld [vmem:[#allocation8 + $0x16e8] sm:$0xff]  ;;  %v4239_v18 = vld [vmem:[#allocation8 + $0x16d8] sm:$0xff] }
 0x416   :  { %13233 = vst [vmem:[#allocation168_spill] sm:$0xff] %v10636_v60  ;;  %13235 = vst [vmem:[#allocation81_spill] sm:$0xff] %v10640_v62  ;;  %v3803_v34 = vmax.f32 %v7365_v56, 0.0  ;;  %v10642_v14 = vpop.f32.mrb[149].mxu1  ;;  %7062 = vmatprep.subr.bf16.mxu0 %v7061_v54  ;;  %7190 = vmatprep.subr.bf16.mxu1 %v7189_v58  ;;  %v7067_v61 = vpack.c.bf16 %v4232_v3, %v4228_v16  ;;  %v13237_v54 = vld [vmem:[#allocation40_spill] sm:$0xff]  ;;  %v7195_v51 = vpack.c.bf16 %v4234_v32, %v4230_v6  ;;  %v4236_v56 = vld [vmem:[#allocation8 + $0x16c0] sm:$0xff] }
 0x417   :  { %13232 = vst [vmem:[#allocation91_spill] sm:$0xff] %v10634_v48  ;;  %13236 = vst [vmem:[#allocation171_spill] sm:$0xff] %v10642_v14  ;;  %v3804_v60 = vmax.f32 %v7366_v12, 0.0  ;;  %v3124_v17 = vpop.f32.mrb[150].mxu0  ;;  %4417 = vmatprep.mubr.f32.mxu0 %v10634_v48  ;;  %4931 = vmatprep.mubr.f32.mxu1 %v10634_v48  ;;  %v4240_v12 = vld [vmem:[#allocation8 + $0x16e0] sm:$0xff]  ;;  %v13240_v24 = vld [vmem:[#allocation41_spill] sm:$0xff]  ;;  %v7069_v16 = vpack.c.bf16 %v4241_v4, %v4237_v49 }
 0x418   :  { %v7367_v52 = vadd.f32 %v3124_v17, %v10477_v1  ;;  %v3126_v63 = vpop.f32.mrb[151].mxu0  ;;  %4418 = vmatmul.mubr.f32.gmra.mrb[210].mxu0 %v10640_v62  ;;  %4932 = vmatmul.mubr.f32.gmra.mrb[210].mxu1 %v10640_v62  ;;  %v10656_v17 = vadd.f32 %v3803_v34, %v13240_v24  ;;  %v4238_v3 = vld [vmem:[#allocation8 + $0x16d0] sm:$0xff]  ;;  %v4245_v62 = vld [vmem:[#allocation8 + $0x1708] sm:$0xff]  ;;  %v4251_v34 = vld [vmem:[#allocation8 + $0x1738] sm:$0xff]  ;;  %v7071_v49 = vpack.c.bf16 %v4240_v12, %v4236_v56 }
 0x419   :  { %v10650_v58 = vadd.f32 %v3804_v60, %v13237_v54  ;;  %v10652_v41 = vpop.f32.mrb[150].mxu1  ;;  %v7368_v2 = vadd.f32 %v3126_v63, %v10480_v8  ;;  %7064 = vmatpush1.bf16.msra.mxu0 %v7063_v35  ;;  %7192 = vmatpush1.bf16.msra.mxu1 %v7191_v29  ;;  %v7197_v60 = vpack.c.bf16 %v4243_v30, %v4239_v18  ;;  %v4242_v54 = vld [vmem:[#allocation8 + $0x16f0] sm:$0xff]  ;;  %v4249_v35 = vld [vmem:[#allocation8 + $0x1728] sm:$0xff]  ;;  %v4247_v29 = vld [vmem:[#allocation8 + $0x1718] sm:$0xff] }
 0x41a   :  { %13239 = vst [vmem:[#allocation170_spill] sm:$0xff] %v10652_v41  ;;  %13241 = vst [vmem:[#allocation85_spill] sm:$0xff] %v10656_v17  ;;  %v3807_v48 = vmax.f32 %v7367_v52, 0.0  ;;  %v10658_v14 = vpop.f32.mrb[151].mxu1  ;;  %7066 = vmatprep.subr.bf16.mxu0 %v7065_v46  ;;  %7194 = vmatprep.subr.bf16.mxu1 %v7193_v28  ;;  %v13243_v46 = vld [vmem:[#allocation42_spill] sm:$0xff]  ;;  %v7199_v30 = vpack.c.bf16 %v4242_v54, %v4238_v3  ;;  %v13246_v24 = vld [vmem:[#allocation43_spill] sm:$0xff]  ;;  %v7073_v56 = vpack.c.bf16 %v4249_v35, %v4245_v62 }
 0x41b   :  { %13238 = vst [vmem:[#allocation96_spill] sm:$0xff] %v10650_v58  ;;  %13242 = vst [vmem:[#allocation173_spill] sm:$0xff] %v10658_v14  ;;  %v3808_v41 = vmax.f32 %v7368_v2, 0.0  ;;  %v3130_v63 = vpop.f32.mrb[152].mxu0  ;;  %4423 = vmatprep.mubr.f32.mxu0 %v10650_v58  ;;  %4937 = vmatprep.mubr.f32.mxu1 %v10650_v58  ;;  %v4244_v52 = vld [vmem:[#allocation8 + $0x1700] sm:$0xff]  ;;  %v4246_v12 = vld [vmem:[#allocation8 + $0x1710] sm:$0xff] }
 0x41c   :  { %v7369_v6 = vadd.f32 %v3130_v63, %v10477_v1  ;;  %v3132_v32 = vpop.f32.mrb[153].mxu0  ;;  %4424 = vmatmul.mubr.f32.gmra.mrb[212].mxu0 %v10656_v17  ;;  %4938 = vmatmul.mubr.f32.gmra.mrb[212].mxu1 %v10656_v17  ;;  %v4248_v2 = vld [vmem:[#allocation8 + $0x1720] sm:$0xff]  ;;  %v10672_v63 = vadd.f32 %v3807_v48, %v13246_v24  ;;  %v4253_v17 = vld [vmem:[#allocation8 + $0x1748] sm:$0xff]  ;;  %v4259_v48 = vld [vmem:[#allocation8 + $0x1778] sm:$0xff] }
 0x41d   :  { %v10666_v28 = vadd.f32 %v3808_v41, %v13243_v46  ;;  %v10668_v4 = vpop.f32.mrb[152].mxu1  ;;  %v7370_v18 = vadd.f32 %v3132_v32, %v10480_v8  ;;  %7068 = vmatpush1.bf16.msra.mxu0 %v7067_v61  ;;  %7196 = vmatpush1.bf16.msra.mxu1 %v7195_v51  ;;  %v7201_v41 = vpack.c.bf16 %v4251_v34, %v4247_v29  ;;  %v4250_v46 = vld [vmem:[#allocation8 + $0x1730] sm:$0xff]  ;;  %v4257_v61 = vld [vmem:[#allocation8 + $0x1768] sm:$0xff]  ;;  %v4255_v51 = vld [vmem:[#allocation8 + $0x1758] sm:$0xff] }
 0x41e   :  { %13245 = vst [vmem:[#allocation172_spill] sm:$0xff] %v10668_v4  ;;  %13247 = vst [vmem:[#allocation90_spill] sm:$0xff] %v10672_v63  ;;  %v3811_v58 = vmax.f32 %v7369_v6, 0.0  ;;  %v10674_v14 = vpop.f32.mrb[153].mxu1  ;;  %7070 = vmatprep.subr.bf16.mxu0 %v7069_v16  ;;  %7198 = vmatprep.subr.bf16.mxu1 %v7197_v60  ;;  %v7075_v62 = vpack.c.bf16 %v4248_v2, %v4244_v52  ;;  %v13249_v16 = vld [vmem:[#allocation44_spill] sm:$0xff]  ;;  %v7203_v34 = vpack.c.bf16 %v4250_v46, %v4246_v12  ;;  %v4252_v6 = vld [vmem:[#allocation8 + $0x1740] sm:$0xff] }
 0x41f   :  { %13244 = vst [vmem:[#allocation100_spill] sm:$0xff] %v10666_v28  ;;  %13248 = vst [vmem:[#allocation174_spill] sm:$0xff] %v10674_v14  ;;  %v3812_v4 = vmax.f32 %v7370_v18, 0.0  ;;  %v3136_v32 = vpop.f32.mrb[154].mxu0  ;;  %4429 = vmatprep.mubr.f32.mxu0 %v10666_v28  ;;  %4943 = vmatprep.mubr.f32.mxu1 %v10666_v28  ;;  %v4256_v18 = vld [vmem:[#allocation8 + $0x1760] sm:$0xff]  ;;  %v13252_v24 = vld [vmem:[#allocation45_spill] sm:$0xff]  ;;  %v7077_v52 = vpack.c.bf16 %v4257_v61, %v4253_v17 }
 0x420   :  { %v7371_v3 = vadd.f32 %v3136_v32, %v10477_v1  ;;  %v3138_v54 = vpop.f32.mrb[155].mxu0  ;;  %4430 = vmatmul.mubr.f32.gmra.mrb[214].mxu0 %v10672_v63  ;;  %4944 = vmatmul.mubr.f32.gmra.mrb[214].mxu1 %v10672_v63  ;;  %v10688_v32 = vadd.f32 %v3811_v58, %v13252_v24  ;;  %v4254_v2 = vld [vmem:[#allocation8 + $0x1750] sm:$0xff]  ;;  %v4261_v63 = vld [vmem:[#allocation8 + $0x1788] sm:$0xff]  ;;  %v4267_v58 = vld [vmem:[#allocation8 + $0x17b8] sm:$0xff]  ;;  %v7079_v17 = vpack.c.bf16 %v4256_v18, %v4252_v6 }
 0x421   :  { %v10682_v60 = vadd.f32 %v3812_v4, %v13249_v16  ;;  %v10684_v35 = vpop.f32.mrb[154].mxu1  ;;  %v7372_v29 = vadd.f32 %v3138_v54, %v10480_v8  ;;  %7072 = vmatpush1.bf16.msra.mxu0 %v7071_v49  ;;  %7200 = vmatpush1.bf16.msra.mxu1 %v7199_v30  ;;  %v7205_v4 = vpack.c.bf16 %v4259_v48, %v4255_v51  ;;  %v4258_v16 = vld [vmem:[#allocation8 + $0x1770] sm:$0xff]  ;;  %v4265_v49 = vld [vmem:[#allocation8 + $0x17a8] sm:$0xff]  ;;  %v4263_v30 = vld [vmem:[#allocation8 + $0x1798] sm:$0xff] }
 0x422   :  { %13251 = vst [vmem:[#allocation89_spill] sm:$0xff] %v10684_v35  ;;  %13253 = vst [vmem:[#allocation95_spill] sm:$0xff] %v10688_v32  ;;  %v3815_v28 = vmax.f32 %v7371_v3, 0.0  ;;  %v10690_v14 = vpop.f32.mrb[155].mxu1  ;;  %7074 = vmatprep.subr.bf16.mxu0 %v7073_v56  ;;  %7202 = vmatprep.subr.bf16.mxu1 %v7201_v41  ;;  %v13255_v56 = vld [vmem:[#allocation46_spill] sm:$0xff]  ;;  %v7207_v48 = vpack.c.bf16 %v4258_v16, %v4254_v2  ;;  %v13258_v24 = vld [vmem:[#allocation47_spill] sm:$0xff]  ;;  %v7081_v6 = vpack.c.bf16 %v4265_v49, %v4261_v63 }
 0x423   :  { %13250 = vst [vmem:[#allocation105_spill] sm:$0xff] %v10682_v60  ;;  %13254 = vst [vmem:[#allocation109_spill] sm:$0xff] %v10690_v14  ;;  %v3816_v35 = vmax.f32 %v7372_v29, 0.0  ;;  %v3142_v54 = vpop.f32.mrb[156].mxu0  ;;  %4435 = vmatprep.mubr.f32.mxu0 %v10682_v60  ;;  %4949 = vmatprep.mubr.f32.mxu1 %v10682_v60  ;;  %v4260_v3 = vld [vmem:[#allocation8 + $0x1780] sm:$0xff]  ;;  %v4262_v18 = vld [vmem:[#allocation8 + $0x1790] sm:$0xff] }
 0x424   :  { %v7373_v12 = vadd.f32 %v3142_v54, %v10477_v1  ;;  %v3144_v46 = vpop.f32.mrb[157].mxu0  ;;  %4436 = vmatmul.mubr.f32.gmra.mrb[216].mxu0 %v10688_v32  ;;  %4950 = vmatmul.mubr.f32.gmra.mrb[216].mxu1 %v10688_v32  ;;  %v4264_v29 = vld [vmem:[#allocation8 + $0x17a0] sm:$0xff]  ;;  %v10704_v54 = vadd.f32 %v3815_v28, %v13258_v24  ;;  %v4269_v32 = vld [vmem:[#allocation8 + $0x17c8] sm:$0xff]  ;;  %v4275_v28 = vld [vmem:[#allocation8 + $0x17f8] sm:$0xff] }
 0x425   :  { %v10698_v41 = vadd.f32 %v3816_v35, %v13255_v56  ;;  %v10700_v61 = vpop.f32.mrb[156].mxu1  ;;  %v7374_v51 = vadd.f32 %v3144_v46, %v10480_v8  ;;  %7076 = vmatpush1.bf16.msra.mxu0 %v7075_v62  ;;  %7204 = vmatpush1.bf16.msra.mxu1 %v7203_v34  ;;  %v7209_v35 = vpack.c.bf16 %v4267_v58, %v4263_v30  ;;  %v4266_v56 = vld [vmem:[#allocation8 + $0x17b0] sm:$0xff]  ;;  %v4273_v62 = vld [vmem:[#allocation8 + $0x17e8] sm:$0xff]  ;;  %v4271_v34 = vld [vmem:[#allocation8 + $0x17d8] sm:$0xff] }
 0x426   :  { %13257 = vst [vmem:[#allocation135_spill] sm:$0xff] %v10700_v61  ;;  %13259 = vst [vmem:[#allocation104_spill] sm:$0xff] %v10704_v54  ;;  %v3819_v60 = vmax.f32 %v7373_v12, 0.0  ;;  %v10706_v14 = vpop.f32.mrb[157].mxu1  ;;  %7078 = vmatprep.subr.bf16.mxu0 %v7077_v52  ;;  %7206 = vmatprep.subr.bf16.mxu1 %v7205_v4  ;;  %v7083_v63 = vpack.c.bf16 %v4264_v29, %v4260_v3  ;;  %v13261_v52 = vld [vmem:[#allocation48_spill] sm:$0xff]  ;;  %v7211_v58 = vpack.c.bf16 %v4266_v56, %v4262_v18  ;;  %v4268_v12 = vld [vmem:[#allocation8 + $0x17c0] sm:$0xff] }
 0x427   :  { %13256 = vst [vmem:[#allocation99_spill] sm:$0xff] %v10698_v41  ;;  %13260 = vst [vmem:[#allocation108_spill] sm:$0xff] %v10706_v14  ;;  %v3820_v61 = vmax.f32 %v7374_v51, 0.0  ;;  %v3148_v46 = vpop.f32.mrb[158].mxu0  ;;  %4441 = vmatprep.mubr.f32.mxu0 %v10698_v41  ;;  %4955 = vmatprep.mubr.f32.mxu1 %v10698_v41  ;;  %v4272_v51 = vld [vmem:[#allocation8 + $0x17e0] sm:$0xff]  ;;  %v13264_v24 = vld [vmem:[#allocation49_spill] sm:$0xff]  ;;  %v7085_v3 = vpack.c.bf16 %v4273_v62, %v4269_v32 }
 0x428   :  { %v7375_v2 = vadd.f32 %v3148_v46, %v10477_v1  ;;  %v3150_v16 = vpop.f32.mrb[159].mxu0  ;;  %4442 = vmatmul.mubr.f32.gmra.mrb[218].mxu0 %v10704_v54  ;;  %4956 = vmatmul.mubr.f32.gmra.mrb[218].mxu1 %v10704_v54  ;;  %v10720_v46 = vadd.f32 %v3819_v60, %v13264_v24  ;;  %v4270_v29 = vld [vmem:[#allocation8 + $0x17d0] sm:$0xff]  ;;  %v7087_v60 = vpack.c.bf16 %v4272_v51, %v4268_v12  ;;  %v13268_v62 = vld [vmem:[#allocation51_spill] sm:$0xff]  ;;  %v13272_v51 = vld [vmem:[#allocation53_spill] sm:$0xff] }
 0x429   :  { %v10714_v4 = vadd.f32 %v3820_v61, %v13261_v52  ;;  %v10716_v49 = vpop.f32.mrb[158].mxu1  ;;  %v7376_v30 = vadd.f32 %v3150_v16, %v10480_v8  ;;  %7080 = vmatpush1.bf16.msra.mxu0 %v7079_v17  ;;  %7208 = vmatpush1.bf16.msra.mxu1 %v7207_v48  ;;  %v7213_v61 = vpack.c.bf16 %v4275_v28, %v4271_v34  ;;  %v4274_v52 = vld [vmem:[#allocation8 + $0x17f0] sm:$0xff] }
 0x42a   :  { %13263 = vst [vmem:[#allocation21_spill] sm:$0xff] %v10716_v49  ;;  %13265 = vst [vmem:[#allocation22_spill] sm:$0xff] %v10720_v46  ;;  %v3823_v41 = vmax.f32 %v7375_v2, 0.0  ;;  %v10722_v14 = vpop.f32.mrb[159].mxu1  ;;  %7082 = vmatprep.subr.bf16.mxu0 %v7081_v6  ;;  %7210 = vmatprep.subr.bf16.mxu1 %v7209_v35  ;;  %v13266_v6 = vld [vmem:[#allocation50_spill] sm:$0xff]  ;;  %v7215_v56 = vpack.c.bf16 %v4274_v52, %v4270_v29 }
 0x42b   :  { %13262 = vst [vmem:[#allocation20_spill] sm:$0xff] %v10714_v4  ;;  %v3824_v54 = vmax.f32 %v7376_v30, 0.0  ;;  %v3154_v49 = vpop.f32.mrb[160].mxu0  ;;  %4447 = vmatprep.mubr.f32.mxu0 %v10714_v4  ;;  %4961 = vmatprep.mubr.f32.mxu1 %v10714_v4 }
 0x42c   :  { %v7377_v17 = vadd.f32 %v3154_v49, %v10477_v1  ;;  %v3156_v48 = vpop.f32.mrb[161].mxu0  ;;  %4448 = vmatmul.mubr.f32.gmra.mrb[220].mxu0 %v10720_v46  ;;  %4962 = vmatmul.mubr.f32.gmra.mrb[220].mxu1 %v10720_v46  ;;  %v10736_v34 = vadd.f32 %v3823_v41, %v13268_v62  ;;  %v13270_v41 = vld [vmem:[#allocation52_spill] sm:$0xff]  ;;  %v13276_v62 = vld [vmem:[#allocation55_spill] sm:$0xff] }
 0x42d   :  { %v10730_v35 = vadd.f32 %v3824_v54, %v13266_v6  ;;  %v10732_v32 = vpop.f32.mrb[160].mxu1  ;;  %v7378_v18 = vadd.f32 %v3156_v48, %v10480_v8  ;;  %7084 = vmatpush1.bf16.msra.mxu0 %v7083_v63  ;;  %7212 = vmatpush1.bf16.msra.mxu1 %v7211_v58 }
 0x42e   :  { %13269 = vst [vmem:[#allocation24_spill] sm:$0xff] %v10736_v34  ;;  %v3827_v28 = vmax.f32 %v7377_v17, 0.0  ;;  %v10738_v2 = vpop.f32.mrb[161].mxu1  ;;  %7086 = vmatprep.subr.bf16.mxu0 %v7085_v3  ;;  %7214 = vmatprep.subr.bf16.mxu1 %v7213_v61 }
 0x42f   :  { %13267 = vst [vmem:[#allocation23_spill] sm:$0xff] %v10730_v35  ;;  %v3828_v16 = vmax.f32 %v7378_v18, 0.0  ;;  %v3160_v49 = vpop.f32.mrb[162].mxu0  ;;  %4453 = vmatprep.mubr.f32.mxu0 %v10730_v35  ;;  %4967 = vmatprep.mubr.f32.mxu1 %v10730_v35 }
 0x430   :  { %v7379_v54 = vadd.f32 %v3160_v49, %v10477_v1  ;;  %v3162_v30 = vpop.f32.mrb[163].mxu0  ;;  %4454 = vmatmul.mubr.f32.gmra.mrb[222].mxu0 %v10736_v34  ;;  %4968 = vmatmul.mubr.f32.gmra.mrb[222].mxu1 %v10736_v34  ;;  %v10752_v24 = vadd.f32 %v3827_v28, %v13272_v51  ;;  %v13278_v51 = vld [vmem:[#allocation56_spill] sm:$0xff] }
 0x431   :  { %v10746_v63 = vadd.f32 %v3828_v16, %v13270_v41  ;;  %v10748_v58 = vpop.f32.mrb[162].mxu1  ;;  %v7380_v12 = vadd.f32 %v3162_v30, %v10480_v8  ;;  %7088 = vmatpush1.bf16.msra.mxu0 %v7087_v60  ;;  %7216 = vmatpush1.bf16.msra.mxu1 %v7215_v56  ;;  %v13274_v60 = vld [vmem:[#allocation54_spill] sm:$0xff] }
 0x432   :  { %13273 = vst [vmem:[#allocation26_spill] sm:$0xff] %v10752_v24  ;;  %v3831_v3 = vmax.f32 %v7379_v54, 0.0  ;;  %v10754_v61 = vpop.f32.mrb[163].mxu1 }
 0x433   :  { %13271 = vst [vmem:[#allocation25_spill] sm:$0xff] %v10746_v63  ;;  %v3832_v29 = vmax.f32 %v7380_v12, 0.0  ;;  %v3166_v52 = vpop.f32.mrb[164].mxu0  ;;  %4459 = vmatprep.mubr.f32.mxu0 %v10746_v63  ;;  %4973 = vmatprep.mubr.f32.mxu1 %v10746_v63 }
 0x434   :  { %v7381_v17 = vadd.f32 %v3166_v52, %v10477_v1  ;;  %v3168_v48 = vpop.f32.mrb[165].mxu0  ;;  %4460 = vmatmul.mubr.f32.gmra.mrb[224].mxu0 %v10752_v24  ;;  %4974 = vmatmul.mubr.f32.gmra.mrb[224].mxu1 %v10752_v24  ;;  %v10768_v28 = vadd.f32 %v3831_v3, %v13276_v62 }
 0x435   :  { %v10762_v6 = vadd.f32 %v3832_v29, %v13274_v60  ;;  %v10764_v18 = vpop.f32.mrb[164].mxu1  ;;  %v7382_v56 = vadd.f32 %v3168_v48, %v10480_v8 }
 0x436   :  { %13277 = vst [vmem:[#allocation28_spill] sm:$0xff] %v10768_v28  ;;  %v3835_v16 = vmax.f32 %v7381_v17, 0.0  ;;  %v10770_v49 = vpop.f32.mrb[165].mxu1  ;;  %v13280_v17 = vld [vmem:[#allocation57_spill] sm:$0xff] }
 0x437   :  { %13275 = vst [vmem:[#allocation27_spill] sm:$0xff] %v10762_v6  ;;  %v3836_v54 = vmax.f32 %v7382_v56, 0.0  ;;  %v3172_v30 = vpop.f32.mrb[166].mxu0  ;;  %4465 = vmatprep.mubr.f32.mxu0 %v10762_v6  ;;  %4979 = vmatprep.mubr.f32.mxu1 %v10762_v6 }
 0x438   :  { %v7383_v41 = vadd.f32 %v3172_v30, %v10477_v1  ;;  %v3174_v12 = vpop.f32.mrb[167].mxu0  ;;  %4466 = vmatmul.mubr.f32.gmra.mrb[226].mxu0 %v10768_v28  ;;  %4980 = vmatmul.mubr.f32.gmra.mrb[226].mxu1 %v10768_v28  ;;  %v10784_v48 = vadd.f32 %v3835_v16, %v13280_v17 }
 0x439   :  { %v10778_v29 = vadd.f32 %v3836_v54, %v13278_v51  ;;  %v10780_v3 = vpop.f32.mrb[166].mxu1  ;;  %v7384_v52 = vadd.f32 %v3174_v12, %v10480_v8  ;;  %v13282_v12 = vld [vmem:[#allocation58_spill] sm:$0xff] }
 0x43a   :  { %13281 = vst [vmem:[#allocation30_spill] sm:$0xff] %v10784_v48  ;;  %v3839_v60 = vmax.f32 %v7383_v41, 0.0  ;;  %v10786_v56 = vpop.f32.mrb[167].mxu1 }
 0x43b   :  { %13279 = vst [vmem:[#allocation29_spill] sm:$0xff] %v10778_v29  ;;  %v3840_v62 = vmax.f32 %v7384_v52, 0.0  ;;  %v3178_v30 = vpop.f32.mrb[168].mxu0  ;;  %4471 = vmatprep.mubr.f32.mxu0 %v10778_v29  ;;  %4985 = vmatprep.mubr.f32.mxu1 %v10778_v29  ;;  %v13284_v52 = vld [vmem:[#allocation59_spill] sm:$0xff] }
 0x43c   :  { %v7385_v6 = vadd.f32 %v3178_v30, %v10477_v1  ;;  %v3180_v54 = vpop.f32.mrb[169].mxu0  ;;  %4472 = vmatmul.mubr.f32.gmra.mrb[228].mxu0 %v10784_v48  ;;  %4986 = vmatmul.mubr.f32.gmra.mrb[228].mxu1 %v10784_v48  ;;  %v10800_v17 = vadd.f32 %v3839_v60, %v13284_v52 }
 0x43d   :  { %v10794_v51 = vadd.f32 %v3840_v62, %v13282_v12  ;;  %v10796_v16 = vpop.f32.mrb[168].mxu1  ;;  %v7386_v41 = vadd.f32 %v3180_v54, %v10480_v8  ;;  %v13286_v54 = vld [vmem:[#allocation60_spill] sm:$0xff] }
 0x43e   :  { %13285 = vst [vmem:[#allocation32_spill] sm:$0xff] %v10800_v17  ;;  %v3843_v28 = vmax.f32 %v7385_v6, 0.0  ;;  %v10802_v63 = vpop.f32.mrb[169].mxu1 }
 0x43f   :  { %13283 = vst [vmem:[#allocation31_spill] sm:$0xff] %v10794_v51  ;;  %v3844_v29 = vmax.f32 %v7386_v41, 0.0  ;;  %v3184_v30 = vpop.f32.mrb[170].mxu0  ;;  %4477 = vmatprep.mubr.f32.mxu0 %v10794_v51  ;;  %4991 = vmatprep.mubr.f32.mxu1 %v10794_v51  ;;  %v13289_v41 = vld [vmem:[#allocation61_spill] sm:$0xff] }
 0x440   :  { %v7387_v48 = vadd.f32 %v3184_v30, %v10477_v1  ;;  %v3186_v62 = vpop.f32.mrb[171].mxu0  ;;  %4478 = vmatmul.mubr.f32.gmra.mrb[230].mxu0 %v10800_v17  ;;  %4992 = vmatmul.mubr.f32.gmra.mrb[230].mxu1 %v10800_v17  ;;  %v10816_v52 = vadd.f32 %v3843_v28, %v13289_v41 }
 0x441   :  { %v10810_v12 = vadd.f32 %v3844_v29, %v13286_v54  ;;  %v10812_v60 = vpop.f32.mrb[170].mxu1  ;;  %v7388_v6 = vadd.f32 %v3186_v62, %v10480_v8  ;;  %v13291_v62 = vld [vmem:[#allocation62_spill] sm:$0xff] }
 0x442   :  { %13288 = vst [vmem:[#allocation34_spill] sm:$0xff] %v10812_v60  ;;  %13290 = vst [vmem:[#allocation35_spill] sm:$0xff] %v10816_v52  ;;  %v3847_v24 = vmax.f32 %v7387_v48, 0.0  ;;  %v10818_v35 = vpop.f32.mrb[171].mxu1 }
 0x443   :  { %13287 = vst [vmem:[#allocation33_spill] sm:$0xff] %v10810_v12  ;;  %v3848_v51 = vmax.f32 %v7388_v6, 0.0  ;;  %v3190_v30 = vpop.f32.mrb[172].mxu0  ;;  %4483 = vmatprep.mubr.f32.mxu0 %v10810_v12  ;;  %4997 = vmatprep.mubr.f32.mxu1 %v10810_v12  ;;  %v13294_v6 = vld [vmem:[#allocation63_spill] sm:$0xff] }
 0x444   :  { %v7389_v17 = vadd.f32 %v3190_v30, %v10477_v1  ;;  %v3192_v29 = vpop.f32.mrb[173].mxu0  ;;  %4484 = vmatmul.mubr.f32.gmra.mrb[232].mxu0 %v10816_v52  ;;  %4998 = vmatmul.mubr.f32.gmra.mrb[232].mxu1 %v10816_v52  ;;  %v10832_v41 = vadd.f32 %v3847_v24, %v13294_v6 }
 0x445   :  { %v10826_v54 = vadd.f32 %v3848_v51, %v13291_v62  ;;  %v10828_v28 = vpop.f32.mrb[172].mxu1  ;;  %v7390_v48 = vadd.f32 %v3192_v29, %v10480_v8  ;;  %v13297_v29 = vld [vmem:[#allocation64_spill] sm:$0xff] }
 0x446   :  { %13293 = vst [vmem:[#allocation37_spill] sm:$0xff] %v10828_v28  ;;  %13295 = vst [vmem:[#allocation38_spill] sm:$0xff] %v10832_v41  ;;  %v3851_v34 = vmax.f32 %v7389_v17, 0.0  ;;  %v10834_v4 = vpop.f32.mrb[173].mxu1 }
 0x447   :  { %13292 = vst [vmem:[#allocation36_spill] sm:$0xff] %v10826_v54  ;;  %13296 = vst [vmem:[#allocation39_spill] sm:$0xff] %v10834_v4  ;;  %v3852_v12 = vmax.f32 %v7390_v48, 0.0  ;;  %v3196_v30 = vpop.f32.mrb[174].mxu0  ;;  %4489 = vmatprep.mubr.f32.mxu0 %v10826_v54  ;;  %5003 = vmatprep.mubr.f32.mxu1 %v10826_v54  ;;  %v13300_v48 = vld [vmem:[#allocation65_spill] sm:$0xff] }
 0x448   :  { %v7391_v52 = vadd.f32 %v3196_v30, %v10477_v1  ;;  %v3198_v51 = vpop.f32.mrb[175].mxu0  ;;  %4490 = vmatmul.mubr.f32.gmra.mrb[234].mxu0 %v10832_v41  ;;  %5004 = vmatmul.mubr.f32.gmra.mrb[234].mxu1 %v10832_v41  ;;  %v10848_v6 = vadd.f32 %v3851_v34, %v13300_v48 }
 0x449   :  { %v10842_v62 = vadd.f32 %v3852_v12, %v13297_v29  ;;  %v10844_v24 = vpop.f32.mrb[174].mxu1  ;;  %v7392_v17 = vadd.f32 %v3198_v51, %v10480_v8  ;;  %v13303_v51 = vld [vmem:[#allocation67_spill] sm:$0xff] }
 0x44a   :  { %13299 = vst [vmem:[#allocation41_spill] sm:$0xff] %v10844_v24  ;;  %13301 = vst [vmem:[#allocation42_spill] sm:$0xff] %v10848_v6  ;;  %v3855_v46 = vmax.f32 %v7391_v52, 0.0  ;;  %v10850_v28 = vpop.f32.mrb[175].mxu1 }
 0x44b   :  { %13298 = vst [vmem:[#allocation40_spill] sm:$0xff] %v10842_v62  ;;  %13302 = vst [vmem:[#allocation43_spill] sm:$0xff] %v10850_v28  ;;  %v3856_v54 = vmax.f32 %v7392_v17, 0.0  ;;  %v3202_v30 = vpop.f32.mrb[176].mxu0  ;;  %4495 = vmatprep.mubr.f32.mxu0 %v10842_v62  ;;  %5009 = vmatprep.mubr.f32.mxu1 %v10842_v62  ;;  %v13306_v17 = vld [vmem:[#allocation68_spill] sm:$0xff] }
 0x44c   :  { %v7393_v41 = vadd.f32 %v3202_v30, %v10477_v1  ;;  %v3204_v12 = vpop.f32.mrb[177].mxu0  ;;  %4496 = vmatmul.mubr.f32.gmra.mrb[236].mxu0 %v10848_v6  ;;  %5010 = vmatmul.mubr.f32.gmra.mrb[236].mxu1 %v10848_v6  ;;  %v10864_v48 = vadd.f32 %v3855_v46, %v13306_v17 }
 0x44d   :  { %v10858_v29 = vadd.f32 %v3856_v54, %v13303_v51  ;;  %v10860_v34 = vpop.f32.mrb[176].mxu1  ;;  %v7394_v52 = vadd.f32 %v3204_v12, %v10480_v8  ;;  %v13309_v12 = vld [vmem:[#allocation71_spill] sm:$0xff] }
 0x44e   :  { %13305 = vst [vmem:[#allocation45_spill] sm:$0xff] %v10860_v34  ;;  %13307 = vst [vmem:[#allocation46_spill] sm:$0xff] %v10864_v48  ;;  %v3859_v24 = vmax.f32 %v7393_v41, 0.0  ;;  %v10866_v28 = vpop.f32.mrb[177].mxu1 }
 0x44f   :  { %13304 = vst [vmem:[#allocation44_spill] sm:$0xff] %v10858_v29  ;;  %13308 = vst [vmem:[#allocation47_spill] sm:$0xff] %v10866_v28  ;;  %v3860_v62 = vmax.f32 %v7394_v52, 0.0  ;;  %v3208_v30 = vpop.f32.mrb[178].mxu0  ;;  %4501 = vmatprep.mubr.f32.mxu0 %v10858_v29  ;;  %5015 = vmatprep.mubr.f32.mxu1 %v10858_v29  ;;  %v13312_v52 = vld [vmem:[#allocation72_spill] sm:$0xff] }
 0x450   :  { %v7395_v6 = vadd.f32 %v3208_v30, %v10477_v1  ;;  %v3210_v54 = vpop.f32.mrb[179].mxu0  ;;  %4502 = vmatmul.mubr.f32.gmra.mrb[238].mxu0 %v10864_v48  ;;  %5016 = vmatmul.mubr.f32.gmra.mrb[238].mxu1 %v10864_v48  ;;  %v10880_v17 = vadd.f32 %v3859_v24, %v13312_v52 }
 0x451   :  { %v10874_v51 = vadd.f32 %v3860_v62, %v13309_v12  ;;  %v10876_v46 = vpop.f32.mrb[178].mxu1  ;;  %v7396_v41 = vadd.f32 %v3210_v54, %v10480_v8  ;;  %v13315_v54 = vld [vmem:[#allocation75_spill] sm:$0xff] }
 0x452   :  { %13311 = vst [vmem:[#allocation49_spill] sm:$0xff] %v10876_v46  ;;  %13313 = vst [vmem:[#allocation50_spill] sm:$0xff] %v10880_v17  ;;  %v3863_v34 = vmax.f32 %v7395_v6, 0.0  ;;  %v10882_v28 = vpop.f32.mrb[179].mxu1 }
 0x453   :  { %13310 = vst [vmem:[#allocation48_spill] sm:$0xff] %v10874_v51  ;;  %13314 = vst [vmem:[#allocation51_spill] sm:$0xff] %v10882_v28  ;;  %v3864_v29 = vmax.f32 %v7396_v41, 0.0  ;;  %v3214_v30 = vpop.f32.mrb[180].mxu0  ;;  %4507 = vmatprep.mubr.f32.mxu0 %v10874_v51  ;;  %5021 = vmatprep.mubr.f32.mxu1 %v10874_v51  ;;  %v13318_v41 = vld [vmem:[#allocation76_spill] sm:$0xff] }
 0x454   :  { %v7397_v48 = vadd.f32 %v3214_v30, %v10477_v1  ;;  %v3216_v62 = vpop.f32.mrb[181].mxu0  ;;  %4508 = vmatmul.mubr.f32.gmra.mrb[240].mxu0 %v10880_v17  ;;  %5022 = vmatmul.mubr.f32.gmra.mrb[240].mxu1 %v10880_v17  ;;  %v10896_v52 = vadd.f32 %v3863_v34, %v13318_v41 }
 0x455   :  { %v10890_v12 = vadd.f32 %v3864_v29, %v13315_v54  ;;  %v10892_v24 = vpop.f32.mrb[180].mxu1  ;;  %v7398_v6 = vadd.f32 %v3216_v62, %v10480_v8  ;;  %v13321_v62 = vld [vmem:[#allocation79_spill] sm:$0xff] }
 0x456   :  { %13317 = vst [vmem:[#allocation53_spill] sm:$0xff] %v10892_v24  ;;  %13319 = vst [vmem:[#allocation54_spill] sm:$0xff] %v10896_v52  ;;  %v3867_v46 = vmax.f32 %v7397_v48, 0.0  ;;  %v10898_v28 = vpop.f32.mrb[181].mxu1 }
 0x457   :  { %13316 = vst [vmem:[#allocation52_spill] sm:$0xff] %v10890_v12  ;;  %13320 = vst [vmem:[#allocation55_spill] sm:$0xff] %v10898_v28  ;;  %v3868_v51 = vmax.f32 %v7398_v6, 0.0  ;;  %v3220_v30 = vpop.f32.mrb[182].mxu0  ;;  %4513 = vmatprep.mubr.f32.mxu0 %v10890_v12  ;;  %5027 = vmatprep.mubr.f32.mxu1 %v10890_v12  ;;  %v13324_v6 = vld [vmem:[#allocation80_spill] sm:$0xff] }
 0x458   :  { %v7399_v17 = vadd.f32 %v3220_v30, %v10477_v1  ;;  %v3222_v29 = vpop.f32.mrb[183].mxu0  ;;  %4514 = vmatmul.mubr.f32.gmra.mrb[242].mxu0 %v10896_v52  ;;  %5028 = vmatmul.mubr.f32.gmra.mrb[242].mxu1 %v10896_v52  ;;  %v10912_v41 = vadd.f32 %v3867_v46, %v13324_v6 }
 0x459   :  { %v10906_v54 = vadd.f32 %v3868_v51, %v13321_v62  ;;  %v10908_v34 = vpop.f32.mrb[182].mxu1  ;;  %v7400_v48 = vadd.f32 %v3222_v29, %v10480_v8  ;;  %v13327_v29 = vld [vmem:[#allocation83_spill] sm:$0xff] }
 0x45a   :  { %13323 = vst [vmem:[#allocation57_spill] sm:$0xff] %v10908_v34  ;;  %13325 = vst [vmem:[#allocation58_spill] sm:$0xff] %v10912_v41  ;;  %v3871_v24 = vmax.f32 %v7399_v17, 0.0  ;;  %v10914_v28 = vpop.f32.mrb[183].mxu1 }
 0x45b   :  { %13322 = vst [vmem:[#allocation56_spill] sm:$0xff] %v10906_v54  ;;  %13326 = vst [vmem:[#allocation59_spill] sm:$0xff] %v10914_v28  ;;  %v3872_v12 = vmax.f32 %v7400_v48, 0.0  ;;  %v3226_v30 = vpop.f32.mrb[184].mxu0  ;;  %4519 = vmatprep.mubr.f32.mxu0 %v10906_v54  ;;  %5033 = vmatprep.mubr.f32.mxu1 %v10906_v54  ;;  %v13330_v48 = vld [vmem:[#allocation84_spill] sm:$0xff] }
 0x45c   :  { %v7401_v52 = vadd.f32 %v3226_v30, %v10477_v1  ;;  %v3228_v51 = vpop.f32.mrb[185].mxu0  ;;  %4520 = vmatmul.mubr.f32.gmra.mrb[244].mxu0 %v10912_v41  ;;  %5034 = vmatmul.mubr.f32.gmra.mrb[244].mxu1 %v10912_v41  ;;  %v10928_v6 = vadd.f32 %v3871_v24, %v13330_v48 }
 0x45d   :  { %v10922_v62 = vadd.f32 %v3872_v12, %v13327_v29  ;;  %v10924_v46 = vpop.f32.mrb[184].mxu1  ;;  %v7402_v17 = vadd.f32 %v3228_v51, %v10480_v8  ;;  %v13333_v51 = vld [vmem:[#allocation87_spill] sm:$0xff] }
 0x45e   :  { %13329 = vst [vmem:[#allocation61_spill] sm:$0xff] %v10924_v46  ;;  %13331 = vst [vmem:[#allocation62_spill] sm:$0xff] %v10928_v6  ;;  %v3875_v34 = vmax.f32 %v7401_v52, 0.0  ;;  %v10930_v28 = vpop.f32.mrb[185].mxu1 }
 0x45f   :  { %13328 = vst [vmem:[#allocation60_spill] sm:$0xff] %v10922_v62  ;;  %13332 = vst [vmem:[#allocation63_spill] sm:$0xff] %v10930_v28  ;;  %v3876_v54 = vmax.f32 %v7402_v17, 0.0  ;;  %v3232_v30 = vpop.f32.mrb[186].mxu0  ;;  %4525 = vmatprep.mubr.f32.mxu0 %v10922_v62  ;;  %5039 = vmatprep.mubr.f32.mxu1 %v10922_v62  ;;  %v8126_v62 = vld [vmem:[#allocation9 + $0x4] sm:$0xf] }
 0x460   :  { %v7403_v41 = vadd.f32 %v3232_v30, %v10477_v1  ;;  %v3234_v12 = vpop.f32.mrb[187].mxu0  ;;  %4526 = vmatmul.mubr.f32.gmra.mrb[246].mxu0 %v10928_v6  ;;  %5040 = vmatmul.mubr.f32.gmra.mrb[246].mxu1 %v10928_v6  ;;  %v10944_v17 = vadd.f32 %v3875_v34, %v9973_v39  ;;  %v13338_v30 = vld [vmem:[#allocation88_spill] sm:$0xff] }
 0x461   :  { %v10938_v29 = vadd.f32 %v3876_v54, %v13333_v51  ;;  %v10940_v24 = vpop.f32.mrb[186].mxu1  ;;  %v7404_v52 = vadd.f32 %v3234_v12, %v10480_v8  ;;  %v10949_v28 = vrot.slane %v8126_v62, %v13338_v30  ;;  %v13339_v39 = vld [vmem:[#allocation92_spill] sm:$0xff] }
 0x462   :  { %13335 = vst [vmem:[#allocation65_spill] sm:$0xff] %v10940_v24  ;;  %13336 = vst [vmem:[#allocation67_spill] sm:$0xff] %v10944_v17  ;;  %v3879_v48 = vmax.f32 %v7403_v41, 0.0  ;;  %v10946_v46 = vpop.f32.mrb[187].mxu1 }
 0x463   :  { %13334 = vst [vmem:[#allocation64_spill] sm:$0xff] %v10938_v29  ;;  %13337 = vst [vmem:[#allocation68_spill] sm:$0xff] %v10946_v46  ;;  %v3880_v4 = vmax.f32 %v7404_v52, 0.0  ;;  %v3238_v60 = vpop.f32.mrb[188].mxu0  ;;  %4531 = vmatprep.mubr.f32.mxu0 %v10938_v29  ;;  %5045 = vmatprep.mubr.f32.mxu1 %v10938_v29  ;;  %v13341_v52 = vld [vmem:[#allocation94_spill] sm:$0xff]  ;;  %v7410_v24 = vadd.f32 %v10486_v23, %v10949_v28 }
 0x464   :  { %v7405_v54 = vadd.f32 %v3238_v60, %v10477_v1  ;;  %v3240_v51 = vpop.f32.mrb[189].mxu0  ;;  %4532 = vmatmul.mubr.f32.gmra.mrb[248].mxu0 %v10944_v17  ;;  %5046 = vmatmul.mubr.f32.gmra.mrb[248].mxu1 %v10944_v17  ;;  %v10963_v6 = vrot.slane %v8126_v62, %v13341_v52  ;;  %v10966_v30 = vadd.f32 %v3879_v48, %v9995_v59 }
 0x465   :  { %v10957_v34 = vadd.f32 %v3880_v4, %v13339_v39  ;;  %v10959_v41 = vpop.f32.mrb[188].mxu1  ;;  %v7406_v12 = vadd.f32 %v3240_v51, %v10480_v8 }
 0x466   :  { %13342 = vst [vmem:[#allocation72_spill] sm:$0xff] %v10966_v30  ;;  %v3883_v29 = vmax.f32 %v7405_v54, 0.0  ;;  %v10968_v60 = vpop.f32.mrb[189].mxu1  ;;  %v7409_v48 = vadd.f32 %v10483_v7, %v10963_v6  ;;  %v13344_v54 = vld [vmem:[#allocation93_spill] sm:$0xff] }
 0x467   :  { %13340 = vst [vmem:[#allocation71_spill] sm:$0xff] %v10957_v34  ;;  %v3884_v17 = vmax.f32 %v7406_v12, 0.0  ;;  %v3244_v46 = vpop.f32.mrb[190].mxu0  ;;  %4537 = vmatprep.mubr.f32.mxu0 %v10957_v34  ;;  %5051 = vmatprep.mubr.f32.mxu1 %v10957_v34  ;;  %v7412_v34 = vadd.f32 %v10498_v55, %v10949_v28  ;;  %v13350_v55 = vld [vmem:[#allocation101_spill] sm:$0xff] }
 0x468   :  { %v7407_v4 = vadd.f32 %v3244_v46, %v10477_v1  ;;  %v3246_v51 = vpop.f32.mrb[191].mxu0  ;;  %4538 = vmatmul.mubr.f32.gmra.mrb[250].mxu0 %v10966_v30  ;;  %5052 = vmatmul.mubr.f32.gmra.mrb[250].mxu1 %v10966_v30  ;;  %v10986_v39 = vadd.f32 %v3883_v29, %v13344_v54  ;;  %v3766_v46 = vmax.f32 %v7410_v24, 0.0  ;;  %v3765_v7 = vmax.f32 %v7409_v48, 0.0  ;;  %v13348_v24 = vld [vmem:[#allocation98_spill] sm:$0xff] }
 0x469   :  { %v10978_v59 = vadd.f32 %v3884_v17, %v10009_v53  ;;  %v10980_v62 = vpop.f32.mrb[190].mxu1  ;;  %v7408_v23 = vadd.f32 %v3246_v51, %v10480_v8  ;;  %v13346_v53 = vld [vmem:[#allocation97_spill] sm:$0xff]  ;;  %v7411_v29 = vadd.f32 %v10492_v31, %v10963_v6  ;;  %v3770_v51 = vmax.f32 %v7412_v34, 0.0 }
 0x46a   :  { %13345 = vst [vmem:[#allocation76_spill] sm:$0xff] %v10986_v39  ;;  %v3887_v12 = vmax.f32 %v7407_v4, 0.0  ;;  %v10988_v1 = vpop.f32.mrb[191].mxu1  ;;  %v11005_v4 = vadd.f32 %v3766_v46, %v13350_v55  ;;  %v11016_v31 = vadd.f32 %v3765_v7, %v10042_v19  ;;  %v7413_v34 = vadd.f32 %v10508_v27, %v10963_v6 }
 0x46b   :  { %13343 = vst [vmem:[#allocation75_spill] sm:$0xff] %v10978_v59  ;;  %v3888_v30 = vmax.f32 %v7408_v23, 0.0  ;;  %4543 = vmatprep.mubr.f32.mxu0 %v10978_v59  ;;  %5057 = vmatprep.mubr.f32.mxu1 %v10978_v59  ;;  %v7414_v23 = vadd.f32 %v10514_v0, %v10949_v28  ;;  %v11021_v0 = vadd.f32 %v3770_v51, %v10048_v33 }
 0x46c   :  { %4544 = vmatmul.mubr.f32.gmra.mrb[252].mxu0 %v10986_v39  ;;  %5058 = vmatmul.mubr.f32.gmra.mrb[252].mxu1 %v10986_v39  ;;  %v11002_v17 = vadd.f32 %v3887_v12, %v13348_v24  ;;  %v7416_v54 = vadd.f32 %v10530_v50, %v10949_v28  ;;  %v3773_v12 = vmax.f32 %v7413_v34, 0.0  ;;  %v7415_v33 = vadd.f32 %v10524_v9, %v10963_v6 }
 0x46d   :  { %v10997_v8 = vadd.f32 %v3888_v30, %v13346_v53  ;;  %v3769_v30 = vmax.f32 %v7411_v29, 0.0  ;;  %v3774_v48 = vmax.f32 %v7414_v23, 0.0  ;;  %v7418_v50 = vadd.f32 %v10546_v42, %v10949_v28 }
 0x46e   :  { %13349 = vst [vmem:[#allocation80_spill] sm:$0xff] %v11002_v17  ;;  %v3778_v46 = vmax.f32 %v7416_v54, 0.0  ;;  %v3777_v53 = vmax.f32 %v7415_v33, 0.0  ;;  %v7420_v42 = vadd.f32 %v10562_v10, %v10949_v28  ;;  %v7422_v10 = vadd.f32 %v10578_v37, %v10949_v28 }
 0x46f   :  { %13347 = vst [vmem:[#allocation79_spill] sm:$0xff] %v10997_v8  ;;  %4549 = vmatprep.mubr.f32.mxu0 %v10997_v8  ;;  %5063 = vmatprep.mubr.f32.mxu1 %v10997_v8  ;;  %v11030_v19 = vadd.f32 %v3769_v30, %v10056_v36  ;;  %v11035_v27 = vadd.f32 %v3774_v48, %v10062_v22  ;;  %v3782_v7 = vmax.f32 %v7418_v50, 0.0  ;;  %v13352_v48 = vld [vmem:[#allocation103_spill] sm:$0xff] }
 0x470   :  { %4550 = vmatmul.mubr.f32.gmra.mrb[254].mxu0 %v11002_v17  ;;  %5064 = vmatmul.mubr.f32.gmra.mrb[254].mxu1 %v11002_v17  ;;  %v11044_v36 = vadd.f32 %v3773_v12, %v10070_v47  ;;  %v7417_v22 = vadd.f32 %v10540_v57, %v10963_v6  ;;  %v11049_v9 = vadd.f32 %v3778_v46, %v10076_v5  ;;  %v3786_v24 = vmax.f32 %v7420_v42, 0.0 }
 0x471   :  { %4620 = vmatprep.mubr.f32.mxu0 %v11005_v4  ;;  %5134 = vmatprep.mubr.f32.mxu1 %v11005_v4  ;;  %v11058_v47 = vadd.f32 %v3777_v53, %v10084_v21  ;;  %v7419_v5 = vadd.f32 %v10556_v13, %v10963_v6  ;;  %v11063_v57 = vadd.f32 %v3782_v7, %v10090_v11  ;;  %v3790_v51 = vmax.f32 %v7422_v10, 0.0  ;;  %v13355_v53 = vld [vmem:[#allocation166_spill] sm:$0xff]  ;;  %v13356_v7 = vld [vmem:[#allocation107_spill] sm:$0xff] }
 0x472   :  { %v3781_v29 = vmax.f32 %v7417_v22, 0.0  ;;  %v7421_v11 = vadd.f32 %v10572_v26, %v10963_v6  ;;  %v11077_v13 = vadd.f32 %v3786_v24, %v10104_v40  ;;  %v7424_v37 = vadd.f32 %v10594_v45, %v10949_v28  ;;  %v13358_v10 = vld [vmem:[#allocation106_spill] sm:$0xff] }
 0x473   :  { %v3785_v55 = vmax.f32 %v7419_v5, 0.0  ;;  %v7423_v40 = vadd.f32 %v10588_v15, %v10963_v6  ;;  %v11091_v26 = vadd.f32 %v3790_v51, %v10118_v44  ;;  %v7426_v45 = vadd.f32 %v10610_v25, %v10949_v28  ;;  %v13351_v15 = vld [vmem:[#allocation73_spill] sm:$0xff]  ;;  %v13357_v5 = vld [vmem:[#allocation171_spill] sm:$0xff]  ;;  %v13359_v51 = vld [vmem:[#allocation168_spill] sm:$0xff] }
 0x474   :  { %4621 = vmatmul.mubr.f32.vlgmr.msra.gmra.mrb[192].mxu0 %v11016_v31  ;;  %5135 = vmatmul.mubr.f32.vlgmr.msra.gmra.mrb[192].mxu1 %v11016_v31  ;;  %v11072_v21 = vadd.f32 %v3781_v29, %v10098_v20  ;;  %v3789_v23 = vmax.f32 %v7421_v11, 0.0  ;;  %v3794_v30 = vmax.f32 %v7424_v37, 0.0  ;;  %v7425_v44 = vadd.f32 %v13351_v15, %v10963_v6  ;;  %v13353_v25 = vld [vmem:[#allocation169_spill] sm:$0xff]  ;;  %v13362_v15 = vld [vmem:[#allocation110_spill] sm:$0xff] }
 0x475   :  { %4626 = vmatprep.mubr.f32.mxu0 %v11021_v0  ;;  %5140 = vmatprep.mubr.f32.mxu1 %v11021_v0  ;;  %v11086_v20 = vadd.f32 %v3785_v55, %v10112_v43  ;;  %v3793_v34 = vmax.f32 %v7423_v40, 0.0  ;;  %v3798_v12 = vmax.f32 %v7426_v45, 0.0  ;;  %v7428_v33 = vadd.f32 %v13353_v25, %v10949_v28  ;;  %v13361_v45 = vld [vmem:[#allocation173_spill] sm:$0xff] }
 0x476   :  { %v11100_v43 = vadd.f32 %v3789_v23, %v10126_v38  ;;  %v11105_v54 = vadd.f32 %v3794_v30, %v13352_v48  ;;  %v13354_v38 = vld [vmem:[#allocation102_spill] sm:$0xff]  ;;  %v3797_v50 = vmax.f32 %v7425_v44, 0.0  ;;  %v7427_v22 = vadd.f32 %v13355_v53, %v10963_v6  ;;  %v13360_v23 = vld [vmem:[#allocation111_spill] sm:$0xff] }
 0x477   :  { %v11114_v46 = vadd.f32 %v3793_v34, %v13354_v38  ;;  %v11119_v42 = vadd.f32 %v3798_v12, %v13356_v7  ;;  %v3802_v29 = vmax.f32 %v7428_v33, 0.0  ;;  %v7430_v24 = vadd.f32 %v13357_v5, %v10949_v28  ;;  %v13363_v12 = vld [vmem:[#allocation170_spill] sm:$0xff]  ;;  %v13364_v33 = vld [vmem:[#allocation137_spill] sm:$0xff] }
 0x478   :  { %4627 = vmatmul.mubr.f32.gmra.mrb[194].mxu0 %v11030_v19  ;;  %5141 = vmatmul.mubr.f32.gmra.mrb[194].mxu1 %v11030_v19  ;;  %v11128_v55 = vadd.f32 %v3797_v50, %v13358_v10  ;;  %v3801_v11 = vmax.f32 %v7427_v22, 0.0  ;;  %v7429_v37 = vadd.f32 %v13359_v51, %v10963_v6  ;;  %v7432_v34 = vadd.f32 %v13361_v45, %v10949_v28  ;;  %v13365_v53 = vld [vmem:[#allocation174_spill] sm:$0xff]  ;;  %v13366_v7 = vld [vmem:[#allocation113_spill] sm:$0xff]  ;;  %v13370_v45 = vld [vmem:[#allocation112_spill] sm:$0xff] }
 0x479   :  { %4632 = vmatprep.mubr.f32.mxu0 %v11035_v27  ;;  %5146 = vmatprep.mubr.f32.mxu1 %v11035_v27  ;;  %v11133_v40 = vadd.f32 %v3802_v29, %v13360_v23  ;;  %v3806_v30 = vmax.f32 %v7430_v24, 0.0  ;;  %v7431_v25 = vadd.f32 %v13363_v12, %v10963_v6  ;;  %v7434_v22 = vadd.f32 %v13365_v53, %v10949_v28  ;;  %v13367_v24 = vld [vmem:[#allocation172_spill] sm:$0xff]  ;;  %v13369_v23 = vld [vmem:[#allocation109_spill] sm:$0xff] }
 0x47a   :  { %v11142_v44 = vadd.f32 %v3801_v11, %v13362_v15  ;;  %v3805_v48 = vmax.f32 %v7429_v37, 0.0  ;;  %v3810_v50 = vmax.f32 %v7432_v34, 0.0  ;;  %v7433_v10 = vadd.f32 %v13367_v24, %v10963_v6  ;;  %v13368_v11 = vld [vmem:[#allocation136_spill] sm:$0xff] }
 0x47b   :  { %v11147_v38 = vadd.f32 %v3806_v30, %v13364_v33  ;;  %v3809_v5 = vmax.f32 %v7431_v25, 0.0  ;;  %v3814_v37 = vmax.f32 %v7434_v22, 0.0  ;;  %v7436_v30 = vadd.f32 %v13369_v23, %v10949_v28  ;;  %v13372_v25 = vld [vmem:[#allocation139_spill] sm:$0xff]  ;;  %v13373_v53 = vld [vmem:[#allocation108_spill] sm:$0xff] }
 0x47c   :  { %4633 = vmatmul.mubr.f32.gmra.mrb[196].mxu0 %v11044_v36  ;;  %5147 = vmatmul.mubr.f32.gmra.mrb[196].mxu1 %v11044_v36  ;;  %v11156_v29 = vadd.f32 %v3805_v48, %v13366_v7  ;;  %v11161_v51 = vadd.f32 %v3810_v50, %v13368_v11  ;;  %v3813_v15 = vmax.f32 %v7433_v10, 0.0  ;;  %v13371_v48 = vld [vmem:[#allocation89_spill] sm:$0xff]  ;;  %v7438_v22 = vadd.f32 %v13373_v53, %v10949_v28  ;;  %v13374_v7 = vld [vmem:[#allocation115_spill] sm:$0xff] }
 0x47d   :  { %4638 = vmatprep.mubr.f32.mxu0 %v11049_v9  ;;  %5152 = vmatprep.mubr.f32.mxu1 %v11049_v9  ;;  %v11170_v34 = vadd.f32 %v3809_v5, %v13370_v45  ;;  %v7435_v12 = vadd.f32 %v13371_v48, %v10963_v6  ;;  %v11175_v33 = vadd.f32 %v3814_v37, %v13372_v25  ;;  %v3818_v50 = vmax.f32 %v7436_v30, 0.0  ;;  %v13375_v10 = vld [vmem:[#allocation135_spill] sm:$0xff]  ;;  %v13376_v37 = vld [vmem:[#allocation138_spill] sm:$0xff]  ;;  %v13378_v25 = vld [vmem:[#allocation21_spill] sm:$0xff] }
 0x47e   :  { %v11184_v5 = vadd.f32 %v3813_v15, %v13374_v7  ;;  %v7437_v11 = vadd.f32 %v13375_v10, %v10963_v6  ;;  %v3822_v30 = vmax.f32 %v7438_v22, 0.0  ;;  %v7440_v45 = vadd.f32 %v10722_v14, %v10949_v28  ;;  %v13377_v15 = vld [vmem:[#allocation114_spill] sm:$0xff]  ;;  %v13379_v53 = vld [vmem:[#allocation141_spill] sm:$0xff] }
 0x47f   :  { %v3817_v24 = vmax.f32 %v7435_v12, 0.0  ;;  %v11189_v23 = vadd.f32 %v3818_v50, %v13376_v37  ;;  %v7439_v50 = vadd.f32 %v13378_v25, %v10963_v6  ;;  %v7442_v14 = vadd.f32 %v10738_v2, %v10949_v28 }
 0x480   :  { %4639 = vmatmul.mubr.f32.gmra.mrb[198].mxu0 %v11058_v47  ;;  %5153 = vmatmul.mubr.f32.gmra.mrb[198].mxu1 %v11058_v47  ;;  %v3821_v12 = vmax.f32 %v7437_v11, 0.0  ;;  %v11203_v22 = vadd.f32 %v3822_v30, %v13379_v53  ;;  %v3826_v7 = vmax.f32 %v7440_v45, 0.0  ;;  %v7441_v37 = vadd.f32 %v10732_v32, %v10963_v6  ;;  %v13382_v30 = vld [vmem:[#allocation140_spill] sm:$0xff]  ;;  %v13386_v53 = vld [vmem:[#allocation143_spill] sm:$0xff] }
 0x481   :  { %4644 = vmatprep.mubr.f32.mxu0 %v11063_v57  ;;  %5158 = vmatprep.mubr.f32.mxu1 %v11063_v57  ;;  %v11198_v48 = vadd.f32 %v3817_v24, %v13377_v15  ;;  %v13381_v24 = vld [vmem:[#allocation117_spill] sm:$0xff]  ;;  %v3825_v11 = vmax.f32 %v7439_v50, 0.0  ;;  %v3830_v15 = vmax.f32 %v7442_v14, 0.0  ;;  %v7444_v2 = vadd.f32 %v10754_v61, %v10949_v28 }
 0x482   :  { %13380 = vst [vmem:[#allocation83_spill] sm:$0xff] %v11203_v22  ;;  %v11212_v10 = vadd.f32 %v3821_v12, %v13381_v24  ;;  %v11217_v45 = vadd.f32 %v3826_v7, %v13382_v30  ;;  %v13384_v12 = vld [vmem:[#allocation116_spill] sm:$0xff]  ;;  %v3829_v50 = vmax.f32 %v7441_v37, 0.0  ;;  %v7443_v32 = vadd.f32 %v10748_v58, %v10963_v6  ;;  %v13388_v24 = vld [vmem:[#allocation119_spill] sm:$0xff]  ;;  %v13390_v30 = vld [vmem:[#allocation142_spill] sm:$0xff] }
 0x483   :  { %v11226_v25 = vadd.f32 %v3825_v11, %v13384_v12  ;;  %v11231_v7 = vadd.f32 %v3830_v15, %v13386_v53  ;;  %v3834_v14 = vmax.f32 %v7444_v2, 0.0  ;;  %v7446_v61 = vadd.f32 %v10770_v49, %v10949_v28  ;;  %v13392_v12 = vld [vmem:[#allocation118_spill] sm:$0xff]  ;;  %v13394_v53 = vld [vmem:[#allocation145_spill] sm:$0xff] }
 0x484   :  { %4645 = vmatmul.mubr.f32.gmra.mrb[200].mxu0 %v11072_v21  ;;  %5159 = vmatmul.mubr.f32.gmra.mrb[200].mxu1 %v11072_v21  ;;  %13383 = vst [vmem:[#allocation84_spill] sm:$0xff] %v11217_v45  ;;  %v11240_v11 = vadd.f32 %v3829_v50, %v13388_v24  ;;  %v3833_v37 = vmax.f32 %v7443_v32, 0.0  ;;  %v7445_v58 = vadd.f32 %v10764_v18, %v10963_v6  ;;  %v13396_v24 = vld [vmem:[#allocation121_spill] sm:$0xff] }
 0x485   :  { %4650 = vmatprep.mubr.f32.mxu0 %v11077_v13  ;;  %5164 = vmatprep.mubr.f32.mxu1 %v11077_v13  ;;  %13385 = vst [vmem:[#allocation87_spill] sm:$0xff] %v11226_v25  ;;  %13387 = vst [vmem:[#allocation92_spill] sm:$0xff] %v11231_v7  ;;  %v11245_v15 = vadd.f32 %v3834_v14, %v13390_v30  ;;  %v3838_v2 = vmax.f32 %v7446_v61, 0.0  ;;  %v7448_v49 = vadd.f32 %v10786_v56, %v10949_v28  ;;  %v13398_v30 = vld [vmem:[#allocation144_spill] sm:$0xff] }
 0x486   :  { %13389 = vst [vmem:[#allocation94_spill] sm:$0xff] %v11240_v11  ;;  %v11254_v50 = vadd.f32 %v3833_v37, %v13392_v12  ;;  %v3837_v32 = vmax.f32 %v7445_v58, 0.0  ;;  %v7447_v18 = vadd.f32 %v10780_v3, %v10963_v6  ;;  %v7450_v56 = vadd.f32 %v10802_v63, %v10949_v28  ;;  %v13400_v12 = vld [vmem:[#allocation120_spill] sm:$0xff] }
 0x487   :  { %13391 = vst [vmem:[#allocation93_spill] sm:$0xff] %v11245_v15  ;;  %v11259_v14 = vadd.f32 %v3838_v2, %v13394_v53  ;;  %v3842_v61 = vmax.f32 %v7448_v49, 0.0  ;;  %v7449_v3 = vadd.f32 %v10796_v16, %v10963_v6  ;;  %v7452_v63 = vadd.f32 %v10818_v35, %v10949_v28  ;;  %v13402_v16 = vld [vmem:[#allocation34_spill] sm:$0xff]  ;;  %v13405_v35 = vld [vmem:[#allocation39_spill] sm:$0xff] }
 0x488   :  { %4651 = vmatmul.mubr.f32.gmra.mrb[202].mxu0 %v11086_v20  ;;  %5165 = vmatmul.mubr.f32.gmra.mrb[202].mxu1 %v11086_v20  ;;  %13393 = vst [vmem:[#allocation97_spill] sm:$0xff] %v11254_v50  ;;  %v11268_v37 = vadd.f32 %v3837_v32, %v13396_v24  ;;  %v3841_v58 = vmax.f32 %v7447_v18, 0.0  ;;  %v3846_v49 = vmax.f32 %v7450_v56, 0.0  ;;  %v7451_v53 = vadd.f32 %v13402_v16, %v10963_v6  ;;  %v13408_v16 = vld [vmem:[#allocation37_spill] sm:$0xff] }
 0x489   :  { %4656 = vmatprep.mubr.f32.mxu0 %v11091_v26  ;;  %5170 = vmatprep.mubr.f32.mxu1 %v11091_v26  ;;  %13395 = vst [vmem:[#allocation98_spill] sm:$0xff] %v11259_v14  ;;  %v11273_v2 = vadd.f32 %v3842_v61, %v13398_v30  ;;  %v3845_v18 = vmax.f32 %v7449_v3, 0.0  ;;  %v13403_v61 = vld [vmem:[#allocation147_spill] sm:$0xff]  ;;  %v3850_v24 = vmax.f32 %v7452_v63, 0.0  ;;  %v7454_v30 = vadd.f32 %v13405_v35, %v10949_v28 }
 0x48a   :  { %13397 = vst [vmem:[#allocation101_spill] sm:$0xff] %v11268_v37  ;;  %v11282_v32 = vadd.f32 %v3841_v58, %v13400_v12  ;;  %v11287_v56 = vadd.f32 %v3846_v49, %v13403_v61  ;;  %v13406_v58 = vld [vmem:[#allocation123_spill] sm:$0xff]  ;;  %v3849_v12 = vmax.f32 %v7451_v53, 0.0  ;;  %v7453_v49 = vadd.f32 %v13408_v16, %v10963_v6  ;;  %v13409_v61 = vld [vmem:[#allocation146_spill] sm:$0xff]  ;;  %v13414_v16 = vld [vmem:[#allocation41_spill] sm:$0xff] }
 0x48b   :  { %13399 = vst [vmem:[#allocation73_spill] sm:$0xff] %v11273_v2  ;;  %v11296_v3 = vadd.f32 %v3845_v18, %v13406_v58  ;;  %v11301_v63 = vadd.f32 %v3850_v24, %v13409_v61  ;;  %v3854_v8 = vmax.f32 %v7454_v30, 0.0  ;;  %v13411_v35 = vld [vmem:[#allocation43_spill] sm:$0xff]  ;;  %v13412_v18 = vld [vmem:[#allocation122_spill] sm:$0xff]  ;;  %v7455_v24 = vadd.f32 %v13414_v16, %v10963_v6  ;;  %v13415_v61 = vld [vmem:[#allocation149_spill] sm:$0xff] }
 0x48c   :  { %4657 = vmatmul.mubr.f32.gmra.mrb[204].mxu0 %v11100_v43  ;;  %5171 = vmatmul.mubr.f32.gmra.mrb[204].mxu1 %v11100_v43  ;;  %13401 = vst [vmem:[#allocation103_spill] sm:$0xff] %v11282_v32  ;;  %13404 = vst [vmem:[#allocation169_spill] sm:$0xff] %v11287_v56  ;;  %v7456_v17 = vadd.f32 %v13411_v35, %v10949_v28  ;;  %v11310_v53 = vadd.f32 %v3849_v12, %v13412_v18  ;;  %v3853_v58 = vmax.f32 %v7453_v49, 0.0  ;;  %v13417_v35 = vld [vmem:[#allocation47_spill] sm:$0xff]  ;;  %v13418_v12 = vld [vmem:[#allocation125_spill] sm:$0xff] }
 0x48d   :  { %4662 = vmatprep.mubr.f32.mxu0 %v11105_v54  ;;  %5176 = vmatprep.mubr.f32.mxu1 %v11105_v54  ;;  %13407 = vst [vmem:[#allocation102_spill] sm:$0xff] %v11296_v3  ;;  %13410 = vst [vmem:[#allocation166_spill] sm:$0xff] %v11301_v63  ;;  %v11315_v30 = vadd.f32 %v3854_v8, %v13415_v61  ;;  %v7458_v39 = vadd.f32 %v13417_v35, %v10949_v28  ;;  %v3857_v18 = vmax.f32 %v7455_v24, 0.0  ;;  %v13420_v16 = vld [vmem:[#allocation45_spill] sm:$0xff]  ;;  %v13421_v61 = vld [vmem:[#allocation148_spill] sm:$0xff] }
 0x48e   :  { %13413 = vst [vmem:[#allocation107_spill] sm:$0xff] %v11310_v53  ;;  %v3858_v59 = vmax.f32 %v7456_v17, 0.0  ;;  %v11324_v49 = vadd.f32 %v3853_v58, %v13418_v12  ;;  %v7457_v8 = vadd.f32 %v13420_v16, %v10963_v6  ;;  %v13423_v35 = vld [vmem:[#allocation51_spill] sm:$0xff]  ;;  %v13424_v58 = vld [vmem:[#allocation124_spill] sm:$0xff]  ;;  %v13426_v16 = vld [vmem:[#allocation49_spill] sm:$0xff] }
 0x48f   :  { %13416 = vst [vmem:[#allocation171_spill] sm:$0xff] %v11315_v30  ;;  %v11338_v24 = vadd.f32 %v3857_v18, %v13424_v58  ;;  %v13430_v18 = vld [vmem:[#allocation127_spill] sm:$0xff] }
 0x490   :  { %4663 = vmatmul.mubr.f32.gmra.mrb[206].mxu0 %v11114_v46  ;;  %5177 = vmatmul.mubr.f32.gmra.mrb[206].mxu1 %v11114_v46  ;;  %13419 = vst [vmem:[#allocation106_spill] sm:$0xff] %v11324_v49  ;;  %v11329_v17 = vadd.f32 %v3858_v59, %v13421_v61  ;;  %v3861_v12 = vmax.f32 %v7457_v8, 0.0  ;;  %v7459_v59 = vadd.f32 %v13426_v16, %v10963_v6  ;;  %v13427_v61 = vld [vmem:[#allocation151_spill] sm:$0xff]  ;;  %v13432_v16 = vld [vmem:[#allocation53_spill] sm:$0xff] }
 0x491   :  { %4668 = vmatprep.mubr.f32.mxu0 %v11119_v42  ;;  %5182 = vmatprep.mubr.f32.mxu1 %v11119_v42  ;;  %13425 = vst [vmem:[#allocation111_spill] sm:$0xff] %v11338_v24 }
 0x492   :  { %13422 = vst [vmem:[#allocation168_spill] sm:$0xff] %v11329_v17  ;;  %v11352_v8 = vadd.f32 %v3861_v12, %v13430_v18  ;;  %v3865_v58 = vmax.f32 %v7459_v59, 0.0  ;;  %v13436_v12 = vld [vmem:[#allocation126_spill] sm:$0xff] }
 0x494   :  { %4669 = vmatmul.mubr.f32.gmra.mrb[208].mxu0 %v11128_v55  ;;  %5183 = vmatmul.mubr.f32.gmra.mrb[208].mxu1 %v11128_v55  ;;  %13431 = vst [vmem:[#allocation110_spill] sm:$0xff] %v11352_v8  ;;  %v11366_v59 = vadd.f32 %v3865_v58, %v13436_v12  ;;  %v13442_v58 = vld [vmem:[#allocation129_spill] sm:$0xff] }
 0x495   :  { %4674 = vmatprep.mubr.f32.mxu0 %v11133_v40  ;;  %5188 = vmatprep.mubr.f32.mxu1 %v11133_v40 }
 0x496   :  { %13437 = vst [vmem:[#allocation137_spill] sm:$0xff] %v11366_v59 }
 0x498   :  { %4675 = vmatmul.mubr.f32.gmra.mrb[210].mxu0 %v11142_v44  ;;  %5189 = vmatmul.mubr.f32.gmra.mrb[210].mxu1 %v11142_v44 }
 0x499   :  { %4680 = vmatprep.mubr.f32.mxu0 %v11147_v38  ;;  %5194 = vmatprep.mubr.f32.mxu1 %v11147_v38 }
 0x49c   :  { %4681 = vmatmul.mubr.f32.gmra.mrb[212].mxu0 %v11156_v29  ;;  %5195 = vmatmul.mubr.f32.gmra.mrb[212].mxu1 %v11156_v29 }
 0x49d   :  { %4686 = vmatprep.mubr.f32.mxu0 %v11161_v51  ;;  %5200 = vmatprep.mubr.f32.mxu1 %v11161_v51 }
 0x4a0   :  { %4687 = vmatmul.mubr.f32.gmra.mrb[214].mxu0 %v11170_v34  ;;  %5201 = vmatmul.mubr.f32.gmra.mrb[214].mxu1 %v11170_v34 }
 0x4a1   :  { %4692 = vmatprep.mubr.f32.mxu0 %v11175_v33  ;;  %5206 = vmatprep.mubr.f32.mxu1 %v11175_v33 }
 0x4a4   :  { %4693 = vmatmul.mubr.f32.gmra.mrb[216].mxu0 %v11184_v5  ;;  %5207 = vmatmul.mubr.f32.gmra.mrb[216].mxu1 %v11184_v5 }
 0x4a5   :  { %4698 = vmatprep.mubr.f32.mxu0 %v11189_v23  ;;  %5212 = vmatprep.mubr.f32.mxu1 %v11189_v23 }
 0x4a8   :  { %4699 = vmatmul.mubr.f32.gmra.mrb[218].mxu0 %v11198_v48  ;;  %5213 = vmatmul.mubr.f32.gmra.mrb[218].mxu1 %v11198_v48 }
 0x4a9   :  { %4704 = vmatprep.mubr.f32.mxu0 %v11203_v22  ;;  %5218 = vmatprep.mubr.f32.mxu1 %v11203_v22 }
 0x4ac   :  { %4705 = vmatmul.mubr.f32.gmra.mrb[220].mxu0 %v11212_v10  ;;  %5219 = vmatmul.mubr.f32.gmra.mrb[220].mxu1 %v11212_v10 }
 0x4ad   :  { %4710 = vmatprep.mubr.f32.mxu0 %v11217_v45  ;;  %5224 = vmatprep.mubr.f32.mxu1 %v11217_v45 }
 0x4b0   :  { %4711 = vmatmul.mubr.f32.gmra.mrb[222].mxu0 %v11226_v25  ;;  %5225 = vmatmul.mubr.f32.gmra.mrb[222].mxu1 %v11226_v25 }
 0x4b1   :  { %4716 = vmatprep.mubr.f32.mxu0 %v11231_v7  ;;  %5230 = vmatprep.mubr.f32.mxu1 %v11231_v7 }
 0x4b4   :  { %4717 = vmatmul.mubr.f32.gmra.mrb[224].mxu0 %v11240_v11  ;;  %5231 = vmatmul.mubr.f32.gmra.mrb[224].mxu1 %v11240_v11 }
 0x4b5   :  { %4722 = vmatprep.mubr.f32.mxu0 %v11245_v15  ;;  %5236 = vmatprep.mubr.f32.mxu1 %v11245_v15 }
 0x4b8   :  { %4723 = vmatmul.mubr.f32.gmra.mrb[226].mxu0 %v11254_v50  ;;  %5237 = vmatmul.mubr.f32.gmra.mrb[226].mxu1 %v11254_v50 }
 0x4b9   :  { %4728 = vmatprep.mubr.f32.mxu0 %v11259_v14  ;;  %5242 = vmatprep.mubr.f32.mxu1 %v11259_v14 }
 0x4bc   :  { %4729 = vmatmul.mubr.f32.gmra.mrb[228].mxu0 %v11268_v37  ;;  %5243 = vmatmul.mubr.f32.gmra.mrb[228].mxu1 %v11268_v37 }
 0x4bd   :  { %4734 = vmatprep.mubr.f32.mxu0 %v11273_v2  ;;  %5248 = vmatprep.mubr.f32.mxu1 %v11273_v2  ;;  %v13470_v2 = vld [vmem:[#allocation70_spill] sm:$0xff] }
 0x4c0   :  { %4735 = vmatmul.mubr.f32.gmra.mrb[230].mxu0 %v11282_v32  ;;  %5249 = vmatmul.mubr.f32.gmra.mrb[230].mxu1 %v11282_v32 }
 0x4c1   :  { %4740 = vmatprep.mubr.f32.mxu0 %v11287_v56  ;;  %5254 = vmatprep.mubr.f32.mxu1 %v11287_v56  ;;  %v7460_v56 = vadd.f32 %v13423_v35, %v10949_v28  ;;  %v13429_v35 = vld [vmem:[#allocation55_spill] sm:$0xff] }
 0x4c4   :  { %4741 = vmatmul.mubr.f32.gmra.mrb[232].mxu0 %v11296_v3  ;;  %5255 = vmatmul.mubr.f32.gmra.mrb[232].mxu1 %v11296_v3 }
 0x4c5   :  { %4746 = vmatprep.mubr.f32.mxu0 %v11301_v63  ;;  %5260 = vmatprep.mubr.f32.mxu1 %v11301_v63  ;;  %v3862_v63 = vmax.f32 %v7458_v39, 0.0 }
 0x4c7   :  { %v11343_v39 = vadd.f32 %v3862_v63, %v13427_v61  ;;  %v7461_v63 = vadd.f32 %v13432_v16, %v10963_v6  ;;  %v13433_v61 = vld [vmem:[#allocation150_spill] sm:$0xff]  ;;  %v13438_v16 = vld [vmem:[#allocation57_spill] sm:$0xff] }
 0x4c8   :  { %4747 = vmatmul.mubr.f32.gmra.mrb[234].mxu0 %v11310_v53  ;;  %5261 = vmatmul.mubr.f32.gmra.mrb[234].mxu1 %v11310_v53  ;;  %v7462_v53 = vadd.f32 %v13429_v35, %v10949_v28  ;;  %v13435_v35 = vld [vmem:[#allocation59_spill] sm:$0xff] }
 0x4c9   :  { %4752 = vmatprep.mubr.f32.mxu0 %v11315_v30  ;;  %5266 = vmatprep.mubr.f32.mxu1 %v11315_v30  ;;  %13428 = vst [vmem:[#allocation173_spill] sm:$0xff] %v11343_v39  ;;  %v3866_v30 = vmax.f32 %v7460_v56, 0.0  ;;  %v3869_v18 = vmax.f32 %v7461_v63, 0.0 }
 0x4cb   :  { %v11357_v56 = vadd.f32 %v3866_v30, %v13433_v61  ;;  %v7463_v30 = vadd.f32 %v13438_v16, %v10963_v6  ;;  %v13439_v61 = vld [vmem:[#allocation153_spill] sm:$0xff]  ;;  %v11380_v63 = vadd.f32 %v3869_v18, %v13442_v58  ;;  %v13448_v18 = vld [vmem:[#allocation128_spill] sm:$0xff] }
 0x4cc   :  { %4753 = vmatmul.mubr.f32.gmra.mrb[236].mxu0 %v11324_v49  ;;  %5267 = vmatmul.mubr.f32.gmra.mrb[236].mxu1 %v11324_v49  ;;  %v7464_v49 = vadd.f32 %v13435_v35, %v10949_v28  ;;  %v13441_v35 = vld [vmem:[#allocation63_spill] sm:$0xff]  ;;  %v13444_v16 = vld [vmem:[#allocation61_spill] sm:$0xff] }
 0x4cd   :  { %4758 = vmatprep.mubr.f32.mxu0 %v11329_v17  ;;  %5272 = vmatprep.mubr.f32.mxu1 %v11329_v17  ;;  %13434 = vst [vmem:[#allocation170_spill] sm:$0xff] %v11357_v56  ;;  %v3870_v17 = vmax.f32 %v7462_v53, 0.0  ;;  %13443 = vst [vmem:[#allocation113_spill] sm:$0xff] %v11380_v63  ;;  %v3873_v12 = vmax.f32 %v7463_v30, 0.0 }
 0x4cf   :  { %v11371_v53 = vadd.f32 %v3870_v17, %v13439_v61  ;;  %v7465_v17 = vadd.f32 %v13444_v16, %v10963_v6  ;;  %v13445_v61 = vld [vmem:[#allocation152_spill] sm:$0xff]  ;;  %v11394_v30 = vadd.f32 %v3873_v12, %v13448_v18  ;;  %v13450_v16 = vld [vmem:[#allocation65_spill] sm:$0xff]  ;;  %v13453_v12 = vld [vmem:[#allocation131_spill] sm:$0xff] }
 0x4d0   :  { %4759 = vmatmul.mubr.f32.gmra.mrb[238].mxu0 %v11338_v24  ;;  %5273 = vmatmul.mubr.f32.gmra.mrb[238].mxu1 %v11338_v24  ;;  %v7466_v24 = vadd.f32 %v13441_v35, %v10949_v28  ;;  %v13447_v35 = vld [vmem:[#allocation68_spill] sm:$0xff] }
 0x4d1   :  { %4764 = vmatprep.mubr.f32.mxu0 %v11343_v39  ;;  %5278 = vmatprep.mubr.f32.mxu1 %v11343_v39  ;;  %13440 = vst [vmem:[#allocation174_spill] sm:$0xff] %v11371_v53  ;;  %v3874_v39 = vmax.f32 %v7464_v49, 0.0  ;;  %13449 = vst [vmem:[#allocation136_spill] sm:$0xff] %v11394_v30  ;;  %v3877_v58 = vmax.f32 %v7465_v17, 0.0 }
 0x4d3   :  { %v11385_v49 = vadd.f32 %v3874_v39, %v13445_v61  ;;  %v7467_v39 = vadd.f32 %v13450_v16, %v10963_v6  ;;  %v13451_v61 = vld [vmem:[#allocation155_spill] sm:$0xff]  ;;  %v11408_v17 = vadd.f32 %v3877_v58, %v13453_v12  ;;  %v13455_v16 = vld [vmem:[#allocation154_spill] sm:$0xff] }
 0x4d4   :  { %4765 = vmatmul.mubr.f32.gmra.mrb[240].mxu0 %v11352_v8  ;;  %5279 = vmatmul.mubr.f32.gmra.mrb[240].mxu1 %v11352_v8  ;;  %v7468_v8 = vadd.f32 %v13447_v35, %v10949_v28  ;;  %v7470_v35 = vadd.f32 %v10968_v60, %v10949_v28  ;;  %v7472_v60 = vadd.f32 %v10988_v1, %v10949_v28  ;;  %v13457_v58 = vld [vmem:[#allocation130_spill] sm:$0xff]  ;;  %v13461_v28 = vld [vmem:[#allocation133_spill] sm:$0xff] }
 0x4d5   :  { %4770 = vmatprep.mubr.f32.mxu0 %v11357_v56  ;;  %5284 = vmatprep.mubr.f32.mxu1 %v11357_v56  ;;  %13446 = vst [vmem:[#allocation172_spill] sm:$0xff] %v11385_v49  ;;  %v3878_v56 = vmax.f32 %v7466_v24, 0.0  ;;  %13454 = vst [vmem:[#allocation112_spill] sm:$0xff] %v11408_v17  ;;  %v3881_v18 = vmax.f32 %v7467_v39, 0.0 }
 0x4d7   :  { %v11399_v24 = vadd.f32 %v3878_v56, %v13451_v61  ;;  %v7469_v56 = vadd.f32 %v10959_v41, %v10963_v6  ;;  %v3886_v61 = vmax.f32 %v7470_v35, 0.0  ;;  %v11422_v39 = vadd.f32 %v3881_v18, %v13457_v58 }
 0x4d8   :  { %4771 = vmatmul.mubr.f32.gmra.mrb[242].mxu0 %v11366_v59  ;;  %5285 = vmatmul.mubr.f32.gmra.mrb[242].mxu1 %v11366_v59  ;;  %v7471_v41 = vadd.f32 %v10980_v62, %v10963_v6  ;;  %v13465_v6 = vld [vmem:[#allocation132_spill] sm:$0xff] }
 0x4d9   :  { %4776 = vmatprep.mubr.f32.mxu0 %v11371_v53  ;;  %5290 = vmatprep.mubr.f32.mxu1 %v11371_v53  ;;  %13452 = vst [vmem:[#allocation109_spill] sm:$0xff] %v11399_v24  ;;  %v3882_v53 = vmax.f32 %v7468_v8, 0.0  ;;  %13458 = vst [vmem:[#allocation139_spill] sm:$0xff] %v11422_v39  ;;  %v3885_v12 = vmax.f32 %v7469_v56, 0.0  ;;  %v13463_v56 = vld [vmem:[#allocation156_spill] sm:$0xff] }
 0x4da   :  { %v3889_v18 = vmax.f32 %v7471_v41, 0.0 }
 0x4db   :  { %v11413_v8 = vadd.f32 %v3882_v53, %v13455_v16  ;;  %v13459_v53 = vld [vmem:[#allocation157_spill] sm:$0xff]  ;;  %v3890_v16 = vmax.f32 %v7472_v60, 0.0  ;;  %v11434_v1 = vadd.f32 %v3885_v12, %v13461_v28  ;;  %v13467_v60 = vld [vmem:[#allocation18_spill] sm:$0xff]  ;;  %v13469_v28 = vld [vmem:[#allocation88_spill] sm:$0xff] }
 0x4dc   :  { %4777 = vmatmul.mubr.f32.gmra.mrb[244].mxu0 %v11380_v63  ;;  %5291 = vmatmul.mubr.f32.gmra.mrb[244].mxu1 %v11380_v63  ;;  %v11427_v35 = vadd.f32 %v3886_v61, %v13459_v53  ;;  %v11444_v62 = vadd.f32 %v3889_v18, %v13465_v6  ;;  %v4277_v61 = vld [vmem:[#allocation9 + $0x8] sm:$0xf] }
 0x4dd   :  { %4782 = vmatprep.mubr.f32.mxu0 %v11385_v49  ;;  %5296 = vmatprep.mubr.f32.mxu1 %v11385_v49  ;;  %13456 = vst [vmem:[#allocation89_spill] sm:$0xff] %v11413_v8  ;;  %13462 = vst [vmem:[#allocation115_spill] sm:$0xff] %v11434_v1  ;;  %v11437_v58 = vadd.f32 %v3890_v16, %v13463_v56  ;;  %v11449_v12 = vrot.slane %v4277_v61, %v13467_v60  ;;  %v13468_v53 = vld [vmem:[#allocation19_spill] sm:$0xff] }
 0x4de   :  { %13460 = vst [vmem:[#allocation108_spill] sm:$0xff] %v11427_v35  ;;  %13466 = vst [vmem:[#allocation138_spill] sm:$0xff] %v11444_v62  ;;  %v11452_v41 = vrot.slane %v4277_v61, %v13341_v52  ;;  %v11455_v16 = vrot.slane %v4277_v61, %v13468_v53  ;;  %v11458_v56 = vrot.slane %v4277_v61, %v13469_v28 }
 0x4df   :  { %13464 = vst [vmem:[#allocation135_spill] sm:$0xff] %v11437_v58 }
 0x4e0   :  { %4783 = vmatmul.mubr.f32.gmra.mrb[246].mxu0 %v11394_v30  ;;  %5297 = vmatmul.mubr.f32.gmra.mrb[246].mxu1 %v11394_v30 }
 0x4e1   :  { %4788 = vmatprep.mubr.f32.mxu0 %v11399_v24  ;;  %5302 = vmatprep.mubr.f32.mxu1 %v11399_v24 }
 0x4e4   :  { %4789 = vmatmul.mubr.f32.gmra.mrb[248].mxu0 %v11408_v17  ;;  %5303 = vmatmul.mubr.f32.gmra.mrb[248].mxu1 %v11408_v17 }
 0x4e5   :  { %4794 = vmatprep.mubr.f32.mxu0 %v11413_v8  ;;  %5308 = vmatprep.mubr.f32.mxu1 %v11413_v8 }
 0x4e8   :  { %4795 = vmatmul.mubr.f32.gmra.mrb[250].mxu0 %v11422_v39  ;;  %5309 = vmatmul.mubr.f32.gmra.mrb[250].mxu1 %v11422_v39 }
 0x4e9   :  { %4800 = vmatprep.mubr.f32.mxu0 %v11427_v35  ;;  %5314 = vmatprep.mubr.f32.mxu1 %v11427_v35  ;;  %v5583_v35 = vld [vmem:[#allocation11] sm:$0xf] }
 0x4ea   :  { %v11465_v30 = vrot.slane %v5583_v35, %v13467_v60  ;;  %v11468_v63 = vrot.slane %v5583_v35, %v13468_v53  ;;  %v13471_v60 = vld [vmem:[#allocation159_spill] sm:$0xff] }
 0x4ec   :  { %4801 = vmatmul.mubr.f32.gmra.mrb[252].mxu0 %v11434_v1  ;;  %5315 = vmatmul.mubr.f32.gmra.mrb[252].mxu1 %v11434_v1 }
 0x4ed   :  { %4806 = vmatprep.mubr.f32.mxu0 %v11437_v58  ;;  %5320 = vmatprep.mubr.f32.mxu1 %v11437_v58 }
 0x4f0   :  { %4807 = vmatmul.mubr.f32.gmra.mrb[254].mxu0 %v11444_v62  ;;  %5321 = vmatmul.mubr.f32.gmra.mrb[254].mxu1 %v11444_v62 }
 0x547   :  { %v4622_v58 = vpop.f32.mrb[192].mxu0  ;;  %v5136_v18 = vpop.f32.mrb[192].mxu1 }
 0x548   :  { %v7473_v6 = vadd.f32 %v4622_v58, %v11449_v12  ;;  %v7537_v62 = vadd.f32 %v5136_v18, %v11452_v41  ;;  %v4624_v1 = vpop.f32.mrb[193].mxu0  ;;  %v5138_v8 = vpop.f32.mrb[193].mxu1 }
 0x549   :  { %v7474_v24 = vadd.f32 %v4624_v1, %v11455_v16  ;;  %v7538_v39 = vadd.f32 %v5138_v8, %v11458_v56  ;;  %v11474_v8 = vrot.slane %v5583_v35, %v13341_v52 }
 0x54a   :  { %v5327_v17 = vmax.f32 %v7473_v6, 0.0  ;;  %v5329_v49 = vmax.f32 %v7537_v62, 0.0 }
 0x54b   :  { %v5328_v61 = vmax.f32 %v7474_v24, 0.0  ;;  %v5330_v59 = vmax.f32 %v7538_v39, 0.0  ;;  %v4628_v58 = vpop.f32.mrb[194].mxu0  ;;  %v5142_v3 = vpop.f32.mrb[194].mxu1  ;;  %v11480_v39 = vrot.slane %v5583_v35, %v13469_v28 }
 0x54c   :  { %v5455_v18 = vadd.f32 %v5327_v17, %v13470_v2  ;;  %v7475_v14 = vadd.f32 %v4628_v58, %v11449_v12  ;;  %v7539_v1 = vadd.f32 %v5142_v3, %v11452_v41  ;;  %v4630_v62 = vpop.f32.mrb[195].mxu0  ;;  %v5144_v6 = vpop.f32.mrb[195].mxu1  ;;  %v5457_v2 = vadd.f32 %v5329_v49, %v11016_v31 }
 0x54d   :  { %v5456_v32 = vadd.f32 %v5328_v61, %v13471_v60  ;;  %v7476_v24 = vadd.f32 %v4630_v62, %v11455_v16  ;;  %v7540_v53 = vadd.f32 %v5144_v6, %v11458_v56  ;;  %v5458_v17 = vadd.f32 %v5330_v59, %v11005_v4  ;;  %v13472_v62 = vld [vmem:[#allocation134_spill] sm:$0xff] }
 0x54e   :  { %v5331_v58 = vmax.f32 %v7475_v14, 0.0  ;;  %v5333_v3 = vmax.f32 %v7539_v1, 0.0  ;;  %v5605_v52 = vmul.f32 %v11465_v30, %v5455_v18  ;;  %v5607_v18 = vmul.f32 %v11474_v8, %v5457_v2 }
 0x54f   :  { %v5606_v37 = vmul.f32 %v11468_v63, %v5456_v32  ;;  %v5332_v15 = vmax.f32 %v7476_v24, 0.0  ;;  %v5334_v7 = vmax.f32 %v7540_v53, 0.0  ;;  %v4634_v61 = vpop.f32.mrb[196].mxu0  ;;  %v5148_v60 = vpop.f32.mrb[196].mxu1  ;;  %v5608_v1 = vmul.f32 %v11480_v39, %v5458_v17  ;;  %v13473_v24 = vld [vmem:[#allocation158_spill] sm:$0xff] }
 0x550   :  { %v5459_v50 = vadd.f32 %v5331_v58, %v13472_v62  ;;  %v7477_v6 = vadd.f32 %v4634_v61, %v11449_v12  ;;  %v7541_v35 = vadd.f32 %v5148_v60, %v11452_v41  ;;  %v4636_v28 = vpop.f32.mrb[197].mxu0  ;;  %v5150_v31 = vpop.f32.mrb[197].mxu1  ;;  %v5461_v4 = vadd.f32 %v5333_v3, %v11030_v19  ;;  %v13474_v17 = vld [vmem:[#allocation74_spill] sm:$0xff] }
 0x551   :  { %v7478_v14 = vadd.f32 %v4636_v28, %v11455_v16  ;;  %v7542_v59 = vadd.f32 %v5150_v31, %v11458_v56  ;;  %v5460_v53 = vadd.f32 %v5332_v15, %v13473_v24  ;;  %v5462_v58 = vadd.f32 %v5334_v7, %v11021_v0 }
 0x552   :  { %v5335_v49 = vmax.f32 %v7477_v6, 0.0  ;;  %v5337_v32 = vmax.f32 %v7541_v35, 0.0  ;;  %v5733_v11 = vadd.f32 %v5606_v37, %v5605_v52  ;;  %v5609_v19 = vmul.f32 %v11465_v30, %v5459_v50  ;;  %v13475_v37 = vld [vmem:[#allocation161_spill] sm:$0xff] }
 0x553   :  { %v5336_v61 = vmax.f32 %v7478_v14, 0.0  ;;  %v4640_v60 = vpop.f32.mrb[198].mxu0  ;;  %v5154_v62 = vpop.f32.mrb[198].mxu1  ;;  %v5338_v3 = vmax.f32 %v7542_v59, 0.0  ;;  %v5611_v2 = vmul.f32 %v11474_v8, %v5461_v4  ;;  %v5610_v59 = vmul.f32 %v11468_v63, %v5460_v53 }
 0x554   :  { %v7479_v28 = vadd.f32 %v4640_v60, %v11449_v12  ;;  %v7543_v6 = vadd.f32 %v5154_v62, %v11452_v41  ;;  %v4642_v35 = vpop.f32.mrb[199].mxu0  ;;  %v5156_v31 = vpop.f32.mrb[199].mxu1  ;;  %v5463_v45 = vadd.f32 %v5335_v49, %v13474_v17  ;;  %v5465_v7 = vadd.f32 %v5337_v32, %v11044_v36  ;;  %v13476_v49 = vld [vmem:[#allocation66_spill] sm:$0xff] }
 0x555   :  { %v7480_v15 = vadd.f32 %v4642_v35, %v11455_v16  ;;  %v7544_v0 = vadd.f32 %v5156_v31, %v11458_v56  ;;  %v5464_v52 = vadd.f32 %v5336_v61, %v13475_v37  ;;  %v5734_v25 = vadd.f32 %v5733_v11, %v5607_v18  ;;  %v13478_v37 = vld [vmem:[#allocation78_spill] sm:$0xff] }
 0x556   :  { %v5339_v50 = vmax.f32 %v7479_v28, 0.0  ;;  %v5341_v14 = vmax.f32 %v7543_v6, 0.0  ;;  %v5466_v4 = vadd.f32 %v5338_v3, %v11035_v27  ;;  %v5613_v61 = vmul.f32 %v11465_v30, %v5463_v45  ;;  %v13477_v27 = vld [vmem:[#allocation160_spill] sm:$0xff] }
 0x557   :  { %v5340_v24 = vmax.f32 %v7480_v15, 0.0  ;;  %v5342_v60 = vmax.f32 %v7544_v0, 0.0  ;;  %v4646_v62 = vpop.f32.mrb[200].mxu0  ;;  %v5160_v22 = vpop.f32.mrb[200].mxu1  ;;  %v5735_v53 = vadd.f32 %v5734_v25, %v5608_v1  ;;  %v5615_v15 = vmul.f32 %v11474_v8, %v5465_v7 }
 0x558   :  { %v5467_v17 = vadd.f32 %v5339_v50, %v13476_v49  ;;  %v7481_v35 = vadd.f32 %v4646_v62, %v11449_v12  ;;  %v7545_v31 = vadd.f32 %v5160_v22, %v11452_v41  ;;  %v4648_v36 = vpop.f32.mrb[201].mxu0  ;;  %v5162_v32 = vpop.f32.mrb[201].mxu1  ;;  %v5469_v28 = vadd.f32 %v5341_v14, %v11058_v47 }
 0x559   :  { %v7482_v6 = vadd.f32 %v4648_v36, %v11455_v16  ;;  %v5614_v11 = vmul.f32 %v11468_v63, %v5464_v52  ;;  %v5468_v18 = vadd.f32 %v5340_v24, %v13477_v27  ;;  %v11520_v22 = vadd.f32 %v5342_v60, %v11049_v9  ;;  %5736 = vadd.xlane.f32.xlu0 %v5735_v53  ;;  %v13479_v9 = vld [vmem:[#allocation163_spill] sm:$0xff] }
 0x55a   :  { %v5343_v3 = vmax.f32 %v7481_v35, 0.0  ;;  %v11517_v0 = vmul.f32 %v11465_v30, %v5467_v17  ;;  %v7546_v47 = vadd.f32 %v5162_v32, %v11458_v56  ;;  %v5345_v7 = vmax.f32 %v7545_v31, 0.0 }
 0x55b   :  { %v5344_v45 = vmax.f32 %v7482_v6, 0.0  ;;  %v4652_v25 = vpop.f32.mrb[202].mxu0  ;;  %v5166_v1 = vpop.f32.mrb[202].mxu1  ;;  %v11527_v49 = vmul.f32 %v11474_v8, %v5469_v28  ;;  %v5738_v17 = vadd.f32 %v5610_v59, %v5609_v19  ;;  %v5618_v31 = vmul.f32 %v11468_v63, %v5468_v18  ;;  %v13480_v18 = vld [vmem:[#allocation69_spill] sm:$0xff] }
 0x55c   :  { %v5471_v50 = vadd.f32 %v5343_v3, %v13478_v37  ;;  %v7483_v52 = vadd.f32 %v4652_v25, %v11449_v12  ;;  %v7547_v14 = vadd.f32 %v5166_v1, %v11452_v41  ;;  %v4654_v24 = vpop.f32.mrb[203].mxu0  ;;  %v5168_v62 = vpop.f32.mrb[203].mxu1  ;;  %v5346_v36 = vmax.f32 %v7546_v47, 0.0 }
 0x55d   :  { %v5472_v60 = vadd.f32 %v5344_v45, %v13479_v9  ;;  %v7484_v35 = vadd.f32 %v4654_v24, %v11455_v16  ;;  %v7548_v6 = vadd.f32 %v5168_v62, %v11458_v56  ;;  %v5612_v27 = vmul.f32 %v11480_v39, %v5462_v58  ;;  %v13481_v62 = vld [vmem:[#allocation162_spill] sm:$0xff] }
 0x55e   :  { %v5347_v32 = vmax.f32 %v7483_v52, 0.0  ;;  %v5349_v53 = vmax.f32 %v7547_v14, 0.0  ;;  %v5739_v3 = vadd.f32 %v5738_v17, %v5611_v2  ;;  %v11535_v28 = vmul.f32 %v11465_v30, %v5471_v50 }
 0x55f   :  { %v5348_v25 = vmax.f32 %v7484_v35, 0.0  ;;  %v4658_v1 = vpop.f32.mrb[204].mxu0  ;;  %v5172_v37 = vpop.f32.mrb[204].mxu1  ;;  %v11538_v19 = vadd.f32 %v5345_v7, %v11072_v21  ;;  %v11541_v59 = vmul.f32 %v11468_v63, %v5472_v60  ;;  %v11548_v50 = vadd.f32 %v5346_v36, %v11063_v57 }
 0x560   :  { %v7485_v45 = vadd.f32 %v4658_v1, %v11449_v12  ;;  %v4660_v47 = vpop.f32.mrb[205].mxu0  ;;  %v5174_v52 = vpop.f32.mrb[205].mxu1  ;;  %v5475_v14 = vadd.f32 %v5347_v32, %v13480_v18  ;;  %v5477_v58 = vadd.f32 %v5349_v53, %v11086_v20  ;;  %v5740_v2 = vadd.f32 %v5739_v3, %v5612_v27  ;;  %v13482_v20 = vld [vmem:[#allocation82_spill] sm:$0xff] }
 0x561   :  { %v7549_v24 = vadd.f32 %v5172_v37, %v11452_v41  ;;  %v5476_v21 = vadd.f32 %v5348_v25, %v13481_v62  ;;  %v5350_v7 = vmax.f32 %v7548_v6, 0.0  ;;  %v5616_v17 = vmul.f32 %v11480_v39, %v5466_v4 }
 0x562   :  { %v5351_v9 = vmax.f32 %v7485_v45, 0.0  ;;  %5741 = vadd.xlane.f32.xlu0 %v5740_v2  ;;  %v5743_v35 = vadd.f32 %v5614_v11, %v5613_v61  ;;  %v7486_v1 = vadd.f32 %v4660_v47, %v11455_v16  ;;  %v7550_v27 = vadd.f32 %v5174_v52, %v11458_v56 }
 0x563   :  { %v5353_v60 = vmax.f32 %v7549_v24, 0.0  ;;  %v4664_v32 = vpop.f32.mrb[206].mxu0  ;;  %v5178_v18 = vpop.f32.mrb[206].mxu1  ;;  %v11558_v25 = vmul.f32 %v11465_v30, %v5475_v14  ;;  %v11561_v4 = vmul.f32 %v11474_v8, %v5477_v58  ;;  %v11564_v37 = vadd.f32 %v5350_v7, %v11077_v13 }
 0x564   :  { %v5479_v53 = vadd.f32 %v5351_v9, %v13482_v20  ;;  %v7487_v57 = vadd.f32 %v4664_v32, %v11449_v12  ;;  %v7551_v36 = vadd.f32 %v5178_v18, %v11452_v41  ;;  %v4666_v3 = vpop.f32.mrb[207].mxu0  ;;  %v5180_v6 = vpop.f32.mrb[207].mxu1  ;;  %v5744_v61 = vadd.f32 %v5743_v35, %v5615_v15  ;;  %v13483_v15 = vld [vmem:[#allocation165_spill] sm:$0xff] }
 0x565   :  { %v5352_v11 = vmax.f32 %v7486_v1, 0.0  ;;  %v5481_v45 = vadd.f32 %v5353_v60, %v11100_v43  ;;  %v5626_v2 = vmul.f32 %v11468_v63, %v5476_v21  ;;  %v5354_v62 = vmax.f32 %v7550_v27, 0.0  ;;  %v13484_v21 = vld [vmem:[#allocation167_spill] sm:$0xff] }
 0x566   :  { %v5355_v47 = vmax.f32 %v7487_v57, 0.0  ;;  %v5357_v52 = vmax.f32 %v7551_v36, 0.0  ;;  %v5745_v24 = vadd.f32 %v5744_v61, %v5616_v17  ;;  %v5748_v9 = vadd.f32 %v5618_v31, %v11517_v0 }
 0x567   :  { %v4670_v14 = vpop.f32.mrb[208].mxu0  ;;  %v5184_v32 = vpop.f32.mrb[208].mxu1  ;;  %v11570_v58 = vmul.f32 %v11465_v30, %v5479_v53  ;;  %v5480_v35 = vadd.f32 %v5352_v11, %v13483_v15  ;;  %v5620_v13 = vmul.f32 %v11480_v39, %v11520_v22  ;;  %v7488_v43 = vadd.f32 %v4666_v3, %v11455_v16  ;;  %v13485_v11 = vld [vmem:[#allocation164_spill] sm:$0xff] }
 0x568   :  { %v4672_v7 = vpop.f32.mrb[209].mxu0  ;;  %v5186_v60 = vpop.f32.mrb[209].mxu1  ;;  %5746 = vadd.xlane.f32.xlu0 %v5745_v24  ;;  %v5483_v17 = vadd.f32 %v5355_v47, %v13484_v21  ;;  %v5749_v1 = vadd.f32 %v5748_v9, %v11527_v49  ;;  %v7552_v0 = vadd.f32 %v5180_v6, %v11458_v56  ;;  %v7489_v31 = vadd.f32 %v4670_v14, %v11449_v12 }
 0x569   :  { %v11581_v18 = vmul.f32 %v11474_v8, %v5481_v45  ;;  %v5485_v20 = vadd.f32 %v5357_v52, %v11114_v46  ;;  %v5356_v53 = vmax.f32 %v7488_v43, 0.0  ;;  %v7553_v22 = vadd.f32 %v5184_v32, %v11452_v41 }
 0x56a   :  { %v11586_v27 = vadd.f32 %v5354_v62, %v11091_v26  ;;  %v5750_v57 = vadd.f32 %v5749_v1, %v5620_v13  ;;  %v5358_v36 = vmax.f32 %v7552_v0, 0.0  ;;  %v5359_v3 = vmax.f32 %v7489_v31, 0.0 }
 0x56b   :  { %v4676_v61 = vpop.f32.mrb[210].mxu0  ;;  %v5190_v49 = vpop.f32.mrb[210].mxu1  ;;  %v5484_v6 = vadd.f32 %v5356_v53, %v13485_v11  ;;  %v5361_v47 = vmax.f32 %v7553_v22, 0.0  ;;  %v5623_v45 = vmul.f32 %v11474_v8, %v11538_v19  ;;  %v5753_v46 = vadd.f32 %v11541_v59, %v11535_v28  ;;  %v13487_v53 = vld [vmem:[#allocation86_spill] sm:$0xff] }
 0x56c   :  { %v4678_v52 = vpop.f32.mrb[211].mxu0  ;;  %v5192_v24 = vpop.f32.mrb[211].mxu1  ;;  %v5630_v9 = vmul.f32 %v11468_v63, %v5480_v35  ;;  %v11595_v26 = vmul.f32 %v11465_v30, %v5483_v17  ;;  %5751 = vadd.xlane.f32.xlu0 %v5750_v57  ;;  %v7490_v62 = vadd.f32 %v4672_v7, %v11455_v16  ;;  %v7554_v14 = vadd.f32 %v5186_v60, %v11458_v56  ;;  %v13486_v35 = vld [vmem:[#allocation77_spill] sm:$0xff] }
 0x56d   :  { %v11600_v32 = vmul.f32 %v11474_v8, %v5485_v20  ;;  %v5624_v19 = vmul.f32 %v11480_v39, %v11548_v50  ;;  %v5754_v15 = vadd.f32 %v5753_v46, %v5623_v45  ;;  %v7491_v28 = vadd.f32 %v4676_v61, %v11449_v12 }
 0x56e   :  { %v11606_v59 = vadd.f32 %v5358_v36, %v11105_v54  ;;  %v5487_v13 = vadd.f32 %v5359_v3, %v13486_v35  ;;  %v5360_v43 = vmax.f32 %v7490_v62, 0.0  ;;  %v7555_v21 = vadd.f32 %v5190_v49, %v11452_v41  ;;  %v13488_v3 = vld [vmem:[#allocation81_spill] sm:$0xff] }
 0x56f   :  { %v4682_v7 = vpop.f32.mrb[212].mxu0  ;;  %v5196_v17 = vpop.f32.mrb[212].mxu1  ;;  %v5634_v60 = vmul.f32 %v11468_v63, %v5484_v6  ;;  %v5489_v1 = vadd.f32 %v5361_v47, %v11128_v55  ;;  %v5755_v0 = vadd.f32 %v5754_v15, %v5624_v19  ;;  %v5363_v31 = vmax.f32 %v7491_v28, 0.0 }
 0x570   :  { %v4684_v50 = vpop.f32.mrb[213].mxu0  ;;  %v5198_v20 = vpop.f32.mrb[213].mxu1  ;;  %v5488_v22 = vadd.f32 %v5360_v43, %v13487_v53  ;;  %v5362_v57 = vmax.f32 %v7554_v14, 0.0  ;;  %v5365_v54 = vmax.f32 %v7555_v21, 0.0  ;;  %v5758_v36 = vadd.f32 %v5626_v2, %v11558_v25  ;;  %v13489_v21 = vld [vmem:[#allocation91_spill] sm:$0xff] }
 0x571   :  { %5756 = vadd.xlane.f32.xlu1 %v5755_v0  ;;  %v5491_v61 = vadd.f32 %v5363_v31, %v13488_v3  ;;  %v7492_v49 = vadd.f32 %v4678_v52, %v11455_v16  ;;  %v7556_v11 = vadd.f32 %v5192_v24, %v11458_v56  ;;  %v7493_v6 = vadd.f32 %v4682_v7, %v11449_v12  ;;  %v13490_v3 = vld [vmem:[#allocation85_spill] sm:$0xff] }
 0x572   :  { %v5493_v55 = vadd.f32 %v5365_v54, %v11142_v44  ;;  %v5628_v47 = vmul.f32 %v11480_v39, %v11564_v37  ;;  %v5759_v45 = vadd.f32 %v5758_v36, %v11561_v4  ;;  %v7557_v46 = vadd.f32 %v5196_v17, %v11452_v41 }
 0x573   :  { %v4688_v62 = vpop.f32.mrb[214].mxu0  ;;  %v5202_v25 = vpop.f32.mrb[214].mxu1  ;;  %v5637_v2 = vmul.f32 %v11465_v30, %v5487_v13  ;;  %v11625_v14 = vmul.f32 %v11474_v8, %v5489_v1  ;;  %v5364_v52 = vmax.f32 %v7492_v49, 0.0  ;;  %v5366_v24 = vmax.f32 %v7556_v11, 0.0 }
 0x574   :  { %v4690_v19 = vpop.f32.mrb[215].mxu0  ;;  %v5204_v15 = vpop.f32.mrb[215].mxu1  ;;  %v11628_v44 = vadd.f32 %v5362_v57, %v11119_v42  ;;  %v5760_v28 = vadd.f32 %v5759_v45, %v5628_v47  ;;  %v5367_v37 = vmax.f32 %v7493_v6, 0.0  ;;  %v5369_v35 = vmax.f32 %v7557_v46, 0.0  ;;  %v13491_v47 = vld [vmem:[#allocation96_spill] sm:$0xff] }
 0x575   :  { %v5638_v4 = vmul.f32 %v11468_v63, %v5488_v22  ;;  %v11632_v43 = vmul.f32 %v11465_v30, %v5491_v61  ;;  %v5492_v13 = vadd.f32 %v5364_v52, %v13489_v21  ;;  %v5763_v7 = vadd.f32 %v5630_v9, %v11570_v58 }
 0x576   :  { %v11637_v17 = vmul.f32 %v11474_v8, %v5493_v55  ;;  %5761 = vadd.xlane.f32.xlu1 %v5760_v28  ;;  %v7494_v1 = vadd.f32 %v4684_v50, %v11455_v16  ;;  %v7558_v42 = vadd.f32 %v5198_v20, %v11458_v56  ;;  %v7495_v0 = vadd.f32 %v4688_v62, %v11449_v12 }
 0x577   :  { %v4694_v31 = vpop.f32.mrb[216].mxu0  ;;  %v5208_v53 = vpop.f32.mrb[216].mxu1  ;;  %v11643_v22 = vadd.f32 %v5366_v24, %v11133_v40  ;;  %v5632_v57 = vmul.f32 %v11480_v39, %v11586_v27  ;;  %v5764_v58 = vadd.f32 %v5763_v7, %v11581_v18  ;;  %v7559_v9 = vadd.f32 %v5202_v25, %v11452_v41 }
 0x578   :  { %v4696_v54 = vpop.f32.mrb[217].mxu0  ;;  %v5210_v36 = vpop.f32.mrb[217].mxu1  ;;  %v5495_v50 = vadd.f32 %v5367_v37, %v13490_v3  ;;  %v5497_v20 = vadd.f32 %v5369_v35, %v11156_v29  ;;  %v5368_v61 = vmax.f32 %v7494_v1, 0.0  ;;  %v5371_v49 = vmax.f32 %v7495_v0, 0.0  ;;  %v13492_v29 = vld [vmem:[#allocation90_spill] sm:$0xff] }
 0x579   :  { %v5642_v11 = vmul.f32 %v11468_v63, %v5492_v13  ;;  %v5765_v6 = vadd.f32 %v5764_v58, %v5632_v57  ;;  %v5373_v40 = vmax.f32 %v7559_v9, 0.0  ;;  %v5768_v55 = vadd.f32 %v5634_v60, %v11595_v26 }
 0x57a   :  { %v5496_v27 = vadd.f32 %v5368_v61, %v13491_v47  ;;  %v5370_v45 = vmax.f32 %v7558_v42, 0.0  ;;  %v5636_v18 = vmul.f32 %v11480_v39, %v11606_v59  ;;  %v7496_v46 = vadd.f32 %v4690_v19, %v11455_v16  ;;  %v13493_v42 = vld [vmem:[#allocation100_spill] sm:$0xff] }
 0x57b   :  { %v4700_v62 = vpop.f32.mrb[218].mxu0  ;;  %v5214_v25 = vpop.f32.mrb[218].mxu1  ;;  %5766 = vadd.xlane.f32.xlu1 %v5765_v6  ;;  %v5499_v52 = vadd.f32 %v5371_v49, %v13492_v29  ;;  %v5769_v24 = vadd.f32 %v5768_v55, %v11600_v32  ;;  %v7560_v28 = vadd.f32 %v5204_v15, %v11458_v56  ;;  %v7497_v37 = vadd.f32 %v4694_v31, %v11449_v12  ;;  %v13495_v29 = vld [vmem:[#allocation105_spill] sm:$0xff] }
 0x57c   :  { %v4702_v26 = vpop.f32.mrb[219].mxu0  ;;  %v5216_v60 = vpop.f32.mrb[219].mxu1  ;;  %v11662_v35 = vmul.f32 %v11465_v30, %v5495_v50  ;;  %v5501_v59 = vadd.f32 %v5373_v40, %v11170_v34  ;;  %v5372_v21 = vmax.f32 %v7496_v46, 0.0  ;;  %v7561_v19 = vadd.f32 %v5208_v53, %v11452_v41  ;;  %v13494_v40 = vld [vmem:[#allocation95_spill] sm:$0xff] }
 0x57d   :  { %v11667_v13 = vmul.f32 %v11474_v8, %v5497_v20  ;;  %v5770_v7 = vadd.f32 %v5769_v24, %v5636_v18  ;;  %v5374_v1 = vmax.f32 %v7560_v28, 0.0  ;;  %v5375_v32 = vmax.f32 %v7497_v37, 0.0  ;;  %v13496_v37 = vld [vmem:[#allocation104_spill] sm:$0xff] }
 0x57e   :  { %v11670_v15 = vadd.f32 %v5370_v45, %v11147_v38  ;;  %v5500_v0 = vadd.f32 %v5372_v21, %v13493_v42  ;;  %v5377_v31 = vmax.f32 %v7561_v19, 0.0  ;;  %v5773_v57 = vadd.f32 %v5638_v4, %v5637_v2 }
 0x57f   :  { %v4706_v58 = vpop.f32.mrb[220].mxu0  ;;  %v5220_v9 = vpop.f32.mrb[220].mxu1  ;;  %v5646_v34 = vmul.f32 %v11468_v63, %v5496_v27  ;;  %v11675_v3 = vmul.f32 %v11465_v30, %v5499_v52  ;;  %5771 = vadd.xlane.f32.xlu1 %v5770_v7  ;;  %v7498_v53 = vadd.f32 %v4696_v54, %v11455_v16  ;;  %v7562_v50 = vadd.f32 %v5210_v36, %v11458_v56 }
 0x580   :  { %v4708_v20 = vpop.f32.mrb[221].mxu0  ;;  %v5222_v61 = vpop.f32.mrb[221].mxu1  ;;  %v11680_v38 = vmul.f32 %v11474_v8, %v5501_v59  ;;  %v5640_v2 = vmul.f32 %v11480_v39, %v11628_v44  ;;  %v5774_v4 = vadd.f32 %v5773_v57, %v11625_v14  ;;  %v7499_v49 = vadd.f32 %v4700_v62, %v11449_v12 }
 0x581   :  { %v11687_v6 = vadd.f32 %v5374_v1, %v11161_v51  ;;  %v5503_v55 = vadd.f32 %v5375_v32, %v13494_v40  ;;  %v5376_v54 = vmax.f32 %v7498_v53, 0.0  ;;  %v7563_v36 = vadd.f32 %v5214_v25, %v11452_v41 }
 0x582   :  { %v5650_v47 = vmul.f32 %v11468_v63, %v5500_v0  ;;  %v5505_v27 = vadd.f32 %v5377_v31, %v11184_v5  ;;  %v5775_v45 = vadd.f32 %v5774_v4, %v5640_v2  ;;  %v5379_v18 = vmax.f32 %v7499_v49, 0.0 }
 0x583   :  { %v4712_v46 = vpop.f32.mrb[222].mxu0  ;;  %v5226_v44 = vpop.f32.mrb[222].mxu1  ;;  %v5504_v14 = vadd.f32 %v5376_v54, %v13495_v29  ;;  %v5378_v52 = vmax.f32 %v7562_v50, 0.0  ;;  %v5381_v62 = vmax.f32 %v7563_v36, 0.0  ;;  %v5778_v51 = vadd.f32 %v5642_v11, %v11632_v43  ;;  %v13497_v50 = vld [vmem:[#allocation99_spill] sm:$0xff] }
 0x584   :  { %v4714_v24 = vpop.f32.mrb[223].mxu0  ;;  %v5228_v28 = vpop.f32.mrb[223].mxu1  ;;  %5776 = vadd.xlane.f32.xlu0 %v5775_v45  ;;  %v5507_v59 = vadd.f32 %v5379_v18, %v13496_v37  ;;  %v7500_v25 = vadd.f32 %v4702_v26, %v11455_v16  ;;  %v7564_v21 = vadd.f32 %v5216_v60, %v11458_v56  ;;  %v7501_v5 = vadd.f32 %v4706_v58, %v11449_v12  ;;  %v13498_v18 = vld [vmem:[#allocation22_spill] sm:$0xff]  ;;  %v13499_v37 = vld [vmem:[#allocation20_spill] sm:$0xff] }
 0x585   :  { %v5509_v19 = vadd.f32 %v5381_v62, %v11198_v48  ;;  %v5644_v7 = vmul.f32 %v11480_v39, %v11643_v22  ;;  %v5779_v1 = vadd.f32 %v5778_v51, %v11637_v17  ;;  %v7565_v43 = vadd.f32 %v5220_v9, %v11452_v41 }
 0x586   :  { %v5653_v11 = vmul.f32 %v11465_v30, %v5503_v55  ;;  %v11706_v32 = vmul.f32 %v11474_v8, %v5505_v27  ;;  %v5380_v42 = vmax.f32 %v7500_v25, 0.0  ;;  %v5382_v26 = vmax.f32 %v7564_v21, 0.0 }
 0x587   :  { %v4718_v0 = vpop.f32.mrb[224].mxu0  ;;  %v5232_v60 = vpop.f32.mrb[224].mxu1  ;;  %v11709_v31 = vadd.f32 %v5378_v52, %v11175_v33  ;;  %v5780_v48 = vadd.f32 %v5779_v1, %v5644_v7  ;;  %v5383_v57 = vmax.f32 %v7501_v5, 0.0  ;;  %v5385_v58 = vmax.f32 %v7565_v43, 0.0 }
 0x588   :  { %v4720_v22 = vpop.f32.mrb[225].mxu0  ;;  %v5234_v53 = vpop.f32.mrb[225].mxu1  ;;  %v5654_v17 = vmul.f32 %v11468_v63, %v5504_v14  ;;  %v11713_v9 = vmul.f32 %v11465_v30, %v5507_v59  ;;  %v5508_v2 = vadd.f32 %v5380_v42, %v13497_v50  ;;  %v5783_v4 = vadd.f32 %v5646_v34, %v11662_v35 }
 0x589   :  { %v11718_v49 = vmul.f32 %v11474_v8, %v5509_v19  ;;  %5781 = vadd.xlane.f32.xlu1 %v5780_v48  ;;  %v7502_v33 = vadd.f32 %v4708_v20, %v11455_v16  ;;  %v7566_v40 = vadd.f32 %v5222_v61, %v11458_v56  ;;  %v7503_v55 = vadd.f32 %v4712_v46, %v11449_v12 }
 0x58a   :  { %v11724_v54 = vadd.f32 %v5382_v26, %v11189_v23  ;;  %v5648_v36 = vmul.f32 %v11480_v39, %v11670_v15  ;;  %v5784_v27 = vadd.f32 %v5783_v4, %v11667_v13  ;;  %v7567_v35 = vadd.f32 %v5226_v44, %v11452_v41 }
 0x58b   :  { %v4724_v34 = vpop.f32.mrb[226].mxu0  ;;  %v5238_v45 = vpop.f32.mrb[226].mxu1  ;;  %v5511_v29 = vadd.f32 %v5383_v57, %v13498_v18  ;;  %v5513_v20 = vadd.f32 %v5385_v58, %v11212_v10  ;;  %v5384_v14 = vmax.f32 %v7502_v33, 0.0  ;;  %v5387_v61 = vmax.f32 %v7503_v55, 0.0  ;;  %v13500_v10 = vld [vmem:[#allocation24_spill] sm:$0xff]  ;;  %v13502_v58 = vld [vmem:[#allocation83_spill] sm:$0xff] }
 0x58c   :  { %v4726_v52 = vpop.f32.mrb[227].mxu0  ;;  %v5240_v46 = vpop.f32.mrb[227].mxu1  ;;  %v5658_v23 = vmul.f32 %v11468_v63, %v5508_v2  ;;  %v5785_v62 = vadd.f32 %v5784_v27, %v5648_v36  ;;  %v5389_v51 = vmax.f32 %v7567_v35, 0.0  ;;  %v5788_v15 = vadd.f32 %v5650_v47, %v11675_v3  ;;  %v13501_v47 = vld [vmem:[#allocation87_spill] sm:$0xff] }
 0x58d   :  { %v5512_v13 = vadd.f32 %v5384_v14, %v13499_v37  ;;  %v5386_v59 = vmax.f32 %v7566_v40, 0.0  ;;  %v5652_v44 = vmul.f32 %v11480_v39, %v11687_v6  ;;  %v7504_v25 = vadd.f32 %v4714_v24, %v11455_v16  ;;  %v13503_v2 = vld [vmem:[#allocation23_spill] sm:$0xff] }
 0x58e   :  { %5786 = vadd.xlane.f32.xlu0 %v5785_v62  ;;  %v5515_v21 = vadd.f32 %v5387_v61, %v13500_v10  ;;  %v5789_v5 = vadd.f32 %v5788_v15, %v11680_v38  ;;  %v7568_v19 = vadd.f32 %v5228_v28, %v11458_v56  ;;  %v7505_v7 = vadd.f32 %v4718_v0, %v11449_v12  ;;  %v13504_v62 = vld [vmem:[#allocation84_spill] sm:$0xff] }
 0x58f   :  { %v4730_v1 = vpop.f32.mrb[228].mxu0  ;;  %v5244_v43 = vpop.f32.mrb[228].mxu1  ;;  %v11743_v3 = vmul.f32 %v11465_v30, %v5511_v29  ;;  %v5517_v42 = vadd.f32 %v5389_v51, %v13501_v47  ;;  %v5388_v26 = vmax.f32 %v7504_v25, 0.0  ;;  %v7569_v6 = vadd.f32 %v5232_v60, %v11452_v41  ;;  %v13507_v25 = vld [vmem:[#allocation25_spill] sm:$0xff]  ;;  %v13508_v47 = vld [vmem:[#allocation28_spill] sm:$0xff] }
 0x590   :  { %v11747_v24 = vpop.f32.mrb[229].mxu0  ;;  %v11749_v48 = vpop.f32.mrb[229].mxu1  ;;  %v11752_v38 = vmul.f32 %v11474_v8, %v5513_v20  ;;  %v5790_v28 = vadd.f32 %v5789_v5, %v5652_v44  ;;  %v5390_v57 = vmax.f32 %v7568_v19, 0.0  ;;  %v5391_v0 = vmax.f32 %v7505_v7, 0.0 }
 0x591   :  { %v11755_v50 = vadd.f32 %v5386_v59, %v13502_v58  ;;  %v5516_v4 = vadd.f32 %v5388_v26, %v13503_v2  ;;  %v5393_v33 = vmax.f32 %v7569_v6, 0.0  ;;  %v5793_v40 = vadd.f32 %v5654_v17, %v5653_v11  ;;  %v13506_v59 = vld [vmem:[#allocation94_spill] sm:$0xff] }
 0x592   :  { %v5662_v55 = vmul.f32 %v11468_v63, %v5512_v13  ;;  %v11760_v60 = vmul.f32 %v11465_v30, %v5515_v21  ;;  %5791 = vadd.xlane.f32.xlu1 %v5790_v28  ;;  %v7506_v36 = vadd.f32 %v4720_v22, %v11455_v16  ;;  %v7570_v27 = vadd.f32 %v5234_v53, %v11458_v56  ;;  %v13505_v53 = vld [vmem:[#allocation26_spill] sm:$0xff] }
 0x593   :  { %v4736_v35 = vpop.f32.mrb[230].mxu0  ;;  %v5250_v18 = vpop.f32.mrb[230].mxu1  ;;  %v11765_v29 = vmul.f32 %v11474_v8, %v5517_v42  ;;  %v5656_v20 = vmul.f32 %v11480_v39, %v11709_v31  ;;  %v5794_v11 = vadd.f32 %v5793_v40, %v11706_v32  ;;  %v7507_v17 = vadd.f32 %v4724_v34, %v11449_v12 }
 0x594   :  { %v11771_v14 = vpop.f32.mrb[231].mxu0  ;;  %v11773_v61 = vpop.f32.mrb[231].mxu1  ;;  %v11776_v22 = vadd.f32 %v5390_v57, %v13504_v62  ;;  %v5519_v51 = vadd.f32 %v5391_v0, %v13505_v53  ;;  %v5392_v15 = vmax.f32 %v7506_v36, 0.0  ;;  %v7571_v37 = vadd.f32 %v5238_v45, %v11452_v41  ;;  %v13509_v0 = vld [vmem:[#allocation97_spill] sm:$0xff] }
 0x595   :  { %v5666_v13 = vmul.f32 %v11468_v63, %v5516_v4  ;;  %v5521_v31 = vadd.f32 %v5393_v33, %v13506_v59  ;;  %v5795_v44 = vadd.f32 %v5794_v11, %v5656_v20  ;;  %v5395_v32 = vmax.f32 %v7507_v17, 0.0  ;;  %v13510_v33 = vld [vmem:[#allocation92_spill] sm:$0xff] }
 0x596   :  { %v5520_v34 = vadd.f32 %v5392_v15, %v13507_v25  ;;  %v5394_v10 = vmax.f32 %v7570_v27, 0.0  ;;  %v5397_v21 = vmax.f32 %v7571_v37, 0.0  ;;  %v5798_v5 = vadd.f32 %v5658_v23, %v11713_v9 }
 0x597   :  { %v4742_v19 = vpop.f32.mrb[232].mxu0  ;;  %v5256_v7 = vpop.f32.mrb[232].mxu1  ;;  %5796 = vadd.xlane.f32.xlu1 %v5795_v44  ;;  %v5523_v42 = vadd.f32 %v5395_v32, %v13508_v47  ;;  %v7508_v26 = vadd.f32 %v4726_v52, %v11455_v16  ;;  %v7572_v45 = vadd.f32 %v5240_v46, %v11458_v56  ;;  %v7509_v6 = vadd.f32 %v4730_v1, %v11449_v12  ;;  %v13512_v32 = vld [vmem:[#allocation93_spill] sm:$0xff] }
 0x598   :  { %v11788_v28 = vpop.f32.mrb[233].mxu0  ;;  %v11790_v57 = vpop.f32.mrb[233].mxu1  ;;  %v5525_v58 = vadd.f32 %v5397_v21, %v13509_v0  ;;  %v5660_v9 = vmul.f32 %v11480_v39, %v11724_v54  ;;  %v5799_v23 = vadd.f32 %v5798_v5, %v11718_v49  ;;  %v7573_v2 = vadd.f32 %v5244_v43, %v11452_v41  ;;  %v13511_v43 = vld [vmem:[#allocation27_spill] sm:$0xff]  ;;  %v13514_v5 = vld [vmem:[#allocation101_spill] sm:$0xff] }
 0x599   :  { %v5669_v4 = vmul.f32 %v11465_v30, %v5519_v51  ;;  %v11799_v52 = vmul.f32 %v11474_v8, %v5521_v31  ;;  %v5396_v46 = vmax.f32 %v7508_v26, 0.0  ;;  %v5398_v1 = vmax.f32 %v7572_v45, 0.0 }
 0x59a   :  { %v11802_v40 = vadd.f32 %v5394_v10, %v13510_v33  ;;  %v5800_v36 = vadd.f32 %v5799_v23, %v5660_v9  ;;  %v5399_v27 = vmax.f32 %v7509_v6, 0.0  ;;  %v5401_v20 = vmax.f32 %v7573_v2, 0.0  ;;  %v13513_v10 = vld [vmem:[#allocation30_spill] sm:$0xff] }
 0x59b   :  { %v4748_v11 = vpop.f32.mrb[234].mxu0  ;;  %v11804_v17 = vpop.f32.mrb[234].mxu1  ;;  %v5670_v49 = vmul.f32 %v11468_v63, %v5520_v34  ;;  %v11808_v54 = vmul.f32 %v11465_v30, %v5523_v42  ;;  %v5524_v62 = vadd.f32 %v5396_v46, %v13511_v43  ;;  %v5803_v53 = vadd.f32 %v5662_v55, %v11743_v3  ;;  %v13516_v46 = vld [vmem:[#allocation32_spill] sm:$0xff] }
 0x59c   :  { %v11812_v51 = vpop.f32.mrb[235].mxu0  ;;  %v11814_v15 = vpop.f32.mrb[235].mxu1  ;;  %v11817_v37 = vmul.f32 %v11474_v8, %v5525_v58  ;;  %5801 = vadd.xlane.f32.xlu0 %v5800_v36  ;;  %v7510_v59 = vadd.f32 %v11747_v24, %v11455_v16  ;;  %v7574_v31 = vadd.f32 %v11749_v48, %v11458_v56  ;;  %v7511_v44 = vadd.f32 %v4736_v35, %v11449_v12 }
 0x59d   :  { %v11825_v25 = vadd.f32 %v5398_v1, %v13512_v32  ;;  %v5664_v3 = vmul.f32 %v11480_v39, %v11755_v50  ;;  %v5804_v55 = vadd.f32 %v5803_v53, %v11752_v38  ;;  %v7575_v34 = vadd.f32 %v5250_v18, %v11452_v41  ;;  %v13515_v18 = vld [vmem:[#allocation29_spill] sm:$0xff] }
 0x59e   :  { %v5527_v21 = vadd.f32 %v5399_v27, %v13513_v10  ;;  %v5529_v47 = vadd.f32 %v5401_v20, %v13514_v5  ;;  %v5400_v24 = vmax.f32 %v7510_v59, 0.0  ;;  %v5403_v42 = vmax.f32 %v7511_v44, 0.0  ;;  %v13517_v27 = vld [vmem:[#allocation103_spill] sm:$0xff]  ;;  %v13518_v44 = vld [vmem:[#allocation98_spill] sm:$0xff] }
 0x59f   :  { %v4754_v26 = vpop.f32.mrb[236].mxu0  ;;  %v11833_v48 = vpop.f32.mrb[236].mxu1  ;;  %v5674_v35 = vmul.f32 %v11468_v63, %v5524_v62  ;;  %v5805_v45 = vadd.f32 %v5804_v55, %v5664_v3  ;;  %v5405_v6 = vmax.f32 %v7575_v34, 0.0  ;;  %v5808_v0 = vadd.f32 %v5666_v13, %v11760_v60  ;;  %v13519_v3 = vld [vmem:[#allocation31_spill] sm:$0xff] }
 0x5a0   :  { %v11837_v50 = vpop.f32.mrb[237].mxu0  ;;  %v11839_v38 = vpop.f32.mrb[237].mxu1  ;;  %v5528_v58 = vadd.f32 %v5400_v24, %v13515_v18  ;;  %v5402_v9 = vmax.f32 %v7574_v31, 0.0  ;;  %v5668_v23 = vmul.f32 %v11480_v39, %v11776_v22  ;;  %v7512_v2 = vadd.f32 %v11771_v14, %v11455_v16 }
 0x5a1   :  { %5806 = vadd.xlane.f32.xlu0 %v5805_v45  ;;  %v5531_v1 = vadd.f32 %v5403_v42, %v13516_v46  ;;  %v5809_v33 = vadd.f32 %v5808_v0, %v11765_v29  ;;  %v7576_v60 = vadd.f32 %v11773_v61, %v11458_v56  ;;  %v7513_v13 = vadd.f32 %v4742_v19, %v11449_v12  ;;  %v13520_v0 = vld [vmem:[#allocation73_spill] sm:$0xff] }
 0x5a2   :  { %v11852_v36 = vmul.f32 %v11465_v30, %v5527_v21  ;;  %v5533_v20 = vadd.f32 %v5405_v6, %v13517_v27  ;;  %v5404_v43 = vmax.f32 %v7512_v2, 0.0  ;;  %v7577_v22 = vadd.f32 %v5256_v7, %v11452_v41 }
 0x5a3   :  { %v11856_v62 = vpop.f32.mrb[238].mxu0  ;;  %v11858_v14 = vpop.f32.mrb[238].mxu1  ;;  %v11861_v53 = vmul.f32 %v11474_v8, %v5529_v47  ;;  %v5810_v29 = vadd.f32 %v5809_v33, %v5668_v23  ;;  %v5406_v59 = vmax.f32 %v7576_v60, 0.0  ;;  %v5407_v61 = vmax.f32 %v7513_v13, 0.0  ;;  %v13523_v33 = vld [vmem:[#allocation33_spill] sm:$0xff] }
 0x5a4   :  { %v11863_v31 = vpop.f32.mrb[239].mxu0  ;;  %v11865_v19 = vpop.f32.mrb[239].mxu1  ;;  %v11868_v32 = vadd.f32 %v5402_v9, %v13518_v44  ;;  %v5532_v55 = vadd.f32 %v5404_v43, %v13519_v3  ;;  %v5409_v7 = vmax.f32 %v7577_v22, 0.0  ;;  %v5813_v34 = vadd.f32 %v5670_v49, %v5669_v4  ;;  %v13524_v43 = vld [vmem:[#allocation38_spill] sm:$0xff]  ;;  %v13525_v3 = vld [vmem:[#allocation107_spill] sm:$0xff] }
 0x5a5   :  { %v5678_v10 = vmul.f32 %v11468_v63, %v5528_v58  ;;  %v11873_v21 = vmul.f32 %v11465_v30, %v5531_v1  ;;  %5811 = vadd.xlane.f32.xlu1 %v5810_v29  ;;  %v7514_v5 = vadd.f32 %v11788_v28, %v11455_v16  ;;  %v7578_v47 = vadd.f32 %v11790_v57, %v11458_v56  ;;  %v13521_v28 = vld [vmem:[#allocation35_spill] sm:$0xff] }
 0x5a6   :  { %v11880_v24 = vmul.f32 %v11474_v8, %v5533_v20  ;;  %v5672_v42 = vmul.f32 %v11480_v39, %v11802_v40  ;;  %v5814_v4 = vadd.f32 %v5813_v34, %v11799_v52  ;;  %v7515_v49 = vadd.f32 %v4748_v11, %v11449_v12  ;;  %v13522_v11 = vld [vmem:[#allocation102_spill] sm:$0xff] }
 0x5a7   :  { %v11886_v45 = vpop.f32.mrb[240].mxu0  ;;  %v11888_v6 = vpop.f32.mrb[240].mxu1  ;;  %v11891_v18 = vadd.f32 %v5406_v59, %v13520_v0  ;;  %v5535_v58 = vadd.f32 %v5407_v61, %v13521_v28  ;;  %v5408_v57 = vmax.f32 %v7514_v5, 0.0  ;;  %v7579_v9 = vadd.f32 %v11804_v17, %v11452_v41  ;;  %v13527_v28 = vld [vmem:[#allocation36_spill] sm:$0xff] }
 0x5a8   :  { %v11896_v23 = vpop.f32.mrb[241].mxu0  ;;  %v11898_v40 = vpop.f32.mrb[241].mxu1  ;;  %v5682_v52 = vmul.f32 %v11468_v63, %v5532_v55  ;;  %v5537_v2 = vadd.f32 %v5409_v7, %v13522_v11  ;;  %v5815_v46 = vadd.f32 %v5814_v4, %v5672_v42  ;;  %v5411_v1 = vmax.f32 %v7515_v49, 0.0  ;;  %v13526_v42 = vld [vmem:[#allocation169_spill] sm:$0xff] }
 0x5a9   :  { %v5536_v60 = vadd.f32 %v5408_v57, %v13523_v33  ;;  %v5410_v13 = vmax.f32 %v7578_v47, 0.0  ;;  %v5413_v27 = vmax.f32 %v7579_v9, 0.0  ;;  %v5818_v20 = vadd.f32 %v5674_v35, %v11808_v54 }
 0x5aa   :  { %5816 = vadd.xlane.f32.xlu1 %v5815_v46  ;;  %v5539_v22 = vadd.f32 %v5411_v1, %v13524_v43  ;;  %v7516_v17 = vadd.f32 %v11812_v51, %v11455_v16  ;;  %v7580_v29 = vadd.f32 %v11814_v15, %v11458_v56  ;;  %v7517_v59 = vadd.f32 %v4754_v26, %v11449_v12  ;;  %v13529_v43 = vld [vmem:[#allocation42_spill] sm:$0xff] }
 0x5ab   :  { %v11910_v61 = vpop.f32.mrb[242].mxu0  ;;  %v11912_v44 = vpop.f32.mrb[242].mxu1  ;;  %v5541_v55 = vadd.f32 %v5413_v27, %v13525_v3  ;;  %v5676_v54 = vmul.f32 %v11480_v39, %v11825_v25  ;;  %v5819_v35 = vadd.f32 %v5818_v20, %v11817_v37  ;;  %v7581_v7 = vadd.f32 %v11833_v48, %v11452_v41 }
 0x5ac   :  { %v11920_v51 = vpop.f32.mrb[243].mxu0  ;;  %v11922_v34 = vpop.f32.mrb[243].mxu1  ;;  %v5685_v15 = vmul.f32 %v11465_v30, %v5535_v58  ;;  %v11926_v26 = vmul.f32 %v11474_v8, %v5537_v2  ;;  %v5412_v5 = vmax.f32 %v7516_v17, 0.0  ;;  %v5414_v47 = vmax.f32 %v7580_v29, 0.0 }
 0x5ad   :  { %v11929_v4 = vadd.f32 %v5410_v13, %v13526_v42  ;;  %v5820_v25 = vadd.f32 %v5819_v35, %v5676_v54  ;;  %v5415_v49 = vmax.f32 %v7517_v59, 0.0  ;;  %v5417_v37 = vmax.f32 %v7581_v7, 0.0 }
 0x5ae   :  { %v5686_v0 = vmul.f32 %v11468_v63, %v5536_v60  ;;  %v11933_v48 = vmul.f32 %v11465_v30, %v5539_v22  ;;  %v5540_v57 = vadd.f32 %v5412_v5, %v13527_v28  ;;  %v5823_v58 = vadd.f32 %v5678_v10, %v11852_v36  ;;  %v13528_v10 = vld [vmem:[#allocation166_spill] sm:$0xff] }
 0x5af   :  { %v11937_v9 = vpop.f32.mrb[244].mxu0  ;;  %v11939_v11 = vpop.f32.mrb[244].mxu1  ;;  %v11942_v2 = vmul.f32 %v11474_v8, %v5541_v55  ;;  %5821 = vadd.xlane.f32.xlu0 %v5820_v25  ;;  %v7518_v46 = vadd.f32 %v11837_v50, %v11455_v16  ;;  %v7582_v1 = vadd.f32 %v11839_v38, %v11458_v56  ;;  %v7519_v33 = vadd.f32 %v11856_v62, %v11449_v12  ;;  %v13530_v22 = vld [vmem:[#allocation106_spill] sm:$0xff] }
 0x5b0   :  { %v11950_v60 = vpop.f32.mrb[245].mxu0  ;;  %v11952_v36 = vpop.f32.mrb[245].mxu1  ;;  %v11955_v13 = vadd.f32 %v5414_v47, %v13528_v10  ;;  %v5680_v27 = vmul.f32 %v11480_v39, %v11868_v32  ;;  %v5824_v20 = vadd.f32 %v5823_v58, %v11861_v53  ;;  %v7583_v50 = vadd.f32 %v11858_v14, %v11452_v41  ;;  %v13531_v53 = vld [vmem:[#allocation40_spill] sm:$0xff] }
 0x5b1   :  { %v5543_v38 = vadd.f32 %v5415_v49, %v13529_v43  ;;  %v5545_v17 = vadd.f32 %v5417_v37, %v13530_v22  ;;  %v5416_v62 = vmax.f32 %v7518_v46, 0.0  ;;  %v5419_v29 = vmax.f32 %v7519_v33, 0.0  ;;  %v13532_v49 = vld [vmem:[#allocation46_spill] sm:$0xff] }
 0x5b2   :  { %v5690_v59 = vmul.f32 %v11468_v63, %v5540_v57  ;;  %v5825_v3 = vadd.f32 %v5824_v20, %v5680_v27  ;;  %v5421_v55 = vmax.f32 %v7583_v50, 0.0  ;;  %v5828_v54 = vadd.f32 %v5682_v52, %v11873_v21  ;;  %v13533_v57 = vld [vmem:[#allocation111_spill] sm:$0xff]  ;;  %v13535_v50 = vld [vmem:[#allocation44_spill] sm:$0xff] }
 0x5b3   :  { %v11966_v35 = vpop.f32.mrb[246].mxu0  ;;  %v11968_v32 = vpop.f32.mrb[246].mxu1  ;;  %v5544_v7 = vadd.f32 %v5416_v62, %v13531_v53  ;;  %v5418_v5 = vmax.f32 %v7582_v1, 0.0  ;;  %v5684_v14 = vmul.f32 %v11480_v39, %v11891_v18  ;;  %v7520_v47 = vadd.f32 %v11863_v31, %v11455_v16 }
 0x5b4   :  { %v11975_v42 = vpop.f32.mrb[247].mxu0  ;;  %v11977_v25 = vpop.f32.mrb[247].mxu1  ;;  %5826 = vadd.xlane.f32.xlu0 %v5825_v3  ;;  %v5547_v21 = vadd.f32 %v5419_v29, %v13532_v49  ;;  %v5829_v52 = vadd.f32 %v5828_v54, %v11880_v24  ;;  %v7584_v37 = vadd.f32 %v11865_v19, %v11458_v56  ;;  %v7521_v28 = vadd.f32 %v11886_v45, %v11449_v12  ;;  %v13534_v45 = vld [vmem:[#allocation171_spill] sm:$0xff] }
 0x5b5   :  { %v11986_v18 = vmul.f32 %v11465_v30, %v5543_v38  ;;  %v5549_v31 = vadd.f32 %v5421_v55, %v13533_v57  ;;  %v5420_v58 = vmax.f32 %v7520_v47, 0.0  ;;  %v7585_v46 = vadd.f32 %v11888_v6, %v11452_v41 }
 0x5b6   :  { %v11992_v1 = vmul.f32 %v11474_v8, %v5545_v17  ;;  %v5830_v33 = vadd.f32 %v5829_v52, %v5684_v14  ;;  %v5422_v24 = vmax.f32 %v7584_v37, 0.0  ;;  %v5423_v10 = vmax.f32 %v7521_v28, 0.0  ;;  %v13537_v14 = vld [vmem:[#allocation50_spill] sm:$0xff] }
 0x5b7   :  { %v11994_v27 = vpop.f32.mrb[248].mxu0  ;;  %v11996_v19 = vpop.f32.mrb[248].mxu1  ;;  %v11999_v20 = vadd.f32 %v5418_v5, %v13534_v45  ;;  %v5548_v43 = vadd.f32 %v5420_v58, %v13535_v50  ;;  %v5425_v38 = vmax.f32 %v7585_v46, 0.0  ;;  %v5833_v22 = vadd.f32 %v5686_v0, %v5685_v15  ;;  %v13538_v52 = vld [vmem:[#allocation110_spill] sm:$0xff] }
 0x5b8   :  { %v12002_v62 = vpop.f32.mrb[249].mxu0  ;;  %v12004_v6 = vpop.f32.mrb[249].mxu1  ;;  %v5694_v17 = vmul.f32 %v11468_v63, %v5544_v7  ;;  %v12008_v29 = vmul.f32 %v11465_v30, %v5547_v21  ;;  %5831 = vadd.xlane.f32.xlu1 %v5830_v33  ;;  %v7522_v3 = vadd.f32 %v11896_v23, %v11455_v16  ;;  %v7586_v55 = vadd.f32 %v11898_v40, %v11458_v56  ;;  %v13536_v7 = vld [vmem:[#allocation168_spill] sm:$0xff] }
 0x5b9   :  { %v12015_v54 = vmul.f32 %v11474_v8, %v5549_v31  ;;  %v5688_v15 = vmul.f32 %v11480_v39, %v11929_v4  ;;  %v5834_v0 = vadd.f32 %v5833_v22, %v11926_v26  ;;  %v7523_v53 = vadd.f32 %v11910_v61, %v11449_v12  ;;  %v13539_v31 = vld [vmem:[#allocation48_spill] sm:$0xff] }
 0x5ba   :  { %v12023_v5 = vadd.f32 %v5422_v24, %v13536_v7  ;;  %v5551_v47 = vadd.f32 %v5423_v10, %v13537_v14  ;;  %v5424_v23 = vmax.f32 %v7522_v3, 0.0  ;;  %v7587_v40 = vadd.f32 %v11912_v44, %v11452_v41  ;;  %v13540_v24 = vld [vmem:[#allocation54_spill] sm:$0xff] }
 0x5bb   :  { %v12028_v49 = vpop.f32.mrb[250].mxu0  ;;  %v12030_v21 = vpop.f32.mrb[250].mxu1  ;;  %v5698_v4 = vmul.f32 %v11468_v63, %v5548_v43  ;;  %v5553_v26 = vadd.f32 %v5425_v38, %v13538_v52  ;;  %v5835_v37 = vadd.f32 %v5834_v0, %v5688_v15  ;;  %v5427_v28 = vmax.f32 %v7523_v53, 0.0  ;;  %v13541_v38 = vld [vmem:[#allocation137_spill] sm:$0xff] }
 0x5bc   :  { %v12034_v61 = vpop.f32.mrb[251].mxu0  ;;  %v12036_v57 = vpop.f32.mrb[251].mxu1  ;;  %v5552_v58 = vadd.f32 %v5424_v23, %v13539_v31  ;;  %v5426_v46 = vmax.f32 %v7586_v55, 0.0  ;;  %v5429_v33 = vmax.f32 %v7587_v40, 0.0  ;;  %v5838_v44 = vadd.f32 %v5690_v59, %v11933_v48 }
 0x5bd   :  { %5836 = vadd.xlane.f32.xlu1 %v5835_v37  ;;  %v5555_v10 = vadd.f32 %v5427_v28, %v13540_v24  ;;  %v7524_v45 = vadd.f32 %v11920_v51, %v11455_v16  ;;  %v7588_v50 = vadd.f32 %v11922_v34, %v11458_v56  ;;  %v7525_v43 = vadd.f32 %v11937_v9, %v11449_v12  ;;  %v13543_v37 = vld [vmem:[#allocation52_spill] sm:$0xff]  ;;  %v13544_v24 = vld [vmem:[#allocation170_spill] sm:$0xff] }
 0x5be   :  { %v5557_v22 = vadd.f32 %v5429_v33, %v13541_v38  ;;  %v5692_v3 = vmul.f32 %v11480_v39, %v11955_v13  ;;  %v5839_v55 = vadd.f32 %v5838_v44, %v11942_v2  ;;  %v7589_v48 = vadd.f32 %v11939_v11, %v11452_v41  ;;  %v13542_v13 = vld [vmem:[#allocation173_spill] sm:$0xff] }
 0x5bf   :  { %v12053_v59 = vpop.f32.mrb[252].mxu0  ;;  %v12055_v15 = vpop.f32.mrb[252].mxu1  ;;  %v5701_v51 = vmul.f32 %v11465_v30, %v5551_v47  ;;  %v5703_v34 = vmul.f32 %v11474_v8, %v5553_v26  ;;  %v5428_v0 = vmax.f32 %v7524_v45, 0.0  ;;  %v5430_v9 = vmax.f32 %v7588_v50, 0.0  ;;  %v13545_v50 = vld [vmem:[#allocation58_spill] sm:$0xff] }
 0x5c0   :  { %v12059_v53 = vpop.f32.mrb[253].mxu0  ;;  %v12061_v7 = vpop.f32.mrb[253].mxu1  ;;  %v5554_v14 = vadd.f32 %v5426_v46, %v13542_v13  ;;  %v5840_v2 = vadd.f32 %v5839_v55, %v5692_v3  ;;  %v5431_v23 = vmax.f32 %v7525_v43, 0.0  ;;  %v5433_v40 = vmax.f32 %v7589_v48, 0.0  ;;  %v13546_v43 = vld [vmem:[#allocation113_spill] sm:$0xff] }
 0x5c1   :  { %v5702_v11 = vmul.f32 %v11468_v63, %v5552_v58  ;;  %v12066_v52 = vmul.f32 %v11465_v30, %v5555_v10  ;;  %v5556_v47 = vadd.f32 %v5428_v0, %v13543_v37  ;;  %v5843_v26 = vadd.f32 %v5694_v17, %v11986_v18 }
 0x5c2   :  { %v12071_v28 = vmul.f32 %v11474_v8, %v5557_v22  ;;  %5841 = vadd.xlane.f32.xlu0 %v5840_v2  ;;  %v7526_v31 = vadd.f32 %v11950_v60, %v11455_v16  ;;  %v7590_v46 = vadd.f32 %v11952_v36, %v11458_v56  ;;  %v7527_v58 = vadd.f32 %v11966_v35, %v11449_v12 }
 0x5c3   :  { %v12079_v33 = vpop.f32.mrb[254].mxu0  ;;  %v12081_v44 = vpop.f32.mrb[254].mxu1  ;;  %v5558_v10 = vadd.f32 %v5430_v9, %v13544_v24  ;;  %v5696_v18 = vmul.f32 %v11480_v39, %v11999_v20  ;;  %v5844_v17 = vadd.f32 %v5843_v26, %v11992_v1  ;;  %v7591_v60 = vadd.f32 %v11968_v32, %v11452_v41  ;;  %v13547_v1 = vld [vmem:[#allocation56_spill] sm:$0xff] }
 0x5c4   :  { %v12089_v45 = vpop.f32.mrb[255].mxu0  ;;  %v12091_v36 = vpop.f32.mrb[255].mxu1  ;;  %v5559_v35 = vadd.f32 %v5431_v23, %v13545_v50  ;;  %v5561_v38 = vadd.f32 %v5433_v40, %v13546_v43  ;;  %v5432_v22 = vmax.f32 %v7526_v31, 0.0  ;;  %v5435_v3 = vmax.f32 %v7527_v58, 0.0  ;;  %v13548_v23 = vld [vmem:[#allocation62_spill] sm:$0xff]  ;;  %v13549_v26 = vld [vmem:[#allocation136_spill] sm:$0xff] }
 0x5c5   :  { %v5706_v55 = vmul.f32 %v11468_v63, %v5556_v47  ;;  %v5845_v48 = vadd.f32 %v5844_v17, %v5696_v18  ;;  %v5437_v0 = vmax.f32 %v7591_v60, 0.0  ;;  %v5848_v20 = vadd.f32 %v5698_v4, %v12008_v29  ;;  %v13551_v60 = vld [vmem:[#allocation60_spill] sm:$0xff] }
 0x5c6   :  { %v5560_v9 = vadd.f32 %v5432_v22, %v13547_v1  ;;  %v5434_v13 = vmax.f32 %v7590_v46, 0.0  ;;  %v5700_v32 = vmul.f32 %v11480_v39, %v12023_v5  ;;  %v7528_v2 = vadd.f32 %v11975_v42, %v11455_v16 }
 0x5c7   :  { %5846 = vadd.xlane.f32.xlu0 %v5845_v48  ;;  %v5563_v40 = vadd.f32 %v5435_v3, %v13548_v23  ;;  %v5849_v37 = vadd.f32 %v5848_v20, %v12015_v54  ;;  %v7592_v47 = vadd.f32 %v11977_v25, %v11458_v56  ;;  %v7529_v29 = vadd.f32 %v11994_v27, %v11449_v12  ;;  %v13550_v54 = vld [vmem:[#allocation174_spill] sm:$0xff]  ;;  %v13553_v20 = vld [vmem:[#allocation67_spill] sm:$0xff] }
 0x5c8   :  { %v5709_v4 = vmul.f32 %v11465_v30, %v5559_v35  ;;  %v5565_v31 = vadd.f32 %v5437_v0, %v13549_v26  ;;  %v5436_v46 = vmax.f32 %v7528_v2, 0.0  ;;  %v7593_v5 = vadd.f32 %v11996_v19, %v11452_v41 }
 0x5c9   :  { %v5711_v42 = vmul.f32 %v11474_v8, %v5561_v38  ;;  %v5850_v58 = vadd.f32 %v5849_v37, %v5700_v32  ;;  %v5438_v24 = vmax.f32 %v7592_v47, 0.0  ;;  %v5439_v18 = vmax.f32 %v7529_v29, 0.0  ;;  %v13554_v32 = vld [vmem:[#allocation112_spill] sm:$0xff] }
 0x5ca   :  { %v5562_v17 = vadd.f32 %v5434_v13, %v13550_v54  ;;  %v5564_v25 = vadd.f32 %v5436_v46, %v13551_v60  ;;  %v5441_v50 = vmax.f32 %v7593_v5, 0.0  ;;  %v5853_v43 = vadd.f32 %v5702_v11, %v5701_v51  ;;  %v13552_v51 = vld [vmem:[#allocation172_spill] sm:$0xff]  ;;  %v13557_v46 = vld [vmem:[#allocation139_spill] sm:$0xff]  ;;  %v13558_v60 = vld [vmem:[#allocation109_spill] sm:$0xff] }
 0x5cb   :  { %v5710_v27 = vmul.f32 %v11468_v63, %v5560_v9  ;;  %v5713_v35 = vmul.f32 %v11465_v30, %v5563_v40  ;;  %5851 = vadd.xlane.f32.xlu1 %v5850_v58  ;;  %v7530_v22 = vadd.f32 %v12002_v62, %v11455_v16  ;;  %v7594_v19 = vadd.f32 %v12004_v6, %v11458_v56  ;;  %v13555_v40 = vld [vmem:[#allocation64_spill] sm:$0xff] }
 0x5cc   :  { %v5715_v38 = vmul.f32 %v11474_v8, %v5565_v31  ;;  %v5704_v3 = vmul.f32 %v11480_v39, %v5554_v14  ;;  %v5854_v48 = vadd.f32 %v5853_v43, %v5703_v34  ;;  %v7531_v0 = vadd.f32 %v12028_v49, %v11449_v12  ;;  %v13556_v47 = vld [vmem:[#allocation72_spill] sm:$0xff] }
 0x5cd   :  { %v5566_v11 = vadd.f32 %v5438_v24, %v13552_v51  ;;  %v5567_v1 = vadd.f32 %v5439_v18, %v13553_v20  ;;  %v5440_v9 = vmax.f32 %v7530_v22, 0.0  ;;  %v7595_v13 = vadd.f32 %v12030_v21, %v11452_v41  ;;  %v13560_v51 = vld [vmem:[#allocation76_spill] sm:$0xff] }
 0x5ce   :  { %v5714_v62 = vmul.f32 %v11468_v63, %v5564_v25  ;;  %v5569_v6 = vadd.f32 %v5441_v50, %v13554_v32  ;;  %v5855_v2 = vadd.f32 %v5854_v48, %v5704_v3  ;;  %v5443_v23 = vmax.f32 %v7531_v0, 0.0 }
 0x5cf   :  { %v5568_v14 = vadd.f32 %v5440_v9, %v13555_v40  ;;  %v5442_v34 = vmax.f32 %v7594_v19, 0.0  ;;  %v5445_v37 = vmax.f32 %v7595_v13, 0.0  ;;  %v5858_v49 = vadd.f32 %v5706_v55, %v12066_v52 }
 0x5d0   :  { %5856 = vadd.xlane.f32.xlu1 %v5855_v2  ;;  %v5571_v29 = vadd.f32 %v5443_v23, %v13556_v47  ;;  %v7532_v26 = vadd.f32 %v12034_v61, %v11455_v16  ;;  %v7596_v21 = vadd.f32 %v12036_v57, %v11458_v56  ;;  %v7533_v31 = vadd.f32 %v12053_v59, %v11449_v12 }
 0x5d1   :  { %v5573_v5 = vadd.f32 %v5445_v37, %v13557_v46  ;;  %v5708_v58 = vmul.f32 %v11480_v39, %v5558_v10  ;;  %v5859_v24 = vadd.f32 %v5858_v49, %v12071_v28  ;;  %v7597_v52 = vadd.f32 %v12055_v15, %v11452_v41  ;;  %v13559_v15 = vld [vmem:[#allocation71_spill] sm:$0xff]  ;;  %v13564_v37 = vld [vmem:[#allocation80_spill] sm:$0xff] }
 0x5d2   :  { %v5717_v55 = vmul.f32 %v11465_v30, %v5567_v1  ;;  %v5719_v18 = vmul.f32 %v11474_v8, %v5569_v6  ;;  %v5444_v61 = vmax.f32 %v7532_v26, 0.0  ;;  %v5447_v54 = vmax.f32 %v7533_v31, 0.0  ;;  %v13566_v31 = vld [vmem:[#allocation138_spill] sm:$0xff] }
 0x5d3   :  { %v5718_v57 = vmul.f32 %v11468_v63, %v5568_v14  ;;  %v5570_v25 = vadd.f32 %v5442_v34, %v13558_v60  ;;  %v5860_v59 = vadd.f32 %v5859_v24, %v5708_v58  ;;  %v5446_v50 = vmax.f32 %v7596_v21, 0.0  ;;  %v13567_v24 = vld [vmem:[#allocation79_spill] sm:$0xff] }
 0x5d4   :  { %v5721_v43 = vmul.f32 %v11465_v30, %v5571_v29  ;;  %v5723_v10 = vmul.f32 %v11474_v8, %v5573_v5  ;;  %v5449_v28 = vmax.f32 %v7597_v52, 0.0  ;;  %v5863_v22 = vadd.f32 %v5710_v27, %v5709_v4  ;;  %v13561_v27 = vld [vmem:[#allocation89_spill] sm:$0xff] }
 0x5d5   :  { %5861 = vadd.xlane.f32.xlu0 %v5860_v59  ;;  %v5572_v19 = vadd.f32 %v5444_v61, %v13559_v15  ;;  %v7534_v3 = vadd.f32 %v12059_v53, %v11455_v16  ;;  %v7598_v48 = vadd.f32 %v12061_v7, %v11458_v56  ;;  %v7535_v0 = vadd.f32 %v12079_v33, %v11449_v12  ;;  %v13562_v53 = vld [vmem:[#allocation115_spill] sm:$0xff] }
 0x5d6   :  { %v5575_v20 = vadd.f32 %v5447_v54, %v13560_v51  ;;  %v5712_v1 = vmul.f32 %v11480_v39, %v5562_v17  ;;  %v5864_v9 = vadd.f32 %v5863_v22, %v5711_v42  ;;  %v7599_v4 = vadd.f32 %v12081_v44, %v11452_v41  ;;  %v13563_v33 = vld [vmem:[#allocation75_spill] sm:$0xff] }
 0x5d7   :  { %v5574_v13 = vadd.f32 %v5446_v50, %v13561_v27  ;;  %v5448_v32 = vmax.f32 %v7534_v3, 0.0  ;;  %v5450_v6 = vmax.f32 %v7598_v48, 0.0  ;;  %v5451_v2 = vmax.f32 %v7535_v0, 0.0  ;;  %v13568_v54 = vld [vmem:[#allocation135_spill] sm:$0xff] }
 0x5d8   :  { %v5577_v23 = vadd.f32 %v5449_v28, %v13562_v53  ;;  %v5865_v40 = vadd.f32 %v5864_v9, %v5712_v1  ;;  %v5453_v7 = vmax.f32 %v7599_v4, 0.0  ;;  %v5868_v14 = vadd.f32 %v5714_v62, %v5713_v35  ;;  %v13565_v62 = vld [vmem:[#allocation108_spill] sm:$0xff] }
 0x5d9   :  { %v5722_v12 = vmul.f32 %v11468_v63, %v5572_v19  ;;  %v5576_v34 = vadd.f32 %v5448_v32, %v13563_v33  ;;  %v5579_v17 = vadd.f32 %v5451_v2, %v13564_v37  ;;  %v7536_v42 = vadd.f32 %v12089_v45, %v11455_v16 }
 0x5da   :  { %v5725_v41 = vmul.f32 %v11465_v30, %v5575_v20  ;;  %5866 = vadd.xlane.f32.xlu0 %v5865_v40  ;;  %v5716_v44 = vmul.f32 %v11480_v39, %v5566_v11  ;;  %v5869_v49 = vadd.f32 %v5868_v14, %v5715_v38  ;;  %v7600_v47 = vadd.f32 %v12091_v36, %v11458_v56 }
 0x5db   :  { %v5726_v35 = vmul.f32 %v11468_v63, %v5576_v34  ;;  %v5578_v29 = vadd.f32 %v5450_v6, %v13565_v62  ;;  %v5452_v26 = vmax.f32 %v7536_v42, 0.0  ;;  %v5873_v21 = vadd.f32 %v5718_v57, %v5717_v55 }
 0x5dc   :  { %v5581_v46 = vadd.f32 %v5453_v7, %v13566_v31  ;;  %v5870_v5 = vadd.f32 %v5869_v49, %v5716_v44  ;;  %v5454_v58 = vmax.f32 %v7600_v47, 0.0  ;;  %v5720_v16 = vmul.f32 %v11480_v39, %v5570_v25 }
 0x5dd   :  { %v5729_v45 = vmul.f32 %v11465_v30, %v5579_v17  ;;  %v5580_v11 = vadd.f32 %v5452_v26, %v13567_v24  ;;  %v5874_v38 = vadd.f32 %v5873_v21, %v5719_v18  ;;  %v5878_v52 = vadd.f32 %v5722_v12, %v5721_v43 }
 0x5de   :  { %v5727_v56 = vmul.f32 %v11474_v8, %v5577_v23  ;;  %5871 = vadd.xlane.f32.xlu1 %v5870_v5  ;;  %v5724_v36 = vmul.f32 %v11480_v39, %v5574_v13  ;;  %v5883_v61 = vadd.f32 %v5726_v35, %v5725_v41  ;;  %v5582_v57 = vadd.f32 %v5454_v58, %v13568_v54 }
 0x5df   :  { %v5730_v55 = vmul.f32 %v11468_v63, %v5580_v11  ;;  %v5875_v60 = vadd.f32 %v5874_v38, %v5720_v16  ;;  %v5879_v59 = vadd.f32 %v5878_v52, %v5723_v10  ;;  %v5728_v25 = vmul.f32 %v11480_v39, %v5578_v29 }
 0x5e0   :  { %v5884_v50 = vadd.f32 %v5883_v61, %v5727_v56  ;;  %v5731_v30 = vmul.f32 %v11474_v8, %v5581_v46  ;;  %v5732_v22 = vmul.f32 %v11480_v39, %v5582_v57  ;;  %v12189_v8 = vstv %s12381_s6  ;;  %s8277_s6 = smov [#allocation12]  }
 0x5e1   :  { %v5880_v28 = vadd.f32 %v5879_v59, %v5724_v36  ;;  %v5888_v18 = vadd.f32 %v5730_v55, %v5729_v45  ;;  %s6334_s21 = sshll.u32 %s8277_s6, 4  ;;  %s6335_s21 = int_to_ptr.vmem [resolvable:$true] %s6334_s21 }
 0x5e2   :  { %5876 = vadd.xlane.f32.xlu1 %v5875_v60  ;;  %v5885_v43 = vadd.f32 %v5884_v50, %v5728_v25  ;;  %s8237_s22 = scalar_lea.vmem %s6335_s21, 128  ;;  %p8242_p13 = scmp.lt.s32.totalorder %s6335_s21, %s6335_s21 }
 0x5e3   :  { %5881 = vadd.xlane.f32.xlu0 %v5880_v28  ;;  %v5889_v15 = vadd.f32 %v5888_v18, %v5731_v30  ;;  %p8238_p12 = scmp.ne.s32.totalorder %s6335_s21, %s8237_s22  ;;  %p8243_p0 = scmp.lt.s32.totalorder %s8237_s22, %s8237_s22 }
 0x5e5   :  { %v5890_v19 = vadd.f32 %v5889_v15, %v5732_v22  ;;  %p8244_p1 = por %p8243_p0, %p8242_p13 }
 0x5e6   :  { %v5737_v3 = vpop.xlane.xlu0 %5736 }
 0x5e7   :  { %5886 = vadd.xlane.f32.xlu0 %v5885_v43  ;;  %5891 = vadd.xlane.f32.xlu1 %v5890_v19  ;;  %v5895_v1 = vadd.f32 %v12189_v8, %v5737_v3  ;;  %p8245_p2 = pnand %p8244_p1, %p8238_p12 }
 0x5e9   :  { %v6409_v27 = vmul.f32 -1.442695, %v5895_v1 }
 0x5eb   :  { %7996 = vpow2.f32 %v6409_v27 }
 0x5ef   :  { %v5742_v10 = vpop.xlane.xlu0 %5741 }
 0x5f0   :  { %v5896_v39 = vadd.f32 %v12189_v8, %v5742_v10 }
 0x5f2   :  { %v6410_v6 = vmul.f32 -1.442695, %v5896_v39 }
 0x5f4   :  { %7998 = vpow2.f32 %v6410_v6 }
 0x5f5   :  { %v5747_v51 = vpop.xlane.xlu0 %5746  ;;  %v7997_v31 = vpop.eup %7996 }
 0x5f6   :  { %v5897_v13 = vadd.f32 %v12189_v8, %v5747_v51  ;;  %v6023_v24 = vadd.f32 1.0, %v7997_v31 }
 0x5f8   :  { %v6411_v40 = vmul.f32 -1.442695, %v5897_v13 }
 0x5f9   :  { %v5752_v9 = vpop.xlane.xlu0 %5751 }
 0x5fa   :  { %v5898_v2 = vadd.f32 %v12189_v8, %v5752_v9  ;;  %8000 = vpow2.f32 %v6411_v40 }
 0x5fc   :  { %v6412_v14 = vmul.f32 -1.442695, %v5898_v2 }
 0x5fe   :  { %v5757_v63 = vpop.xlane.xlu1 %5756  ;;  %8002 = vpow2.f32 %v6412_v14  ;;  %v7999_v58 = vpop.eup %7998 }
 0x5ff   :  { %v5899_v53 = vadd.f32 %v12189_v8, %v5757_v63  ;;  %v6024_v38 = vadd.f32 1.0, %v7999_v58 }
 0x601   :  { %v6413_v33 = vmul.f32 -1.442695, %v5899_v53 }
 0x603   :  { %v5762_v48 = vpop.xlane.xlu1 %5761  ;;  %8004 = vpow2.f32 %v6413_v33 }
 0x604   :  { %v5900_v12 = vadd.f32 %v12189_v8, %v5762_v48  ;;  %v8001_v11 = vpop.eup %8000 }
 0x605   :  { %v6025_v60 = vadd.f32 1.0, %v8001_v11 }
 0x606   :  { %v6414_v44 = vmul.f32 -1.442695, %v5900_v12 }
 0x608   :  { %v5767_v0 = vpop.xlane.xlu1 %5766  ;;  %8006 = vpow2.f32 %v6414_v44  ;;  %v8003_v36 = vpop.eup %8002 }
 0x609   :  { %v5901_v34 = vadd.f32 %v12189_v8, %v5767_v0  ;;  %v6026_v25 = vadd.f32 1.0, %v8003_v36 }
 0x60b   :  { %v6415_v47 = vmul.f32 -1.442695, %v5901_v34 }
 0x60c   :  { %v5772_v20 = vpop.xlane.xlu1 %5771 }
 0x60d   :  { %v5902_v37 = vadd.f32 %v12189_v8, %v5772_v20  ;;  %8008 = vpow2.f32 %v6415_v47  ;;  %v8005_v55 = vpop.eup %8004 }
 0x60e   :  { %v6027_v28 = vadd.f32 1.0, %v8005_v55 }
 0x60f   :  { %v6416_v62 = vmul.f32 -1.442695, %v5902_v37 }
 0x611   :  { %v5777_v32 = vpop.xlane.xlu0 %5776  ;;  %8010 = vpow2.f32 %v6416_v62 }
 0x612   :  { %v5903_v17 = vadd.f32 %v12189_v8, %v5777_v32  ;;  %v8007_v30 = vpop.eup %8006 }
 0x613   :  { %v6028_v3 = vadd.f32 1.0, %v8007_v30 }
 0x614   :  { %v6417_v29 = vmul.f32 -1.442695, %v5903_v17 }
 0x616   :  { %v5782_v4 = vpop.xlane.xlu1 %5781  ;;  %8012 = vpow2.f32 %v6417_v29 }
 0x617   :  { %v5904_v49 = vadd.f32 %v12189_v8, %v5782_v4  ;;  %v8009_v18 = vpop.eup %8008 }
 0x618   :  { %v6029_v10 = vadd.f32 1.0, %v8009_v18 }
 0x619   :  { %v6418_v21 = vmul.f32 -1.442695, %v5904_v49 }
 0x61b   :  { %v5787_v7 = vpop.xlane.xlu0 %5786  ;;  %8014 = vpow2.f32 %v6418_v21  ;;  %v8011_v15 = vpop.eup %8010 }
 0x61c   :  { %v5905_v35 = vadd.f32 %v12189_v8, %v5787_v7  ;;  %v6030_v51 = vadd.f32 1.0, %v8011_v15 }
 0x61e   :  { %v6419_v46 = vmul.f32 -1.442695, %v5905_v35 }
 0x61f   :  { %v5792_v23 = vpop.xlane.xlu1 %5791 }
 0x620   :  { %v5906_v16 = vadd.f32 %v12189_v8, %v5792_v23  ;;  %8016 = vpow2.f32 %v6419_v46  ;;  %v8013_v63 = vpop.eup %8012 }
 0x621   :  { %8018 = vrcp.f32 %v6023_v24  ;;  %v6031_v39 = vadd.f32 1.0, %v8013_v63 }
 0x622   :  { %v6420_v61 = vmul.f32 -1.442695, %v5906_v16  ;;  %8020 = vrcp.f32 %v6024_v38 }
 0x624   :  { %v5797_v42 = vpop.xlane.xlu1 %5796  ;;  %8022 = vpow2.f32 %v6420_v61 }
 0x625   :  { %v5907_v45 = vadd.f32 %v12189_v8, %v5797_v42  ;;  %v8015_v48 = vpop.eup %8014 }
 0x626   :  { %v6032_v27 = vadd.f32 1.0, %v8015_v48 }
 0x627   :  { %v6421_v54 = vmul.f32 -1.442695, %v5907_v45 }
 0x629   :  { %v5802_v41 = vpop.xlane.xlu0 %5801  ;;  %8024 = vpow2.f32 %v6421_v54 }
 0x62a   :  { %v5908_v57 = vadd.f32 %v12189_v8, %v5802_v41  ;;  %8026 = vrcp.f32 %v6025_v60  ;;  %v8017_v0 = vpop.eup %8016 }
 0x62b   :  { %8028 = vrcp.f32 %v6026_v25  ;;  %v12209_v32 = vpop.eup %8018  ;;  %v6033_v6 = vadd.f32 1.0, %v8017_v0 }
 0x62c   :  { %v6422_v43 = vmul.f32 -1.442695, %v5908_v57  ;;  %8030 = vrcp.f32 %v6027_v28  ;;  %v12212_v53 = vpop.eup %8020 }
 0x62e   :  { %v5807_v5 = vpop.xlane.xlu0 %5806  ;;  %8032 = vpow2.f32 %v6422_v43  ;;  %v8023_v7 = vpop.eup %8022 }
 0x62f   :  { %v5909_v59 = vadd.f32 %v12189_v8, %v5807_v5  ;;  %v6034_v49 = vadd.f32 1.0, %v8023_v7 }
 0x631   :  { %v6423_v19 = vmul.f32 -1.442695, %v5909_v59 }
 0x632   :  { %v5812_v26 = vpop.xlane.xlu1 %5811 }
 0x633   :  { %v5910_v20 = vadd.f32 %v12189_v8, %v5812_v26  ;;  %8034 = vpow2.f32 %v6423_v19  ;;  %v8025_v12 = vpop.eup %8024 }
 0x634   :  { %8036 = vrcp.f32 %v6028_v3  ;;  %v12215_v17 = vpop.eup %8026  ;;  %v6035_v62 = vadd.f32 1.0, %v8025_v12 }
 0x635   :  { %8038 = vrcp.f32 %v6029_v10  ;;  %v6424_v23 = vmul.f32 -1.442695, %v5910_v20  ;;  %v12218_v44 = vpop.eup %8028 }
 0x636   :  { %8040 = vrcp.f32 %v6030_v51  ;;  %v12221_v35 = vpop.eup %8030 }
 0x637   :  { %v5817_v52 = vpop.xlane.xlu1 %5816  ;;  %8042 = vrcp.f32 %v6031_v39 }
 0x638   :  { %v5911_v4 = vadd.f32 %v12189_v8, %v5817_v52  ;;  %8044 = vrcp.f32 %v6032_v27  ;;  %v8033_v29 = vpop.eup %8032 }
 0x639   :  { %8046 = vrcp.f32 %v6033_v6  ;;  %v6036_v38 = vadd.f32 1.0, %v8033_v29 }
 0x63a   :  { %v6425_v14 = vmul.f32 -1.442695, %v5911_v4  ;;  %8048 = vpow2.f32 %v6424_v23 }
 0x63c   :  { %v5822_v56 = vpop.xlane.xlu0 %5821  ;;  %8050 = vpow2.f32 %v6425_v14 }
 0x63d   :  { %v5912_v13 = vadd.f32 %v12189_v8, %v5822_v56  ;;  %v8035_v46 = vpop.eup %8034 }
 0x63e   :  { %v12224_v16 = vpop.eup %8036  ;;  %v6037_v36 = vadd.f32 1.0, %v8035_v46 }
 0x63f   :  { %v6426_v33 = vmul.f32 -1.442695, %v5912_v13  ;;  %v12227_v11 = vpop.eup %8038 }
 0x640   :  { %v12230_v56 = vpop.eup %8040 }
 0x641   :  { %v5827_v22 = vpop.xlane.xlu0 %5826  ;;  %8052 = vpow2.f32 %v6426_v33  ;;  %v12233_v55 = vpop.eup %8042 }
 0x642   :  { %v5913_v2 = vadd.f32 %v12189_v8, %v5827_v22  ;;  %v12235_v60 = vpop.eup %8044 }
 0x644   :  { %v6427_v42 = vmul.f32 -1.442695, %v5913_v2 }
 0x645   :  { %v5832_v50 = vpop.xlane.xlu1 %5831 }
 0x646   :  { %v5914_v34 = vadd.f32 %v12189_v8, %v5832_v50  ;;  %8054 = vpow2.f32 %v6427_v42  ;;  %v12238_v50 = vpop.eup %8046 }
 0x647   :  { %8056 = vrcp.f32 %v6034_v49  ;;  %v8049_v28 = vpop.eup %8048 }
 0x648   :  { %v6428_v26 = vmul.f32 -1.442695, %v5914_v34  ;;  %8058 = vrcp.f32 %v6035_v62  ;;  %v8051_v43 = vpop.eup %8050  ;;  %v6038_v48 = vadd.f32 1.0, %v8049_v28 }
 0x649   :  { %v6039_v0 = vadd.f32 1.0, %v8051_v43 }
 0x64a   :  { %v5837_v1 = vpop.xlane.xlu1 %5836  ;;  %8060 = vpow2.f32 %v6428_v26 }
 0x64b   :  { %v5915_v41 = vadd.f32 %v12189_v8, %v5837_v1  ;;  %v8053_v19 = vpop.eup %8052 }
 0x64c   :  { %v6040_v1 = vadd.f32 1.0, %v8053_v19 }
 0x64d   :  { %v6429_v5 = vmul.f32 -1.442695, %v5915_v41 }
 0x64f   :  { %v5842_v9 = vpop.xlane.xlu0 %5841  ;;  %8062 = vpow2.f32 %v6429_v5 }
 0x650   :  { %v5916_v47 = vadd.f32 %v12189_v8, %v5842_v9  ;;  %v8055_v3 = vpop.eup %8054 }
 0x651   :  { %v12241_v10 = vpop.eup %8056  ;;  %v6041_v4 = vadd.f32 1.0, %v8055_v3 }
 0x652   :  { %v6430_v45 = vmul.f32 -1.442695, %v5916_v47  ;;  %v12243_v20 = vpop.eup %8058 }
 0x654   :  { %v5847_v37 = vpop.xlane.xlu0 %5846  ;;  %8064 = vpow2.f32 %v6430_v45  ;;  %v8061_v39 = vpop.eup %8060  ;;  %v13569_v45 = vlaneseq }
 0x655   :  { %v5917_v58 = vadd.f32 %v12189_v8, %v5847_v37  ;;  %8066 = vrcp.f32 %v6036_v38  ;;  %v6042_v14 = vadd.f32 1.0, %v8061_v39 }
 0x656   :  { %8068 = vrcp.f32 %v6037_v36 }
 0x657   :  { %v6431_v54 = vmul.f32 -1.442695, %v5917_v58 }
 0x658   :  { %v5852_v40 = vpop.xlane.xlu1 %5851 }
 0x659   :  { %v5918_v24 = vadd.f32 %v12189_v8, %v5852_v40  ;;  %8070 = vpow2.f32 %v6431_v54  ;;  %v8063_v6 = vpop.eup %8062 }
 0x65a   :  { %v6043_v34 = vadd.f32 1.0, %v8063_v6 }
 0x65b   :  { %v6432_v59 = vmul.f32 -1.442695, %v5918_v24  ;;  %v6152_v24 = vand.u32 127, %v13569_v45 }
 0x65d   :  { %v5857_v21 = vpop.xlane.xlu1 %5856  ;;  %8072 = vpow2.f32 %v6432_v59  ;;  %v6164_v54 = vadd.s32 4294967280, %v6152_v24 }
 0x65e   :  { %v5919_v52 = vadd.f32 %v12189_v8, %v5857_v21  ;;  %v8065_v23 = vpop.eup %8064 }
 0x65f   :  { %v12247_v7 = vpop.eup %8066  ;;  %v6044_v49 = vadd.f32 1.0, %v8065_v23 }
 0x660   :  { %v6433_v30 = vmul.f32 -1.442695, %v5919_v52  ;;  %v12249_v33 = vpop.eup %8068 }
 0x662   :  { %v5862_v31 = vpop.xlane.xlu0 %5861  ;;  %8074 = vpow2.f32 %v6433_v30 }
 0x663   :  { %v5920_v61 = vadd.f32 %v12189_v8, %v5862_v31  ;;  %v8071_v41 = vpop.eup %8070 }
 0x664   :  { %v6045_v5 = vadd.f32 1.0, %v8071_v41 }
 0x665   :  { %v6434_v18 = vmul.f32 -1.442695, %v5920_v61 }
 0x667   :  { %v5867_v57 = vpop.xlane.xlu0 %5866  ;;  %8076 = vpow2.f32 %v6434_v18  ;;  %v8073_v29 = vpop.eup %8072 }
 0x668   :  { %v5921_v25 = vadd.f32 %v12189_v8, %v5867_v57  ;;  %v6046_v38 = vadd.f32 1.0, %v8073_v29 }
 0x66a   :  { %v6435_v22 = vmul.f32 -1.442695, %v5921_v25  ;;  %v6171_v25 = vadd.s32 4294967272, %v6152_v24 }
 0x66b   :  { %v5872_v15 = vpop.xlane.xlu1 %5871 }
 0x66c   :  { %v5922_v63 = vadd.f32 %v12189_v8, %v5872_v15  ;;  %8078 = vpow2.f32 %v6435_v22  ;;  %v8075_v26 = vpop.eup %8074  ;;  %v13570_v15 = vld [vmem:[#allocation17_spill] sm:$0xff] }
 0x66d   :  { %v6047_v36 = vadd.f32 1.0, %v8075_v26  ;;  %v12263_v19 = vsub.s32 %v6152_v24, %v13570_v15  ;;  %v12269_v3 = vsub.s32 %v6164_v54, %v13570_v15 }
 0x66e   :  { %v6436_v51 = vmul.f32 -1.442695, %v5922_v63 }
 0x66f   :  { %v5877_v9 = vpop.xlane.xlu1 %5876  ;;  %v6168_v6 = vrot.slane %v12215_v17, %v12269_v3  ;;  %v6209_v17 = vrot.slane %v12238_v50, %v12269_v3 }
 0x670   :  { %8080 = vpow2.f32 %v6436_v51  ;;  %v5923_v27 = vadd.f32 %v12189_v8, %v5877_v9  ;;  %v5882_v13 = vpop.xlane.xlu0 %5881 }
 0x671   :  { %8082 = vrcp.f32 %v6038_v48  ;;  %v5924_v2 = vadd.f32 %v12189_v8, %v5882_v13  ;;  %v8077_v46 = vpop.eup %8076 }
 0x672   :  { %8084 = vrcp.f32 %v6039_v0  ;;  %v6437_v40 = vmul.f32 -1.442695, %v5923_v27  ;;  %v6048_v57 = vadd.f32 1.0, %v8077_v46  ;;  %v12272_v0 = vsub.s32 %v6171_v25, %v13570_v15 }
 0x673   :  { %8086 = vrcp.f32 %v6040_v1  ;;  %v6438_v12 = vmul.f32 -1.442695, %v5924_v2  ;;  %v6156_v27 = vrot.slane %v12209_v32, %v12263_v19  ;;  %v6181_v32 = vrot.slane %v12221_v35, %v12263_v19 }
 0x674   :  { %8088 = vrcp.f32 %v6041_v4  ;;  %v5887_v37 = vpop.xlane.xlu0 %5886  ;;  %v5892_v42 = vpop.xlane.xlu1 %5891  ;;  %v6175_v23 = vrot.slane %v12218_v44, %v12272_v0 }
 0x675   :  { %8090 = vpow2.f32 %v6437_v40  ;;  %v5925_v47 = vadd.f32 %v12189_v8, %v5887_v37  ;;  %v5926_v62 = vadd.f32 %v12189_v8, %v5892_v42  ;;  %v6157_v8 = vadd.s32 4294967288, %v6152_v24 }
 0x676   :  { %8092 = vpow2.f32 %v6438_v12  ;;  %v8079_v58 = vpop.eup %8078  ;;  %v6214_v37 = vrot.slane %v12241_v10, %v12272_v0 }
 0x677   :  { %8094 = vrcp.f32 %v6042_v14  ;;  %v6439_v21 = vmul.f32 -1.442695, %v5925_v47  ;;  %v6440_v31 = vmul.f32 -1.442695, %v5926_v62  ;;  %v6049_v30 = vadd.f32 1.0, %v8079_v58 }
 0x678   :  { %8096 = vrcp.f32 %v6043_v34  ;;  %v12266_v63 = vsub.s32 %v6157_v8, %v13570_v15 }
 0x679   :  { %8098 = vrcp.f32 %v6044_v49 }
 0x67a   :  { %v8081_v52 = vpop.eup %8080  ;;  %8100 = vpow2.f32 %v6439_v21  ;;  %v6161_v13 = vrot.slane %v12212_v53, %v12266_v63  ;;  %v6185_v40 = vrot.slane %v12224_v16, %v12266_v63  ;;  %v6204_v14 = vrot.slane %v12235_v60, %v12266_v63 }
 0x67b   :  { %v12254_v61 = vpop.eup %8082  ;;  %8102 = vpow2.f32 %v6440_v31  ;;  %v6050_v18 = vadd.f32 1.0, %v8081_v52  ;;  %v6190_v53 = vrot.slane %v12227_v11, %v12269_v3  ;;  %v6195_v16 = vrot.slane %v12230_v56, %v12272_v0 }
 0x67c   :  { %v12256_v59 = vpop.eup %8084  ;;  %8104 = vrcp.f32 %v6045_v5  ;;  %v6200_v60 = vrot.slane %v12233_v55, %v12263_v19  ;;  %v6163_v41 = vsel %vm6162_vm1, %v6161_v13, %v6156_v27  ;;  %v6186_v49 = vsel %vm6162_vm1, %v6185_v40, %v6181_v32 }
 0x67d   :  { %v12258_v28 = vpop.eup %8086  ;;  %8106 = vrcp.f32 %v6046_v38  ;;  %v6170_v50 = vsel %vm6169_vm2, %v6168_v6, %v6163_v41  ;;  %v6191_v47 = vsel %vm6169_vm2, %v6190_v53, %v6186_v49  ;;  %v6223_v10 = vrot.slane %v12247_v7, %v12266_v63 }
 0x67e   :  { %v12260_v43 = vpop.eup %8088  ;;  %8108 = vrcp.f32 %v6047_v36  ;;  %v6205_v56 = vsel %vm6162_vm1, %v6204_v14, %v6200_v60  ;;  %v6177_v62 = vsel %vm6176_vm3, %v6175_v23, %v6170_v50  ;;  %v6228_v21 = vrot.slane %v12249_v33, %v12269_v3 }
 0x67f   :  { %v8091_v22 = vpop.eup %8090  ;;  %8110 = vrcp.f32 %v6048_v57  ;;  %v6210_v29 = vsel %vm6169_vm2, %v6209_v17, %v6205_v56  ;;  %v6242_v31 = vrot.slane %v12258_v28, %v12266_v63  ;;  %v6196_v46 = vsel %vm6176_vm3, %v6195_v16, %v6191_v47 }
 0x680   :  { %v8093_v48 = vpop.eup %8092  ;;  %8112 = vrcp.f32 %v6049_v30  ;;  %v6051_v51 = vadd.f32 1.0, %v8091_v22  ;;  %v6215_v5 = vsel %vm6176_vm3, %v6214_v37, %v6210_v29  ;;  %v6219_v7 = vrot.slane %v12243_v20, %v12263_v19 }
 0x681   :  { %v12274_v1 = vpop.eup %8094  ;;  %8114 = vrcp.f32 %v6050_v18  ;;  %v6052_v9 = vadd.f32 1.0, %v8093_v48  ;;  %v6233_v45 = vrot.slane %v12254_v61, %v12272_v0  ;;  %v6247_v24 = vrot.slane %v12260_v43, %v12269_v3 }
 0x682   :  { %v12276_v39 = vpop.eup %8096  ;;  %v6238_v38 = vrot.slane %v12256_v59, %v12263_v19  ;;  %v6252_v52 = vrot.slane %v12274_v1, %v12272_v0  ;;  %v6224_v54 = vsel %vm6162_vm1, %v6223_v10, %v6219_v7 }
 0x683   :  { %v12278_v4 = vpop.eup %8098  ;;  %8116 = vrcp.f32 %v6052_v9  ;;  %v6257_v61 = vrot.slane %v12276_v39, %v12263_v19  ;;  %v6229_v28 = vsel %vm6169_vm2, %v6228_v21, %v6224_v54 }
 0x684   :  { %v8101_v2 = vpop.eup %8100  ;;  %8118 = vrcp.f32 %v6051_v51  ;;  %v6261_v33 = vrot.slane %v12278_v4, %v12266_v63  ;;  %v6243_v18 = vsel %vm6162_vm1, %v6242_v31, %v6238_v38  ;;  %v6234_v22 = vsel %vm6176_vm3, %v6233_v45, %v6229_v28 }
 0x685   :  { %v8103_v12 = vpop.eup %8102  ;;  %v6053_v34 = vadd.f32 1.0, %v8101_v2  ;;  %v6248_v15 = vsel %vm6169_vm2, %v6247_v24, %v6243_v18  ;;  %v6312_v4 = vsel %vm6311_vm4, %v6196_v46, %v6177_v62 }
 0x686   :  { %v8105_v44 = vpop.eup %8104  ;;  %v6054_v42 = vadd.f32 1.0, %v8103_v12  ;;  %v6262_v48 = vsel %vm6162_vm1, %v6261_v33, %v6257_v61  ;;  %v6253_v1 = vsel %vm6176_vm3, %v6252_v52, %v6248_v15  ;;  %v6314_v23 = vsel %vm6313_vm5, %v6215_v5, %v6312_v4 }
 0x687   :  { %v8107_v35 = vpop.eup %8106  ;;  %8120 = vrcp.f32 %v6053_v34  ;;  %v6266_v36 = vrot.slane %v8105_v44, %v12269_v3  ;;  %v6316_v12 = vsel %vm6315_vm6, %v6234_v22, %v6314_v23 }
 0x688   :  { %v8109_v11 = vpop.eup %8108  ;;  %8122 = vrcp.f32 %v6054_v42  ;;  %v6271_v57 = vrot.slane %v8107_v35, %v12272_v0  ;;  %v6318_v17 = vsel %vm6317_vm7, %v6253_v1, %v6316_v12 }
 0x689   :  { %v8111_v55 = vpop.eup %8110  ;;  %v6276_v59 = vrot.slane %v8109_v11, %v12263_v19  ;;  %v6267_v9 = vsel %vm6169_vm2, %v6266_v36, %v6262_v48 }
 0x68a   :  { %v8113_v26 = vpop.eup %8112  ;;  %v6280_v8 = vrot.slane %v8111_v55, %v12266_v63  ;;  %v6272_v13 = vsel %vm6176_vm3, %v6271_v57, %v6267_v9 }
 0x68b   :  { %v8115_v58 = vpop.eup %8114  ;;  %v6285_v25 = vrot.slane %v8113_v26, %v12269_v3  ;;  %v6320_v34 = vsel %vm6319_vm8, %v6272_v13, %v6318_v17 }
 0x68c   :  { %v6290_v43 = vrot.slane %v8115_v58, %v12272_v0  ;;  %v6281_v39 = vsel %vm6162_vm1, %v6280_v8, %v6276_v59 }
 0x68d   :  { %v8117_v20 = vpop.eup %8116  ;;  %v6286_v6 = vsel %vm6169_vm2, %v6285_v25, %v6281_v39 }
 0x68e   :  { %v8119_v30 = vpop.eup %8118  ;;  %v6299_v51 = vrot.slane %v8117_v20, %v12266_v63  ;;  %v6291_v63 = vsel %vm6176_vm3, %v6290_v43, %v6286_v6 }
 0x68f   :  { %v6295_v2 = vrot.slane %v8119_v30, %v12263_v19 }
 0x691   :  { %v8121_v27 = vpop.eup %8120  ;;  %v6300_v32 = vsel %vm6162_vm1, %v6299_v51, %v6295_v2 }
 0x692   :  { %v8123_v40 = vpop.eup %8122  ;;  %v6304_v14 = vrot.slane %v8121_v27, %v12269_v3  ;;  %v6322_v3 = vsel %vm6321_vm9, %v6291_v63, %v6320_v34 }
 0x693   :  { %v6309_v53 = vrot.slane %v8123_v40, %v12272_v0 }
 0x694   :  { %v6305_v19 = vsel %vm6169_vm2, %v6304_v14, %v6300_v32 }
 0x695   :  { %v6310_v44 = vsel %vm6176_vm3, %v6309_v53, %v6305_v19 }
 0x696   :  { %v6324_v16 = vsel %vm6323_vm10, %v6310_v44, %v6322_v3 }
 0x697   :  { %6327 = vst.msk [vmem:[#allocation12] sm:$0xff] %vm6326_vm11, %v6324_v16 }
 0x698   :  { %8248 = shalt.err (!%p8245_p2)
}
 0x699   :  { %s8249_s24 = scalar_lea.hbm %s12382_s7, 128 }
 0x69a   :  { %p8250_p3 = scmp.ne.s32.totalorder %s12382_s7, %s8249_s24  ;;  %p8253_p4 = scmp.lt.u32.totalorder %s8249_s24, %s12382_s7 }
 0x69c   :  { %p8255_p5 = pnand %p8253_p4, %p8250_p3 }
 0x69e   :  { %8258 = shalt.err (!%p8255_p5)
}
 0x69f   :  { %6337 = dma.vmem_to_hbm [thread:$0]  %s6335_s21, 128, %s12382_s7, [#allocation5]  }
 0x6a0   :  { %8265 = dma.done.wait [#allocation5], 128  }
 0x6a1   :  { %8266 = vsyncadd [#allocation5], 4294967168 }
 0x6a2   :  { %6341 = vsyncpa [#allocation4], 1 }
 0x6a3   :  { %6342 = vsyncpa [#allocation7], 1 }
 0x6a4   :  { %6343 = vsyncpa [#allocation10], 1 }
 0x6a5   :  { %6344 = vsyncpa [#allocation5], 1 }

</bundles_post_ra>
